<compile_context>
chip_gen: v7x
topology: tpu7x:2x2x1
jax: 0.10.0
libtpu: 0.0.40
codegen_flags: <defaults>
</compile_context>

<pallas_src>
import jax
import jax.numpy as jnp
from jax.experimental import pallas as pl
from jax.experimental.pallas import tpu as pltpu


# ------------------------------ Pallas kernels --------------------------------

def upsampler_kernel(x_ref, w_ref, scale_ref, shift_ref, o_ref):
    """UpsamplerBlock: ConvTranspose2d(256,128,3,s2,p1,op1) + BN + ReLU.

    Phase-decomposed (sub-pixel): one 2x2-window conv producing the 4 output
    phases of every input pixel with a single big-K MXU matmul (K = 4*256).

    x_ref : (1, H+1, W+1, 256) bf16, input with one zero row/col (bottom/right)
    w_ref : (4*256, 4*128)     bf16, rows (dh,dw,cin), cols (ph,pw,cout)
    o_ref : (1, H, W, 512)     bf16, phase-packed output, channels (ph,pw,cout)
    """
    _, Hp, Wp, Cin = x_ref.shape
    H, W = Hp - 1, Wp - 1

    x = x_ref[0]                                          # (H+1, W+1, Cin)
    cols = [x[:, dw:dw + W, :] for dw in range(2)]        # 2 W-shifted slabs
    taps = [cols[dw][dh:dh + H] for dh in range(2) for dw in range(2)]
    patch = jnp.concatenate(taps, axis=-1).reshape(H * W, 4 * Cin)

    acc = jnp.dot(patch, w_ref[...], preferred_element_type=jnp.float32)
    y = jnp.maximum(acc * scale_ref[...] + shift_ref[...], 0.0)
    o_ref[...] = y.reshape(o_ref.shape).astype(o_ref.dtype)


def block_out_kernel(y_ref, w1_ref, s1_ref, b1_ref, w2_ref, s2_ref, b2_ref,
                     wo_ref, bo_ref, o_ref):
    """BasicBlock(128,128) fused with the final ConvTranspose2d(128,nc,2,s2).

    conv1+BN+ReLU -> conv2+BN -> +residual -> ReLU -> per-pixel output projection,
    all resident in VMEM.  conv1 is evaluated on a 1-pixel-extended (EH x EW)
    domain and the border ring is masked to zero, which provides conv2's zero
    halo without any in-kernel padding/scatter primitives.

    y_ref : (1, H+4, WP, 128) bf16, upsampled activation; valid data in
            rows/cols [2:H+2, 2:W+2], zeros elsewhere (WP >= EW+2, mult of 8).
    w1/w2 : (9*128, 128) bf16 im2col weights, row order (kh, kw, cin)
    wo    : (128, 128)   bf16 output-conv weight, first 4*nc cols real, rest 0
    o_ref : (1, H, W, 128) bf16, phase-packed logits, channels (kh, kw, class)
    """
    f32, bf16 = jnp.float32, jnp.bfloat16
    _, H, W, C = o_ref.shape
    EH = H + 2                                   # extended row domain
    EW = ((W + 2 + 7) // 8) * 8                  # extended col domain (mult of 8)
    K3 = 3 * C

    y = y_ref[0]                                 # (H+4, WP, C) bf16

    def conv3x3(src, w_ref_, rows, width):
        """Per-kh accumulated 3x3 conv: 3 matmuls of K = 3*C each."""
        slab = jnp.concatenate([src[:, dw:dw + width, :] for dw in range(3)],
                               axis=-1)                      # (rows+2, width, 3C)
        acc = None
        for dh in range(3):
            part = jnp.dot(slab[dh:dh + rows].reshape(rows * width, K3),
                           w_ref_[dh * K3:(dh + 1) * K3, :],
                           preferred_element_type=f32)
            acc = part if acc is None else acc + part
        return acc                                           # (rows*width, C) f32

    # ---- conv1 + BN + ReLU on the extended domain, border ring masked to 0 ----
    h = conv3x3(y, w1_ref, EH, EW) * s1_ref[...] + b1_ref[...]
    h = jnp.maximum(h, 0.0).reshape(EH, EW, C)
    ii = jax.lax.broadcasted_iota(jnp.int32, (EH, EW, C), 0)
    jj = jax.lax.broadcasted_iota(jnp.int32, (EH, EW, C), 1)
    valid = (ii >= 1) & (ii <= H) & (jj >= 1) & (jj <= W)
    hb = jnp.where(valid, h, 0.0).astype(bf16)               # zero-haloed conv2 input

    # ---- conv2 + BN on the valid (H, W) domain ----
    h2 = conv3x3(hb, w2_ref, H, W) * s2_ref[...] + b2_ref[...]

    # ---- residual add + ReLU + fused 2x2 output ConvTranspose (pointwise matmul) ----
    res = y[2:2 + H, 2:2 + W, :].reshape(H * W, C).astype(f32)
    z = jnp.maximum(h2 + res, 0.0)
    out = jnp.dot(z.astype(bf16), wo_ref[...],
                  preferred_element_type=f32) + bo_ref[...]
    o_ref[...] = out.reshape(o_ref.shape).astype(o_ref.dtype)


# -------------------------------- glue helpers ---------------------------------

def interleave_2x2(yp, C):
    """(N, H, W, 4*C) with channel order (ph, pw, c) -> (N, 2H, 2W, C)."""
    N, H, W, _ = yp.shape
    y = yp.reshape(N, H, W, 2, 2, C)
    y = jnp.transpose(y, (0, 1, 3, 2, 4, 5))
    return y.reshape(N, 2 * H, 2 * W, C)


def _bn_fold(gamma, beta, mean, var, eps, conv_bias=None):
    scale = gamma / jnp.sqrt(var + eps)
    if conv_bias is None:
        shift = beta - mean * scale
    else:
        shift = beta + (conv_bias - mean) * scale
    return scale[None, :], shift[None, :]


# ---------------------------- one-time weight prep -----------------------------

def prepare_params(params, num_classes):
    """Hoisted weight preprocessing: phase-decomposed upsampler weight, im2col
    3x3 weights, folded BN, lane-padded output-conv weight (bf16 matmul operands,
    f32 scale/shift/bias)."""
    bf16 = jnp.bfloat16
    prep = {}

    # UpsamplerBlock: ConvTranspose2d(256,128,3,s2,p1,op1) -> dense 2x2-phase weight.
    p = params["up"]
    w = p["w"]                                   # (Cin, Cout, 3, 3), PyTorch layout
    Cin, Cout = w.shape[0], w.shape[1]
    scale, shift = _bn_fold(p["gamma"], p["beta"], p["mean"], p["var"], 1e-3,
                            conv_bias=p["bias"])
    wbig = jnp.zeros((4 * Cin, 4 * Cout), jnp.float32)
    for ph in range(2):
        for pw in range(2):
            for dh in range(2):
                kh = ph + 1 - 2 * dh
                if not 0 <= kh <= 2:
                    continue
                for dw in range(2):
                    kw = pw + 1 - 2 * dw
                    if not 0 <= kw <= 2:
                        continue
                    r = (dh * 2 + dw) * Cin
                    c = (ph * 2 + pw) * Cout
                    wbig = wbig.at[r:r + Cin, c:c + Cout].set(w[:, :, kh, kw])
    prep["up"] = dict(w=wbig.astype(bf16),
                      scale=jnp.tile(scale, (1, 4)),
                      shift=jnp.tile(shift, (1, 4)))

    # BasicBlock: 3x3 convs as (9*C, C) im2col weights (rows (kh,kw,cin)), folded BN.
    # (BasicBlock BNs use their constructor-default eps=1e-5; the upsampler BN uses
    #  the explicit eps=1e-3 from the module.)
    p = params["bb"]
    C = p["w1"].shape[0]
    w1 = jnp.transpose(p["w1"], (2, 3, 1, 0)).reshape(9 * C, C)
    w2 = jnp.transpose(p["w2"], (2, 3, 1, 0)).reshape(9 * C, C)
    s1, sh1 = _bn_fold(p["g1"], p["b1"], p["m1"], p["v1"], 1e-5)
    s2, sh2 = _bn_fold(p["g2"], p["b2"], p["m2"], p["v2"], 1e-5)
    prep["bb"] = dict(w1=w1.astype(bf16), s1=s1, sh1=sh1,
                      w2=w2.astype(bf16), s2=s2, sh2=sh2)

    # output_conv: ConvTranspose2d(128, nc, 2, s2) -> per-pixel matmul, columns
    # padded up to 128 lanes (store-dense; real channels sliced outside the kernel).
    p = params["out"]
    C = p["w"].shape[0]
    ncol = 4 * num_classes
    cpad = ((ncol + 127) // 128) * 128
    wmat = jnp.transpose(p["w"], (0, 2, 3, 1)).reshape(C, ncol)
    bvec = jnp.broadcast_to(p["b"], (2, 2, num_classes)).reshape(ncol)
    wpad = jnp.zeros((C, cpad), jnp.float32).at[:, :ncol].set(wmat)
    bpad = jnp.zeros((1, cpad), jnp.float32).at[0, :ncol].set(bvec)
    prep["out"] = dict(w=wpad.astype(bf16), b=bpad)
    return prep


# ----------------------------------- forward -----------------------------------

def decoder_forward(x_nchw, prep, num_classes):
    bf16 = jnp.bfloat16
    x = jnp.transpose(x_nchw, (0, 2, 3, 1)).astype(bf16)          # NHWC, bf16
    N, H, W, Cin = x.shape
    assert H % 8 == 0 and W % 8 == 0, "spatial dims must be multiples of 8"
    H2, W2 = 2 * H, 2 * W

    # ---------------- kernel 1: UpsamplerBlock ----------------
    pu = prep["up"]
    xpad = jnp.pad(x, ((0, 0), (0, 1), (0, 1), (0, 0)))           # tiny, one XLA op
    yph = pl.pallas_call(
        upsampler_kernel,
        out_shape=jax.ShapeDtypeStruct((N, H, W, 4 * 128), bf16),
        grid=(N,),
        in_specs=[pl.BlockSpec((1, H + 1, W + 1, Cin), lambda n: (n, 0, 0, 0)),
                  pl.BlockSpec(pu["w"].shape, lambda n: (0, 0)),
                  pl.BlockSpec(pu["scale"].shape, lambda n: (0, 0)),
                  pl.BlockSpec(pu["shift"].shape, lambda n: (0, 0))],
        out_specs=pl.BlockSpec((1, H, W, 4 * 128), lambda n: (n, 0, 0, 0)),
        compiler_params=pltpu.CompilerParams(dimension_semantics=("parallel",)),
    )(xpad, pu["w"], pu["scale"], pu["shift"])

    # phase (ph,pw,c) -> spatial interleave + zero border, one small fused XLA op
    y = interleave_2x2(yph, 128)                                  # (N, 2H, 2W, 128)
    EW = ((W2 + 2 + 7) // 8) * 8
    WP = EW + 8
    ypad = jnp.pad(y, ((0, 0), (2, 2), (2, WP - W2 - 2), (0, 0)))

    # ---------------- kernel 2: BasicBlock + output ConvTranspose ----------------
    pb, po = prep["bb"], prep["out"]
    out_ph = pl.pallas_call(
        block_out_kernel,
        out_shape=jax.ShapeDtypeStruct((N, H2, W2, 128), bf16),
        grid=(N,),
        in_specs=[pl.BlockSpec((1, H2 + 4, WP, 128), lambda n: (n, 0, 0, 0))]
                 + [pl.BlockSpec(a.shape, lambda n: (0, 0)) for a in
                    (pb["w1"], pb["s1"], pb["sh1"], pb["w2"], pb["s2"], pb["sh2"],
                     po["w"], po["b"])],
        out_specs=pl.BlockSpec((1, H2, W2, 128), lambda n: (n, 0, 0, 0)),
        compiler_params=pltpu.CompilerParams(dimension_semantics=("parallel",)),
    )(ypad, pb["w1"], pb["s1"], pb["sh1"], pb["w2"], pb["s2"], pb["sh2"],
      po["w"], po["b"])

    # slice real channels, interleave the final 2x2 phases, NCHW f32 (tiny tensors)
    o = interleave_2x2(out_ph[..., :4 * num_classes], num_classes)
    return jnp.transpose(o, (0, 3, 1, 2)).astype(jnp.float32)     # (N, nc, 4H, 4W)


# ---------------------------------- reference -----------------------------------

def ref_forward(x_nchw, params, num_classes):
    """Pure-JAX (XLA conv) reference mirroring the kernel's bf16/f32 mixed precision."""
    dn = ("NHWC", "HWIO", "NHWC")
    f32, bf16 = jnp.float32, jnp.bfloat16
    x = jnp.transpose(x_nchw, (0, 2, 3, 1)).astype(bf16)

    # UpsamplerBlock
    p = params["up"]
    wk = jnp.transpose(p["w"][:, :, ::-1, ::-1], (2, 3, 0, 1)).astype(bf16)
    scale, shift = _bn_fold(p["gamma"], p["beta"], p["mean"], p["var"], 1e-3,
                            conv_bias=p["bias"])
    y = jax.lax.conv_general_dilated(x, wk, (1, 1), [(1, 2), (1, 2)],
                                     lhs_dilation=(2, 2), dimension_numbers=dn,
                                     preferred_element_type=f32)
    y = jnp.maximum(y * scale + shift, 0.0).astype(bf16)

    # BasicBlock
    p = params["bb"]
    w1 = jnp.transpose(p["w1"], (2, 3, 1, 0)).astype(bf16)
    w2 = jnp.transpose(p["w2"], (2, 3, 1, 0)).astype(bf16)
    s1, sh1 = _bn_fold(p["g1"], p["b1"], p["m1"], p["v1"], 1e-5)
    s2, sh2 = _bn_fold(p["g2"], p["b2"], p["m2"], p["v2"], 1e-5)
    h = jax.lax.conv_general_dilated(y, w1, (1, 1), [(1, 1), (1, 1)],
                                     dimension_numbers=dn, preferred_element_type=f32)
    h = jnp.maximum(h * s1 + sh1, 0.0).astype(bf16)
    h2 = jax.lax.conv_general_dilated(h, w2, (1, 1), [(1, 1), (1, 1)],
                                      dimension_numbers=dn, preferred_element_type=f32)
    z = jnp.maximum(h2 * s2 + sh2 + y.astype(f32), 0.0).astype(bf16)

    # output ConvTranspose2d(128, nc, 2, s2)
    p = params["out"]
    N, H2, W2, _ = z.shape
    out = jnp.einsum("nhwc,cokl->nhkwlo", z, p["w"].astype(bf16),
                     preferred_element_type=f32)
    out = out.reshape(N, 2 * H2, 2 * W2, num_classes) + p["b"]
    return jnp.transpose(out, (0, 3, 1, 2)).astype(f32)


# ---------------------------------- param init ----------------------------------

def init_params(key, num_classes):
    keys = iter(jax.random.split(key, 32))

    def nrm(shape, s=0.05):
        return jax.random.normal(next(keys), shape, jnp.float32) * s

    def bn(c):
        return dict(gamma=1.0 + nrm((c,), 0.1),
                    beta=nrm((c,), 0.1),
                    mean=nrm((c,), 0.1),
                    var=0.5 + jax.random.uniform(next(keys), (c,), jnp.float32))

    params = {}
    params["up"] = dict(w=nrm((256, 128, 3, 3)), bias=nrm((128,)), **bn(128))
    bn1, bn2 = bn(128), bn(128)
    params["bb"] = dict(
        w1=nrm((128, 128, 3, 3)),
        g1=bn1["gamma"], b1=bn1["beta"], m1=bn1["mean"], v1=bn1["var"],
        w2=nrm((128, 128, 3, 3)),
        g2=bn2["gamma"], b2=bn2["beta"], m2=bn2["mean"], v2=bn2["var"],
    )
    params["out"] = dict(w=nrm((128, num_classes, 2, 2)), b=nrm((num_classes,)))
    return params


# ------------------------------------- main -------------------------------------

if __name__ == "__main__":
    num_classes = 4
    key = jax.random.PRNGKey(0)
    kx, kp = jax.random.split(key)

    # Input mirrors the Decoder contract: NCHW, 256 channels.
    x = jax.random.normal(kx, (2, 256, 8, 8), jnp.float32)
    params = init_params(kp, num_classes)
    prep = prepare_params(params, num_classes)          # hoisted weight prep

    fwd = jax.jit(decoder_forward, static_argnums=(2,))
    out = jax.block_until_ready(fwd(x, prep, num_classes))

    ref = ref_forward(x, params, num_classes)
    assert out.shape == (2, num_classes, 32, 32), out.shape
    assert bool(jnp.all(jnp.isfinite(out)))

    max_err = float(jnp.max(jnp.abs(out - ref)))
    mean_err = float(jnp.mean(jnp.abs(out - ref)))
    # bf16 activations cross HBM between stages, and the Pallas MXU path and XLA's
    # conv path accumulate the same bf16 products in different f32 orders, so O(1)
    # activations legitimately differ by a few bf16 ulps after 3 conv layers.
    # A structural bug (wrong tap / phase / BN fold) shows up as O(0.1-1) error.
    assert max_err < 5e-2, f"max mismatch vs reference: {max_err}"
    assert mean_err < 1.5e-2, f"mean mismatch vs reference: {mean_err}"

    print("KERNEL_OK")
</pallas_src>

<mosaic_0001>
module attributes {stable_mosaic.version = 11 : i64} {
  func.func @upsampler_kernel(%arg0: i32, %arg1: memref<1x9x9x256xbf16, #tpu.memory_space<vmem>>, %arg2: memref<1024x512xbf16, #tpu.memory_space<vmem>>, %arg3: memref<1x512xf32, #tpu.memory_space<vmem>>, %arg4: memref<1x512xf32, #tpu.memory_space<vmem>>, %arg5: memref<1x8x8x512xbf16, #tpu.memory_space<vmem>>) attributes {dimension_semantics = [#tpu.dimension_semantics<parallel>], iteration_bounds = array<i64: 2>, scalar_prefetch = 0 : i64, scratch_operands = 0 : i64, tpu.core_type = #tpu.core_type<tc>, window_params = [{transform_indices = @transform_0, window_bounds = array<i64: 1, 9, 9, 256>}, {pipeline_mode = #tpu.pipeline_mode<synchronous>, transform_indices = @transform_1, window_bounds = array<i64: 1024, 512>}, {pipeline_mode = #tpu.pipeline_mode<synchronous>, transform_indices = @transform_2, window_bounds = array<i64: 1, 512>}, {pipeline_mode = #tpu.pipeline_mode<synchronous>, transform_indices = @transform_3, window_bounds = array<i64: 1, 512>}, {transform_indices = @transform_4, window_bounds = array<i64: 1, 8, 8, 512>}]} {
    %c0 = arith.constant 0 : index
    %c0_0 = arith.constant 0 : index
    %c0_1 = arith.constant 0 : index
    %c0_2 = arith.constant 0 : index
    %0 = vector.load %arg1[%c0, %c0_0, %c0_1, %c0_2] : memref<1x9x9x256xbf16, #tpu.memory_space<vmem>>, vector<1x9x9x256xbf16>
    %1 = vector.shape_cast %0 : vector<1x9x9x256xbf16> to vector<9x9x256xbf16>
    %2 = vector.extract_strided_slice %1 {offsets = [0, 0, 0], sizes = [9, 8, 256], strides = [1, 1, 1]} : vector<9x9x256xbf16> to vector<9x8x256xbf16>
    %3 = vector.extract_strided_slice %1 {offsets = [0, 1, 0], sizes = [9, 8, 256], strides = [1, 1, 1]} : vector<9x9x256xbf16> to vector<9x8x256xbf16>
    %4 = vector.extract_strided_slice %2 {offsets = [0, 0, 0], sizes = [8, 8, 256], strides = [1, 1, 1]} : vector<9x8x256xbf16> to vector<8x8x256xbf16>
    %5 = vector.extract_strided_slice %3 {offsets = [0, 0, 0], sizes = [8, 8, 256], strides = [1, 1, 1]} : vector<9x8x256xbf16> to vector<8x8x256xbf16>
    %6 = vector.extract_strided_slice %2 {offsets = [1, 0, 0], sizes = [8, 8, 256], strides = [1, 1, 1]} : vector<9x8x256xbf16> to vector<8x8x256xbf16>
    %7 = vector.extract_strided_slice %3 {offsets = [1, 0, 0], sizes = [8, 8, 256], strides = [1, 1, 1]} : vector<9x8x256xbf16> to vector<8x8x256xbf16>
    %8 = tpu.concatenate %4, %5, %6, %7 in 2 : vector<8x8x256xbf16>, vector<8x8x256xbf16>, vector<8x8x256xbf16>, vector<8x8x256xbf16> -> vector<8x8x1024xbf16>
    %9 = vector.shape_cast %8 : vector<8x8x1024xbf16> to vector<64x1024xbf16>
    %c0_3 = arith.constant 0 : index
    %c0_4 = arith.constant 0 : index
    %10 = vector.load %arg2[%c0_3, %c0_4] : memref<1024x512xbf16, #tpu.memory_space<vmem>>, vector<1024x512xbf16>
    %cst = arith.constant dense<0.000000e+00> : vector<64x512xf32>
    %11 = tpu.matmul %9, %10, %cst {dimension_numbers = #tpu.dot_dimension_numbers<[1], [0], [0], [1], [0, 0, 1, 1], [], []>} : vector<64x1024xbf16>, vector<1024x512xbf16>, vector<64x512xf32> -> vector<64x512xf32>
    %c0_5 = arith.constant 0 : index
    %c0_6 = arith.constant 0 : index
    %12 = vector.load %arg3[%c0_5, %c0_6] : memref<1x512xf32, #tpu.memory_space<vmem>>, vector<1x512xf32>
    %13 = vector.broadcast %12 : vector<1x512xf32> to vector<64x512xf32>
    %14 = arith.mulf %11, %13 : vector<64x512xf32>
    %c0_7 = arith.constant 0 : index
    %c0_8 = arith.constant 0 : index
    %15 = vector.load %arg4[%c0_7, %c0_8] : memref<1x512xf32, #tpu.memory_space<vmem>>, vector<1x512xf32>
    %16 = vector.broadcast %15 : vector<1x512xf32> to vector<64x512xf32>
    %17 = arith.addf %14, %16 : vector<64x512xf32>
    %cst_9 = arith.constant 0.000000e+00 : f32
    %18 = vector.broadcast %cst_9 : f32 to vector<64x512xf32>
    %19 = arith.maximumf %17, %18 : vector<64x512xf32>
    %20 = vector.shape_cast %19 : vector<64x512xf32> to vector<1x8x8x512xf32>
    %21 = arith.truncf %20 : vector<1x8x8x512xf32> to vector<1x8x8x512xbf16>
    %c0_10 = arith.constant 0 : index
    %c0_11 = arith.constant 0 : index
    %c0_12 = arith.constant 0 : index
    %c0_13 = arith.constant 0 : index
    %22 = vector.load %arg5[%c0_10, %c0_11, %c0_12, %c0_13] : memref<1x8x8x512xbf16, #tpu.memory_space<vmem>>, vector<1x8x8x512xbf16>
    tpu.vector_store %arg5[%c0_10, %c0_11, %c0_12, %c0_13], %21 {strides = array<i32>} : memref<1x8x8x512xbf16, #tpu.memory_space<vmem>>, vector<1x8x8x512xbf16>,
    return
  }
  func.func @transform_0(%arg0: i32) -> (i32, i32, i32, i32) {
    %c0_i32 = arith.constant 0 : i32
    %c0_i32_0 = arith.constant 0 : i32
    %c0_i32_1 = arith.constant 0 : i32
    %c0_i32_2 = arith.constant 0 : i32
    return %arg0, %c0_i32, %c0_i32_0, %c0_i32_1 : i32, i32, i32, i32
  }
  func.func @transform_1(%arg0: i32) -> (i32, i32) {
    %c0_i32 = arith.constant 0 : i32
    %c0_i32_0 = arith.constant 0 : i32
    %c0_i32_1 = arith.constant 0 : i32
    return %c0_i32, %c0_i32_0 : i32, i32
  }
  func.func @transform_2(%arg0: i32) -> (i32, i32) {
    %c0_i32 = arith.constant 0 : i32
    %c0_i32_0 = arith.constant 0 : i32
    %c0_i32_1 = arith.constant 0 : i32
    return %c0_i32, %c0_i32_0 : i32, i32
  }
  func.func @transform_3(%arg0: i32) -> (i32, i32) {
    %c0_i32 = arith.constant 0 : i32
    %c0_i32_0 = arith.constant 0 : i32
    %c0_i32_1 = arith.constant 0 : i32
    return %c0_i32, %c0_i32_0 : i32, i32
  }
  func.func @transform_4(%arg0: i32) -> (i32, i32, i32, i32) {
    %c0_i32 = arith.constant 0 : i32
    %c0_i32_0 = arith.constant 0 : i32
    %c0_i32_1 = arith.constant 0 : i32
    %c0_i32_2 = arith.constant 0 : i32
    return %arg0, %c0_i32, %c0_i32_0, %c0_i32_1 : i32, i32, i32, i32
  }
}

module attributes {stable_mosaic.version = 11 : i64} {
  func.func @block_out_kernel(%arg0: i32, %arg1: memref<1x20x32x128xbf16, #tpu.memory_space<vmem>>, %arg2: memref<1152x128xbf16, #tpu.memory_space<vmem>>, %arg3: memref<1x128xf32, #tpu.memory_space<vmem>>, %arg4: memref<1x128xf32, #tpu.memory_space<vmem>>, %arg5: memref<1152x128xbf16, #tpu.memory_space<vmem>>, %arg6: memref<1x128xf32, #tpu.memory_space<vmem>>, %arg7: memref<1x128xf32, #tpu.memory_space<vmem>>, %arg8: memref<128x128xbf16, #tpu.memory_space<vmem>>, %arg9: memref<1x128xf32, #tpu.memory_space<vmem>>, %arg10: memref<1x16x16x128xbf16, #tpu.memory_space<vmem>>) attributes {dimension_semantics = [#tpu.dimension_semantics<parallel>], iteration_bounds = array<i64: 2>, scalar_prefetch = 0 : i64, scratch_operands = 0 : i64, tpu.core_type = #tpu.core_type<tc>, window_params = [{transform_indices = @transform_0, window_bounds = array<i64: 1, 20, 32, 128>}, {pipeline_mode = #tpu.pipeline_mode<synchronous>, transform_indices = @transform_1, window_bounds = array<i64: 1152, 128>}, {pipeline_mode = #tpu.pipeline_mode<synchronous>, transform_indices = @transform_2, window_bounds = array<i64: 1, 128>}, {pipeline_mode = #tpu.pipeline_mode<synchronous>, transform_indices = @transform_3, window_bounds = array<i64: 1, 128>}, {pipeline_mode = #tpu.pipeline_mode<synchronous>, transform_indices = @transform_4, window_bounds = array<i64: 1152, 128>}, {pipeline_mode = #tpu.pipeline_mode<synchronous>, transform_indices = @transform_5, window_bounds = array<i64: 1, 128>}, {pipeline_mode = #tpu.pipeline_mode<synchronous>, transform_indices = @transform_6, window_bounds = array<i64: 1, 128>}, {pipeline_mode = #tpu.pipeline_mode<synchronous>, transform_indices = @transform_7, window_bounds = array<i64: 128, 128>}, {pipeline_mode = #tpu.pipeline_mode<synchronous>, transform_indices = @transform_8, window_bounds = array<i64: 1, 128>}, {transform_indices = @transform_9, window_bounds = array<i64: 1, 16, 16, 128>}]} {
    %c0 = arith.constant 0 : index
    %c0_0 = arith.constant 0 : index
    %c0_1 = arith.constant 0 : index
    %c0_2 = arith.constant 0 : index
    %0 = vector.load %arg1[%c0, %c0_0, %c0_1, %c0_2] : memref<1x20x32x128xbf16, #tpu.memory_space<vmem>>, vector<1x20x32x128xbf16>
    %1 = vector.shape_cast %0 : vector<1x20x32x128xbf16> to vector<20x32x128xbf16>
    %2 = vector.extract_strided_slice %1 {offsets = [0, 0, 0], sizes = [20, 24, 128], strides = [1, 1, 1]} : vector<20x32x128xbf16> to vector<20x24x128xbf16>
    %3 = vector.extract_strided_slice %1 {offsets = [0, 1, 0], sizes = [20, 24, 128], strides = [1, 1, 1]} : vector<20x32x128xbf16> to vector<20x24x128xbf16>
    %4 = vector.extract_strided_slice %1 {offsets = [0, 2, 0], sizes = [20, 24, 128], strides = [1, 1, 1]} : vector<20x32x128xbf16> to vector<20x24x128xbf16>
    %5 = tpu.concatenate %2, %3, %4 in 2 : vector<20x24x128xbf16>, vector<20x24x128xbf16>, vector<20x24x128xbf16> -> vector<20x24x384xbf16>
    %6 = vector.extract_strided_slice %5 {offsets = [0, 0, 0], sizes = [18, 24, 384], strides = [1, 1, 1]} : vector<20x24x384xbf16> to vector<18x24x384xbf16>
    %7 = vector.shape_cast %6 : vector<18x24x384xbf16> to vector<432x384xbf16>
    %c0_3 = arith.constant 0 : index
    %c0_4 = arith.constant 0 : index
    %8 = vector.load %arg2[%c0_3, %c0_4] : memref<1152x128xbf16, #tpu.memory_space<vmem>>, vector<384x128xbf16>
    %cst = arith.constant dense<0.000000e+00> : vector<432x128xf32>
    %9 = tpu.matmul %7, %8, %cst {dimension_numbers = #tpu.dot_dimension_numbers<[1], [0], [0], [1], [0, 0, 1, 1], [], []>} : vector<432x384xbf16>, vector<384x128xbf16>, vector<432x128xf32> -> vector<432x128xf32>
    %10 = vector.extract_strided_slice %5 {offsets = [1, 0, 0], sizes = [18, 24, 384], strides = [1, 1, 1]} : vector<20x24x384xbf16> to vector<18x24x384xbf16>
    %11 = vector.shape_cast %10 : vector<18x24x384xbf16> to vector<432x384xbf16>
    %c384 = arith.constant 384 : index
    %c0_5 = arith.constant 0 : index
    %12 = vector.load %arg2[%c384, %c0_5] : memref<1152x128xbf16, #tpu.memory_space<vmem>>, vector<384x128xbf16>
    %cst_6 = arith.constant dense<0.000000e+00> : vector<432x128xf32>
    %13 = tpu.matmul %11, %12, %cst_6 {dimension_numbers = #tpu.dot_dimension_numbers<[1], [0], [0], [1], [0, 0, 1, 1], [], []>} : vector<432x384xbf16>, vector<384x128xbf16>, vector<432x128xf32> -> vector<432x128xf32>
    %14 = arith.addf %9, %13 : vector<432x128xf32>
    %15 = vector.extract_strided_slice %5 {offsets = [2, 0, 0], sizes = [18, 24, 384], strides = [1, 1, 1]} : vector<20x24x384xbf16> to vector<18x24x384xbf16>
    %16 = vector.shape_cast %15 : vector<18x24x384xbf16> to vector<432x384xbf16>
    %c768 = arith.constant 768 : index
    %c0_7 = arith.constant 0 : index
    %17 = vector.load %arg2[%c768, %c0_7] : memref<1152x128xbf16, #tpu.memory_space<vmem>>, vector<384x128xbf16>
    %cst_8 = arith.constant dense<0.000000e+00> : vector<432x128xf32>
    %18 = tpu.matmul %16, %17, %cst_8 {dimension_numbers = #tpu.dot_dimension_numbers<[1], [0], [0], [1], [0, 0, 1, 1], [], []>} : vector<432x384xbf16>, vector<384x128xbf16>, vector<432x128xf32> -> vector<432x128xf32>
    %19 = arith.addf %14, %18 : vector<432x128xf32>
    %c0_9 = arith.constant 0 : index
    %c0_10 = arith.constant 0 : index
    %20 = vector.load %arg3[%c0_9, %c0_10] : memref<1x128xf32, #tpu.memory_space<vmem>>, vector<1x128xf32>
    %21 = vector.broadcast %20 : vector<1x128xf32> to vector<432x128xf32>
    %22 = arith.mulf %19, %21 : vector<432x128xf32>
    %c0_11 = arith.constant 0 : index
    %c0_12 = arith.constant 0 : index
    %23 = vector.load %arg4[%c0_11, %c0_12] : memref<1x128xf32, #tpu.memory_space<vmem>>, vector<1x128xf32>
    %24 = vector.broadcast %23 : vector<1x128xf32> to vector<432x128xf32>
    %25 = arith.addf %22, %24 : vector<432x128xf32>
    %cst_13 = arith.constant 0.000000e+00 : f32
    %26 = vector.broadcast %cst_13 : f32 to vector<432x128xf32>
    %27 = arith.maximumf %25, %26 : vector<432x128xf32>
    %28 = vector.shape_cast %27 : vector<432x128xf32> to vector<18x24x128xf32>
    %29 = tpu.iota {dimensions = array<i32: 0>} : vector<18x24x128xi32>
    %30 = tpu.iota {dimensions = array<i32: 1>} : vector<18x24x128xi32>
    %c1_i32 = arith.constant 1 : i32
    %31 = vector.broadcast %c1_i32 : i32 to vector<18x24x128xi32>
    %32 = arith.cmpi sge, %29, %31 : vector<18x24x128xi32>
    %c16_i32 = arith.constant 16 : i32
    %33 = vector.broadcast %c16_i32 : i32 to vector<18x24x128xi32>
    %34 = arith.cmpi sle, %29, %33 : vector<18x24x128xi32>
    %35 = arith.andi %32, %34 : vector<18x24x128xi1>
    %c1_i32_14 = arith.constant 1 : i32
    %36 = vector.broadcast %c1_i32_14 : i32 to vector<18x24x128xi32>
    %37 = arith.cmpi sge, %30, %36 : vector<18x24x128xi32>
    %38 = arith.andi %35, %37 : vector<18x24x128xi1>
    %c16_i32_15 = arith.constant 16 : i32
    %39 = vector.broadcast %c16_i32_15 : i32 to vector<18x24x128xi32>
    %40 = arith.cmpi sle, %30, %39 : vector<18x24x128xi32>
    %41 = arith.andi %38, %40 : vector<18x24x128xi1>
    %cst_16 = arith.constant 0.000000e+00 : f32
    %42 = vector.broadcast %cst_16 : f32 to vector<18x24x128xf32>
    %43 = arith.select %41, %28, %42 : vector<18x24x128xi1>, vector<18x24x128xf32>
    %44 = arith.truncf %43 : vector<18x24x128xf32> to vector<18x24x128xbf16>
    %45 = vector.extract_strided_slice %44 {offsets = [0, 0, 0], sizes = [18, 16, 128], strides = [1, 1, 1]} : vector<18x24x128xbf16> to vector<18x16x128xbf16>
    %46 = vector.extract_strided_slice %44 {offsets = [0, 1, 0], sizes = [18, 16, 128], strides = [1, 1, 1]} : vector<18x24x128xbf16> to vector<18x16x128xbf16>
    %47 = vector.extract_strided_slice %44 {offsets = [0, 2, 0], sizes = [18, 16, 128], strides = [1, 1, 1]} : vector<18x24x128xbf16> to vector<18x16x128xbf16>
    %48 = tpu.concatenate %45, %46, %47 in 2 : vector<18x16x128xbf16>, vector<18x16x128xbf16>, vector<18x16x128xbf16> -> vector<18x16x384xbf16>
    %49 = vector.extract_strided_slice %48 {offsets = [0, 0, 0], sizes = [16, 16, 384], strides = [1, 1, 1]} : vector<18x16x384xbf16> to vector<16x16x384xbf16>
    %50 = vector.shape_cast %49 : vector<16x16x384xbf16> to vector<256x384xbf16>
    %c0_17 = arith.constant 0 : index
    %c0_18 = arith.constant 0 : index
    %51 = vector.load %arg5[%c0_17, %c0_18] : memref<1152x128xbf16, #tpu.memory_space<vmem>>, vector<384x128xbf16>
    %cst_19 = arith.constant dense<0.000000e+00> : vector<256x128xf32>
    %52 = tpu.matmul %50, %51, %cst_19 {dimension_numbers = #tpu.dot_dimension_numbers<[1], [0], [0], [1], [0, 0, 1, 1], [], []>} : vector<256x384xbf16>, vector<384x128xbf16>, vector<256x128xf32> -> vector<256x128xf32>
    %53 = vector.extract_strided_slice %48 {offsets = [1, 0, 0], sizes = [16, 16, 384], strides = [1, 1, 1]} : vector<18x16x384xbf16> to vector<16x16x384xbf16>
    %54 = vector.shape_cast %53 : vector<16x16x384xbf16> to vector<256x384xbf16>
    %c384_20 = arith.constant 384 : index
    %c0_21 = arith.constant 0 : index
    %55 = vector.load %arg5[%c384_20, %c0_21] : memref<1152x128xbf16, #tpu.memory_space<vmem>>, vector<384x128xbf16>
    %cst_22 = arith.constant dense<0.000000e+00> : vector<256x128xf32>
    %56 = tpu.matmul %54, %55, %cst_22 {dimension_numbers = #tpu.dot_dimension_numbers<[1], [0], [0], [1], [0, 0, 1, 1], [], []>} : vector<256x384xbf16>, vector<384x128xbf16>, vector<256x128xf32> -> vector<256x128xf32>
    %57 = arith.addf %52, %56 : vector<256x128xf32>
    %58 = vector.extract_strided_slice %48 {offsets = [2, 0, 0], sizes = [16, 16, 384], strides = [1, 1, 1]} : vector<18x16x384xbf16> to vector<16x16x384xbf16>
    %59 = vector.shape_cast %58 : vector<16x16x384xbf16> to vector<256x384xbf16>
    %c768_23 = arith.constant 768 : index
    %c0_24 = arith.constant 0 : index
    %60 = vector.load %arg5[%c768_23, %c0_24] : memref<1152x128xbf16, #tpu.memory_space<vmem>>, vector<384x128xbf16>
    %cst_25 = arith.constant dense<0.000000e+00> : vector<256x128xf32>
    %61 = tpu.matmul %59, %60, %cst_25 {dimension_numbers = #tpu.dot_dimension_numbers<[1], [0], [0], [1], [0, 0, 1, 1], [], []>} : vector<256x384xbf16>, vector<384x128xbf16>, vector<256x128xf32> -> vector<256x128xf32>
    %62 = arith.addf %57, %61 : vector<256x128xf32>
    %c0_26 = arith.constant 0 : index
    %c0_27 = arith.constant 0 : index
    %63 = vector.load %arg6[%c0_26, %c0_27] : memref<1x128xf32, #tpu.memory_space<vmem>>, vector<1x128xf32>
    %64 = vector.broadcast %63 : vector<1x128xf32> to vector<256x128xf32>
    %65 = arith.mulf %62, %64 : vector<256x128xf32>
    %c0_28 = arith.constant 0 : index
    %c0_29 = arith.constant 0 : index
    %66 = vector.load %arg7[%c0_28, %c0_29] : memref<1x128xf32, #tpu.memory_space<vmem>>, vector<1x128xf32>
    %67 = vector.broadcast %66 : vector<1x128xf32> to vector<256x128xf32>
    %68 = arith.addf %65, %67 : vector<256x128xf32>
    %69 = vector.extract_strided_slice %1 {offsets = [2, 2, 0], sizes = [16, 16, 128], strides = [1, 1, 1]} : vector<20x32x128xbf16> to vector<16x16x128xbf16>
    %70 = vector.shape_cast %69 : vector<16x16x128xbf16> to vector<256x128xbf16>
    %71 = arith.extf %70 : vector<256x128xbf16> to vector<256x128xf32>
    %72 = arith.addf %68, %71 : vector<256x128xf32>
    %cst_30 = arith.constant 0.000000e+00 : f32
    %73 = vector.broadcast %cst_30 : f32 to vector<256x128xf32>
    %74 = arith.maximumf %72, %73 : vector<256x128xf32>
    %75 = arith.truncf %74 : vector<256x128xf32> to vector<256x128xbf16>
    %c0_31 = arith.constant 0 : index
    %c0_32 = arith.constant 0 : index
    %76 = vector.load %arg8[%c0_31, %c0_32] : memref<128x128xbf16, #tpu.memory_space<vmem>>, vector<128x128xbf16>
    %cst_33 = arith.constant dense<0.000000e+00> : vector<256x128xf32>
    %77 = tpu.matmul %75, %76, %cst_33 {dimension_numbers = #tpu.dot_dimension_numbers<[1], [0], [0], [1], [0, 0, 1, 1], [], []>} : vector<256x128xbf16>, vector<128x128xbf16>, vector<256x128xf32> -> vector<256x128xf32>
    %c0_34 = arith.constant 0 : index
    %c0_35 = arith.constant 0 : index
    %78 = vector.load %arg9[%c0_34, %c0_35] : memref<1x128xf32, #tpu.memory_space<vmem>>, vector<1x128xf32>
    %79 = vector.broadcast %78 : vector<1x128xf32> to vector<256x128xf32>
    %80 = arith.addf %77, %79 : vector<256x128xf32>
    %81 = vector.shape_cast %80 : vector<256x128xf32> to vector<1x16x16x128xf32>
    %82 = arith.truncf %81 : vector<1x16x16x128xf32> to vector<1x16x16x128xbf16>
    %c0_36 = arith.constant 0 : index
    %c0_37 = arith.constant 0 : index
    %c0_38 = arith.constant 0 : index
    %c0_39 = arith.constant 0 : index
    %83 = vector.load %arg10[%c0_36, %c0_37, %c0_38, %c0_39] : memref<1x16x16x128xbf16, #tpu.memory_space<vmem>>, vector<1x16x16x128xbf16>
    tpu.vector_store %arg10[%c0_36, %c0_37, %c0_38, %c0_39], %82 {strides = array<i32>} : memref<1x16x16x128xbf16, #tpu.memory_space<vmem>>, vector<1x16x16x128xbf16>,
    return
  }
  func.func @transform_0(%arg0: i32) -> (i32, i32, i32, i32) {
    %c0_i32 = arith.constant 0 : i32
    %c0_i32_0 = arith.constant 0 : i32
    %c0_i32_1 = arith.constant 0 : i32
    %c0_i32_2 = arith.constant 0 : i32
    return %arg0, %c0_i32, %c0_i32_0, %c0_i32_1 : i32, i32, i32, i32
  }
  func.func @transform_1(%arg0: i32) -> (i32, i32) {
    %c0_i32 = arith.constant 0 : i32
    %c0_i32_0 = arith.constant 0 : i32
    %c0_i32_1 = arith.constant 0 : i32
    return %c0_i32, %c0_i32_0 : i32, i32
  }
  func.func @transform_2(%arg0: i32) -> (i32, i32) {
    %c0_i32 = arith.constant 0 : i32
    %c0_i32_0 = arith.constant 0 : i32
    %c0_i32_1 = arith.constant 0 : i32
    return %c0_i32, %c0_i32_0 : i32, i32
  }
  func.func @transform_3(%arg0: i32) -> (i32, i32) {
    %c0_i32 = arith.constant 0 : i32
    %c0_i32_0 = arith.constant 0 : i32
    %c0_i32_1 = arith.constant 0 : i32
    return %c0_i32, %c0_i32_0 : i32, i32
  }
  func.func @transform_4(%arg0: i32) -> (i32, i32) {
    %c0_i32 = arith.constant 0 : i32
    %c0_i32_0 = arith.constant 0 : i32
    %c0_i32_1 = arith.constant 0 : i32
    return %c0_i32, %c0_i32_0 : i32, i32
  }
  func.func @transform_5(%arg0: i32) -> (i32, i32) {
    %c0_i32 = arith.constant 0 : i32
    %c0_i32_0 = arith.constant 0 : i32
    %c0_i32_1 = arith.constant 0 : i32
    return %c0_i32, %c0_i32_0 : i32, i32
  }
  func.func @transform_6(%arg0: i32) -> (i32, i32) {
    %c0_i32 = arith.constant 0 : i32
    %c0_i32_0 = arith.constant 0 : i32
    %c0_i32_1 = arith.constant 0 : i32
    return %c0_i32, %c0_i32_0 : i32, i32
  }
  func.func @transform_7(%arg0: i32) -> (i32, i32) {
    %c0_i32 = arith.constant 0 : i32
    %c0_i32_0 = arith.constant 0 : i32
    %c0_i32_1 = arith.constant 0 : i32
    return %c0_i32, %c0_i32_0 : i32, i32
  }
  func.func @transform_8(%arg0: i32) -> (i32, i32) {
    %c0_i32 = arith.constant 0 : i32
    %c0_i32_0 = arith.constant 0 : i32
    %c0_i32_1 = arith.constant 0 : i32
    return %c0_i32, %c0_i32_0 : i32, i32
  }
  func.func @transform_9(%arg0: i32) -> (i32, i32, i32, i32) {
    %c0_i32 = arith.constant 0 : i32
    %c0_i32_0 = arith.constant 0 : i32
    %c0_i32_1 = arith.constant 0 : i32
    %c0_i32_2 = arith.constant 0 : i32
    return %arg0, %c0_i32, %c0_i32_0, %c0_i32_1 : i32, i32, i32, i32
  }
}

</mosaic_0001>

<bundles_post_ra>
// kernel: decoder_forward.2
= control target key start
LH: loop header
LB: loop body
LE: loop exit
PB: predicated region body
PF: predicated region fallthrough
CT: control target
= control target key end

     0   :  { %9 = vsyncpa [#allocation3], 0  ;;  %s3938_s15 = smov 0   ;;  %s4257_s0 = inlined_call_operand.vmem [shape: bf16[2,9,9,256], index: 0, kind: input, shape index: {}]   ;;  %s4258_s1 = inlined_call_operand.hbm [shape: bf16[1024,512], index: 1, kind: input, shape index: {}]   ;;  %s4259_s2 = inlined_call_operand.vmem [shape: f32[1,512], index: 2, kind: input, shape index: {}]   ;;  %s4260_s3 = inlined_call_operand.vmem [shape: f32[1,512], index: 3, kind: input, shape index: {}]   ;;  %s4261_s4 = inlined_call_operand.vmem [shape: bf16[2,8,8,512], index: 4, kind: output, shape index: {}]  }
   0x1 LB: > { %s3944_s16 = sadd.s32 4294967295, %s3908_s15   ;;  %p2984_p0 = scmp.ge.s32.totalorder %s3908_s15, 1  ;;  %s3908_s15 = sphi %s3938_s15, %s15_s15  }
   0x2   : > { %p135_p1 = scmp.lt.s32.totalorder %s3908_s15, 3  ;;  %s3910_s17 = smov [#allocation2]  }
   0x3   : > { %s147_s18 = sshll.u32 %s3910_s17, 4  ;;  %p4262_p3 = scmp.eq.s32.totalorder %s3944_s16, 0  ;;  %s148_s18 = int_to_ptr.vmem [resolvable:$true] %s147_s18 }
   0x4   : > { %p3948_p2 = pnand %p2984_p0, %p135_p1  ;;  %s3870_s23 = scalar_lea.hbm %s4258_s1, 32768 }
   0x5   : > { %p3871_p6 = scmp.ne.s32.totalorder %s4258_s1, %s3870_s23  ;;  %p3877_p10 = scmp.lt.u32.totalorder %s3870_s23, %s4258_s1 }
   0x6   : > { %s4264_s19 = scalar_select %p3948_p2, 1, 0 }
   0x7   : > { %p3434_p4 = pneg %p3948_p2 }
   0x9   : > { %p3957_p5 = pnand %p4262_p3, %p3434_p4 }
   0xb   : > { %p3872_p7 = pneg %p3957_p5 }
   0xd   : > { %p3873_p8 = pnand %p3872_p7, %p3871_p6 }
   0xf   : > { %p3874_p9 = pneg %p3873_p8 }
  0x11   : > { %p3879_p11 = pnand %p3877_p10, %p3874_p9 }
  0x13   : > { %3882 = shalt.err (!%p3879_p11)
}
  0x14   : > { %s3883_s28 = scalar_lea.vmem %s148_s18, 32768  ;;  %p3891_p1 = scmp.lt.s32.totalorder %s148_s18, %s148_s18 }
  0x15   : > { %p3884_p12 = scmp.ne.s32.totalorder %s148_s18, %s3883_s28  ;;  %p3892_p4 = scmp.lt.s32.totalorder %s3883_s28, %s3883_s28 }
  0x17   : > { %p3886_p13 = pnand %p3884_p12, %p3872_p7  ;;  %p3893_p3 = por %p3892_p4, %p3891_p1 }
  0x19   : > { %p3887_p0 = pneg %p3886_p13 }
  0x1b   : > { %p3894_p2 = pnand %p3893_p3, %p3887_p0 }
  0x1d   : > { %3897 = shalt.err (!%p3894_p2)
}
  0x1e   : > { %s3911_s29 = smov 256   ;;  %s3912_s30 = smov 16  }
  0x1f   : > { %3437 = dma.hbm_to_vmem [thread:$0]  (!%p3957_p5), %s4258_s1, 32768, %s148_s18, [#allocation3], %s3911_s29, %s3911_s29, %s3912_s30  }
  0x20   : > { %p4266_p6 = scmp.ne.s32.totalorder %s4264_s19, 0 }
  0x21   : > { %p4267_p8 = scmp.eq.s32.totalorder (!%p4266_p6), %s3944_s16, 0 }
  0x22   : > { %177 = sbr.rel (%p4266_p6) target bundleno = 548 (0x224), region = 36 }
  0x29   : > { %3903 = dma.done.wait (%p4267_p8), [#allocation3], 32768   ;;  %p4268_p7 = pmov %p4267_p8 }
  0x2a   : > { %v3451_v0 = vld [vmem:[#allocation2 + $0x4] ss:$16 sps:$4 sm:$0xff]   ;;  %v3453_v1 = vld [vmem:[#allocation2 + $0xc] ss:$16 sps:$4 sm:$0xff]   ;;  %v3455_v2 = vld [vmem:[#allocation2] ss:$16 sps:$4 sm:$0xff]  }
  0x2b   : > { %3905 = vsyncadd (%p4268_p7), [#allocation3], 4294934528  ;;  %2047 = vmatprep.subr.bf16.mxu0 %v3451_v0  ;;  %v3456_v3 = vld [vmem:[#allocation2 + $0x8] ss:$16 sps:$4 sm:$0xff]   ;;  %2339 = vmatprep.subr.bf16.mxu1 %v3453_v1  ;;  %v3457_v4 = vld [vmem:[#allocation2 + $0x24] ss:$16 sps:$4 sm:$0xff]  }
  0x2c   : > { %2048 = vmatpush1.bf16.msra.mxu0 %v3455_v2  ;;  %2340 = vmatpush1.bf16.msra.mxu1 %v3456_v3  ;;  %v3459_v5 = vld [vmem:[#allocation2 + $0x2c] ss:$16 sps:$4 sm:$0xff]   ;;  %v3461_v6 = vld [vmem:[#allocation2 + $0x20] ss:$16 sps:$4 sm:$0xff]   ;;  %v3462_v7 = vld [vmem:[#allocation2 + $0x28] ss:$16 sps:$4 sm:$0xff]  }
  0x2d   : > { %2049 = vmatprep.subr.bf16.mxu0 %v3457_v4  ;;  %2341 = vmatprep.subr.bf16.mxu1 %v3459_v5  ;;  %v3463_v8 = vld [vmem:[#allocation2 + $0x44] ss:$16 sps:$4 sm:$0xff]   ;;  %v3465_v9 = vld [vmem:[#allocation2 + $0x4c] ss:$16 sps:$4 sm:$0xff]   ;;  %v3467_v10 = vld [vmem:[#allocation2 + $0x40] ss:$16 sps:$4 sm:$0xff]  }
  0x2e   : > { %v3468_v11 = vld [vmem:[#allocation2 + $0x48] ss:$16 sps:$4 sm:$0xff]   ;;  %v3469_v12 = vld [vmem:[#allocation2 + $0x64] ss:$16 sps:$4 sm:$0xff]   ;;  %v3471_v13 = vld [vmem:[#allocation2 + $0x6c] ss:$16 sps:$4 sm:$0xff]  }
  0x2f   : > { %v3473_v14 = vld [vmem:[#allocation2 + $0x60] ss:$16 sps:$4 sm:$0xff]   ;;  %v3474_v15 = vld [vmem:[#allocation2 + $0x68] ss:$16 sps:$4 sm:$0xff]   ;;  %v3475_v16 = vld [vmem:[#allocation2 + $0x84] ss:$16 sps:$4 sm:$0xff]  }
  0x30   : > { %2050 = vmatpush1.bf16.msra.mxu0 %v3461_v6  ;;  %2342 = vmatpush1.bf16.msra.mxu1 %v3462_v7  ;;  %v3477_v17 = vld [vmem:[#allocation2 + $0x8c] ss:$16 sps:$4 sm:$0xff]   ;;  %v3479_v18 = vld [vmem:[#allocation2 + $0x80] ss:$16 sps:$4 sm:$0xff]   ;;  %v3480_v19 = vld [vmem:[#allocation2 + $0x88] ss:$16 sps:$4 sm:$0xff]  }
  0x31   : > { %2051 = vmatprep.subr.bf16.mxu0 %v3463_v8  ;;  %2343 = vmatprep.subr.bf16.mxu1 %v3465_v9  ;;  %v3481_v20 = vld [vmem:[#allocation2 + $0xa4] ss:$16 sps:$4 sm:$0xff]   ;;  %v3483_v21 = vld [vmem:[#allocation2 + $0xac] ss:$16 sps:$4 sm:$0xff]   ;;  %v3485_v22 = vld [vmem:[#allocation2 + $0xa0] ss:$16 sps:$4 sm:$0xff]  }
  0x32   : > { %v3486_v23 = vld [vmem:[#allocation2 + $0xa8] ss:$16 sps:$4 sm:$0xff]   ;;  %v3487_v24 = vld [vmem:[#allocation2 + $0xc4] ss:$16 sps:$4 sm:$0xff]   ;;  %v3489_v25 = vld [vmem:[#allocation2 + $0xcc] ss:$16 sps:$4 sm:$0xff]  }
  0x33   : > { %v3491_v26 = vld [vmem:[#allocation2 + $0xc0] ss:$16 sps:$4 sm:$0xff]   ;;  %v3492_v27 = vld [vmem:[#allocation2 + $0xc8] ss:$16 sps:$4 sm:$0xff]   ;;  %v3493_v28 = vld [vmem:[#allocation2 + $0xe4] ss:$16 sps:$4 sm:$0xff]  }
  0x34   : > { %2052 = vmatpush1.bf16.msra.mxu0 %v3467_v10  ;;  %2344 = vmatpush1.bf16.msra.mxu1 %v3468_v11  ;;  %v3495_v29 = vld [vmem:[#allocation2 + $0xec] ss:$16 sps:$4 sm:$0xff]   ;;  %v3497_v30 = vld [vmem:[#allocation2 + $0xe0] ss:$16 sps:$4 sm:$0xff]   ;;  %p203_p2 = scmp.lt.s32.totalorder %s3944_s16, 1 }
  0x35   : > { %2053 = vmatprep.subr.bf16.mxu0 %v3469_v12  ;;  %2345 = vmatprep.subr.bf16.mxu1 %v3471_v13  ;;  %v3498_v31 = vld [vmem:[#allocation2 + $0xe8] ss:$16 sps:$4 sm:$0xff]   ;;  %v3499_v32 = vld [vmem:[#allocation2 + $0x104] ss:$16 sps:$4 sm:$0xff]   ;;  %v3501_v33 = vld [vmem:[#allocation2 + $0x10c] ss:$16 sps:$4 sm:$0xff]  }
  0x36   : > { %v3503_v34 = vld [vmem:[#allocation2 + $0x100] ss:$16 sps:$4 sm:$0xff]   ;;  %v3504_v35 = vld [vmem:[#allocation2 + $0x108] ss:$16 sps:$4 sm:$0xff]   ;;  %s4270_s16 = smov (!%p203_p2, %s3944_s16), 1 }
  0x37   : > { %v3505_v36 = vld [vmem:[#allocation2 + $0x124] ss:$16 sps:$4 sm:$0xff]   ;;  %v3507_v37 = vld [vmem:[#allocation2 + $0x12c] ss:$16 sps:$4 sm:$0xff]   ;;  %v3509_v38 = vld [vmem:[#allocation2 + $0x120] ss:$16 sps:$4 sm:$0xff]  }
  0x38   : > { %2054 = vmatpush1.bf16.msra.mxu0 %v3473_v14  ;;  %2346 = vmatpush1.bf16.msra.mxu1 %v3474_v15  ;;  %s3429_s7 = smul.u32 144, %s4270_s16  ;;  %v3510_v39 = vld [vmem:[#allocation2 + $0x128] ss:$16 sps:$4 sm:$0xff]   ;;  %v3511_v40 = vld [vmem:[#allocation2 + $0x144] ss:$16 sps:$4 sm:$0xff]   ;;  %s3316_s17 = sshll.u32 %s4270_s16, 7 }
  0x39   : > { %2055 = vmatprep.subr.bf16.mxu0 %v3475_v16  ;;  %2347 = vmatprep.subr.bf16.mxu1 %v3477_v17  ;;  %v3513_v41 = vld [vmem:[#allocation2 + $0x14c] ss:$16 sps:$4 sm:$0xff]   ;;  %v3515_v42 = vld [vmem:[#allocation2 + $0x140] ss:$16 sps:$4 sm:$0xff]   ;;  %v3516_v43 = vld [vmem:[#allocation2 + $0x148] ss:$16 sps:$4 sm:$0xff]   ;;  %s4188_s19 = scalar_lea.vmem %s4261_s4, %s3316_s17 }
  0x3a   : > { %s3991_s10 = scalar_lea.vmem %s4257_s0, %s3429_s7  ;;  %v3517_v44 = vld [vmem:[#allocation2 + $0x164] ss:$16 sps:$4 sm:$0xff]   ;;  %v3519_v45 = vld [vmem:[#allocation2 + $0x16c] ss:$16 sps:$4 sm:$0xff]   ;;  %v3521_v47 = vld [vmem:[#allocation2 + $0x160] ss:$16 sps:$4 sm:$0xff]  }
  0x3b   : > { %v3994_v46 = vld [vmem:[%s3991_s10] sm:$0xff]  ;;  %v3997_v48 = vld [vmem:[%s3991_s10 + $0x10] sm:$0xff]  ;;  %v3522_v49 = vld [vmem:[#allocation2 + $0x168] ss:$16 sps:$4 sm:$0xff]  }
  0x3c   : > { %2056 = vmatpush1.bf16.msra.mxu0 %v3479_v18  ;;  %2348 = vmatpush1.bf16.msra.mxu1 %v3480_v19  ;;  %v3523_v50 = vld [vmem:[#allocation2 + $0x184] ss:$16 sps:$4 sm:$0xff]   ;;  %v3011_v51 = vcombine.high %v3994_v46, %v3997_v48  ;;  %v3525_v52 = vld [vmem:[#allocation2 + $0x18c] ss:$16 sps:$4 sm:$0xff]   ;;  %v3527_v53 = vld [vmem:[#allocation2 + $0x180] ss:$16 sps:$4 sm:$0xff]   ;;  %v3010_v6 = vcombine.low %v3994_v46, %v3997_v48 }
  0x3d   : > { %2057 = vmatprep.subr.bf16.mxu0 %v3481_v20  ;;  %2349 = vmatprep.subr.bf16.mxu1 %v3483_v21  ;;  %v3528_v54 = vld [vmem:[#allocation2 + $0x188] ss:$16 sps:$4 sm:$0xff]   ;;  %v3529_v55 = vld [vmem:[#allocation2 + $0x1a4] ss:$16 sps:$4 sm:$0xff]   ;;  %v3531_v56 = vld [vmem:[#allocation2 + $0x1ac] ss:$16 sps:$4 sm:$0xff]  }
  0x3e   : > { %2079 = vmatprep.mubr.bf16.mxu0 %v3011_v51  ;;  %2371 = vmatprep.mubr.bf16.mxu1 %v3011_v51  ;;  %v3533_v57 = vld [vmem:[#allocation2 + $0x1a0] ss:$16 sps:$4 sm:$0xff]   ;;  %v3534_v58 = vld [vmem:[#allocation2 + $0x1a8] ss:$16 sps:$4 sm:$0xff]   ;;  %v3535_v59 = vld [vmem:[#allocation2 + $0x1c4] ss:$16 sps:$4 sm:$0xff]  }
  0x3f   : > { %v3537_v60 = vld [vmem:[#allocation2 + $0x1cc] ss:$16 sps:$4 sm:$0xff]   ;;  %v3539_v61 = vld [vmem:[#allocation2 + $0x1c0] ss:$16 sps:$4 sm:$0xff]   ;;  %v3540_v62 = vld [vmem:[#allocation2 + $0x1c8] ss:$16 sps:$4 sm:$0xff]  }
  0x40   : > { %2058 = vmatpush1.bf16.msra.mxu0 %v3485_v22  ;;  %2350 = vmatpush1.bf16.msra.mxu1 %v3486_v23  ;;  %v3541_v63 = vld [vmem:[#allocation2 + $0x1e4] ss:$16 sps:$4 sm:$0xff]   ;;  %v3543_v0 = vld [vmem:[#allocation2 + $0x1ec] ss:$16 sps:$4 sm:$0xff]   ;;  %v3545_v1 = vld [vmem:[#allocation2 + $0x1e0] ss:$16 sps:$4 sm:$0xff]  }
  0x41   : > { %2059 = vmatprep.subr.bf16.mxu0 %v3487_v24  ;;  %2351 = vmatprep.subr.bf16.mxu1 %v3489_v25  ;;  %v3546_v2 = vld [vmem:[#allocation2 + $0x1e8] ss:$16 sps:$4 sm:$0xff]   ;;  %v3552_v3 = vld [vmem:[#allocation2 + $0x204] ss:$16 sps:$4 sm:$0xff]   ;;  %v3555_v4 = vld [vmem:[#allocation2 + $0x20c] ss:$16 sps:$4 sm:$0xff]  }
  0x42   : > { %v3550_v5 = vld [vmem:[#allocation2 + $0x200] ss:$16 sps:$4 sm:$0xff]   ;;  %v3553_v7 = vld [vmem:[#allocation2 + $0x208] ss:$16 sps:$4 sm:$0xff]   ;;  %v3559_v8 = vld [vmem:[#allocation2 + $0x224] ss:$16 sps:$4 sm:$0xff]  }
  0x43   : > { %v3562_v9 = vld [vmem:[#allocation2 + $0x22c] ss:$16 sps:$4 sm:$0xff]   ;;  %v3557_v10 = vld [vmem:[#allocation2 + $0x220] ss:$16 sps:$4 sm:$0xff]   ;;  %v3560_v11 = vld [vmem:[#allocation2 + $0x228] ss:$16 sps:$4 sm:$0xff]  }
  0x44   : > { %2060 = vmatpush1.bf16.msra.mxu0 %v3491_v26  ;;  %2352 = vmatpush1.bf16.msra.mxu1 %v3492_v27  ;;  %v3565_v12 = vld [vmem:[#allocation2 + $0x244] ss:$16 sps:$4 sm:$0xff]   ;;  %v3568_v13 = vld [vmem:[#allocation2 + $0x24c] ss:$16 sps:$4 sm:$0xff]   ;;  %v3563_v16 = vld [vmem:[#allocation2 + $0x240] ss:$16 sps:$4 sm:$0xff]  }
  0x45   : > { %2061 = vmatprep.subr.bf16.mxu0 %v3493_v28  ;;  %2353 = vmatprep.subr.bf16.mxu1 %v3495_v29  ;;  %v4004_v14 = vld [vmem:[%s3991_s10 + $0x20] sm:$0xff]  ;;  %v4007_v15 = vld [vmem:[%s3991_s10 + $0x30] sm:$0xff]  ;;  %v3566_v21 = vld [vmem:[#allocation2 + $0x248] ss:$16 sps:$4 sm:$0xff]  }
  0x46   : > { %v3019_v17 = vcombine.high %v4004_v14, %v4007_v15  ;;  %v3018_v18 = vcombine.low %v4004_v14, %v4007_v15  ;;  %v4015_v19 = vcombine.high %v3997_v48, %v4004_v14  ;;  %v4019_v20 = vcombine.low %v3997_v48, %v4004_v14  ;;  %v3571_v22 = vld [vmem:[#allocation2 + $0x264] ss:$16 sps:$4 sm:$0xff]   ;;  %v3574_v23 = vld [vmem:[#allocation2 + $0x26c] ss:$16 sps:$4 sm:$0xff]   ;;  %v3569_v24 = vld [vmem:[#allocation2 + $0x260] ss:$16 sps:$4 sm:$0xff]  }
  0x47   : > { %v214_v25 = vld [vmem:[%s3991_s10 + $0x8] sm:$0x11]  ;;  %v3577_v27 = vld [vmem:[#allocation2 + $0x284] ss:$16 sps:$4 sm:$0xff]  }
  0x48   : > { %2062 = vmatpush1.bf16.msra.mxu0 %v3497_v30  ;;  %2354 = vmatpush1.bf16.msra.mxu1 %v3498_v31  ;;  %v3572_v26 = vld [vmem:[#allocation2 + $0x268] ss:$16 sps:$4 sm:$0xff]   ;;  %v4023_v28 = vld [vmem:[%s3991_s10 + $0x40] sm:$0xff]  ;;  %v4026_v29 = vld [vmem:[%s3991_s10 + $0x50] sm:$0xff] }
  0x49   : > { %2063 = vmatprep.subr.bf16.mxu0 %v3499_v32  ;;  %2355 = vmatprep.subr.bf16.mxu1 %v3501_v33  ;;  %v3580_v30 = vld [vmem:[#allocation2 + $0x28c] ss:$16 sps:$4 sm:$0xff]   ;;  %v3027_v31 = vcombine.high %v4023_v28, %v4026_v29  ;;  %v3575_v32 = vld [vmem:[#allocation2 + $0x280] ss:$16 sps:$4 sm:$0xff]   ;;  %v3026_v33 = vcombine.low %v4023_v28, %v4026_v29 }
  0x4c   : > { %2064 = vmatpush1.bf16.msra.mxu0 %v3503_v34  ;;  %2356 = vmatpush1.bf16.msra.mxu1 %v3504_v35  ;;  %v2992_v34 = vcombine.low %v3994_v46, %v214_v25  ;;  %v3578_v35 = vld [vmem:[#allocation2 + $0x288] ss:$16 sps:$4 sm:$0xff]  }
  0x4d   : > { %2065 = vmatprep.subr.bf16.mxu0 %v3505_v36  ;;  %2357 = vmatprep.subr.bf16.mxu1 %v3507_v37  ;;  %v3583_v36 = vld [vmem:[#allocation2 + $0x2a4] ss:$16 sps:$4 sm:$0xff]   ;;  %v2993_v37 = vcombine.high %v3994_v46, %v214_v25  ;;  %v3592_v46 = vld [vmem:[#allocation2 + $0x2cc] ss:$16 sps:$4 sm:$0xff]   ;;  %v3615_v25 = vld [vmem:[#allocation2 + $0x348] ss:$16 sps:$4 sm:$0xff]  }
  0x50   : > { %2066 = vmatpush1.bf16.msra.mxu0 %v3509_v38  ;;  %2358 = vmatpush1.bf16.msra.mxu1 %v3510_v39  ;;  %v3586_v38 = vld [vmem:[#allocation2 + $0x2ac] ss:$16 sps:$4 sm:$0xff]   ;;  %v4035_v39 = vld [vmem:[%s3991_s10 + $0x60] sm:$0xff] }
  0x51   : > { %2067 = vmatprep.subr.bf16.mxu0 %v3511_v40  ;;  %2359 = vmatprep.subr.bf16.mxu1 %v3513_v41  ;;  %v4038_v40 = vld [vmem:[%s3991_s10 + $0x70] sm:$0xff] }
  0x52   : > { %v3581_v41 = vld [vmem:[#allocation2 + $0x2a0] ss:$16 sps:$4 sm:$0xff]   ;;  %v3034_v51 = vcombine.low %v4035_v39, %v4038_v40 }
  0x54   : > { %2068 = vmatpush1.bf16.msra.mxu0 %v3515_v42  ;;  %2360 = vmatpush1.bf16.msra.mxu1 %v3516_v43  ;;  %v3035_v42 = vcombine.high %v4035_v39, %v4038_v40  ;;  %v298_v43 = vshll.u32 %v2992_v34, 16 }
  0x55   : > { %2069 = vmatprep.subr.bf16.mxu0 %v3517_v44  ;;  %2361 = vmatprep.subr.bf16.mxu1 %v3519_v45  ;;  %v3584_v44 = vld [vmem:[#allocation2 + $0x2a8] ss:$16 sps:$4 sm:$0xff]   ;;  %v3589_v45 = vld [vmem:[#allocation2 + $0x2c4] ss:$16 sps:$4 sm:$0xff]  }
  0x58   : > { %2070 = vmatpush1.bf16.msra.mxu0 %v3521_v47  ;;  %2362 = vmatpush1.bf16.msra.mxu1 %v3522_v49  ;;  %v305_v47 = vshll.u32 %v2993_v37, 16  ;;  %v296_v49 = vshrl.u32 %v2992_v34, 16  ;;  %v3628_v34 = vld [vmem:[#allocation2 + $0x384] ss:$16 sps:$4 sm:$0xff]  }
  0x59   : > { %2071 = vmatprep.subr.bf16.mxu0 %v3523_v50  ;;  %2363 = vmatprep.subr.bf16.mxu1 %v3525_v52  ;;  %v3587_v50 = vld [vmem:[#allocation2 + $0x2c0] ss:$16 sps:$4 sm:$0xff]   ;;  %v303_v52 = vshrl.u32 %v2993_v37, 16  ;;  %v3629_v37 = vld [vmem:[#allocation2 + $0x388] ss:$16 sps:$4 sm:$0xff]  }
  0x5c   : > { %2072 = vmatpush1.bf16.msra.mxu0 %v3527_v53  ;;  %2364 = vmatpush1.bf16.msra.mxu1 %v3528_v54  ;;  %v300_v53 = vrot.slane %v298_v43, 1  ;;  %v3590_v54 = vld [vmem:[#allocation2 + $0x2c8] ss:$16 sps:$4 sm:$0xff]   ;;  %v3638_v43 = vld [vmem:[#allocation2 + $0x3ac] ss:$16 sps:$4 sm:$0xff]  }
  0x5d   : > { %2073 = vmatprep.subr.bf16.mxu0 %v3529_v55  ;;  %2365 = vmatprep.subr.bf16.mxu1 %v3531_v56  ;;  %v216_v55 = vld [vmem:[%s3991_s10 + $0x18] sm:$0x11]  ;;  %v3595_v56 = vld [vmem:[#allocation2 + $0x2e4] ss:$16 sps:$4 sm:$0xff]  }
  0x60   : > { %2074 = vmatpush1.bf16.msra.mxu0 %v3533_v57  ;;  %2366 = vmatpush1.bf16.msra.mxu1 %v3534_v58  ;;  %v3598_v57 = vld [vmem:[#allocation2 + $0x2ec] ss:$16 sps:$4 sm:$0xff]   ;;  %v2994_v58 = vcombine.low %v3997_v48, %v216_v55 }
  0x61   : > { %2075 = vmatprep.subr.bf16.mxu0 %v3535_v59  ;;  %2367 = vmatprep.subr.bf16.mxu1 %v3537_v60  ;;  %v2995_v59 = vcombine.high %v3997_v48, %v216_v55  ;;  %v307_v60 = vrot.slane %v305_v47, 1  ;;  %v3599_v48 = vld [vmem:[#allocation2 + $0x300] ss:$16 sps:$4 sm:$0xff]   ;;  %v220_v47 = vld [vmem:[%s3991_s10 + $0x38] sm:$0x11] }
  0x64   : > { %2076 = vmatpush1.bf16.msra.mxu0 %v3539_v61  ;;  %2368 = vmatpush1.bf16.msra.mxu1 %v3540_v62  ;;  %v3593_v61 = vld [vmem:[#allocation2 + $0x2e0] ss:$16 sps:$4 sm:$0xff]   ;;  %v3596_v62 = vld [vmem:[#allocation2 + $0x2e8] ss:$16 sps:$4 sm:$0xff]  }
  0x65   : > { %2077 = vmatprep.subr.bf16.mxu0 %v3541_v63  ;;  %2369 = vmatprep.subr.bf16.mxu1 %v3543_v0  ;;  %v310_v63 = vshrl.u32 %v2994_v58, 16  ;;  %v312_v0 = vshll.u32 %v2994_v58, 16  ;;  %v3643_v58 = vld [vmem:[#allocation2 + $0x3c8] ss:$16 sps:$4 sm:$0xff]  }
  0x68   : > { %2078 = vmatpush1.bf16.msra.mxu0 %v3545_v1  ;;  %2370 = vmatpush1.bf16.msra.mxu1 %v3546_v2  ;;  %v317_v1 = vshrl.u32 %v2995_v59, 16  ;;  %v319_v2 = vshll.u32 %v2995_v59, 16 }
  0x69   : > { %2120 = vmatprep.subr.bf16.mxu0 %v3552_v3  ;;  %2412 = vmatprep.subr.bf16.mxu1 %v3555_v4  ;;  %v3601_v3 = vld [vmem:[#allocation2 + $0x304] ss:$16 sps:$4 sm:$0xff]   ;;  %v301_v4 = vor.u32 %v300_v53, %v296_v49 }
  0x6a   : > { %v3642_v49 = vld [vmem:[#allocation2 + $0x3c4] ss:$16 sps:$4 sm:$0xff]  }
  0x6b   : > { %2080 = vmatmul.mubr.bf16.vlgmr.msra.gmra.mrb[0].mxu0 %v3010_v6  ;;  %2372 = vmatmul.mubr.bf16.vlgmr.msra.gmra.mrb[0].mxu1 %v3010_v6  ;;  %v308_v6 = vor.u32 %v307_v60, %v303_v52  ;;  %v2999_v52 = vcombine.high %v4007_v15, %v220_v47 }
  0x6c   : > { %2121 = vmatpush1.bf16.msra.mxu0 %v3550_v5  ;;  %2413 = vmatpush1.bf16.msra.mxu1 %v3553_v7  ;;  %v3604_v5 = vld [vmem:[#allocation2 + $0x30c] ss:$16 sps:$4 sm:$0xff]   ;;  %v314_v7 = vrot.slane %v312_v0, 1  ;;  %v3647_v0 = vld [vmem:[#allocation2 + $0x3e0] ss:$16 sps:$4 sm:$0xff]  }
  0x6d   : > { %2122 = vmatprep.subr.bf16.mxu0 %v3559_v8  ;;  %2414 = vmatprep.subr.bf16.mxu1 %v3562_v9  ;;  %v321_v8 = vrot.slane %v319_v2, 1  ;;  %v3602_v9 = vld [vmem:[#allocation2 + $0x308] ss:$16 sps:$4 sm:$0xff]   ;;  %v345_v2 = vshrl.u32 %v2999_v52, 16 }
  0x6e   : > { %2089 = vmatprep.mubr.bf16.mxu0 %v3019_v17  ;;  %2381 = vmatprep.mubr.bf16.mxu1 %v3019_v17 }
  0x70   : > { %2123 = vmatpush1.bf16.msra.mxu0 %v3557_v10  ;;  %2415 = vmatpush1.bf16.msra.mxu1 %v3560_v11  ;;  %v4047_v10 = vor.u32 %v321_v8, %v317_v1  ;;  %v4049_v11 = vor.u32 %v314_v7, %v310_v63  ;;  %v3650_v1 = vld [vmem:[#allocation2 + $0x3e8] ss:$16 sps:$4 sm:$0xff]   ;;  %v3657_v7 = vld [vmem:[#allocation2 + $0x404] ss:$16 sps:$4 sm:$0xff]  }
  0x71   : > { %2124 = vmatprep.subr.bf16.mxu0 %v3565_v12  ;;  %2416 = vmatprep.subr.bf16.mxu1 %v3568_v13  ;;  %v3607_v12 = vld [vmem:[#allocation2 + $0x324] ss:$16 sps:$4 sm:$0xff]   ;;  %v3610_v13 = vld [vmem:[#allocation2 + $0x32c] ss:$16 sps:$4 sm:$0xff]  }
  0x72   : > { %v4053_v17 = vcombine.low %v301_v4, %v4049_v11 }
  0x73   : > { %2090 = vmatmul.mubr.bf16.gmra.mrb[4].mxu0 %v3018_v18  ;;  %2382 = vmatmul.mubr.bf16.gmra.mrb[4].mxu1 %v3018_v18  ;;  %v3605_v18 = vld [vmem:[#allocation2 + $0x320] ss:$16 sps:$4 sm:$0xff]  }
  0x74   : > { %2125 = vmatpush1.bf16.msra.mxu0 %v3563_v16  ;;  %2417 = vmatpush1.bf16.msra.mxu1 %v3566_v21  ;;  %v3013_v16 = vcombine.low %v308_v6, %v4047_v10  ;;  %v3608_v21 = vld [vmem:[#allocation2 + $0x328] ss:$16 sps:$4 sm:$0xff]  }
  0x75   : > { %2126 = vmatprep.subr.bf16.mxu0 %v3571_v22  ;;  %2418 = vmatprep.subr.bf16.mxu1 %v3574_v23  ;;  %v3614_v22 = vld [vmem:[#allocation2 + $0x344] ss:$16 sps:$4 sm:$0xff]   ;;  %v3617_v23 = vld [vmem:[#allocation2 + $0x34c] ss:$16 sps:$4 sm:$0xff]  }
  0x76   : > { %2099 = vmatprep.mubr.bf16.mxu0 %v3027_v31  ;;  %2391 = vmatprep.mubr.bf16.mxu1 %v3027_v31  ;;  %v3624_v31 = vld [vmem:[#allocation2 + $0x36c] ss:$16 sps:$4 sm:$0xff]  }
  0x77   : > { %v224_v6 = vld [vmem:[%s3991_s10 + $0x58] sm:$0x11] }
  0x78   : > { %2127 = vmatpush1.bf16.msra.mxu0 %v3569_v24  ;;  %2419 = vmatpush1.bf16.msra.mxu1 %v3572_v26  ;;  %v3612_v24 = vld [vmem:[#allocation2 + $0x340] ss:$16 sps:$4 sm:$0xff]   ;;  %v3621_v26 = vld [vmem:[#allocation2 + $0x364] ss:$16 sps:$4 sm:$0xff]  }
  0x79   : > { %2128 = vmatprep.subr.bf16.mxu0 %v3577_v27  ;;  %2420 = vmatprep.subr.bf16.mxu1 %v3580_v30  ;;  %v4057_v27 = vcombine.high %v4007_v15, %v4023_v28  ;;  %v4061_v30 = vcombine.low %v4007_v15, %v4023_v28 }
  0x7b   : > { %2100 = vmatmul.mubr.bf16.gmra.mrb[8].mxu0 %v3026_v33  ;;  %2392 = vmatmul.mubr.bf16.gmra.mrb[8].mxu1 %v3026_v33  ;;  %v3622_v33 = vld [vmem:[#allocation2 + $0x368] ss:$16 sps:$4 sm:$0xff]  }
  0x7c   : > { %2129 = vmatpush1.bf16.msra.mxu0 %v3575_v32  ;;  %2421 = vmatpush1.bf16.msra.mxu1 %v3578_v35  ;;  %v3619_v32 = vld [vmem:[#allocation2 + $0x360] ss:$16 sps:$4 sm:$0xff]   ;;  %v3631_v35 = vld [vmem:[#allocation2 + $0x38c] ss:$16 sps:$4 sm:$0xff]  }
  0x7d   : > { %2130 = vmatprep.subr.bf16.mxu0 %v3583_v36  ;;  %2422 = vmatprep.subr.bf16.mxu1 %v3586_v38  ;;  %v3626_v36 = vld [vmem:[#allocation2 + $0x380] ss:$16 sps:$4 sm:$0xff]   ;;  %v3635_v38 = vld [vmem:[#allocation2 + $0x3a4] ss:$16 sps:$4 sm:$0xff]  }
  0x7e   : > { %2109 = vmatprep.mubr.bf16.mxu0 %v3035_v42  ;;  %2401 = vmatprep.mubr.bf16.mxu1 %v3035_v42  ;;  %v4069_v42 = vcombine.low %v4026_v29, %v4035_v39 }
  0x80   : > { %2131 = vmatpush1.bf16.msra.mxu0 %v3581_v41  ;;  %2423 = vmatpush1.bf16.msra.mxu1 %v3584_v44  ;;  %v4065_v41 = vcombine.high %v4026_v29, %v4035_v39  ;;  %v3633_v44 = vld [vmem:[#allocation2 + $0x3a0] ss:$16 sps:$4 sm:$0xff]  }
  0x81   : > { %2132 = vmatprep.subr.bf16.mxu0 %v3589_v45  ;;  %2424 = vmatprep.subr.bf16.mxu1 %v3592_v46  ;;  %v3636_v45 = vld [vmem:[#allocation2 + $0x3a8] ss:$16 sps:$4 sm:$0xff]  }
  0x82   : > { %v218_v46 = vld [vmem:[%s3991_s10 + $0x28] sm:$0x11] }
  0x83   : > { %2110 = vmatmul.mubr.bf16.gmra.mrb[12].mxu0 %v3034_v51  ;;  %2402 = vmatmul.mubr.bf16.gmra.mrb[12].mxu1 %v3034_v51  ;;  %v2997_v51 = vcombine.high %v4004_v14, %v218_v46  ;;  %v2996_v53 = vcombine.low %v4004_v14, %v218_v46 }
  0x84   : > { %2133 = vmatpush1.bf16.msra.mxu0 %v3587_v50  ;;  %2425 = vmatpush1.bf16.msra.mxu1 %v3590_v54  ;;  %v3645_v50 = vld [vmem:[#allocation2 + $0x3cc] ss:$16 sps:$4 sm:$0xff]   ;;  %v3640_v54 = vld [vmem:[#allocation2 + $0x3c0] ss:$16 sps:$4 sm:$0xff]  }
  0x85   : > { %2134 = vmatprep.subr.bf16.mxu0 %v3595_v56  ;;  %2426 = vmatprep.subr.bf16.mxu1 %v3598_v57  ;;  %v333_v55 = vshll.u32 %v2997_v51, 16  ;;  %v347_v56 = vshll.u32 %v2999_v52, 16  ;;  %v2998_v57 = vcombine.low %v4007_v15, %v220_v47  ;;  %v324_v59 = vshrl.u32 %v2996_v53, 16  ;;  %v222_v15 = vld [vmem:[%s3991_s10 + $0x48] sm:$0x11] }
  0x86   : > { %2152 = vmatprep.mubr.bf16.mxu0 %v3013_v16  ;;  %2444 = vmatprep.mubr.bf16.mxu1 %v3013_v16  ;;  %v326_v60 = vshll.u32 %v2996_v53, 16  ;;  %v331_v63 = vshrl.u32 %v2997_v51, 16  ;;  %v3655_v16 = vld [vmem:[#allocation2 + $0x400] ss:$16 sps:$4 sm:$0xff]   ;;  %v226_v47 = vld [vmem:[%s3991_s10 + $0x68] sm:$0x11] }
  0x87   : > { %v335_v14 = vrot.slane %v333_v55, 1  ;;  %v3005_v51 = vcombine.high %v4035_v39, %v226_v47  ;;  %v3004_v52 = vcombine.low %v4035_v39, %v226_v47  ;;  %v3669_v53 = vld [vmem:[#allocation2 + $0x444] ss:$16 sps:$4 sm:$0xff]   ;;  %v3691_v47 = vld [vmem:[#allocation2 + $0x4c0] ss:$16 sps:$4 sm:$0xff]  }
  0x88   : > { %2135 = vmatpush1.bf16.msra.mxu0 %v3593_v61  ;;  %2427 = vmatpush1.bf16.msra.mxu1 %v3596_v62  ;;  %v3649_v61 = vld [vmem:[#allocation2 + $0x3e4] ss:$16 sps:$4 sm:$0xff]   ;;  %v3652_v62 = vld [vmem:[#allocation2 + $0x3ec] ss:$16 sps:$4 sm:$0xff]   ;;  %v328_v4 = vrot.slane %v326_v60, 1 }
  0x89   : > { %2136 = vmatprep.subr.bf16.mxu0 %v3601_v3  ;;  %2428 = vmatprep.subr.bf16.mxu1 %v3604_v5  ;;  %v349_v3 = vrot.slane %v347_v56, 1  ;;  %v340_v5 = vshll.u32 %v2998_v57, 16  ;;  %v389_v60 = vshll.u32 %v3005_v51, 16  ;;  %v382_v39 = vshll.u32 %v3004_v52, 16 }
  0x8a   : > { %v329_v8 = vor.u32 %v328_v4, %v324_v59 }
  0x8b   : > { %v384_v4 = vrot.slane %v382_v39, 1  ;;  %v3720_v39 = vld [vmem:[#allocation2 + $0x548] ss:$16 sps:$4 sm:$0xff]  }
  0x8c   : > { %2137 = vmatpush1.bf16.msra.mxu0 %v3599_v48  ;;  %2429 = vmatpush1.bf16.msra.mxu1 %v3602_v9  ;;  %v3001_v48 = vcombine.high %v4023_v28, %v222_v15  ;;  %v3660_v9 = vld [vmem:[#allocation2 + $0x40c] ss:$16 sps:$4 sm:$0xff]  }
  0x8d   : > { %2138 = vmatprep.subr.bf16.mxu0 %v3607_v12  ;;  %2430 = vmatprep.subr.bf16.mxu1 %v3610_v13  ;;  %v3003_v12 = vcombine.high %v4026_v29, %v224_v6  ;;  %v3000_v13 = vcombine.low %v4023_v28, %v222_v15 }
  0x8f   : > { %v354_v28 = vshll.u32 %v3000_v13, 16 }
  0x90   : > { %2139 = vmatpush1.bf16.msra.mxu0 %v3605_v18  ;;  %2431 = vmatpush1.bf16.msra.mxu1 %v3608_v21  ;;  %v3658_v18 = vld [vmem:[#allocation2 + $0x408] ss:$16 sps:$4 sm:$0xff]   ;;  %v336_v21 = vor.u32 %v335_v14, %v331_v63  ;;  %v380_v63 = vshrl.u32 %v3004_v52, 16  ;;  %v391_v14 = vrot.slane %v389_v60, 1  ;;  %v3697_v52 = vld [vmem:[#allocation2 + $0x4e0] ss:$16 sps:$4 sm:$0xff]  }
  0x91   : > { %2140 = vmatprep.subr.bf16.mxu0 %v3614_v22  ;;  %2432 = vmatprep.subr.bf16.mxu1 %v3617_v23  ;;  %v350_v22 = vor.u32 %v349_v3, %v345_v2  ;;  %v4083_v23 = vcombine.low %v4049_v11, %v329_v8  ;;  %v3666_v11 = vld [vmem:[#allocation2 + $0x42c] ss:$16 sps:$4 sm:$0xff]   ;;  %v356_v46 = vrot.slane %v354_v28, 1  ;;  %v3670_v3 = vld [vmem:[#allocation2 + $0x448] ss:$16 sps:$4 sm:$0xff]  }
  0x92   : > { %v3712_v60 = vld [vmem:[#allocation2 + $0x528] ss:$16 sps:$4 sm:$0xff]  }
  0x94   : > { %2141 = vmatpush1.bf16.msra.mxu0 %v3612_v24  ;;  %2433 = vmatpush1.bf16.msra.mxu1 %v3615_v25  ;;  %v361_v24 = vshll.u32 %v3001_v48, 16  ;;  %v338_v25 = vshrl.u32 %v2998_v57, 16  ;;  %v3672_v57 = vld [vmem:[#allocation2 + $0x44c] ss:$16 sps:$4 sm:$0xff]  }
  0x95   : > { %2142 = vmatprep.subr.bf16.mxu0 %v3621_v26  ;;  %2434 = vmatprep.subr.bf16.mxu1 %v3624_v31  ;;  %v342_v26 = vrot.slane %v340_v5, 1  ;;  %v375_v31 = vshll.u32 %v3003_v12, 16 }
  0x98   : > { %2143 = vmatpush1.bf16.msra.mxu0 %v3619_v32  ;;  %2435 = vmatpush1.bf16.msra.mxu1 %v3622_v33  ;;  %v3002_v32 = vcombine.low %v4026_v29, %v224_v6  ;;  %v3663_v33 = vld [vmem:[#allocation2 + $0x424] ss:$16 sps:$4 sm:$0xff]   ;;  %v352_v29 = vshrl.u32 %v3000_v13, 16 }
  0x99   : > { %2144 = vmatprep.subr.bf16.mxu0 %v3628_v34  ;;  %2436 = vmatprep.subr.bf16.mxu1 %v3631_v35  ;;  %v359_v34 = vshrl.u32 %v3001_v48, 16  ;;  %v363_v35 = vrot.slane %v361_v24, 1  ;;  %v3675_v6 = vld [vmem:[#allocation2 + $0x464] ss:$16 sps:$4 sm:$0xff]  }
  0x9a   : > { %v366_v55 = vshrl.u32 %v3002_v32, 16 }
  0x9c   : > { %2145 = vmatpush1.bf16.msra.mxu0 %v3626_v36  ;;  %2437 = vmatpush1.bf16.msra.mxu1 %v3629_v37  ;;  %v4087_v36 = vcombine.low %v4047_v10, %v336_v21  ;;  %v373_v37 = vshrl.u32 %v3003_v12, 16  ;;  %v228_v10 = vld [vmem:[%s3991_s10 + $0x78] sm:$0x11] }
  0x9d   : > { %2146 = vmatprep.subr.bf16.mxu0 %v3635_v38  ;;  %2438 = vmatprep.subr.bf16.mxu1 %v3638_v43  ;;  %v377_v38 = vrot.slane %v375_v31, 1  ;;  %v368_v43 = vshll.u32 %v3002_v32, 16  ;;  %v3007_v56 = vcombine.high %v4038_v40, %v228_v10  ;;  %v3006_v2 = vcombine.low %v4038_v40, %v228_v10  ;;  %v3676_v40 = vld [vmem:[#allocation2 + $0x468] ss:$16 sps:$4 sm:$0xff]   ;;  %v3679_v31 = vld [vmem:[#allocation2 + $0x480] ss:$16 sps:$4 sm:$0xff]  }
  0x9e   : > { %v3699_v10 = vld [vmem:[#allocation2 + $0x4e4] ss:$16 sps:$4 sm:$0xff]  }
  0x9f   : > { %v370_v59 = vrot.slane %v368_v43, 1  ;;  %v401_v13 = vshrl.u32 %v3007_v56, 16  ;;  %v3685_v43 = vld [vmem:[#allocation2 + $0x4a0] ss:$16 sps:$4 sm:$0xff]  }
  0xa0   : > { %2147 = vmatpush1.bf16.msra.mxu0 %v3633_v44  ;;  %2439 = vmatpush1.bf16.msra.mxu1 %v3636_v45  ;;  %v3661_v44 = vld [vmem:[#allocation2 + $0x420] ss:$16 sps:$4 sm:$0xff]   ;;  %v3021_v45 = vcombine.low %v336_v21, %v350_v22  ;;  %v396_v21 = vshll.u32 %v3006_v2, 16 }
  0xa1   : > { %2148 = vmatprep.subr.bf16.mxu0 %v3642_v49  ;;  %2440 = vmatprep.subr.bf16.mxu1 %v3645_v50  ;;  %v3664_v49 = vld [vmem:[#allocation2 + $0x428] ss:$16 sps:$4 sm:$0xff]   ;;  %v343_v50 = vor.u32 %v342_v26, %v338_v25  ;;  %v371_v12 = vor.u32 %v370_v59, %v366_v55  ;;  %v3684_v26 = vld [vmem:[#allocation2 + $0x48c] ss:$16 sps:$4 sm:$0xff]  }
  0xa2   : > { %v398_v28 = vrot.slane %v396_v21, 1  ;;  %v3708_v55 = vld [vmem:[#allocation2 + $0x50c] ss:$16 sps:$4 sm:$0xff]  }
  0xa3   : > { %v3714_v59 = vld [vmem:[#allocation2 + $0x52c] ss:$16 sps:$4 sm:$0xff]  }
  0xa4   : > { %2149 = vmatpush1.bf16.msra.mxu0 %v3640_v54  ;;  %2441 = vmatpush1.bf16.msra.mxu1 %v3643_v58  ;;  %v364_v54 = vor.u32 %v363_v35, %v359_v34  ;;  %v378_v58 = vor.u32 %v377_v38, %v373_v37  ;;  %v394_v35 = vshrl.u32 %v3006_v2, 16  ;;  %v3690_v37 = vld [vmem:[#allocation2 + $0x4ac] ss:$16 sps:$4 sm:$0xff]   ;;  %v3735_v2 = vld [vmem:[#allocation2 + $0x584] ss:$16 sps:$4 sm:$0xff]  }
  0xa5   : > { %2150 = vmatprep.subr.bf16.mxu0 %v3649_v61  ;;  %2442 = vmatprep.subr.bf16.mxu1 %v3652_v62  ;;  %v357_v61 = vor.u32 %v356_v46, %v352_v29  ;;  %v403_v62 = vshll.u32 %v3007_v56, 16  ;;  %v3693_v29 = vld [vmem:[#allocation2 + $0x4c4] ss:$16 sps:$4 sm:$0xff]   ;;  %v3696_v46 = vld [vmem:[#allocation2 + $0x4cc] ss:$16 sps:$4 sm:$0xff]  }
  0xa6   : > { %v4097_v5 = vcombine.low %v350_v22, %v364_v54  ;;  %v3029_v48 = vcombine.low %v364_v54, %v378_v58  ;;  %v3681_v22 = vld [vmem:[#allocation2 + $0x484] ss:$16 sps:$4 sm:$0xff]   ;;  %v3703_v56 = vld [vmem:[#allocation2 + $0x500] ss:$16 sps:$4 sm:$0xff]   ;;  %v3762_v21 = vld [vmem:[#allocation2 + $0x5ec] ss:$16 sps:$4 sm:$0xff]  }
  0xa7   : > { %v4099_v15 = vcombine.low %v343_v50, %v357_v61  ;;  %v3028_v34 = vcombine.low %v357_v61, %v371_v12  ;;  %v3705_v54 = vld [vmem:[#allocation2 + $0x504] ss:$16 sps:$4 sm:$0xff]  }
  0xa8   : > { %2151 = vmatpush1.bf16.msra.mxu0 %v3647_v0  ;;  %2443 = vmatpush1.bf16.msra.mxu1 %v3650_v1  ;;  %v3667_v0 = vld [vmem:[#allocation2 + $0x440] ss:$16 sps:$4 sm:$0xff]   ;;  %v3020_v1 = vcombine.low %v329_v8, %v343_v50  ;;  %v405_v8 = vrot.slane %v403_v62, 1  ;;  %v3719_v61 = vld [vmem:[#allocation2 + $0x544] ss:$16 sps:$4 sm:$0xff]  }
  0xa9   : > { %2193 = vmatprep.subr.bf16.mxu0 %v3657_v7  ;;  %2485 = vmatprep.subr.bf16.mxu1 %v3660_v9  ;;  %v3678_v7 = vld [vmem:[#allocation2 + $0x46c] ss:$16 sps:$4 sm:$0xff]  }
  0xaa   : > { %v4105_v32 = vor.u32 %v405_v8, %v401_v13  ;;  %v3722_v62 = vld [vmem:[#allocation2 + $0x54c] ss:$16 sps:$4 sm:$0xff]   ;;  %v3751_v13 = vld [vmem:[#allocation2 + $0x5c4] ss:$16 sps:$4 sm:$0xff]  }
  0xab   : > { %2153 = vmatmul.mubr.bf16.vlgmr.msra.gmra.mrb[0].mxu0 %v4053_v17  ;;  %2445 = vmatmul.mubr.bf16.vlgmr.msra.gmra.mrb[0].mxu1 %v4053_v17  ;;  %v387_v17 = vshrl.u32 %v3005_v51, 16  ;;  %v3702_v51 = vld [vmem:[#allocation2 + $0x4ec] ss:$16 sps:$4 sm:$0xff]  }
  0xac   : > { %2194 = vmatpush1.bf16.msra.mxu0 %v3655_v16  ;;  %2486 = vmatpush1.bf16.msra.mxu1 %v3658_v18  ;;  %v385_v16 = vor.u32 %v384_v4, %v380_v63  ;;  %v3673_v18 = vld [vmem:[#allocation2 + $0x460] ss:$16 sps:$4 sm:$0xff]   ;;  %v3754_v8 = vld [vmem:[#allocation2 + $0x5cc] ss:$16 sps:$4 sm:$0xff]  }
  0xad   : > { %2195 = vmatprep.subr.bf16.mxu0 %v3663_v33  ;;  %2487 = vmatprep.subr.bf16.mxu1 %v3666_v11  ;;  %v392_v9 = vor.u32 %v391_v14, %v387_v17  ;;  %v3682_v33 = vld [vmem:[#allocation2 + $0x488] ss:$16 sps:$4 sm:$0xff]   ;;  %v3687_v11 = vld [vmem:[#allocation2 + $0x4a4] ss:$16 sps:$4 sm:$0xff]   ;;  %v3709_v17 = vld [vmem:[#allocation2 + $0x520] ss:$16 sps:$4 sm:$0xff]  }
  0xae   : > { %2162 = vmatprep.mubr.bf16.mxu0 %v3021_v45  ;;  %2454 = vmatprep.mubr.bf16.mxu1 %v3021_v45  ;;  %v4103_v25 = vcombine.low %v371_v12, %v385_v16  ;;  %v4108_v45 = vor.u32 %v398_v28, %v394_v35  ;;  %v3717_v63 = vld [vmem:[#allocation2 + $0x540] ss:$16 sps:$4 sm:$0xff]   ;;  %v3728_v14 = vld [vmem:[#allocation2 + $0x568] ss:$16 sps:$4 sm:$0xff]   ;;  %v3773_v28 = vld [vmem:[#allocation2 + $0x624] ss:$16 sps:$4 sm:$0xff]  }
  0xaf   : > { %v4101_v24 = vcombine.low %v378_v58, %v392_v9  ;;  %v3037_v38 = vcombine.low %v392_v9, %v4105_v32  ;;  %v3711_v58 = vld [vmem:[#allocation2 + $0x524] ss:$16 sps:$4 sm:$0xff]   ;;  %v3733_v4 = vld [vmem:[#allocation2 + $0x580] ss:$16 sps:$4 sm:$0xff]   ;;  %v3744_v12 = vld [vmem:[#allocation2 + $0x5a8] ss:$16 sps:$4 sm:$0xff]  }
  0xb0   : > { %2196 = vmatpush1.bf16.msra.mxu0 %v3661_v44  ;;  %2488 = vmatpush1.bf16.msra.mxu1 %v3664_v49  ;;  %v3688_v44 = vld [vmem:[#allocation2 + $0x4a8] ss:$16 sps:$4 sm:$0xff]   ;;  %v3036_v50 = vcombine.low %v385_v16, %v4108_v45  ;;  %v3741_v9 = vld [vmem:[#allocation2 + $0x5a0] ss:$16 sps:$4 sm:$0xff]  }
  0xb1   : > { %2197 = vmatprep.subr.bf16.mxu0 %v3669_v53  ;;  %2489 = vmatprep.subr.bf16.mxu1 %v3672_v57  ;;  %v3694_v49 = vld [vmem:[#allocation2 + $0x4c8] ss:$16 sps:$4 sm:$0xff]   ;;  %v3749_v16 = vld [vmem:[#allocation2 + $0x5c0] ss:$16 sps:$4 sm:$0xff]  }
  0xb2   : > { %v3700_v53 = vld [vmem:[#allocation2 + $0x4e8] ss:$16 sps:$4 sm:$0xff]  }
  0xb3   : > { %2163 = vmatmul.mubr.bf16.gmra.mrb[4].mxu0 %v3020_v1  ;;  %2455 = vmatmul.mubr.bf16.gmra.mrb[4].mxu1 %v3020_v1  ;;  %v3706_v57 = vld [vmem:[#allocation2 + $0x508] ss:$16 sps:$4 sm:$0xff]   ;;  %v3725_v1 = vld [vmem:[#allocation2 + $0x560] ss:$16 sps:$4 sm:$0xff]  }
  0xb4   : > { %2198 = vmatpush1.bf16.msra.mxu0 %v3667_v0  ;;  %2490 = vmatpush1.bf16.msra.mxu1 %v3670_v3  ;;  %v3730_v0 = vld [vmem:[#allocation2 + $0x56c] ss:$16 sps:$4 sm:$0xff]   ;;  %v3767_v35 = vld [vmem:[#allocation2 + $0x608] ss:$16 sps:$4 sm:$0xff]  }
  0xb5   : > { %2199 = vmatprep.subr.bf16.mxu0 %v3675_v6  ;;  %2491 = vmatprep.subr.bf16.mxu1 %v3678_v7  ;;  %v3738_v3 = vld [vmem:[#allocation2 + $0x58c] ss:$16 sps:$4 sm:$0xff]   ;;  %v3736_v6 = vld [vmem:[#allocation2 + $0x588] ss:$16 sps:$4 sm:$0xff]   ;;  %v3743_v7 = vld [vmem:[#allocation2 + $0x5a4] ss:$16 sps:$4 sm:$0xff]  }
  0xb6   : > { %2172 = vmatprep.mubr.bf16.mxu0 %v3029_v48  ;;  %2464 = vmatprep.mubr.bf16.mxu1 %v3029_v48  ;;  %v3746_v48 = vld [vmem:[#allocation2 + $0x5ac] ss:$16 sps:$4 sm:$0xff]  }
  0xb8   : > { %2200 = vmatpush1.bf16.msra.mxu0 %v3673_v18  ;;  %2492 = vmatpush1.bf16.msra.mxu1 %v3676_v40  ;;  %v3752_v18 = vld [vmem:[#allocation2 + $0x5c8] ss:$16 sps:$4 sm:$0xff]   ;;  %v3759_v40 = vld [vmem:[#allocation2 + $0x5e4] ss:$16 sps:$4 sm:$0xff]  }
  0xb9   : > { %2201 = vmatprep.subr.bf16.mxu0 %v3681_v22  ;;  %2493 = vmatprep.subr.bf16.mxu1 %v3684_v26  ;;  %v3757_v22 = vld [vmem:[#allocation2 + $0x5e0] ss:$16 sps:$4 sm:$0xff]   ;;  %v3760_v26 = vld [vmem:[#allocation2 + $0x5e8] ss:$16 sps:$4 sm:$0xff]  }
  0xbb   : > { %2173 = vmatmul.mubr.bf16.gmra.mrb[8].mxu0 %v3028_v34  ;;  %2465 = vmatmul.mubr.bf16.gmra.mrb[8].mxu1 %v3028_v34  ;;  %v3764_v34 = vld [vmem:[#allocation2 + $0x600] ss:$16 sps:$4 sm:$0xff]  }
  0xbc   : > { %2202 = vmatpush1.bf16.msra.mxu0 %v3679_v31  ;;  %2494 = vmatpush1.bf16.msra.mxu1 %v3682_v33  ;;  %v3766_v31 = vld [vmem:[#allocation2 + $0x604] ss:$16 sps:$4 sm:$0xff]   ;;  %v3769_v33 = vld [vmem:[#allocation2 + $0x60c] ss:$16 sps:$4 sm:$0xff]  }
  0xbd   : > { %2203 = vmatprep.subr.bf16.mxu0 %v3687_v11  ;;  %2495 = vmatprep.subr.bf16.mxu1 %v3690_v37  ;;  %v3776_v11 = vld [vmem:[#allocation2 + $0x62c] ss:$16 sps:$4 sm:$0xff]   ;;  %v3771_v37 = vld [vmem:[#allocation2 + $0x620] ss:$16 sps:$4 sm:$0xff]  }
  0xbe   : > { %2182 = vmatprep.mubr.bf16.mxu0 %v3037_v38  ;;  %2474 = vmatprep.mubr.bf16.mxu1 %v3037_v38  ;;  %v3774_v38 = vld [vmem:[#allocation2 + $0x628] ss:$16 sps:$4 sm:$0xff]  }
  0xc0   : > { %2204 = vmatpush1.bf16.msra.mxu0 %v3685_v43  ;;  %2496 = vmatpush1.bf16.msra.mxu1 %v3688_v44  ;;  %v3779_v43 = vld [vmem:[#allocation2 + $0x644] ss:$16 sps:$4 sm:$0xff]   ;;  %v3782_v44 = vld [vmem:[#allocation2 + $0x64c] ss:$16 sps:$4 sm:$0xff]  }
  0xc1   : > { %2205 = vmatprep.subr.bf16.mxu0 %v3693_v29  ;;  %2497 = vmatprep.subr.bf16.mxu1 %v3696_v46  ;;  %v3777_v29 = vld [vmem:[#allocation2 + $0x640] ss:$16 sps:$4 sm:$0xff]   ;;  %v3780_v46 = vld [vmem:[#allocation2 + $0x648] ss:$16 sps:$4 sm:$0xff]  }
  0xc3   : > { %2183 = vmatmul.mubr.bf16.gmra.mrb[12].mxu0 %v3036_v50  ;;  %2475 = vmatmul.mubr.bf16.gmra.mrb[12].mxu1 %v3036_v50  ;;  %v3786_v50 = vld [vmem:[#allocation2 + $0x668] ss:$16 sps:$4 sm:$0xff]  }
  0xc4   : > { %2206 = vmatpush1.bf16.msra.mxu0 %v3691_v47  ;;  %2498 = vmatpush1.bf16.msra.mxu1 %v3694_v49  ;;  %v3788_v47 = vld [vmem:[#allocation2 + $0x66c] ss:$16 sps:$4 sm:$0xff]   ;;  %v3783_v49 = vld [vmem:[#allocation2 + $0x660] ss:$16 sps:$4 sm:$0xff]  }
  0xc5   : > { %2207 = vmatprep.subr.bf16.mxu0 %v3699_v10  ;;  %2499 = vmatprep.subr.bf16.mxu1 %v3702_v51  ;;  %v3794_v10 = vld [vmem:[#allocation2 + $0x68c] ss:$16 sps:$4 sm:$0xff]   ;;  %v4122_v51 = vld [vmem:[%s3991_s10 + $0x80] sm:$0xff] }
  0xc6   : > { %2225 = vmatprep.mubr.bf16.mxu0 %v4015_v19  ;;  %2517 = vmatprep.mubr.bf16.mxu1 %v4015_v19  ;;  %v3727_v19 = vld [vmem:[#allocation2 + $0x564] ss:$16 sps:$4 sm:$0xff]  }
  0xc8   : > { %2208 = vmatpush1.bf16.msra.mxu0 %v3697_v52  ;;  %2500 = vmatpush1.bf16.msra.mxu1 %v3700_v53  ;;  %v3789_v52 = vld [vmem:[#allocation2 + $0x680] ss:$16 sps:$4 sm:$0xff]   ;;  %v3792_v53 = vld [vmem:[#allocation2 + $0x688] ss:$16 sps:$4 sm:$0xff]  }
  0xc9   : > { %2209 = vmatprep.subr.bf16.mxu0 %v3705_v54  ;;  %2501 = vmatprep.subr.bf16.mxu1 %v3708_v55  ;;  %v3800_v54 = vld [vmem:[#allocation2 + $0x6ac] ss:$16 sps:$4 sm:$0xff]   ;;  %v3869_v55 = vld [vmem:[%s3991_s10 + $0x70] sm:$0xff] }
  0xcc   : > { %2210 = vmatpush1.bf16.msra.mxu0 %v3703_v56  ;;  %2502 = vmatpush1.bf16.msra.mxu1 %v3706_v57  ;;  %v3039_v56 = vcombine.high %v3869_v55, %v4122_v51  ;;  %v3798_v57 = vld [vmem:[#allocation2 + $0x6a8] ss:$16 sps:$4 sm:$0xff]  }
  0xcd   : > { %2211 = vmatprep.subr.bf16.mxu0 %v3711_v58  ;;  %2503 = vmatprep.subr.bf16.mxu1 %v3714_v59  ;;  %v3803_v58 = vld [vmem:[#allocation2 + $0x6c4] ss:$16 sps:$4 sm:$0xff]   ;;  %v3806_v59 = vld [vmem:[#allocation2 + $0x6cc] ss:$16 sps:$4 sm:$0xff]  }
  0xd0   : > { %2212 = vmatpush1.bf16.msra.mxu0 %v3709_v17  ;;  %2504 = vmatpush1.bf16.msra.mxu1 %v3712_v60  ;;  %v3038_v17 = vcombine.low %v3869_v55, %v4122_v51  ;;  %v3801_v60 = vld [vmem:[#allocation2 + $0x6c0] ss:$16 sps:$4 sm:$0xff]  }
  0xd1   : > { %2213 = vmatprep.subr.bf16.mxu0 %v3719_v61  ;;  %2505 = vmatprep.subr.bf16.mxu1 %v3722_v62  ;;  %v3804_v61 = vld [vmem:[#allocation2 + $0x6c8] ss:$16 sps:$4 sm:$0xff]   ;;  %v3809_v62 = vld [vmem:[#allocation2 + $0x6e4] ss:$16 sps:$4 sm:$0xff]  }
  0xd4   : > { %2214 = vmatpush1.bf16.msra.mxu0 %v3717_v63  ;;  %2506 = vmatpush1.bf16.msra.mxu1 %v3720_v39  ;;  %v3807_v63 = vld [vmem:[#allocation2 + $0x6e0] ss:$16 sps:$4 sm:$0xff]   ;;  %v3810_v39 = vld [vmem:[#allocation2 + $0x6e8] ss:$16 sps:$4 sm:$0xff]  }
  0xd5   : > { %2215 = vmatprep.subr.bf16.mxu0 %v3727_v19  ;;  %2507 = vmatprep.subr.bf16.mxu1 %v3730_v0  ;;  %v3815_v19 = vld [vmem:[#allocation2 + $0x704] ss:$16 sps:$4 sm:$0xff]   ;;  %v3818_v0 = vld [vmem:[#allocation2 + $0x70c] ss:$16 sps:$4 sm:$0xff]  }
  0xd8   : > { %2216 = vmatpush1.bf16.msra.mxu0 %v3725_v1  ;;  %2508 = vmatpush1.bf16.msra.mxu1 %v3728_v14  ;;  %v3813_v1 = vld [vmem:[#allocation2 + $0x700] ss:$16 sps:$4 sm:$0xff]   ;;  %v3816_v14 = vld [vmem:[#allocation2 + $0x708] ss:$16 sps:$4 sm:$0xff]  }
  0xd9   : > { %2217 = vmatprep.subr.bf16.mxu0 %v3735_v2  ;;  %2509 = vmatprep.subr.bf16.mxu1 %v3738_v3  ;;  %v3821_v2 = vld [vmem:[#allocation2 + $0x724] ss:$16 sps:$4 sm:$0xff]   ;;  %v3824_v3 = vld [vmem:[#allocation2 + $0x72c] ss:$16 sps:$4 sm:$0xff]  }
  0xdc   : > { %2218 = vmatpush1.bf16.msra.mxu0 %v3733_v4  ;;  %2510 = vmatpush1.bf16.msra.mxu1 %v3736_v6  ;;  %v3819_v4 = vld [vmem:[#allocation2 + $0x720] ss:$16 sps:$4 sm:$0xff]   ;;  %v3822_v6 = vld [vmem:[#allocation2 + $0x728] ss:$16 sps:$4 sm:$0xff]  }
  0xdd   : > { %2219 = vmatprep.subr.bf16.mxu0 %v3743_v7  ;;  %2511 = vmatprep.subr.bf16.mxu1 %v3746_v48  ;;  %v3829_v7 = vld [vmem:[#allocation2 + $0x744] ss:$16 sps:$4 sm:$0xff]   ;;  %v3832_v48 = vld [vmem:[#allocation2 + $0x74c] ss:$16 sps:$4 sm:$0xff]  }
  0xe0   : > { %2220 = vmatpush1.bf16.msra.mxu0 %v3741_v9  ;;  %2512 = vmatpush1.bf16.msra.mxu1 %v3744_v12  ;;  %v3827_v9 = vld [vmem:[#allocation2 + $0x740] ss:$16 sps:$4 sm:$0xff]   ;;  %v3835_v12 = vld [vmem:[#allocation2 + $0x764] ss:$16 sps:$4 sm:$0xff]  }
  0xe1   : > { %2221 = vmatprep.subr.bf16.mxu0 %v3751_v13  ;;  %2513 = vmatprep.subr.bf16.mxu1 %v3754_v8  ;;  %v3838_v13 = vld [vmem:[#allocation2 + $0x76c] ss:$16 sps:$4 sm:$0xff]   ;;  %v3833_v8 = vld [vmem:[#allocation2 + $0x760] ss:$16 sps:$4 sm:$0xff]  }
  0xe4   : > { %2222 = vmatpush1.bf16.msra.mxu0 %v3749_v16  ;;  %2514 = vmatpush1.bf16.msra.mxu1 %v3752_v18  ;;  %v3836_v16 = vld [vmem:[#allocation2 + $0x768] ss:$16 sps:$4 sm:$0xff]   ;;  %v3843_v18 = vld [vmem:[#allocation2 + $0x784] ss:$16 sps:$4 sm:$0xff]  }
  0xe5   : > { %2223 = vmatprep.subr.bf16.mxu0 %v3759_v40  ;;  %2515 = vmatprep.subr.bf16.mxu1 %v3762_v21  ;;  %v3846_v40 = vld [vmem:[#allocation2 + $0x78c] ss:$16 sps:$4 sm:$0xff]   ;;  %v3841_v21 = vld [vmem:[#allocation2 + $0x780] ss:$16 sps:$4 sm:$0xff]  }
  0xe8   : > { %2224 = vmatpush1.bf16.msra.mxu0 %v3757_v22  ;;  %2516 = vmatpush1.bf16.msra.mxu1 %v3760_v26  ;;  %v3844_v22 = vld [vmem:[#allocation2 + $0x788] ss:$16 sps:$4 sm:$0xff]   ;;  %v3849_v26 = vld [vmem:[#allocation2 + $0x7a4] ss:$16 sps:$4 sm:$0xff]  }
  0xe9   : > { %2266 = vmatprep.subr.bf16.mxu0 %v3766_v31  ;;  %2558 = vmatprep.subr.bf16.mxu1 %v3769_v33  ;;  %v3852_v31 = vld [vmem:[#allocation2 + $0x7ac] ss:$16 sps:$4 sm:$0xff]   ;;  %v3847_v33 = vld [vmem:[#allocation2 + $0x7a0] ss:$16 sps:$4 sm:$0xff]  }
  0xeb   : > { %2226 = vmatmul.mubr.bf16.vlgmr.msra.gmra.mrb[0].mxu0 %v4019_v20  ;;  %2518 = vmatmul.mubr.bf16.vlgmr.msra.gmra.mrb[0].mxu1 %v4019_v20  ;;  %v3785_v20 = vld [vmem:[#allocation2 + $0x664] ss:$16 sps:$4 sm:$0xff]  }
  0xec   : > { %2267 = vmatpush1.bf16.msra.mxu0 %v3764_v34  ;;  %2559 = vmatpush1.bf16.msra.mxu1 %v3767_v35  ;;  %v3850_v34 = vld [vmem:[#allocation2 + $0x7a8] ss:$16 sps:$4 sm:$0xff]   ;;  %v3857_v35 = vld [vmem:[#allocation2 + $0x7c4] ss:$16 sps:$4 sm:$0xff]  }
  0xed   : > { %2268 = vmatprep.subr.bf16.mxu0 %v3773_v28  ;;  %2560 = vmatprep.subr.bf16.mxu1 %v3776_v11  ;;  %v3860_v28 = vld [vmem:[#allocation2 + $0x7cc] ss:$16 sps:$4 sm:$0xff]   ;;  %v3855_v11 = vld [vmem:[#allocation2 + $0x7c0] ss:$16 sps:$4 sm:$0xff]  }
  0xee   : > { %2235 = vmatprep.mubr.bf16.mxu0 %v4057_v27  ;;  %2527 = vmatprep.mubr.bf16.mxu1 %v4057_v27  ;;  %v3791_v27 = vld [vmem:[#allocation2 + $0x684] ss:$16 sps:$4 sm:$0xff]  }
  0xf0   : > { %2269 = vmatpush1.bf16.msra.mxu0 %v3771_v37  ;;  %2561 = vmatpush1.bf16.msra.mxu1 %v3774_v38  ;;  %v3858_v37 = vld [vmem:[#allocation2 + $0x7c8] ss:$16 sps:$4 sm:$0xff]   ;;  %v3863_v38 = vld [vmem:[#allocation2 + $0x7e4] ss:$16 sps:$4 sm:$0xff]  }
  0xf1   : > { %2270 = vmatprep.subr.bf16.mxu0 %v3779_v43  ;;  %2562 = vmatprep.subr.bf16.mxu1 %v3782_v44  ;;  %v3866_v43 = vld [vmem:[#allocation2 + $0x7ec] ss:$16 sps:$4 sm:$0xff]   ;;  %v3861_v44 = vld [vmem:[#allocation2 + $0x7e0] ss:$16 sps:$4 sm:$0xff]  }
  0xf3   : > { %2236 = vmatmul.mubr.bf16.gmra.mrb[4].mxu0 %v4061_v30  ;;  %2528 = vmatmul.mubr.bf16.gmra.mrb[4].mxu1 %v4061_v30  ;;  %v3797_v30 = vld [vmem:[#allocation2 + $0x6a4] ss:$16 sps:$4 sm:$0xff]  }
  0xf4   : > { %2271 = vmatpush1.bf16.msra.mxu0 %v3777_v29  ;;  %2563 = vmatpush1.bf16.msra.mxu1 %v3780_v46  ;;  %v3864_v29 = vld [vmem:[#allocation2 + $0x7e8] ss:$16 sps:$4 sm:$0xff]  }
  0xf5   : > { %2272 = vmatprep.subr.bf16.mxu0 %v3785_v20  ;;  %2564 = vmatprep.subr.bf16.mxu1 %v3788_v47  ;;  %v230_v46 = vld [vmem:[%s3991_s10 + $0x88] sm:$0x11] }
  0xf6   : > { %2245 = vmatprep.mubr.bf16.mxu0 %v4065_v41  ;;  %2537 = vmatprep.mubr.bf16.mxu1 %v4065_v41  ;;  %v3795_v41 = vld [vmem:[#allocation2 + $0x6a0] ss:$16 sps:$4 sm:$0xff]   ;;  %v3009_v20 = vcombine.high %v4122_v51, %v230_v46 }
  0xf8   : > { %2273 = vmatpush1.bf16.msra.mxu0 %v3783_v49  ;;  %2565 = vmatpush1.bf16.msra.mxu1 %v3786_v50  ;;  %v425_v47 = vshll.u32 %v3009_v20, 16  ;;  %v3008_v49 = vcombine.low %v4122_v51, %v230_v46  ;;  %v423_v50 = vshrl.u32 %v3009_v20, 16 }
  0xf9   : > { %2274 = vmatprep.subr.bf16.mxu0 %v3791_v27  ;;  %2566 = vmatprep.subr.bf16.mxu1 %v3794_v10 }
  0xfa   : > { %v427_v27 = vrot.slane %v425_v47, 1  ;;  %v418_v10 = vshll.u32 %v3008_v49, 16 }
  0xfb   : > { %2246 = vmatmul.mubr.bf16.gmra.mrb[8].mxu0 %v4069_v42  ;;  %2538 = vmatmul.mubr.bf16.gmra.mrb[8].mxu1 %v4069_v42  ;;  %v3812_v42 = vld [vmem:[#allocation2 + $0x6ec] ss:$16 sps:$4 sm:$0xff]  }
  0xfc   : > { %2275 = vmatpush1.bf16.msra.mxu0 %v3789_v52  ;;  %2567 = vmatpush1.bf16.msra.mxu1 %v3792_v53  ;;  %v428_v52 = vor.u32 %v427_v27, %v423_v50  ;;  %v420_v53 = vrot.slane %v418_v10, 1 }
  0xfd   : > { %2276 = vmatprep.subr.bf16.mxu0 %v3797_v30  ;;  %2568 = vmatprep.subr.bf16.mxu1 %v3800_v54 }
  0xfe   : > { %2255 = vmatprep.mubr.bf16.mxu0 %v3039_v56  ;;  %2547 = vmatprep.mubr.bf16.mxu1 %v3039_v56  ;;  %v3041_v30 = vcombine.low %v4105_v32, %v428_v52  ;;  %v2631_v56 = vld [vmem:[%s4259_s2] sm:$0xf] }
 0x100   : > { %2277 = vmatpush1.bf16.msra.mxu0 %v3795_v41  ;;  %2569 = vmatpush1.bf16.msra.mxu1 %v3798_v57 }
 0x101   : > { %2278 = vmatprep.subr.bf16.mxu0 %v3803_v58  ;;  %2570 = vmatprep.subr.bf16.mxu1 %v3806_v59 }
 0x103   : > { %2256 = vmatmul.mubr.bf16.gmra.mrb[12].mxu0 %v3038_v17  ;;  %2548 = vmatmul.mubr.bf16.gmra.mrb[12].mxu1 %v3038_v17 }
 0x104   : > { %2279 = vmatpush1.bf16.msra.mxu0 %v3801_v60  ;;  %2571 = vmatpush1.bf16.msra.mxu1 %v3804_v61 }
 0x105   : > { %2280 = vmatprep.subr.bf16.mxu0 %v3809_v62  ;;  %2572 = vmatprep.subr.bf16.mxu1 %v3812_v42 }
 0x106   : > { %2298 = vmatprep.mubr.bf16.mxu0 %v4087_v36  ;;  %2590 = vmatprep.mubr.bf16.mxu1 %v4087_v36  ;;  %v3830_v36 = vld [vmem:[#allocation2 + $0x748] ss:$16 sps:$4 sm:$0xff]  }
 0x108   : > { %2281 = vmatpush1.bf16.msra.mxu0 %v3807_v63  ;;  %2573 = vmatpush1.bf16.msra.mxu1 %v3810_v39 }
 0x109   : > { %2282 = vmatprep.subr.bf16.mxu0 %v3815_v19  ;;  %2574 = vmatprep.subr.bf16.mxu1 %v3818_v0 }
 0x10c   : > { %2283 = vmatpush1.bf16.msra.mxu0 %v3813_v1  ;;  %2575 = vmatpush1.bf16.msra.mxu1 %v3816_v14 }
 0x10d   : > { %2284 = vmatprep.subr.bf16.mxu0 %v3821_v2  ;;  %2576 = vmatprep.subr.bf16.mxu1 %v3824_v3 }
 0x110   : > { %2285 = vmatpush1.bf16.msra.mxu0 %v3819_v4  ;;  %2577 = vmatpush1.bf16.msra.mxu1 %v3822_v6 }
 0x111   : > { %2286 = vmatprep.subr.bf16.mxu0 %v3829_v7  ;;  %2578 = vmatprep.subr.bf16.mxu1 %v3832_v48 }
 0x114   : > { %2287 = vmatpush1.bf16.msra.mxu0 %v3827_v9  ;;  %2579 = vmatpush1.bf16.msra.mxu1 %v3830_v36 }
 0x115   : > { %2288 = vmatprep.subr.bf16.mxu0 %v3835_v12  ;;  %2580 = vmatprep.subr.bf16.mxu1 %v3838_v13 }
 0x118   : > { %2289 = vmatpush1.bf16.msra.mxu0 %v3833_v8  ;;  %2581 = vmatpush1.bf16.msra.mxu1 %v3836_v16 }
 0x119   : > { %2290 = vmatprep.subr.bf16.mxu0 %v3843_v18  ;;  %2582 = vmatprep.subr.bf16.mxu1 %v3846_v40 }
 0x11c   : > { %2291 = vmatpush1.bf16.msra.mxu0 %v3841_v21  ;;  %2583 = vmatpush1.bf16.msra.mxu1 %v3844_v22 }
 0x11d   : > { %2292 = vmatprep.subr.bf16.mxu0 %v3849_v26  ;;  %2584 = vmatprep.subr.bf16.mxu1 %v3852_v31 }
 0x120   : > { %2293 = vmatpush1.bf16.msra.mxu0 %v3847_v33  ;;  %2585 = vmatpush1.bf16.msra.mxu1 %v3850_v34 }
 0x121   : > { %2294 = vmatprep.subr.bf16.mxu0 %v3857_v35  ;;  %2586 = vmatprep.subr.bf16.mxu1 %v3860_v28 }
 0x124   : > { %2295 = vmatpush1.bf16.msra.mxu0 %v3855_v11  ;;  %2587 = vmatpush1.bf16.msra.mxu1 %v3858_v37 }
 0x125   : > { %2296 = vmatprep.subr.bf16.mxu0 %v3863_v38  ;;  %2588 = vmatprep.subr.bf16.mxu1 %v3866_v43 }
 0x128   : > { %2297 = vmatpush1.bf16.msra.mxu0 %v3861_v44  ;;  %2589 = vmatpush1.bf16.msra.mxu1 %v3864_v29 }
 0x12b   : > { %2299 = vmatmul.mubr.bf16.vlgmr.msra.gmra.mrb[0].mxu0 %v4083_v23  ;;  %2591 = vmatmul.mubr.bf16.vlgmr.msra.gmra.mrb[0].mxu1 %v4083_v23  ;;  %v416_v23 = vshrl.u32 %v3008_v49, 16 }
 0x12c   : > { %2308 = vmatprep.mubr.bf16.mxu0 %v4097_v5  ;;  %2600 = vmatprep.mubr.bf16.mxu1 %v4097_v5 }
 0x12d   : > { %v421_v5 = vor.u32 %v420_v53, %v416_v23 }
 0x12f   : > { %v3040_v51 = vcombine.low %v4108_v45, %v421_v5 }
 0x133   : > { %2309 = vmatmul.mubr.bf16.gmra.mrb[4].mxu0 %v4099_v15  ;;  %2601 = vmatmul.mubr.bf16.gmra.mrb[4].mxu1 %v4099_v15  ;;  %v2633_v15 = vlaneseq }
 0x134   : > { %2318 = vmatprep.mubr.bf16.mxu0 %v4101_v24  ;;  %2610 = vmatprep.mubr.bf16.mxu1 %v4101_v24 }
 0x135   : > { %v2634_v54 = vshrl.u32 %v2633_v15, 7 }
 0x137   : > { %v2635_v55 = vsub.s32 0, %v2634_v54  ;;  %v2643_v24 = vsub.s32 2, %v2634_v54  ;;  %v2639_v32 = vsub.s32 1, %v2634_v54  ;;  %v2647_v41 = vsub.s32 3, %v2634_v54 }
 0x139   : > { %v4152_v57 = vrot.slane %v2631_v56, %v2635_v55  ;;  %v4154_v58 = vrot.slane %v2631_v56, %v2643_v24  ;;  %v4156_v45 = vrot.slane %v2631_v56, %v2639_v32  ;;  %v4158_v59 = vrot.slane %v2631_v56, %v2647_v41 }
 0x13b   : > { %2319 = vmatmul.mubr.bf16.gmra.mrb[8].mxu0 %v4103_v25  ;;  %2611 = vmatmul.mubr.bf16.gmra.mrb[8].mxu1 %v4103_v25  ;;  %v2685_v25 = vld [vmem:[%s4260_s3] sm:$0xf] }
 0x13c   : > { %2328 = vmatprep.mubr.bf16.mxu0 %v3041_v30  ;;  %2620 = vmatprep.mubr.bf16.mxu1 %v3041_v30  ;;  %v4160_v17 = vrot.slane %v2685_v25, %v2635_v55  ;;  %v4162_v60 = vrot.slane %v2685_v25, %v2643_v24  ;;  %v4164_v42 = vrot.slane %v2685_v25, %v2639_v32 }
 0x13d   : > { %v4166_v63 = vrot.slane %v2685_v25, %v2647_v41 }
 0x143   : > { %2329 = vmatmul.mubr.bf16.gmra.mrb[12].mxu0 %v3040_v51  ;;  %2621 = vmatmul.mubr.bf16.gmra.mrb[12].mxu1 %v3040_v51 }
 0x1fe   : > { %v2300_v61 = vpop.f32.mrb[0].mxu0  ;;  %v2592_v62 = vpop.f32.mrb[0].mxu1 }
 0x1ff   : > { %v2653_v39 = vmul.f32 %v4152_v57, %v2300_v61  ;;  %v2655_v19 = vmul.f32 %v4154_v58, %v2592_v62  ;;  %v2302_v0 = vpop.f32.mrb[1].mxu0  ;;  %v2594_v1 = vpop.f32.mrb[1].mxu1 }
 0x200   : > { %v2654_v14 = vmul.f32 %v4156_v45, %v2302_v0  ;;  %v2656_v2 = vmul.f32 %v4158_v59, %v2594_v1  ;;  %v2304_v3 = vpop.f32.mrb[2].mxu0  ;;  %v2596_v4 = vpop.f32.mrb[2].mxu1 }
 0x201   : > { %v2707_v6 = vadd.f32 %v4160_v17, %v2653_v39  ;;  %v2709_v7 = vadd.f32 %v4162_v60, %v2655_v19  ;;  %v2657_v48 = vmul.f32 %v4152_v57, %v2304_v3  ;;  %v2659_v9 = vmul.f32 %v4154_v58, %v2596_v4  ;;  %v2306_v36 = vpop.f32.mrb[3].mxu0  ;;  %v2598_v12 = vpop.f32.mrb[3].mxu1 }
 0x202   : > { %v2708_v13 = vadd.f32 %v4164_v42, %v2654_v14  ;;  %v2710_v8 = vadd.f32 %v4166_v63, %v2656_v2  ;;  %v2658_v16 = vmul.f32 %v4156_v45, %v2306_v36  ;;  %v2660_v18 = vmul.f32 %v4158_v59, %v2598_v12 }
 0x203   : > { %v2739_v40 = vmax.f32 %v2707_v6, 0.0  ;;  %v2741_v21 = vmax.f32 %v2709_v7, 0.0  ;;  %v2711_v22 = vadd.f32 %v4160_v17, %v2657_v48  ;;  %v2713_v26 = vadd.f32 %v4162_v60, %v2659_v9 }
 0x204   : > { %v2740_v31 = vmax.f32 %v2708_v13, 0.0  ;;  %v2742_v33 = vmax.f32 %v2710_v8, 0.0  ;;  %v2712_v34 = vadd.f32 %v4164_v42, %v2658_v16  ;;  %v2714_v35 = vadd.f32 %v4166_v63, %v2660_v18 }
 0x205   : > { %v2743_v28 = vmax.f32 %v2711_v22, 0.0  ;;  %v2745_v11 = vmax.f32 %v2713_v26, 0.0 }
 0x206   : > { %v3317_v37 = vpack.c.bf16 %v2740_v31, %v2739_v40  ;;  %v3318_v38 = vpack.c.bf16 %v2742_v33, %v2741_v21  ;;  %v2744_v43 = vmax.f32 %v2712_v34, 0.0  ;;  %v2746_v44 = vmax.f32 %v2714_v35, 0.0  ;;  %v2310_v29 = vpop.f32.mrb[4].mxu0  ;;  %v2602_v46 = vpop.f32.mrb[4].mxu1 }
 0x207   : > { %v2661_v20 = vmul.f32 %v4152_v57, %v2310_v29  ;;  %v2663_v47 = vmul.f32 %v4154_v58, %v2602_v46  ;;  %v2312_v49 = vpop.f32.mrb[5].mxu0  ;;  %v2604_v50 = vpop.f32.mrb[5].mxu1 }
 0x208   : > { %2899 = vst [vmem:[%s4188_s19] sm:$0xff] %v3317_v37  ;;  %2900 = vst [vmem:[%s4188_s19 + $0x8] sm:$0xff] %v3318_v38  ;;  %v3319_v27 = vpack.c.bf16 %v2744_v43, %v2743_v28  ;;  %v3320_v10 = vpack.c.bf16 %v2746_v44, %v2745_v11  ;;  %v2662_v52 = vmul.f32 %v4156_v45, %v2312_v49  ;;  %v2314_v53 = vpop.f32.mrb[6].mxu0  ;;  %v2606_v30 = vpop.f32.mrb[6].mxu1 }
 0x209   : > { %v2664_v23 = vmul.f32 %v4158_v59, %v2604_v50  ;;  %v2715_v5 = vadd.f32 %v4160_v17, %v2661_v20  ;;  %v2717_v51 = vadd.f32 %v4162_v60, %v2663_v47  ;;  %v2665_v15 = vmul.f32 %v4152_v57, %v2314_v53  ;;  %v2316_v55 = vpop.f32.mrb[7].mxu0  ;;  %v2608_v24 = vpop.f32.mrb[7].mxu1 }
 0x20a   : > { %v2667_v54 = vmul.f32 %v4154_v58, %v2606_v30  ;;  %2901 = vst [vmem:[%s4188_s19 + $0x10] sm:$0xff] %v3319_v27  ;;  %2902 = vst [vmem:[%s4188_s19 + $0x18] sm:$0xff] %v3320_v10  ;;  %v2716_v56 = vadd.f32 %v4164_v42, %v2662_v52  ;;  %v2666_v41 = vmul.f32 %v4156_v45, %v2316_v55 }
 0x20b   : > { %v2718_v32 = vadd.f32 %v4166_v63, %v2664_v23  ;;  %v2668_v25 = vmul.f32 %v4158_v59, %v2608_v24  ;;  %v2747_v61 = vmax.f32 %v2715_v5, 0.0  ;;  %v2749_v62 = vmax.f32 %v2717_v51, 0.0 }
 0x20c   : > { %v2719_v39 = vadd.f32 %v4160_v17, %v2665_v15  ;;  %v2721_v19 = vadd.f32 %v4162_v60, %v2667_v54  ;;  %v2748_v0 = vmax.f32 %v2716_v56, 0.0  ;;  %v2720_v14 = vadd.f32 %v4164_v42, %v2666_v41 }
 0x20d   : > { %v2750_v1 = vmax.f32 %v2718_v32, 0.0  ;;  %v2722_v2 = vadd.f32 %v4166_v63, %v2668_v25 }
 0x20e   : > { %v2751_v3 = vmax.f32 %v2719_v39, 0.0  ;;  %v2753_v4 = vmax.f32 %v2721_v19, 0.0  ;;  %v3321_v6 = vpack.c.bf16 %v2748_v0, %v2747_v61  ;;  %v2752_v48 = vmax.f32 %v2720_v14, 0.0  ;;  %v2320_v36 = vpop.f32.mrb[8].mxu0  ;;  %v2612_v12 = vpop.f32.mrb[8].mxu1 }
 0x20f   : > { %v3322_v7 = vpack.c.bf16 %v2750_v1, %v2749_v62  ;;  %v2754_v9 = vmax.f32 %v2722_v2, 0.0  ;;  %v2669_v13 = vmul.f32 %v4152_v57, %v2320_v36  ;;  %v2671_v8 = vmul.f32 %v4154_v58, %v2612_v12  ;;  %v2322_v16 = vpop.f32.mrb[9].mxu0  ;;  %v2614_v18 = vpop.f32.mrb[9].mxu1 }
 0x210   : > { %2903 = vst [vmem:[%s4188_s19 + $0x20] sm:$0xff] %v3321_v6  ;;  %v3323_v40 = vpack.c.bf16 %v2752_v48, %v2751_v3  ;;  %v2670_v22 = vmul.f32 %v4156_v45, %v2322_v16  ;;  %v2672_v26 = vmul.f32 %v4158_v59, %v2614_v18  ;;  %v2324_v31 = vpop.f32.mrb[10].mxu0  ;;  %v2616_v33 = vpop.f32.mrb[10].mxu1 }
 0x211   : > { %2904 = vst [vmem:[%s4188_s19 + $0x28] sm:$0xff] %v3322_v7  ;;  %v3324_v21 = vpack.c.bf16 %v2754_v9, %v2753_v4  ;;  %v2723_v34 = vadd.f32 %v4160_v17, %v2669_v13  ;;  %v2725_v35 = vadd.f32 %v4162_v60, %v2671_v8  ;;  %v2673_v28 = vmul.f32 %v4152_v57, %v2324_v31  ;;  %v2326_v37 = vpop.f32.mrb[11].mxu0  ;;  %v2618_v38 = vpop.f32.mrb[11].mxu1 }
 0x212   : > { %v2675_v11 = vmul.f32 %v4154_v58, %v2616_v33  ;;  %2905 = vst [vmem:[%s4188_s19 + $0x30] sm:$0xff] %v3323_v40  ;;  %v2724_v43 = vadd.f32 %v4164_v42, %v2670_v22  ;;  %v2726_v44 = vadd.f32 %v4166_v63, %v2672_v26  ;;  %v2674_v29 = vmul.f32 %v4156_v45, %v2326_v37 }
 0x213   : > { %2906 = vst [vmem:[%s4188_s19 + $0x38] sm:$0xff] %v3324_v21  ;;  %v2676_v46 = vmul.f32 %v4158_v59, %v2618_v38  ;;  %v2755_v20 = vmax.f32 %v2723_v34, 0.0  ;;  %v2757_v47 = vmax.f32 %v2725_v35, 0.0  ;;  %v2727_v49 = vadd.f32 %v4160_v17, %v2673_v28 }
 0x214   : > { %v2729_v50 = vadd.f32 %v4162_v60, %v2675_v11  ;;  %v2756_v27 = vmax.f32 %v2724_v43, 0.0  ;;  %v2758_v10 = vmax.f32 %v2726_v44, 0.0  ;;  %v2728_v52 = vadd.f32 %v4164_v42, %v2674_v29 }
 0x215   : > { %v2730_v23 = vadd.f32 %v4166_v63, %v2676_v46  ;;  %v2759_v53 = vmax.f32 %v2727_v49, 0.0 }
 0x216   : > { %v2761_v30 = vmax.f32 %v2729_v50, 0.0  ;;  %v3325_v5 = vpack.c.bf16 %v2756_v27, %v2755_v20  ;;  %v3326_v51 = vpack.c.bf16 %v2758_v10, %v2757_v47  ;;  %v2760_v15 = vmax.f32 %v2728_v52, 0.0  ;;  %v2330_v55 = vpop.f32.mrb[12].mxu0  ;;  %v2622_v24 = vpop.f32.mrb[12].mxu1 }
 0x217   : > { %v2762_v54 = vmax.f32 %v2730_v23, 0.0  ;;  %v2677_v56 = vmul.f32 %v4152_v57, %v2330_v55  ;;  %v2679_v32 = vmul.f32 %v4154_v58, %v2622_v24  ;;  %v2332_v41 = vpop.f32.mrb[13].mxu0  ;;  %v2624_v25 = vpop.f32.mrb[13].mxu1 }
 0x218   : > { %2907 = vst [vmem:[%s4188_s19 + $0x40] sm:$0xff] %v3325_v5  ;;  %2908 = vst [vmem:[%s4188_s19 + $0x48] sm:$0xff] %v3326_v51  ;;  %v3327_v61 = vpack.c.bf16 %v2760_v15, %v2759_v53  ;;  %v2678_v39 = vmul.f32 %v4156_v45, %v2332_v41  ;;  %v2680_v19 = vmul.f32 %v4158_v59, %v2624_v25  ;;  %v2334_v0 = vpop.f32.mrb[14].mxu0  ;;  %v2626_v1 = vpop.f32.mrb[14].mxu1 }
 0x219   : > { %v3328_v62 = vpack.c.bf16 %v2762_v54, %v2761_v30  ;;  %v2731_v14 = vadd.f32 %v4160_v17, %v2677_v56  ;;  %v2733_v2 = vadd.f32 %v4162_v60, %v2679_v32  ;;  %v2681_v3 = vmul.f32 %v4152_v57, %v2334_v0  ;;  %v2336_v6 = vpop.f32.mrb[15].mxu0  ;;  %v2628_v7 = vpop.f32.mrb[15].mxu1 }
 0x21a   : > { %v2683_v4 = vmul.f32 %v4154_v58, %v2626_v1  ;;  %2909 = vst [vmem:[%s4188_s19 + $0x50] sm:$0xff] %v3327_v61  ;;  %v2732_v48 = vadd.f32 %v4164_v42, %v2678_v39  ;;  %v2734_v9 = vadd.f32 %v4166_v63, %v2680_v19  ;;  %v2682_v36 = vmul.f32 %v4156_v45, %v2336_v6 }
 0x21b   : > { %2910 = vst [vmem:[%s4188_s19 + $0x58] sm:$0xff] %v3328_v62  ;;  %v2684_v12 = vmul.f32 %v4158_v59, %v2628_v7  ;;  %v2763_v13 = vmax.f32 %v2731_v14, 0.0  ;;  %v2765_v8 = vmax.f32 %v2733_v2, 0.0  ;;  %v2735_v57 = vadd.f32 %v4160_v17, %v2681_v3 }
 0x21c   : > { %v2737_v58 = vadd.f32 %v4162_v60, %v2683_v4  ;;  %v2764_v16 = vmax.f32 %v2732_v48, 0.0  ;;  %v2766_v18 = vmax.f32 %v2734_v9, 0.0  ;;  %v2736_v40 = vadd.f32 %v4164_v42, %v2682_v36 }
 0x21d   : > { %v2738_v21 = vadd.f32 %v4166_v63, %v2684_v12  ;;  %v2767_v22 = vmax.f32 %v2735_v57, 0.0 }
 0x21e   : > { %v2769_v45 = vmax.f32 %v2737_v58, 0.0  ;;  %v3329_v26 = vpack.c.bf16 %v2764_v16, %v2763_v13  ;;  %v3330_v31 = vpack.c.bf16 %v2766_v18, %v2765_v8  ;;  %v2768_v59 = vmax.f32 %v2736_v40, 0.0 }
 0x21f   : > { %v2770_v33 = vmax.f32 %v2738_v21, 0.0 }
 0x220   : > { %2911 = vst [vmem:[%s4188_s19 + $0x60] sm:$0xff] %v3329_v26  ;;  %2912 = vst [vmem:[%s4188_s19 + $0x68] sm:$0xff] %v3330_v31  ;;  %v3331_v34 = vpack.c.bf16 %v2768_v59, %v2767_v22 }
 0x221   : > { %v3332_v17 = vpack.c.bf16 %v2770_v33, %v2769_v45 }
 0x222   : > { %2913 = vst [vmem:[%s4188_s19 + $0x70] sm:$0xff] %v3331_v34 }
 0x223   : > { %2914 = vst [vmem:[%s4188_s19 + $0x78] sm:$0xff] %v3332_v17 }
 0x224 PF: > { %s15_s15 = sadd.s32 1, %s3908_s15  }
 0x225   : > { %p12_p3 = scmp.ge.s32.totalorder %s15_s15, 4  }
 0x227   :  { %14 = sbr.rel (!%p12_p3) target bundleno = 1 (0x1), region = 71 }
 0x22e   :  { %2936 = vsyncpa [#allocation3], 1 }
 0x22f   :  { %2938 = vsyncpa [#allocation3 + $0x1], 1 }

// kernel: decoder_forward.3
= control target key start
LH: loop header
LB: loop body
LE: loop exit
PB: predicated region body
PF: predicated region fallthrough
CT: control target
= control target key end

     0   :  { %s9240_s30 = smov 0   ;;  %s12423_s0 = inlined_call_operand.vmem [shape: bf16[2,20,32,128], index: 0, kind: input, shape index: {}]   ;;  %s12424_s1 = inlined_call_operand.vmem [shape: bf16[1152,128], index: 1, kind: input, shape index: {}]   ;;  %s12425_s2 = inlined_call_operand.vmem [shape: f32[1,128], index: 2, kind: input, shape index: {}]   ;;  %s12426_s3 = inlined_call_operand.vmem [shape: f32[1,128], index: 3, kind: input, shape index: {}]   ;;  %s12427_s4 = inlined_call_operand.vmem [shape: bf16[1152,128], index: 4, kind: input, shape index: {}]   ;;  %s12428_s5 = inlined_call_operand.vmem [shape: f32[1,128], index: 5, kind: input, shape index: {}]   ;;  %s12429_s6 = inlined_call_operand.vmem [shape: f32[1,128], index: 6, kind: input, shape index: {}]   ;;  %s12430_s7 = inlined_call_operand.vmem [shape: bf16[128,128], index: 7, kind: input, shape index: {}]   ;;  %s12431_s8 = inlined_call_operand.vmem [shape: f32[1,128], index: 8, kind: input, shape index: {}]   ;;  %s12432_s9 = inlined_call_operand.vmem [shape: bf16[2,16,16,128], index: 9, kind: output, shape index: {}]  }
   0x1 LB: > { %s6531_s10 = sadd.s32 4294967295, %s9183_s30   ;;  %p6535_p0 = scmp.ge.s32.totalorder %s9183_s30, 1  ;;  %s9183_s30 = sphi %s9240_s30, %s19_s30  }
   0x2   : > { %p287_p1 = scmp.lt.s32.totalorder %s9183_s30, 3 }
   0x4   : > { %p288_p2 = pnand %p6535_p0, %p287_p1 }
   0x6   : > { %291 = sbr.rel (%p288_p2) target bundleno = 2142 (0x85e), region = 56 }
   0xd   : > { %v8867_v0 = vld [vmem:[%s12424_s1 + $0x140] sm:$0xff]   ;;  %v12435_v1 = vmov 0.0   ;;  %v8868_v2 = vld [vmem:[%s12424_s1 + $0x148] sm:$0xff]   ;;  %vm9186_vm0 = vmmov 0   ;;  %p323_p3 = scmp.lt.s32.totalorder %s6531_s10, 1  ;;  %v8869_v3 = vld [vmem:[%s12424_s1 + $0x150] sm:$0xff]  }
   0xe   : > { %7665 = vmatprep.subr.bf16.mxu0 %v12435_v1  ;;  %7681 = vmatprep.mubr.msk.bf16.mxu0 %vm9186_vm0, %v12435_v1  ;;  %v12433_v4 = vmov 0   ;;  %v8870_v5 = vld [vmem:[%s12424_s1 + $0x158] sm:$0xff]   ;;  %v8871_v6 = vld [vmem:[%s12424_s1 + $0x160] sm:$0xff]   ;;  %v8872_v7 = vld [vmem:[%s12424_s1 + $0x168] sm:$0xff]   ;;  %vm915_vm1 = vcmask 1046528   ;;  %vm9188_vm5 = vmmov 1  }
   0xf   : > { %7666 = vmatpush3.bf16.msra.mxu0 %v8867_v0  ;;  %s12818_s10 = smov (!%p323_p3, %s6531_s10), 1  ;;  %1483 = vmatprep.subr.bf16.mxu1 %v12433_v4  ;;  %v8873_v12 = vld [vmem:[%s12424_s1 + $0x170] sm:$0xff]   ;;  %v8874_v19 = vld [vmem:[%s12424_s1 + $0x178] sm:$0xff]   ;;  %v8877_v25 = vld [vmem:[%s12424_s1] sm:$0xff]   ;;  %vm614_vm2 = vsmask.f32 7424 }
  0x10   : > { %7667 = vmatprep.subr.bf16.mxu0 %v12435_v1  ;;  %s8853_s19 = smul.u32 320, %s12818_s10  ;;  %v8880_v29 = vld [vmem:[%s12424_s1 + $0x8] sm:$0xff]   ;;  %v8881_v31 = vld [vmem:[%s12424_s1 + $0x10] sm:$0xff]   ;;  %v8884_v41 = vld [vmem:[%s12424_s1 + $0x18] sm:$0xff]   ;;  %vm5825_vm7 = vcmask 1042432   ;;  %vm5826_vm8 = vcmask 1046532  }
  0x11   : > { %v8885_v47 = vld [vmem:[%s12424_s1 + $0x20] sm:$0xff]   ;;  %v8888_v60 = vld [vmem:[%s12424_s1 + $0x28] sm:$0xff]   ;;  %v8889_v63 = vld [vmem:[%s12424_s1 + $0x30] sm:$0xff]   ;;  %s7000_s23 = sshll.u32 %s12818_s10, 7 }
  0x12   : > { %s9276_s24 = scalar_lea.vmem %s12423_s0, %s8853_s19  ;;  %vm12004_vm9 = vmor %vm5825_vm7, %vm5826_vm8  ;;  %s12373_s27 = scalar_lea.vmem %s12432_s9, %s7000_s23 }
  0x13   : > { %7668 = vmatpush3.bf16.msra.mxu0 %v8868_v2  ;;  %v338_v8 = vld [vmem:[%s9276_s24 + $0x10] sm:$0xf]  ;;  %v339_v9 = vld [vmem:[%s9276_s24 + $0x14] sm:$0xf]  ;;  %v340_v10 = vld [vmem:[%s9276_s24 + $0x18] sm:$0xf] }
  0x14   : > { %7669 = vmatprep.subr.bf16.mxu0 %v12435_v1  ;;  %v341_v11 = vld [vmem:[%s9276_s24 + $0x1c] sm:$0xf]  ;;  %v9290_v13 = vcombine.low %v338_v8, %v339_v9  ;;  %v342_v15 = vld [vmem:[%s9276_s24 + $0x20] sm:$0xf]  ;;  %v343_v16 = vld [vmem:[%s9276_s24 + $0x24] sm:$0xf] }
  0x15   : > { %v6542_v14 = vcombine.low %v340_v10, %v341_v11  ;;  %v344_v17 = vld [vmem:[%s9276_s24 + $0x28] sm:$0xf]  ;;  %v345_v18 = vld [vmem:[%s9276_s24 + $0x2c] sm:$0xf]  ;;  %v9303_v22 = vcombine.low %v342_v15, %v343_v16  ;;  %v9338_v32 = vld [vmem:[%s9276_s24 + $0x30] sm:$0xf] }
  0x16   : > { %12550 = vst [vmem:[#allocation2_spill] sm:$0xff] %v9290_v13  ;;  %v919_v20 = vrot.slane %v9290_v13, 1  ;;  %v9305_v23 = vcombine.low %v344_v17, %v345_v18  ;;  %v9341_v33 = vld [vmem:[%s9276_s24 + $0x34] sm:$0xf]  ;;  %v631_v34 = vshrl.u32 %v9290_v13, 16  ;;  %v633_v35 = vshll.u32 %v9290_v13, 16 }
  0x17   : > { %7670 = vmatpush3.bf16.msra.mxu0 %v8869_v3  ;;  %v9301_v21 = vrot.slane %v6542_v14, 1  ;;  %12551 = vst [vmem:[#allocation3_spill] sm:$0xff] %v9303_v22  ;;  %v922_v26 = vrot.slane %v9303_v22, 1  ;;  %v9348_v38 = vld [vmem:[%s9276_s24 + $0x38] sm:$0xf]  ;;  %v638_v40 = vshll.u32 %v6542_v14, 16  ;;  %v9367_v51 = vcombine.low %v9338_v32, %v9341_v33 }
  0x18   : > { %7671 = vmatprep.subr.bf16.mxu0 %v12435_v1  ;;  %v9317_v27 = vrot.slane %v9305_v23, 1  ;;  %v349_v39 = vld [vmem:[%s9276_s24 + $0x3c] sm:$0xf]  ;;  %v635_v42 = vrot.slane %v633_v35, 1  ;;  %v350_v43 = vld [vmem:[%s9276_s24 + $0x40] sm:$0xf] }
  0x19   : > { %v9310_v24 = vsel %vm915_vm1, %v919_v20, %v9301_v21  ;;  %v351_v44 = vld [vmem:[%s9276_s24 + $0x44] sm:$0xf]  ;;  %v9360_v45 = vld [vmem:[%s9276_s24 + $0x48] sm:$0xf]  ;;  %v640_v46 = vrot.slane %v638_v40, 1  ;;  %v642_v49 = vshrl.u32 %v6542_v14, 16  ;;  %v9371_v53 = vcombine.low %v9348_v38, %v349_v39 }
  0x1a   : > { %v9325_v28 = vsel %vm915_vm1, %v922_v26, %v9317_v27  ;;  %v993_v37 = vunpack.c.l.b16 %v9317_v27  ;;  %v636_v48 = vor.u32 %v635_v42, %v631_v34  ;;  %v353_v52 = vld [vmem:[%s9276_s24 + $0x4c] sm:$0xf]  ;;  %v9380_v56 = vcombine.low %v350_v43, %v351_v44  ;;  %v8892_v2 = vld [vmem:[%s12424_s1 + $0x38] sm:$0xff]   ;;  %v9428_v8 = vld [vmem:[%s9276_s24 + $0x54] sm:$0xf] }
  0x1b   : > { %7672 = vmatpush3.bf16.msra.mxu0 %v8870_v5  ;;  %v6581_v30 = vcombine.low %v9301_v21, %v9325_v28  ;;  %v991_v36 = vunpack.c.h.b16 %v9325_v28  ;;  %v9376_v55 = vor.u32 %v642_v49, %v640_v46  ;;  %v9383_v57 = vcombine.low %v9360_v45, %v353_v52  ;;  %v8895_v5 = vld [vmem:[%s12424_s1 + $0x40] sm:$0xff]   ;;  %v9433_v11 = vld [vmem:[%s9276_s24 + $0x58] sm:$0xf]  ;;  %v8896_v14 = vld [vmem:[%s12424_s1 + $0x48] sm:$0xff]  }
  0x1c   : > { %7673 = vmatprep.subr.bf16.mxu0 %v12435_v1  ;;  %v9374_v54 = vsel %vm614_vm2, %v636_v48, %v640_v46  ;;  %12552 = vst [vmem:[#allocation4_spill] sm:$0xff] %v9380_v56  ;;  %v925_v58 = vrot.slane %v9367_v51, 1  ;;  %v9389_v59 = vrot.slane %v9371_v53, 1  ;;  %v928_v61 = vrot.slane %v9380_v56, 1  ;;  %v358_v15 = vld [vmem:[%s9276_s24 + $0x60] sm:$0xf] }
  0x1d   : > { %v1193_v50 = vpack.c.b16 %v993_v37, %v991_v36  ;;  %1515 = vmatprep.mubr.bf16.mxu1 %v9374_v54  ;;  %v9397_v62 = vrot.slane %v9383_v57, 1  ;;  %v359_v16 = vld [vmem:[%s9276_s24 + $0x64] sm:$0xf]  ;;  %v9444_v17 = vld [vmem:[%s9276_s24 + $0x68] sm:$0xf]  ;;  %v8902_v35 = vld [vmem:[%s12424_s1 + $0x58] sm:$0xff]  }
  0x1e   : > { %v9404_v0 = vsel %vm915_vm1, %v925_v58, %v9389_v59  ;;  %v361_v18 = vld [vmem:[%s9276_s24 + $0x6c] sm:$0xf]  ;;  %v8903_v39 = vld [vmem:[%s12424_s1 + $0x60] sm:$0xff]   ;;  %v8909_v43 = vld [vmem:[%s12424_s1 + $0x70] sm:$0xff]  }
  0x1f   : > { %7674 = vmatpush3.bf16.msra.mxu0 %v8871_v6  ;;  %v9415_v3 = vsel %vm915_vm1, %v928_v61, %v9397_v62  ;;  %v1005_v10 = vunpack.c.l.b16 %v9397_v62  ;;  %v9504_v46 = vld [vmem:[%s9276_s24 + $0x70] sm:$0xf]  ;;  %v9510_v48 = vld [vmem:[%s9276_s24 + $0x78] sm:$0xf]  ;;  %v365_v52 = vld [vmem:[%s9276_s24 + $0x7c] sm:$0xf] }
  0x20   : > { %7675 = vmatprep.subr.bf16.mxu0 %v12435_v1  ;;  %v6585_v6 = vcombine.low %v9389_v59, %v9415_v3  ;;  %v1003_v9 = vunpack.c.h.b16 %v9415_v3  ;;  %v8910_v58 = vld [vmem:[%s12424_s1 + $0x78] sm:$0xff]   ;;  %v367_v61 = vld [vmem:[%s9276_s24 + $0x84] sm:$0xf]  ;;  %v337_v13 = vld [vmem:[%s9276_s24 + $0xc] sm:$0xf] }
  0x22   : > { %v1201_v20 = vpack.c.b16 %v1005_v10, %v1003_v9  ;;  %v9532_v9 = vcombine.low %v9510_v48, %v365_v52 }
  0x23   : > { %7676 = vmatpush3.bf16.msra.mxu0 %v8872_v7  ;;  %v9425_v7 = vld [vmem:[%s9276_s24 + $0x50] sm:$0xf] }
  0x24   : > { %7677 = vmatprep.subr.bf16.mxu0 %v12435_v1 }
  0x27   : > { %7678 = vmatpush3.bf16.msra.mxu0 %v8873_v12  ;;  %v357_v12 = vld [vmem:[%s9276_s24 + $0x5c] sm:$0xf] }
  0x28   : > { %7679 = vmatprep.subr.bf16.mxu0 %v12435_v1  ;;  %v9456_v26 = vcombine.low %v9433_v11, %v357_v12 }
  0x2a   : > { %v9468_v34 = vrot.slane %v9456_v26, 1 }
  0x2b   : > { %7680 = vmatpush3.bf16.msra.mxu0 %v8874_v19  ;;  %v8899_v19 = vld [vmem:[%s12424_s1 + $0x50] sm:$0xff]  }
  0x2c   : > { %2278 = vmatprep.subr.bf16.mxu0 %v12433_v4  ;;  %12554 = vst [vmem:[#allocation6_spill] sm:$0xff] %v9468_v34 }
  0x2e   : > { %7682 = vmatmul.mubr.bf16.vlgmr.msra.gmra.mrb[0].mxu0 %v9310_v24 }
  0x2f   : > { %2279 = vmatpush1.bf16.msra.mxu0 %v8877_v25  ;;  %7685 = vmatprep.mubr.msk.bf16.mxu0 %vm9186_vm0, %v12435_v1  ;;  %v9453_v25 = vcombine.low %v9425_v7, %v9428_v8 }
  0x30   : > { %2280 = vmatprep.subr.bf16.mxu0 %v12433_v4 }
  0x33   : > { %2281 = vmatpush1.bf16.msra.mxu0 %v8880_v29  ;;  %v9458_v29 = vcombine.low %v358_v15, %v359_v16  ;;  %v9542_v15 = vrot.slane %v9532_v9, 1 }
  0x34   : > { %2282 = vmatprep.subr.bf16.mxu0 %v12433_v4 }
  0x35   : > { %12553 = vst [vmem:[#allocation5_spill] sm:$0xff] %v9458_v29  ;;  %v934_v36 = vrot.slane %v9458_v29, 1  ;;  %12559 = vst [vmem:[#allocation11_spill] sm:$0xff] %v9542_v15 }
  0x36   : > { %7686 = vmatmul.mubr.bf16.gmra.mrb[4].mxu0 %v6581_v30  ;;  %v9461_v30 = vcombine.low %v9444_v17, %v361_v18 }
  0x37   : > { %7689 = vmatprep.mubr.msk.bf16.mxu0 %vm9186_vm0, %v12435_v1  ;;  %2283 = vmatpush1.bf16.msra.mxu0 %v8881_v31  ;;  %v931_v31 = vrot.slane %v9453_v25, 1 }
  0x38   : > { %2284 = vmatprep.subr.bf16.mxu0 %v12433_v4  ;;  %v9475_v37 = vrot.slane %v9461_v30, 1 }
  0x39   : > { %v9483_v40 = vsel %vm915_vm1, %v931_v31, %v9468_v34  ;;  %v9562_v31 = vld [vmem:[%s9276_s24 + $0x90] sm:$0xf] }
  0x3a   : > { %12555 = vst [vmem:[#allocation7_spill] sm:$0xff] %v9475_v37  ;;  %v9494_v42 = vsel %vm915_vm1, %v934_v36, %v9475_v37 }
  0x3b   : > { %2285 = vmatpush1.bf16.msra.mxu0 %v8884_v41  ;;  %v8906_v41 = vld [vmem:[%s12424_s1 + $0x68] sm:$0xff]   ;;  %12556 = vst [vmem:[#allocation8_spill] sm:$0xff] %v9494_v42  ;;  %v6589_v44 = vcombine.low %v9468_v34, %v9494_v42  ;;  %v1015_v49 = vunpack.c.h.b16 %v9494_v42 }
  0x3c   : > { %2286 = vmatprep.subr.bf16.mxu0 %v12433_v4 }
  0x3e   : > { %7690 = vmatmul.mubr.bf16.gmra.mrb[8].mxu0 %v1193_v50  ;;  %v1017_v50 = vunpack.c.l.b16 %v9475_v37 }
  0x3f   : > { %7693 = vmatprep.mubr.msk.bf16.mxu0 %vm9186_vm0, %v12435_v1  ;;  %2287 = vmatpush1.bf16.msra.mxu0 %v8885_v47  ;;  %v9507_v47 = vld [vmem:[%s9276_s24 + $0x74] sm:$0xf] }
  0x40   : > { %2288 = vmatprep.subr.bf16.mxu0 %v12433_v4 }
  0x43   : > { %2289 = vmatpush1.bf16.msra.mxu0 %v8888_v60  ;;  %v366_v60 = vld [vmem:[%s9276_s24 + $0x80] sm:$0xf] }
  0x44   : > { %2290 = vmatprep.subr.bf16.mxu0 %v12433_v4  ;;  %v9534_v10 = vcombine.low %v366_v60, %v367_v61  ;;  %v9587_v60 = vld [vmem:[%s9276_s24 + $0xa8] sm:$0xf]  ;;  %v377_v61 = vld [vmem:[%s9276_s24 + $0xac] sm:$0xf] }
  0x46   : > { %7694 = vmatmul.mubr.bf16.gmra.mrb[12].mxu0 %v9404_v0  ;;  %12558 = vst [vmem:[#allocation10_spill] sm:$0xff] %v9534_v10  ;;  %v940_v16 = vrot.slane %v9534_v10, 1 }
  0x47   : > { %7697 = vmatprep.mubr.msk.bf16.mxu0 %vm9186_vm0, %v12435_v1  ;;  %2291 = vmatpush1.bf16.msra.mxu0 %v8889_v63  ;;  %v9523_v63 = vld [vmem:[%s9276_s24 + $0x88] sm:$0xf] }
  0x48   : > { %2292 = vmatprep.subr.bf16.mxu0 %v12433_v4 }
  0x4b   : > { %2293 = vmatpush1.bf16.msra.mxu0 %v8892_v2  ;;  %v369_v2 = vld [vmem:[%s9276_s24 + $0x8c] sm:$0xf] }
  0x4c   : > { %2294 = vmatprep.subr.bf16.mxu0 %v12433_v4  ;;  %v9537_v12 = vcombine.low %v9523_v63, %v369_v2 }
  0x4e   : > { %7698 = vmatmul.mubr.bf16.gmra.mrb[16].mxu0 %v6585_v6  ;;  %v9529_v6 = vcombine.low %v9504_v46, %v9507_v47  ;;  %v9548_v18 = vrot.slane %v9537_v12, 1 }
  0x4f   : > { %7701 = vmatprep.mubr.msk.bf16.mxu0 %vm9186_vm0, %v12435_v1  ;;  %2295 = vmatpush1.bf16.msra.mxu0 %v8895_v5  ;;  %v1209_v5 = vpack.c.b16 %v1017_v50, %v1015_v49 }
  0x50   : > { %2296 = vmatprep.subr.bf16.mxu0 %v12433_v4  ;;  %12557 = vst [vmem:[#allocation9_spill] sm:$0xff] %v9529_v6  ;;  %12560 = vst [vmem:[#allocation12_spill] sm:$0xff] %v9548_v18  ;;  %v1029_v50 = vunpack.c.l.b16 %v9548_v18 }
  0x53   : > { %2297 = vmatpush1.bf16.msra.mxu0 %v8896_v14  ;;  %v937_v14 = vrot.slane %v9529_v6, 1 }
  0x54   : > { %2298 = vmatprep.subr.bf16.mxu0 %v12433_v4 }
  0x56   : > { %7702 = vmatmul.mubr.bf16.gmra.mrb[20].mxu0 %v1201_v20  ;;  %v9559_v20 = vsel %vm915_vm1, %v940_v16, %v9548_v18  ;;  %v9594_v16 = vld [vmem:[%s9276_s24] sm:$0xff]   ;;  %v12565_v18 = vmov 0.0  }
  0x57   : > { %7705 = vmatprep.mubr.msk.bf16.mxu0 %vm9186_vm0, %v12435_v1  ;;  %2299 = vmatpush1.bf16.msra.mxu0 %v8899_v19  ;;  %v9552_v19 = vsel %vm915_vm1, %v937_v14, %v9542_v15  ;;  %12562 = vst [vmem:[#allocation14_spill] sm:$0xff] %v9559_v20  ;;  %v6593_v36 = vcombine.low %v9542_v15, %v9559_v20  ;;  %v1027_v49 = vunpack.c.h.b16 %v9559_v20 }
  0x58   : > { %2300 = vmatprep.subr.bf16.mxu0 %v12433_v4  ;;  %12561 = vst [vmem:[#allocation13_spill] sm:$0xff] %v9552_v19 }
  0x5b   : > { %2301 = vmatpush1.bf16.msra.mxu0 %v8902_v35  ;;  %v9565_v35 = vld [vmem:[%s9276_s24 + $0x94] sm:$0xf] }
  0x5c   : > { %2302 = vmatprep.subr.bf16.mxu0 %v12433_v4  ;;  %v9579_v52 = vcombine.low %v9562_v31, %v9565_v35 }
  0x5e   : > { %7706 = vmatmul.mubr.bf16.gmra.mrb[24].mxu0 %v9483_v40  ;;  %12563 = vst [vmem:[#allocation15_spill] sm:$0xff] %v9579_v52  ;;  %v943_v14 = vrot.slane %v9579_v52, 1 }
  0x5f   : > { %7709 = vmatprep.mubr.msk.bf16.mxu0 %vm9186_vm0, %v12435_v1  ;;  %2303 = vmatpush1.bf16.msra.mxu0 %v8903_v39  ;;  %v9570_v39 = vld [vmem:[%s9276_s24 + $0x98] sm:$0xf] }
  0x60   : > { %2304 = vmatprep.subr.bf16.mxu0 %v12433_v4 }
  0x63   : > { %2305 = vmatpush1.bf16.msra.mxu0 %v8906_v41  ;;  %v373_v41 = vld [vmem:[%s9276_s24 + $0x9c] sm:$0xf] }
  0x64   : > { %2306 = vmatprep.subr.bf16.mxu0 %v12433_v4 }
  0x66   : > { %7710 = vmatmul.mubr.bf16.gmra.mrb[28].mxu0 %v6589_v44  ;;  %v375_v44 = vld [vmem:[%s9276_s24 + $0xa4] sm:$0xf] }
  0x67   : > { %7713 = vmatprep.mubr.msk.bf16.mxu0 %vm9186_vm0, %v12435_v1  ;;  %2307 = vmatpush1.bf16.msra.mxu0 %v8909_v43  ;;  %v374_v43 = vld [vmem:[%s9276_s24 + $0xa0] sm:$0xf] }
  0x68   : > { %2308 = vmatprep.subr.bf16.mxu0 %v12433_v4  ;;  %v9590_v2 = vcombine.low %v374_v43, %v375_v44  ;;  %v9600_v4 = vcombine.low %v9587_v60, %v377_v61  ;;  %v618_v44 = vshll.u32 %v9594_v16, 16  ;;  %v616_v61 = vshrl.u32 %v9594_v16, 16 }
  0x6a   : > { %12564 = vst [vmem:[#allocation16_spill] sm:$0xff] %v9590_v2  ;;  %v9608_v43 = vrot.slane %v9600_v4, 1 }
  0x6b   : > { %2309 = vmatpush1.bf16.msra.mxu0 %v8910_v58  ;;  %v9584_v58 = vcombine.low %v9570_v39, %v373_v41  ;;  %v336_v41 = vld [vmem:[%s9276_s24 + $0x8] sm:$0xf] }
  0x6c   : > { %7789 = vmatprep.subr.bf16.mxu0 %v12435_v1  ;;  %12566 = vst [vmem:[#allocation17_spill] sm:$0xff] %v9608_v43  ;;  %v1041_v37 = vunpack.c.l.b16 %v9608_v43 }
  0x6e   : > { %7714 = vmatmul.mubr.bf16.gmra.mrb[32].mxu0 %v1209_v5  ;;  %v1217_v5 = vpack.c.b16 %v1029_v50, %v1027_v49  ;;  %v9611_v49 = vcombine.low %v336_v41, %v337_v13 }
  0x6f   : > { %7717 = vmatprep.mubr.msk.bf16.mxu0 %vm9186_vm0, %v12435_v1 }
  0x70   : > { %v623_v20 = vshll.u32 %v9611_v49, 16  ;;  %v627_v42 = vshrl.u32 %v9611_v49, 16 }
  0x76   : > { %7718 = vmatmul.mubr.bf16.gmra.mrb[36].mxu0 %v9552_v19 }
  0x77   : > { %7721 = vmatprep.mubr.msk.bf16.mxu0 %vm9186_vm0, %v12435_v1 }
  0x7e   : > { %7722 = vmatmul.mubr.bf16.gmra.mrb[40].mxu0 %v6593_v36  ;;  %v9597_v36 = vrot.slane %v9584_v58, 1 }
  0x7f   : > { %7725 = vmatprep.mubr.msk.bf16.mxu0 %vm9186_vm0, %v12435_v1  ;;  %v946_v1 = vrot.slane %v9590_v2, 1 }
  0x80   : > { %v9615_v50 = vsel %vm915_vm1, %v943_v14, %v9597_v36 }
  0x81   : > { %12567 = vst [vmem:[#allocation18_spill] sm:$0xff] %v9615_v50  ;;  %v9624_v15 = vsel %vm915_vm1, %v946_v1, %v9608_v43 }
  0x82   : > { %12568 = vst [vmem:[#allocation19_spill] sm:$0xff] %v9624_v15  ;;  %v6597_v13 = vcombine.low %v9597_v36, %v9624_v15  ;;  %v1039_v14 = vunpack.c.h.b16 %v9624_v15 }
  0x84   : > { %v1225_v19 = vpack.c.b16 %v1041_v37, %v1039_v14  ;;  %v984_v37 = vunpack.c.h.b16 %v9374_v54 }
  0x86   : > { %7726 = vmatmul.mubr.bf16.gmra.mrb[44].mxu0 %v1217_v5  ;;  %v620_v5 = vrot.slane %v618_v44, 1 }
  0x87   : > { %7729 = vmatprep.mubr.msk.bf16.mxu0 %vm9186_vm0, %v12565_v18 }
  0x88   : > { %v621_v44 = vor.u32 %v620_v5, %v616_v61 }
  0x8e   : > { %7730 = vmatmul.mubr.bf16.gmra.mrb[48].mxu0 %v9615_v50  ;;  %v625_v50 = vrot.slane %v623_v20, 1  ;;  %v986_v20 = vunpack.c.l.b16 %v9376_v55 }
  0x8f   : > { %7733 = vmatprep.mubr.msk.bf16.mxu0 %vm9186_vm0, %v12565_v18 }
  0x90   : > { %v626_v1 = vsel %vm614_vm2, %v621_v44, %v625_v50  ;;  %v629_v34 = vor.u32 %v627_v42, %v625_v50  ;;  %v648_v42 = vshll.u32 %v9303_v22, 16  ;;  %v9097_v50 = vld [vmem:[%s9276_s24 + $0x10] sm:$0xf]  ;;  %v1987_v5 = vpack.c.b16 %v986_v20, %v984_v37 }
  0x91   : > { %v6639_v61 = vcombine.low %v336_v41, %v9097_v50  ;;  %v663_v44 = vshll.u32 %v9367_v51, 16  ;;  %v661_v37 = vshrl.u32 %v9367_v51, 16  ;;  %v9662_v50 = vld [vmem:[%s9276_s24 + $0x18] sm:$0xf] }
  0x92   : > { %v6640_v43 = vcombine.low %v629_v34, %v9374_v54  ;;  %v653_v34 = vshll.u32 %v9305_v23, 16  ;;  %v8919_v54 = vld [vmem:[%s12424_s1 + $0x90] sm:$0xff]   ;;  %v650_v14 = vrot.slane %v648_v42, 1 }
  0x93   : > { %v665_v20 = vrot.slane %v663_v44, 1  ;;  %v9098_v42 = vld [vmem:[%s9276_s24 + $0x14] sm:$0xf] }
  0x94   : > { %v655_v41 = vrot.slane %v653_v34, 1  ;;  %v8926_v34 = vld [vmem:[%s12424_s1 + $0xa0] sm:$0xff]  }
  0x96   : > { %7734 = vmatmul.mubr.bf16.gmra.mrb[52].mxu0 %v6597_v13  ;;  %v8913_v13 = vld [vmem:[%s12424_s1 + $0x80] sm:$0xff]  }
  0x97   : > { %7737 = vmatprep.mubr.msk.bf16.mxu0 %vm9186_vm0, %v12565_v18 }
  0x9e   : > { %7738 = vmatmul.mubr.bf16.gmra.mrb[56].mxu0 %v1225_v19  ;;  %v8916_v19 = vld [vmem:[%s12424_s1 + $0x88] sm:$0xff]  }
  0x9f   : > { %2310 = vmatprep.mubr.bf16.mxu0 %v626_v1  ;;  %v8923_v1 = vld [vmem:[%s12424_s1 + $0x98] sm:$0xff]  }
  0xa6   : > { %2311 = vmatmul.mubr.bf16.vlgmr.msra.gmra.mrb[60].mxu0 %v9594_v16 }
  0xa7   : > { %7790 = vmatpush3.bf16.msra.mxu0 %v8913_v13  ;;  %2318 = vmatprep.mubr.bf16.mxu0 %v6640_v43  ;;  %v646_v43 = vshrl.u32 %v9303_v22, 16 }
  0xa8   : > { %7791 = vmatprep.subr.bf16.mxu0 %v12565_v18 }
  0xa9   : > { %v651_v13 = vor.u32 %v650_v14, %v646_v43  ;;  %v666_v43 = vor.u32 %v665_v20, %v661_v37 }
  0xab   : > { %7792 = vmatpush3.bf16.msra.mxu0 %v8916_v19  ;;  %v668_v19 = vshll.u32 %v9371_v53, 16 }
  0xac   : > { %7793 = vmatprep.subr.bf16.mxu0 %v12565_v18 }
  0xad   : > { %v670_v14 = vrot.slane %v668_v19, 1  ;;  %v678_v19 = vshll.u32 %v9380_v56, 16 }
  0xae   : > { %2319 = vmatmul.mubr.bf16.gmra.mrb[4].mxu0 %v6639_v61  ;;  %v6642_v61 = vcombine.low %v9098_v42, %v9662_v50  ;;  %v9697_v42 = vld [vmem:[%s9276_s24 + $0x28] sm:$0xf] }
  0xaf   : > { %2326 = vmatprep.mubr.bf16.mxu0 %v1987_v5  ;;  %7794 = vmatpush3.bf16.msra.mxu0 %v8919_v54  ;;  %v657_v5 = vshrl.u32 %v9305_v23, 16  ;;  %v9670_v54 = vsel %vm614_vm2, %v651_v13, %v655_v41  ;;  %v672_v23 = vshrl.u32 %v9371_v53, 16  ;;  %v9681_v13 = vsel %vm614_vm2, %v666_v43, %v670_v14 }
  0xb0   : > { %7795 = vmatprep.subr.bf16.mxu0 %v12565_v18  ;;  %v996_v53 = vunpack.c.h.b16 %v9681_v13  ;;  %v676_v43 = vshrl.u32 %v9380_v56, 16 }
  0xb1   : > { %v9674_v44 = vor.u32 %v657_v5, %v655_v41  ;;  %v9688_v20 = vor.u32 %v672_v23, %v670_v14  ;;  %v680_v14 = vrot.slane %v678_v19, 1  ;;  %v693_v23 = vshll.u32 %v9453_v25, 16 }
  0xb2   : > { %v9718_v19 = vcombine.low %v9341_v33, %v9348_v38 }
  0xb3   : > { %7796 = vmatpush3.bf16.msra.mxu0 %v8923_v1  ;;  %v8932_v1 = vld [vmem:[%s12424_s1 + $0xa8] sm:$0xff]   ;;  %v9686_v37 = vcombine.low %v9674_v44, %v9681_v13  ;;  %12570 = vst [vmem:[#allocation21_spill] sm:$0xff] %v9688_v20  ;;  %v998_v41 = vunpack.c.l.b16 %v9688_v20 }
  0xb4   : > { %7797 = vmatprep.subr.bf16.mxu0 %v12565_v18  ;;  %12573 = vst [vmem:[#allocation24_spill] sm:$0xff] %v9718_v19 }
  0xb5   : > { %12569 = vst [vmem:[#allocation20_spill] sm:$0xff] %v9686_v37  ;;  %v9703_v5 = vpack.c.b16 %v998_v41, %v996_v53  ;;  %v691_v53 = vshrl.u32 %v9453_v25, 16  ;;  %v695_v41 = vrot.slane %v693_v23, 1 }
  0xb6   : > { %2327 = vmatmul.mubr.bf16.gmra.mrb[8].mxu0 %v6642_v61  ;;  %v9701_v61 = vcombine.low %v9697_v42, %v9338_v32  ;;  %v681_v32 = vor.u32 %v680_v14, %v676_v43  ;;  %v702_v14 = vshrl.u32 %v9456_v26, 16 }
  0xb7   : > { %2334 = vmatprep.mubr.bf16.mxu0 %v9670_v54  ;;  %7798 = vmatpush3.bf16.msra.mxu0 %v8926_v34  ;;  %12572 = vst [vmem:[#allocation23_spill] sm:$0xff] %v9703_v5  ;;  %v683_v34 = vshll.u32 %v9383_v57, 16 }
  0xb8   : > { %7799 = vmatprep.subr.bf16.mxu0 %v12565_v18  ;;  %12571 = vst [vmem:[#allocation22_spill] sm:$0xff] %v9701_v61 }
  0xbb   : > { %7800 = vmatpush3.bf16.msra.mxu0 %v8932_v1  ;;  %v8939_v1 = vld [vmem:[%s12424_s1 + $0xb0] sm:$0xff]  }
  0xbc   : > { %7801 = vmatprep.subr.bf16.mxu0 %v12565_v18 }
  0xbe   : > { %2335 = vmatmul.mubr.bf16.gmra.mrb[12].mxu0 %v9303_v22  ;;  %v698_v22 = vshll.u32 %v9456_v26, 16  ;;  %v9745_v26 = vcombine.low %v9360_v45, %v9425_v7  ;;  %v721_v7 = vshrl.u32 %v9529_v6, 16 }
  0xbf   : > { %2342 = vmatprep.mubr.bf16.mxu0 %v9686_v37  ;;  %v685_v37 = vrot.slane %v683_v34, 1  ;;  %7802 = vmatpush3.bf16.msra.mxu0 %v8939_v1  ;;  %v706_v1 = vshrl.u32 %v9458_v29, 16 }
  0xc0   : > { %7803 = vmatprep.subr.bf16.mxu0 %v12565_v18  ;;  %v700_v34 = vrot.slane %v698_v22, 1  ;;  %12575 = vst [vmem:[#allocation26_spill] sm:$0xff] %v9745_v26 }
  0xc1   : > { %v9722_v20 = vsel %vm614_vm2, %v681_v32, %v685_v37 }
  0xc2   : > { %v9736_v38 = vor.u32 %v702_v14, %v700_v34 }
  0xc6   : > { %2343 = vmatmul.mubr.bf16.gmra.mrb[16].mxu0 %v9701_v61  ;;  %v687_v61 = vshrl.u32 %v9383_v57, 16  ;;  %v1010_v57 = vunpack.c.l.b16 %v9736_v38 }
  0xc7   : > { %2350 = vmatprep.mubr.bf16.mxu0 %v9703_v5  ;;  %v696_v5 = vor.u32 %v695_v41, %v691_v53  ;;  %v723_v53 = vshll.u32 %v9529_v6, 16  ;;  %v8946_v41 = vld [vmem:[%s12424_s1 + $0xb8] sm:$0xff]  }
  0xc8   : > { %v9726_v43 = vor.u32 %v687_v61, %v685_v37  ;;  %v708_v37 = vshll.u32 %v9458_v29, 16  ;;  %7804 = vmatpush3.bf16.msra.mxu0 %v8946_v41  ;;  %v738_v41 = vshll.u32 %v9534_v10, 16 }
  0xc9   : > { %v9730_v23 = vsel %vm614_vm2, %v696_v5, %v700_v34  ;;  %v713_v5 = vshll.u32 %v9461_v30, 16  ;;  %v725_v14 = vrot.slane %v723_v53, 1 }
  0xca   : > { %v9734_v33 = vcombine.low %v9726_v43, %v9730_v23  ;;  %v1008_v22 = vunpack.c.h.b16 %v9730_v23  ;;  %v710_v32 = vrot.slane %v708_v37, 1  ;;  %v9762_v37 = vcombine.low %v9428_v8, %v9433_v11 }
  0xcb   : > { %v715_v34 = vrot.slane %v713_v5, 1 }
  0xcc   : > { %12574 = vst [vmem:[#allocation25_spill] sm:$0xff] %v9734_v33  ;;  %v9747_v61 = vpack.c.b16 %v1010_v57, %v1008_v22  ;;  %v711_v45 = vor.u32 %v710_v32, %v706_v1  ;;  %v728_v22 = vshll.u32 %v9532_v9, 16  ;;  %v12577_v57 = vmov 0   ;;  %12578 = vst [vmem:[#allocation28_spill] sm:$0xff] %v9762_v37 }
  0xcd   : > { %2991 = vmatprep.subr.bf16.mxu0 %v12577_v57  ;;  %v732_v32 = vshrl.u32 %v9532_v9, 16  ;;  %v9789_v9 = vcombine.low %v9444_v17, %v9504_v46  ;;  %v758_v17 = vshll.u32 %v9584_v58, 16  ;;  %v9802_v46 = vcombine.low %v9507_v47, %v9510_v48 }
  0xce   : > { %2351 = vmatmul.mubr.bf16.gmra.mrb[20].mxu0 %v9718_v19  ;;  %12576 = vst [vmem:[#allocation27_spill] sm:$0xff] %v9747_v61  ;;  %v730_v5 = vrot.slane %v728_v22, 1 }
  0xcf   : > { %2358 = vmatprep.mubr.bf16.mxu0 %v9722_v20  ;;  %12582 = vst [vmem:[#allocation32_spill] sm:$0xff] %v9789_v9  ;;  %12584 = vst [vmem:[#allocation34_spill] sm:$0xff] %v9802_v46 }
  0xd0   : > { %v9780_v11 = vor.u32 %v732_v32, %v730_v5  ;;  %v751_v32 = vshrl.u32 %v9579_v52, 16 }
  0xd2   : > { %12581 = vst [vmem:[#allocation31_spill] sm:$0xff] %v9780_v11 }
  0xd6   : > { %2359 = vmatmul.mubr.bf16.gmra.mrb[24].mxu0 %v9380_v56 }
  0xd7   : > { %2366 = vmatprep.mubr.bf16.mxu0 %v9734_v33  ;;  %v9766_v33 = vsel %vm614_vm2, %v711_v45, %v715_v34  ;;  %v740_v45 = vrot.slane %v738_v41, 1 }
  0xde   : > { %2367 = vmatmul.mubr.bf16.gmra.mrb[28].mxu0 %v9745_v26  ;;  %v717_v26 = vshrl.u32 %v9461_v30, 16 }
  0xdf   : > { %2374 = vmatprep.mubr.bf16.mxu0 %v9747_v61  ;;  %v726_v61 = vor.u32 %v725_v14, %v721_v7  ;;  %v743_v7 = vshll.u32 %v9537_v12, 16  ;;  %v753_v14 = vshll.u32 %v9579_v52, 16 }
  0xe0   : > { %v9770_v1 = vor.u32 %v717_v26, %v715_v34  ;;  %v1022_v26 = vunpack.c.l.b16 %v9780_v11  ;;  %v736_v34 = vshrl.u32 %v9534_v10, 16 }
  0xe1   : > { %v9774_v53 = vsel %vm614_vm2, %v726_v61, %v730_v5  ;;  %v745_v5 = vrot.slane %v743_v7, 1 }
  0xe2   : > { %12579 = vst [vmem:[#allocation29_spill] sm:$0xff] %v9774_v53  ;;  %v9778_v8 = vcombine.low %v9770_v1, %v9774_v53  ;;  %v1020_v30 = vunpack.c.h.b16 %v9774_v53  ;;  %v741_v22 = vor.u32 %v740_v45, %v736_v34  ;;  %v762_v45 = vshrl.u32 %v9584_v58, 16 }
  0xe4   : > { %12580 = vst [vmem:[#allocation30_spill] sm:$0xff] %v9778_v8  ;;  %v9791_v61 = vpack.c.b16 %v1022_v26, %v1020_v30  ;;  %v747_v30 = vshrl.u32 %v9537_v12, 16  ;;  %v9806_v26 = vsel %vm614_vm2, %v741_v22, %v745_v5 }
  0xe5   : > { %12585 = vst [vmem:[#allocation35_spill] sm:$0xff] %v9806_v26 }
  0xe6   : > { %2375 = vmatmul.mubr.bf16.gmra.mrb[32].mxu0 %v9762_v37  ;;  %12583 = vst [vmem:[#allocation33_spill] sm:$0xff] %v9791_v61  ;;  %v9810_v34 = vor.u32 %v747_v30, %v745_v5  ;;  %v9824_v5 = vld [vmem:[%s9276_s24 + $0xb4] sm:$0xf]  ;;  %v768_v30 = vshll.u32 %v9590_v2, 16  ;;  %v9906_v37 = vld [vmem:[%s9276_s24 + $0xd8] sm:$0xf] }
  0xe7   : > { %2382 = vmatprep.mubr.bf16.mxu0 %v9766_v33  ;;  %12602 = vst [vmem:[#allocation52_spill] sm:$0xff] %v9906_v37 }
  0xe8   : > { %12586 = vst [vmem:[#allocation36_spill] sm:$0xff] %v9810_v34 }
  0xee   : > { %2383 = vmatmul.mubr.bf16.gmra.mrb[36].mxu0 %v9458_v29 }
  0xef   : > { %2390 = vmatprep.mubr.bf16.mxu0 %v9778_v8  ;;  %v755_v8 = vrot.slane %v753_v14, 1 }
  0xf1   : > { %v756_v41 = vor.u32 %v755_v8, %v751_v32  ;;  %v378_v32 = vld [vmem:[%s9276_s24 + $0xb0] sm:$0xf] }
  0xf2   : > { %v9910_v56 = vcombine.low %v9587_v60, %v378_v32 }
  0xf4   : > { %12603 = vst [vmem:[#allocation53_spill] sm:$0xff] %v9910_v56 }
  0xf6   : > { %2391 = vmatmul.mubr.bf16.gmra.mrb[40].mxu0 %v9789_v9 }
  0xf7   : > { %2398 = vmatprep.mubr.bf16.mxu0 %v9791_v61  ;;  %v760_v61 = vrot.slane %v758_v17, 1 }
  0xf9   : > { %v9814_v47 = vsel %vm614_vm2, %v756_v41, %v760_v61  ;;  %v9820_v14 = vor.u32 %v762_v45, %v760_v61  ;;  %v9832_v41 = vcombine.low %v378_v32, %v9824_v5  ;;  %v381_v61 = vld [vmem:[%s9276_s24 + $0xbc] sm:$0xf]  ;;  %v9840_v45 = vcombine.low %v9523_v63, %v9562_v31 }
  0xfa   : > { %12587 = vst [vmem:[#allocation37_spill] sm:$0xff] %v9814_v47  ;;  %v9818_v8 = vcombine.low %v9810_v34, %v9814_v47  ;;  %v1032_v58 = vunpack.c.h.b16 %v9814_v47 }
  0xfb   : > { %12589 = vst [vmem:[#allocation39_spill] sm:$0xff] %v9820_v14  ;;  %v1034_v17 = vunpack.c.l.b16 %v9820_v14  ;;  %12591 = vst [vmem:[#allocation41_spill] sm:$0xff] %v9840_v45  ;;  %v781_v31 = vshrl.u32 %v9832_v41, 16 }
  0xfc   : > { %12588 = vst [vmem:[#allocation38_spill] sm:$0xff] %v9818_v8 }
  0xfe   : > { %2399 = vmatmul.mubr.bf16.gmra.mrb[44].mxu0 %v9802_v46  ;;  %v783_v46 = vshll.u32 %v9832_v41, 16 }
  0xff   : > { %2406 = vmatprep.mubr.bf16.mxu0 %v9806_v26 }
 0x101   : > { %v1766_v48 = vpop.f32.mrb[0].mxu0 }
 0x102   : > { %v7683_v12 = vpop.f32.mrb[1].mxu0  ;;  %v9835_v48 = vld [vmem:[%s9276_s24 + $0xb8] sm:$0xf] }
 0x103   : > { %v1769_v7 = vpop.f32.mrb[2].mxu0  ;;  %12590 = vst [vmem:[#allocation40_spill] sm:$0xff] %v9835_v48  ;;  %v9842_v12 = vpack.c.b16 %v1034_v17, %v1032_v58  ;;  %v785_v58 = vrot.slane %v783_v46, 1 }
 0x104   : > { %v7684_v22 = vpop.f32.mrb[3].mxu0  ;;  %v773_v7 = vshll.u32 %v9600_v4, 16 }
 0x105   : > { %12592 = vst [vmem:[#allocation42_spill] sm:$0xff] %v9842_v12  ;;  %v766_v22 = vshrl.u32 %v9590_v2, 16 }
 0x106   : > { %2407 = vmatmul.mubr.bf16.gmra.mrb[48].mxu0 %v9534_v10  ;;  %v9847_v10 = vcombine.low %v9835_v48, %v381_v61  ;;  %v775_v9 = vrot.slane %v773_v7, 1  ;;  %v777_v61 = vshrl.u32 %v9600_v4, 16  ;;  %v786_v7 = vor.u32 %v785_v58, %v781_v31  ;;  %v9874_v4 = vld [vmem:[%s9276_s24 + $0xc4] sm:$0xf]  ;;  %v9887_v58 = vld [vmem:[%s9276_s24 + $0xc8] sm:$0xf] }
 0x107   : > { %2414 = vmatprep.mubr.bf16.mxu0 %v9818_v8  ;;  %v770_v8 = vrot.slane %v768_v30, 1  ;;  %v9856_v30 = vcombine.low %v9565_v35, %v9570_v39  ;;  %v9871_v39 = vld [vmem:[%s9276_s24 + $0xc0] sm:$0xf]  ;;  %12598 = vst [vmem:[#allocation48_spill] sm:$0xff] %v9874_v4  ;;  %12601 = vst [vmem:[#allocation51_spill] sm:$0xff] %v9887_v58 }
 0x108   : > { %v788_v17 = vshll.u32 %v9847_v10, 16  ;;  %v9864_v46 = vor.u32 %v777_v61, %v775_v9  ;;  %12597 = vst [vmem:[#allocation47_spill] sm:$0xff] %v9871_v39  ;;  %v386_v61 = vld [vmem:[%s9276_s24 + $0xd0] sm:$0xf] }
 0x109   : > { %v771_v63 = vor.u32 %v770_v8, %v766_v22  ;;  %12593 = vst [vmem:[#allocation43_spill] sm:$0xff] %v9856_v30  ;;  %v792_v22 = vshrl.u32 %v9847_v10, 16 }
 0x10a   : > { %v790_v8 = vrot.slane %v788_v17, 1  ;;  %12595 = vst [vmem:[#allocation45_spill] sm:$0xff] %v9864_v46  ;;  %v385_v17 = vld [vmem:[%s9276_s24 + $0xcc] sm:$0xf] }
 0x10c   : > { %v9868_v35 = vsel %vm614_vm2, %v786_v7, %v790_v8  ;;  %v9880_v31 = vor.u32 %v792_v22, %v790_v8  ;;  %v9892_v7 = vld [vmem:[%s9276_s24 + $0xd4] sm:$0xf]  ;;  %v9900_v22 = vcombine.low %v9887_v58, %v385_v17 }
 0x10d   : > { %12596 = vst [vmem:[#allocation46_spill] sm:$0xff] %v9868_v35  ;;  %v9903_v29 = vcombine.low %v386_v61, %v9892_v7 }
 0x10e   : > { %2415 = vmatmul.mubr.bf16.gmra.mrb[52].mxu0 %v9840_v45  ;;  %12600 = vst [vmem:[#allocation50_spill] sm:$0xff] %v9880_v31  ;;  %v1046_v45 = vunpack.c.l.b16 %v9880_v31  ;;  %v803_v31 = vshll.u32 %v9900_v22, 16 }
 0x10f   : > { %2422 = vmatprep.mubr.bf16.mxu0 %v9842_v12  ;;  %v9860_v12 = vsel %vm614_vm2, %v771_v63, %v775_v9  ;;  %v9878_v63 = vcombine.low %v9864_v46, %v9868_v35  ;;  %v9884_v9 = vcombine.low %v9871_v39, %v9874_v4  ;;  %v389_v4 = vld [vmem:[%s9276_s24 + $0xdc] sm:$0xf]  ;;  %v813_v17 = vshll.u32 %v9903_v29, 16 }
 0x110   : > { %12594 = vst [vmem:[#allocation44_spill] sm:$0xff] %v9860_v12  ;;  %v9917_v19 = vcombine.low %v9906_v37, %v389_v4  ;;  %v805_v60 = vrot.slane %v803_v31, 1  ;;  %v811_v32 = vshrl.u32 %v9903_v29, 16  ;;  %v9926_v4 = vcombine.low %v9824_v5, %v9835_v48  ;;  %v9944_v48 = vld [vmem:[%s9276_s24 + $0xe4] sm:$0xf] }
 0x111   : > { %12599 = vst [vmem:[#allocation49_spill] sm:$0xff] %v9878_v63  ;;  %v798_v8 = vshll.u32 %v9884_v9, 16  ;;  %12610 = vst [vmem:[#allocation60_spill] sm:$0xff] %v9944_v48  ;;  %v9980_v46 = vcombine.low %v9887_v58, %v386_v61 }
 0x112   : > { %12605 = vst [vmem:[#allocation55_spill] sm:$0xff] %v9926_v4 }
 0x113   : > { %v800_v39 = vrot.slane %v798_v8, 1  ;;  %v807_v8 = vshrl.u32 %v9900_v22, 16  ;;  %12614 = vst [vmem:[#allocation64_spill] sm:$0xff] %v9980_v46 }
 0x115   : > { %v9934_v31 = vor.u32 %v807_v8, %v805_v60  ;;  %v394_v8 = vld [vmem:[%s9276_s24 + $0xf0] sm:$0xf] }
 0x116   : > { %2423 = vmatmul.mubr.bf16.gmra.mrb[56].mxu0 %v9856_v30  ;;  %v1044_v30 = vunpack.c.h.b16 %v9868_v35 }
 0x117   : > { %2430 = vmatprep.mubr.bf16.mxu0 %v9860_v12  ;;  %12607 = vst [vmem:[#allocation57_spill] sm:$0xff] %v9934_v31 }
 0x11e   : > { %2431 = vmatmul.mubr.bf16.gmra.mrb[64].mxu0 %v9590_v2  ;;  %v9912_v2 = vpack.c.b16 %v1046_v45, %v1044_v30  ;;  %v815_v45 = vrot.slane %v813_v17, 1  ;;  %v818_v30 = vshll.u32 %v9917_v19, 16  ;;  %v822_v17 = vshrl.u32 %v9917_v19, 16 }
 0x11f   : > { %2438 = vmatprep.mubr.bf16.mxu0 %v9878_v63  ;;  %v796_v63 = vshrl.u32 %v9884_v9, 16 }
 0x120   : > { %12604 = vst [vmem:[#allocation54_spill] sm:$0xff] %v9912_v2 }
 0x121   : > { %v801_v35 = vor.u32 %v800_v39, %v796_v63  ;;  %v816_v39 = vor.u32 %v815_v45, %v811_v32  ;;  %v820_v63 = vrot.slane %v818_v30, 1  ;;  %v9957_v45 = vld [vmem:[%s9276_s24 + $0xe8] sm:$0xf]  ;;  %v393_v30 = vld [vmem:[%s9276_s24 + $0xec] sm:$0xf] }
 0x122   : > { %12613 = vst [vmem:[#allocation63_spill] sm:$0xff] %v9957_v45  ;;  %v10047_v47 = vcombine.low %v9957_v45, %v394_v8 }
 0x123   : > { %v9938_v5 = vsel %vm614_vm2, %v816_v39, %v820_v63  ;;  %v9950_v32 = vor.u32 %v822_v17, %v820_v63  ;;  %v9962_v39 = vld [vmem:[%s9276_s24 + $0xf4] sm:$0xf]  ;;  %v9970_v17 = vcombine.low %v9957_v45, %v393_v30 }
 0x124   : > { %12608 = vst [vmem:[#allocation58_spill] sm:$0xff] %v9938_v5  ;;  %12624 = vst [vmem:[#allocation74_spill] sm:$0xff] %v10047_v47 }
 0x125   : > { %12612 = vst [vmem:[#allocation62_spill] sm:$0xff] %v9950_v32  ;;  %v837_v58 = vshrl.u32 %v9970_v17, 16 }
 0x126   : > { %2439 = vmatmul.mubr.bf16.gmra.mrb[68].mxu0 %v9910_v56  ;;  %v9941_v56 = vld [vmem:[%s9276_s24 + $0xe0] sm:$0xf] }
 0x127   : > { %2446 = vmatprep.mubr.bf16.mxu0 %v9912_v2  ;;  %v9930_v2 = vsel %vm614_vm2, %v801_v35, %v805_v60  ;;  %12609 = vst [vmem:[#allocation59_spill] sm:$0xff] %v9941_v56  ;;  %v9948_v35 = vcombine.low %v9934_v31, %v9938_v5  ;;  %v9954_v60 = vcombine.low %v9941_v56, %v9944_v48  ;;  %v1058_v31 = vunpack.c.l.b16 %v9950_v32  ;;  %v9976_v56 = vld [vmem:[%s9276_s24 + $0xf8] sm:$0xf] }
 0x128   : > { %12606 = vst [vmem:[#allocation56_spill] sm:$0xff] %v9930_v2  ;;  %v9973_v48 = vcombine.low %v394_v8, %v9962_v39  ;;  %v833_v32 = vshll.u32 %v9970_v17, 16 }
 0x129   : > { %12611 = vst [vmem:[#allocation61_spill] sm:$0xff] %v9948_v35  ;;  %v828_v63 = vshll.u32 %v9954_v60, 16 }
 0x12a   : > { %v843_v30 = vshll.u32 %v9973_v48, 16  ;;  %v835_v61 = vrot.slane %v833_v32, 1 }
 0x12c   : > { %v10004_v32 = vor.u32 %v837_v58, %v835_v61 }
 0x12e   : > { %2447 = vmatmul.mubr.bf16.gmra.mrb[72].mxu0 %v9926_v4  ;;  %v1056_v4 = vunpack.c.h.b16 %v9938_v5  ;;  %v830_v5 = vrot.slane %v828_v63, 1  ;;  %12618 = vst [vmem:[#allocation68_spill] sm:$0xff] %v10004_v32 }
 0x12f   : > { %2454 = vmatprep.mubr.bf16.mxu0 %v9930_v2  ;;  %v397_v2 = vld [vmem:[%s9276_s24 + $0xfc] sm:$0xf] }
 0x130   : > { %v9982_v14 = vpack.c.b16 %v1058_v31, %v1056_v4  ;;  %v9987_v12 = vcombine.low %v9976_v56, %v397_v2  ;;  %v841_v4 = vshrl.u32 %v9973_v48, 16  ;;  %v845_v31 = vrot.slane %v843_v30, 1 }
 0x131   : > { %v9996_v2 = vcombine.low %v9892_v7, %v9906_v37  ;;  %v10014_v37 = vld [vmem:[%s9276_s24 + $0x104] sm:$0xf] }
 0x132   : > { %12615 = vst [vmem:[#allocation65_spill] sm:$0xff] %v9982_v14  ;;  %v848_v63 = vshll.u32 %v9987_v12, 16  ;;  %v852_v30 = vshrl.u32 %v9987_v12, 16  ;;  %12621 = vst [vmem:[#allocation71_spill] sm:$0xff] %v10014_v37 }
 0x133   : > { %12616 = vst [vmem:[#allocation66_spill] sm:$0xff] %v9996_v2 }
 0x136   : > { %2455 = vmatmul.mubr.bf16.gmra.mrb[76].mxu0 %v9884_v9 }
 0x137   : > { %2462 = vmatprep.mubr.bf16.mxu0 %v9948_v35  ;;  %v826_v35 = vshrl.u32 %v9954_v60, 16 }
 0x139   : > { %v831_v52 = vor.u32 %v830_v5, %v826_v35  ;;  %v846_v5 = vor.u32 %v845_v31, %v841_v4  ;;  %v850_v35 = vrot.slane %v848_v63, 1  ;;  %v401_v31 = vld [vmem:[%s9276_s24 + $0x10c] sm:$0xf]  ;;  %v402_v63 = vld [vmem:[%s9276_s24 + $0x110] sm:$0xf] }
 0x13b   : > { %v10008_v7 = vsel %vm614_vm2, %v846_v5, %v850_v35  ;;  %v10020_v4 = vor.u32 %v852_v30, %v850_v35  ;;  %v403_v5 = vld [vmem:[%s9276_s24 + $0x114] sm:$0xf] }
 0x13c   : > { %12619 = vst [vmem:[#allocation69_spill] sm:$0xff] %v10008_v7 }
 0x13d   : > { %12623 = vst [vmem:[#allocation73_spill] sm:$0xff] %v10020_v4 }
 0x13e   : > { %2463 = vmatmul.mubr.bf16.gmra.mrb[80].mxu0 %v9980_v46  ;;  %v10011_v46 = vld [vmem:[%s9276_s24 + $0x100] sm:$0xf] }
 0x13f   : > { %2470 = vmatprep.mubr.bf16.mxu0 %v9982_v14  ;;  %v10000_v14 = vsel %vm614_vm2, %v831_v52, %v835_v61  ;;  %12620 = vst [vmem:[#allocation70_spill] sm:$0xff] %v10011_v46  ;;  %v10018_v52 = vcombine.low %v10004_v32, %v10008_v7  ;;  %v10024_v58 = vcombine.low %v10011_v46, %v10014_v37  ;;  %v10027_v61 = vld [vmem:[%s9276_s24 + $0x108] sm:$0xf]  ;;  %v1070_v32 = vunpack.c.l.b16 %v10020_v4  ;;  %v10043_v46 = vld [vmem:[%s9276_s24 + $0x118] sm:$0xf] }
 0x140   : > { %12617 = vst [vmem:[#allocation67_spill] sm:$0xff] %v10000_v14  ;;  %v10038_v30 = vcombine.low %v10027_v61, %v401_v31  ;;  %v10040_v37 = vcombine.low %v402_v63, %v403_v5 }
 0x141   : > { %12622 = vst [vmem:[#allocation72_spill] sm:$0xff] %v10018_v52  ;;  %v858_v35 = vshll.u32 %v10024_v58, 16 }
 0x142   : > { %v863_v4 = vshll.u32 %v10038_v30, 16  ;;  %v873_v31 = vshll.u32 %v10040_v37, 16  ;;  %v871_v8 = vshrl.u32 %v10040_v37, 16 }
 0x144   : > { %v865_v6 = vrot.slane %v863_v4, 1 }
 0x146   : > { %2471 = vmatmul.mubr.bf16.gmra.mrb[84].mxu0 %v9996_v2  ;;  %v1068_v2 = vunpack.c.h.b16 %v10008_v7  ;;  %v860_v7 = vrot.slane %v858_v35, 1  ;;  %v10063_v35 = vcombine.low %v9962_v39, %v9976_v56 }
 0x147   : > { %2478 = vmatprep.mubr.bf16.mxu0 %v10000_v14  ;;  %v405_v14 = vld [vmem:[%s9276_s24 + $0x11c] sm:$0xf] }
 0x148   : > { %v10049_v34 = vpack.c.b16 %v1070_v32, %v1068_v2  ;;  %v10054_v11 = vcombine.low %v10043_v46, %v405_v14  ;;  %v875_v2 = vrot.slane %v873_v31, 1  ;;  %v867_v14 = vshrl.u32 %v10038_v30, 16 }
 0x14a   : > { %v878_v32 = vshll.u32 %v10054_v11, 16  ;;  %v876_v53 = vor.u32 %v875_v2, %v871_v8  ;;  %v10088_v8 = vcombine.low %v10027_v61, %v402_v63 }
 0x14e   : > { %2479 = vmatmul.mubr.bf16.gmra.mrb[88].mxu0 %v9954_v60 }
 0x14f   : > { %2486 = vmatprep.mubr.bf16.mxu0 %v10018_v52  ;;  %v856_v52 = vshrl.u32 %v10024_v58, 16 }
 0x151   : > { %v861_v26 = vor.u32 %v860_v7, %v856_v52  ;;  %v10071_v7 = vor.u32 %v867_v14, %v865_v6  ;;  %v882_v52 = vshrl.u32 %v10054_v11, 16 }
 0x153   : > { %v10067_v45 = vsel %vm614_vm2, %v861_v26, %v865_v6 }
 0x156   : > { %2487 = vmatmul.mubr.bf16.gmra.mrb[92].mxu0 %v10047_v47  ;;  %v880_v47 = vrot.slane %v878_v32, 1  ;;  %v917_v32 = vrot.slane %v9611_v49, 1 }
 0x157   : > { %2494 = vmatprep.mubr.bf16.mxu0 %v10049_v34 }
 0x158   : > { %v10075_v4 = vsel %vm614_vm2, %v876_v53, %v880_v47  ;;  %v10081_v31 = vor.u32 %v882_v52, %v880_v47  ;;  %v10095_v53 = vcombine.low %v403_v5, %v10043_v46  ;;  %v916_v47 = vrot.slane %v9594_v16, 1  ;;  %v8954_v16 = vld [vmem:[%s12424_s1 + $0x188] sm:$0xff]  }
 0x159   : > { %v10079_v39 = vcombine.low %v10071_v7, %v10075_v4  ;;  %v1080_v26 = vunpack.c.h.b16 %v10075_v4  ;;  %v6641_v49 = vcombine.low %v917_v32, %v9310_v24 }
 0x15a   : > { %v1082_v6 = vunpack.c.l.b16 %v10081_v31 }
 0x15c   : > { %v10090_v2 = vpack.c.b16 %v1082_v6, %v1080_v26  ;;  %v918_v26 = vsel %vm915_vm1, %v916_v47, %v917_v32  ;;  %v8953_v6 = vld [vmem:[%s12424_s1 + $0x180] sm:$0xff]   ;;  %v8955_v47 = vld [vmem:[%s12424_s1 + $0x190] sm:$0xff]   ;;  %v8956_v32 = vld [vmem:[%s12424_s1 + $0x198] sm:$0xff]  }
 0x15e   : > { %2495 = vmatmul.mubr.bf16.gmra.mrb[96].mxu0 %v10063_v35 }
 0x15f   : > { %2502 = vmatprep.mubr.bf16.mxu0 %v10067_v45 }
 0x166   : > { %2503 = vmatmul.mubr.bf16.gmra.mrb[100].mxu0 %v10024_v58 }
 0x167   : > { %2510 = vmatprep.mubr.bf16.mxu0 %v10079_v39 }
 0x16e   : > { %2511 = vmatmul.mubr.bf16.gmra.mrb[104].mxu0 %v10088_v8 }
 0x16f   : > { %2518 = vmatprep.mubr.bf16.mxu0 %v10090_v2 }
 0x176   : > { %2519 = vmatmul.mubr.bf16.gmra.mrb[108].mxu0 %v10095_v53 }
 0x177   : > { %7805 = vmatprep.mubr.msk.bf16.mxu0 %vm9186_vm0, %v12565_v18 }
 0x179   : > { %v2312_v63 = vpop.f32.mrb[60].mxu0 }
 0x17a   : > { %v2314_v14 = vpop.f32.mrb[61].mxu0  ;;  %v985_v63 = vunpack.c.h.b16 %v9310_v24  ;;  %v8959_v24 = vld [vmem:[%s12424_s1 + $0x1b0] sm:$0xff]  }
 0x17b   : > { %v2315_v52 = vpop.f32.mrb[62].mxu0  ;;  %v987_v14 = vunpack.c.l.b16 %v9301_v21  ;;  %v8958_v21 = vld [vmem:[%s12424_s1 + $0x1a8] sm:$0xff]  }
 0x17c   : > { %v2317_v5 = vpop.f32.mrb[63].mxu0 }
 0x17d   : > { %v1988_v52 = vpack.c.b16 %v987_v14, %v985_v63  ;;  %v10148_v5 = vcombine.low %v9317_v27, %v9404_v0  ;;  %v8962_v27 = vld [vmem:[%s12424_s1 + $0x1c8] sm:$0xff]   ;;  %v8964_v14 = vld [vmem:[%s12424_s1 + $0x1d8] sm:$0xff]  }
 0x17e   : > { %7806 = vmatmul.mubr.bf16.vlgmr.msra.gmra.mrb[112].mxu0 %v918_v26  ;;  %v8957_v26 = vld [vmem:[%s12424_s1 + $0x1a0] sm:$0xff]  }
 0x17f   : > { %2992 = vmatpush1.bf16.msra.mxu0 %v8953_v6  ;;  %7809 = vmatprep.mubr.msk.bf16.mxu0 %vm9186_vm0, %v12565_v18  ;;  %v8960_v6 = vld [vmem:[%s12424_s1 + $0x1b8] sm:$0xff]  }
 0x180   : > { %2993 = vmatprep.subr.bf16.mxu0 %v12577_v57 }
 0x183   : > { %2994 = vmatpush1.bf16.msra.mxu0 %v8954_v16  ;;  %v8961_v16 = vld [vmem:[%s12424_s1 + $0x1c0] sm:$0xff]  }
 0x184   : > { %2995 = vmatprep.subr.bf16.mxu0 %v12577_v57 }
 0x186   : > { %7810 = vmatmul.mubr.bf16.gmra.mrb[4].mxu0 %v6641_v49  ;;  %v997_v49 = vunpack.c.h.b16 %v9404_v0  ;;  %v8963_v0 = vld [vmem:[%s12424_s1 + $0x1d0] sm:$0xff]  }
 0x187   : > { %7813 = vmatprep.mubr.msk.bf16.mxu0 %vm9186_vm0, %v12565_v18  ;;  %2996 = vmatpush1.bf16.msra.mxu0 %v8955_v47  ;;  %v999_v47 = vunpack.c.l.b16 %v9389_v59  ;;  %v8966_v59 = vld [vmem:[%s12424_s1 + $0xc0] sm:$0xff]  }
 0x188   : > { %2997 = vmatprep.subr.bf16.mxu0 %v12577_v57  ;;  %1484 = vmatpush1.bf16.msra.mxu1 %v8966_v59  ;;  %v8974_v59 = vld [vmem:[%s12424_s1 + $0xf0] sm:$0xff]  }
 0x189   : > { %v10163_v63 = vpack.c.b16 %v999_v47, %v997_v49  ;;  %1485 = vmatprep.subr.bf16.mxu1 %v12577_v57  ;;  %v8970_v47 = vld [vmem:[%s12424_s1 + $0xd8] sm:$0xff]  }
 0x18b   : > { %2998 = vmatpush1.bf16.msra.mxu0 %v8956_v32  ;;  %v8965_v32 = vld [vmem:[%s12424_s1 + $0x1e0] sm:$0xff]  }
 0x18c   : > { %2999 = vmatprep.subr.bf16.mxu0 %v12577_v57 }
 0x18e   : > { %7814 = vmatmul.mubr.bf16.gmra.mrb[8].mxu0 %v1988_v52  ;;  %v8968_v52 = vld [vmem:[%s12424_s1 + $0xc8] sm:$0xff]  }
 0x18f   : > { %7817 = vmatprep.mubr.msk.bf16.mxu0 %vm9186_vm0, %v12565_v18  ;;  %3000 = vmatpush1.bf16.msra.mxu0 %v8957_v26  ;;  %v8967_v26 = vld [vmem:[%s12424_s1 + $0x1e8] sm:$0xff]  }
 0x190   : > { %3001 = vmatprep.subr.bf16.mxu0 %v12577_v57  ;;  %1486 = vmatpush1.bf16.msra.mxu1 %v8968_v52  ;;  %v12627_v52 = vld [vmem:[#allocation13_spill] sm:$0xff] }
 0x191   : > { %1487 = vmatprep.subr.bf16.mxu1 %v12577_v57 }
 0x193   : > { %3002 = vmatpush1.bf16.msra.mxu0 %v8958_v21  ;;  %v8969_v21 = vld [vmem:[%s12424_s1 + $0xd0] sm:$0xff]  }
 0x194   : > { %3003 = vmatprep.subr.bf16.mxu0 %v12577_v57  ;;  %1488 = vmatpush1.bf16.msra.mxu1 %v8969_v21 }
 0x195   : > { %1489 = vmatprep.subr.bf16.mxu1 %v12577_v57 }
 0x196   : > { %7818 = vmatmul.mubr.bf16.gmra.mrb[12].mxu0 %v9325_v28 }
 0x197   : > { %7821 = vmatprep.mubr.msk.bf16.mxu0 %vm9186_vm0, %v12565_v18  ;;  %3004 = vmatpush1.bf16.msra.mxu0 %v8959_v24  ;;  %v10200_v24 = vcombine.low %v9397_v62, %v9483_v40  ;;  %v8971_v62 = vld [vmem:[%s12424_s1 + $0x1f0] sm:$0xff]  }
 0x198   : > { %3005 = vmatprep.subr.bf16.mxu0 %v12577_v57  ;;  %1490 = vmatpush1.bf16.msra.mxu1 %v8970_v47  ;;  %v12629_v47 = vld [vmem:[#allocation11_spill] sm:$0xff] }
 0x199   : > { %1491 = vmatprep.subr.bf16.mxu1 %v12577_v57 }
 0x19b   : > { %3006 = vmatpush1.bf16.msra.mxu0 %v8960_v6  ;;  %v1009_v6 = vunpack.c.h.b16 %v9483_v40  ;;  %v8972_v40 = vld [vmem:[%s12424_s1 + $0xe0] sm:$0xff]  }
 0x19c   : > { %3007 = vmatprep.subr.bf16.mxu0 %v12577_v57  ;;  %1492 = vmatpush1.bf16.msra.mxu1 %v8972_v40  ;;  %v8978_v40 = vld [vmem:[%s12424_s1 + $0x108] sm:$0xff]  }
 0x19d   : > { %1493 = vmatprep.subr.bf16.mxu1 %v12577_v57 }
 0x19e   : > { %7822 = vmatmul.mubr.bf16.gmra.mrb[16].mxu0 %v10148_v5 }
 0x19f   : > { %7825 = vmatprep.mubr.msk.bf16.mxu0 %vm9186_vm0, %v12565_v18  ;;  %3008 = vmatpush1.bf16.msra.mxu0 %v8961_v16  ;;  %v12625_v16 = vld [vmem:[#allocation6_spill] sm:$0xff] }
 0x1a0   : > { %3009 = vmatprep.subr.bf16.mxu0 %v12577_v57  ;;  %v1011_v49 = vunpack.c.l.b16 %v12625_v16  ;;  %v8977_v16 = vld [vmem:[%s12424_s1 + $0x100] sm:$0xff]  }
 0x1a3   : > { %3010 = vmatpush1.bf16.msra.mxu0 %v8962_v27  ;;  %v10220_v27 = vpack.c.b16 %v1011_v49, %v1009_v6  ;;  %v8976_v6 = vld [vmem:[%s12424_s1 + $0x1f8] sm:$0xff]   ;;  %v1021_v49 = vunpack.c.h.b16 %v12627_v52 }
 0x1a4   : > { %3011 = vmatprep.subr.bf16.mxu0 %v12577_v57 }
 0x1a6   : > { %7826 = vmatmul.mubr.bf16.gmra.mrb[20].mxu0 %v10163_v63 }
 0x1a7   : > { %7829 = vmatprep.mubr.msk.bf16.mxu0 %vm9186_vm0, %v12565_v18  ;;  %3012 = vmatpush1.bf16.msra.mxu0 %v8963_v0  ;;  %v8973_v0 = vld [vmem:[%s12424_s1 + $0xe8] sm:$0xff]  }
 0x1a8   : > { %3013 = vmatprep.subr.bf16.mxu0 %v12577_v57  ;;  %1494 = vmatpush1.bf16.msra.mxu1 %v8973_v0 }
 0x1a9   : > { %1495 = vmatprep.subr.bf16.mxu1 %v12577_v57 }
 0x1ab   : > { %3014 = vmatpush1.bf16.msra.mxu0 %v8964_v14  ;;  %v12626_v14 = vld [vmem:[#allocation8_spill] sm:$0xff] }
 0x1ac   : > { %3015 = vmatprep.subr.bf16.mxu0 %v12577_v57  ;;  %1496 = vmatpush1.bf16.msra.mxu1 %v8974_v59  ;;  %v8979_v59 = vld [vmem:[%s12424_s1 + $0x110] sm:$0xff]  }
 0x1ad   : > { %1497 = vmatprep.subr.bf16.mxu1 %v12577_v57 }
 0x1ae   : > { %7830 = vmatmul.mubr.bf16.gmra.mrb[24].mxu0 %v9415_v3 }
 0x1af   : > { %7833 = vmatprep.mubr.msk.bf16.mxu0 %vm9186_vm0, %v12565_v18  ;;  %3016 = vmatpush1.bf16.msra.mxu0 %v8965_v32  ;;  %v8975_v32 = vld [vmem:[%s12424_s1 + $0xf8] sm:$0xff]  }
 0x1b0   : > { %3017 = vmatprep.subr.bf16.mxu0 %v12577_v57  ;;  %1498 = vmatpush1.bf16.msra.mxu1 %v8975_v32  ;;  %v8981_v32 = vld [vmem:[%s12424_s1 + $0x118] sm:$0xff]  }
 0x1b1   : > { %1499 = vmatprep.subr.bf16.mxu1 %v12577_v57 }
 0x1b3   : > { %3018 = vmatpush1.bf16.msra.mxu0 %v8967_v26  ;;  %v12628_v26 = vld [vmem:[#allocation7_spill] sm:$0xff] }
 0x1b4   : > { %3019 = vmatprep.subr.bf16.mxu0 %v12577_v57  ;;  %v10243_v21 = vcombine.low %v12628_v26, %v12627_v52  ;;  %1500 = vmatpush1.bf16.msra.mxu1 %v8977_v16  ;;  %v8982_v52 = vld [vmem:[%s12424_s1 + $0x120] sm:$0xff]   ;;  %v8984_v16 = vld [vmem:[%s12424_s1 + $0x130] sm:$0xff]  }
 0x1b5   : > { %1501 = vmatprep.subr.bf16.mxu1 %v12577_v57  ;;  %v12630_v26 = vld [vmem:[#allocation14_spill] sm:$0xff] }
 0x1b6   : > { %7834 = vmatmul.mubr.bf16.gmra.mrb[28].mxu0 %v10200_v24 }
 0x1b7   : > { %7837 = vmatprep.mubr.msk.bf16.mxu0 %vm9186_vm0, %v12565_v18  ;;  %3020 = vmatpush1.bf16.msra.mxu0 %v8971_v62  ;;  %v1023_v62 = vunpack.c.l.b16 %v12629_v47  ;;  %v12632_v47 = vld [vmem:[#allocation12_spill] sm:$0xff] }
 0x1b8   : > { %3021 = vmatprep.subr.bf16.mxu0 %v12577_v57  ;;  %1502 = vmatpush1.bf16.msra.mxu1 %v8978_v40 }
 0x1b9   : > { %1503 = vmatprep.subr.bf16.mxu1 %v12577_v57  ;;  %v10262_v0 = vpack.c.b16 %v1023_v62, %v1021_v49  ;;  %v12631_v49 = vld [vmem:[#allocation18_spill] sm:$0xff] }
 0x1ba   : > { %v10291_v62 = vcombine.low %v12632_v47, %v12631_v49  ;;  %v1033_v40 = vunpack.c.h.b16 %v12631_v49  ;;  %v9102_v49 = vld [vmem:[%s9276_s24 + $0x20] sm:$0xf] }
 0x1bb   : > { %3022 = vmatpush1.bf16.msra.mxu0 %v8976_v6  ;;  %v8983_v6 = vld [vmem:[%s12424_s1 + $0x128] sm:$0xff]   ;;  %v6579_v47 = vcombine.low %v9662_v50, %v9102_v49  ;;  %v990_v50 = vunpack.c.h.b16 %v9670_v54 }
 0x1bc   : > { %7913 = vmatprep.subr.bf16.mxu0 %v12565_v18  ;;  %1504 = vmatpush1.bf16.msra.mxu1 %v8979_v59  ;;  %v1035_v59 = vunpack.c.l.b16 %v9597_v36  ;;  %v6580_v36 = vcombine.low %v9376_v55, %v9670_v54  ;;  %v9104_v55 = vld [vmem:[%s12424_s1 + $0x150] sm:$0xff]  }
 0x1bd   : > { %1505 = vmatprep.subr.bf16.mxu1 %v12577_v57 }
 0x1be   : > { %7838 = vmatmul.mubr.bf16.gmra.mrb[32].mxu0 %v10220_v27 }
 0x1bf   : > { %7841 = vmatprep.mubr.msk.bf16.mxu0 %vm9186_vm0, %v12565_v18 }
 0x1c0   : > { %1506 = vmatpush1.bf16.msra.mxu1 %v8981_v32  ;;  %v8985_v32 = vld [vmem:[%s12424_s1 + $0x138] sm:$0xff]  }
 0x1c1   : > { %1507 = vmatprep.subr.bf16.mxu1 %v12577_v57 }
 0x1c4   : > { %1508 = vmatpush1.bf16.msra.mxu1 %v8982_v52  ;;  %v10303_v52 = vpack.c.b16 %v1035_v59, %v1033_v40  ;;  %v9103_v40 = vld [vmem:[%s12424_s1 + $0x148] sm:$0xff]   ;;  %v949_v59 = vrot.slane %v9832_v41, 1 }
 0x1c5   : > { %1509 = vmatprep.subr.bf16.mxu1 %v12577_v57 }
 0x1c6   : > { %7842 = vmatmul.mubr.bf16.gmra.mrb[36].mxu0 %v12626_v14  ;;  %12633 = vst [vmem:[#allocation6_spill] sm:$0xff] %v10303_v52 }
 0x1c7   : > { %7845 = vmatprep.mubr.msk.bf16.mxu0 %vm9186_vm0, %v12565_v18 }
 0x1c8   : > { %1510 = vmatpush1.bf16.msra.mxu1 %v8983_v6  ;;  %v12634_v6 = vld [vmem:[#allocation2_spill] sm:$0xff] }
 0x1c9   : > { %1511 = vmatprep.subr.bf16.mxu1 %v12577_v57 }
 0x1cc   : > { %1512 = vmatpush1.bf16.msra.mxu1 %v8984_v16  ;;  %v9101_v16 = vld [vmem:[%s12424_s1 + $0x140] sm:$0xff]  }
 0x1cd   : > { %1513 = vmatprep.subr.bf16.mxu1 %v12577_v57  ;;  %v9119_v57 = vld [vmem:[%s9276_s24 + $0x78] sm:$0xf] }
 0x1ce   : > { %7846 = vmatmul.mubr.bf16.gmra.mrb[40].mxu0 %v10243_v21 }
 0x1cf   : > { %7849 = vmatprep.mubr.msk.bf16.mxu0 %vm9186_vm0, %v12565_v18 }
 0x1d0   : > { %1514 = vmatpush1.bf16.msra.mxu1 %v8985_v32  ;;  %v10323_v32 = vrot.slane %v9847_v10, 1 }
 0x1d1   : > { %8229 = vmatprep.subr.bf16.mxu1 %v12565_v18 }
 0x1d2   : > { %v10336_v10 = vsel %vm915_vm1, %v949_v59, %v10323_v32 }
 0x1d3   : > { %1516 = vmatmul.mubr.bf16.vlgmr.msra.gmra.mrb[0].mxu1 %v12634_v6  ;;  %v992_v6 = vunpack.c.l.b16 %v9674_v44  ;;  %v12635_v44 = vld [vmem:[#allocation17_spill] sm:$0xff]  ;;  %v1045_v59 = vunpack.c.h.b16 %v10336_v10 }
 0x1d4   : > { %8237 = vmatpush3.bf16.msra.mxu1 %v9101_v16  ;;  %1523 = vmatprep.mubr.bf16.mxu1 %v6580_v36  ;;  %v9105_v16 = vld [vmem:[%s9276_s24 + $0x24] sm:$0xf] }
 0x1d5   : > { %8230 = vmatprep.subr.bf16.mxu1 %v12565_v18  ;;  %v6582_v36 = vcombine.low %v9105_v16, %v9697_v42  ;;  %v1192_v49 = vpack.c.b16 %v992_v6, %v990_v50  ;;  %v9107_v42 = vld [vmem:[%s12424_s1 + $0x160] sm:$0xff]   ;;  %v9109_v6 = vld [vmem:[%s12424_s1 + $0x170] sm:$0xff]   ;;  %v12638_v16 = vld [vmem:[#allocation21_spill] sm:$0xff] }
 0x1d6   : > { %7850 = vmatmul.mubr.bf16.gmra.mrb[44].mxu0 %v10262_v0 }
 0x1d7   : > { %7853 = vmatprep.mubr.msk.bf16.mxu0 %vm9186_vm0, %v12565_v18 }
 0x1d8   : > { %8238 = vmatpush3.bf16.msra.mxu1 %v9103_v40  ;;  %v10346_v40 = vcombine.low %v12635_v44, %v10336_v10  ;;  %v9111_v44 = vld [vmem:[%s9276_s24 + $0x40] sm:$0xf] }
 0x1d9   : > { %8231 = vmatprep.subr.bf16.mxu1 %v12565_v18 }
 0x1da   : > { %12636 = vst [vmem:[#allocation8_spill] sm:$0xff] %v10346_v40 }
 0x1db   : > { %1524 = vmatmul.mubr.bf16.gmra.mrb[4].mxu1 %v6579_v47  ;;  %v9106_v47 = vld [vmem:[%s12424_s1 + $0x158] sm:$0xff]  }
 0x1dc   : > { %8239 = vmatpush3.bf16.msra.mxu1 %v9104_v55  ;;  %1531 = vmatprep.mubr.bf16.mxu1 %v1192_v49  ;;  %v1047_v55 = vunpack.c.l.b16 %v10323_v32  ;;  %v952_v49 = vrot.slane %v9884_v9, 1 }
 0x1dd   : > { %8232 = vmatprep.subr.bf16.mxu1 %v12565_v18 }
 0x1de   : > { %7854 = vmatmul.mubr.bf16.gmra.mrb[48].mxu0 %v12630_v26  ;;  %v10362_v50 = vpack.c.b16 %v1047_v55, %v1045_v59  ;;  %v9112_v59 = vld [vmem:[%s12424_s1 + $0x178] sm:$0xff]  }
 0x1df   : > { %7857 = vmatprep.mubr.msk.bf16.mxu0 %vm9186_vm0, %v12565_v18 }
 0x1e0   : > { %8240 = vmatpush3.bf16.msra.mxu1 %v9106_v47  ;;  %12637 = vst [vmem:[#allocation13_spill] sm:$0xff] %v10362_v50  ;;  %v10376_v47 = vrot.slane %v9900_v22, 1  ;;  %v10389_v22 = vrot.slane %v9917_v19, 1 }
 0x1e1   : > { %8233 = vmatprep.subr.bf16.mxu1 %v12565_v18 }
 0x1e2   : > { %v10385_v55 = vsel %vm915_vm1, %v952_v49, %v10376_v47  ;;  %v9113_v49 = vld [vmem:[%s9276_s24 + $0x44] sm:$0xf] }
 0x1e3   : > { %1532 = vmatmul.mubr.bf16.gmra.mrb[8].mxu1 %v6582_v36  ;;  %v6584_v36 = vcombine.low %v12638_v16, %v9722_v20  ;;  %v1004_v16 = vunpack.c.l.b16 %v9726_v43 }
 0x1e4   : > { %1539 = vmatprep.mubr.bf16.mxu1 %v9681_v13  ;;  %8241 = vmatpush3.bf16.msra.mxu1 %v9107_v42  ;;  %v9108_v13 = vld [vmem:[%s12424_s1 + $0x168] sm:$0xff]  }
 0x1e5   : > { %8234 = vmatprep.subr.bf16.mxu1 %v12565_v18 }
 0x1e6   : > { %7858 = vmatmul.mubr.bf16.gmra.mrb[52].mxu0 %v10291_v62 }
 0x1e7   : > { %7861 = vmatprep.mubr.msk.bf16.mxu0 %vm9186_vm0, %v12565_v18 }
 0x1e8   : > { %8242 = vmatpush3.bf16.msra.mxu1 %v9108_v13  ;;  %v955_v13 = vrot.slane %v9903_v29, 1 }
 0x1e9   : > { %8235 = vmatprep.subr.bf16.mxu1 %v12565_v18 }
 0x1eb   : > { %1540 = vmatmul.mubr.bf16.gmra.mrb[12].mxu1 %v9367_v51  ;;  %v9110_v51 = vld [vmem:[%s9276_s24 + $0x38] sm:$0xf] }
 0x1ec   : > { %8243 = vmatpush3.bf16.msra.mxu1 %v9109_v6  ;;  %v6583_v42 = vcombine.low %v9110_v51, %v9111_v44  ;;  %1547 = vmatprep.mubr.bf16.mxu1 %v6584_v36  ;;  %v1002_v6 = vunpack.c.h.b16 %v9722_v20  ;;  %v10398_v36 = vsel %vm915_vm1, %v955_v13, %v10389_v22  ;;  %v9114_v51 = vld [vmem:[%s9276_s24 + $0x48] sm:$0xf] }
 0x1ed   : > { %8236 = vmatprep.subr.bf16.mxu1 %v12565_v18  ;;  %v6586_v44 = vcombine.low %v9113_v49, %v9114_v51  ;;  %v10404_v19 = vcombine.low %v10376_v47, %v10398_v36  ;;  %v1057_v43 = vunpack.c.h.b16 %v10398_v36  ;;  %v9115_v49 = vld [vmem:[%s9276_s24 + $0x58] sm:$0xf]  ;;  %v9116_v51 = vld [vmem:[%s9276_s24 + $0x60] sm:$0xf] }
 0x1ee   : > { %7862 = vmatmul.mubr.bf16.gmra.mrb[56].mxu0 %v10303_v52 }
 0x1ef   : > { %7865 = vmatprep.mubr.msk.bf16.mxu0 %vm9186_vm0, %v12565_v18  ;;  %12639 = vst [vmem:[#allocation7_spill] sm:$0xff] %v10404_v19 }
 0x1f0   : > { %8244 = vmatpush3.bf16.msra.mxu1 %v9112_v59  ;;  %v1200_v59 = vpack.c.b16 %v1004_v16, %v1002_v6  ;;  %v6588_v6 = vcombine.low %v9736_v38, %v9766_v33  ;;  %v10422_v16 = vrot.slane %v9970_v17, 1  ;;  %v961_v38 = vrot.slane %v9973_v48, 1 }
 0x1f1   : > { %v1016_v17 = vunpack.c.l.b16 %v9770_v1  ;;  %v12642_v1 = vld [vmem:[#allocation29_spill] sm:$0xff] }
 0x1f3   : > { %1548 = vmatmul.mubr.bf16.gmra.mrb[16].mxu1 %v6583_v42  ;;  %v1059_v42 = vunpack.c.l.b16 %v10389_v22 }
 0x1f4   : > { %1555 = vmatprep.mubr.bf16.mxu1 %v1200_v59  ;;  %v10432_v59 = vrot.slane %v9987_v12, 1 }
 0x1f5   : > { %v10412_v13 = vpack.c.b16 %v1059_v42, %v1057_v43  ;;  %v1014_v43 = vunpack.c.h.b16 %v9766_v33 }
 0x1f6   : > { %7866 = vmatmul.mubr.bf16.gmra.mrb[64].mxu0 %v9624_v15  ;;  %v10441_v42 = vsel %vm915_vm1, %v961_v38, %v10432_v59  ;;  %v1071_v38 = vunpack.c.l.b16 %v10432_v59  ;;  %v9124_v15 = vld [vmem:[%s9276_s24 + $0xa0] sm:$0xf] }
 0x1f7   : > { %7869 = vmatprep.mubr.msk.bf16.mxu0 %vm9186_vm0, %v12565_v18  ;;  %12640 = vst [vmem:[#allocation11_spill] sm:$0xff] %v10412_v13  ;;  %v10447_v12 = vcombine.low %v10422_v16, %v10441_v42 }
 0x1f9   : > { %12641 = vst [vmem:[#allocation14_spill] sm:$0xff] %v10447_v12 }
 0x1fb   : > { %1556 = vmatmul.mubr.bf16.gmra.mrb[20].mxu1 %v6586_v44  ;;  %v6587_v44 = vcombine.low %v9115_v49, %v9116_v51  ;;  %v1208_v51 = vpack.c.b16 %v1016_v17, %v1014_v43  ;;  %v12644_v17 = vld [vmem:[#allocation9_spill] sm:$0xff] }
 0x1fc   : > { %1563 = vmatprep.mubr.bf16.mxu1 %v9730_v23  ;;  %v958_v23 = vrot.slane %v9954_v60, 1 }
 0x1fe   : > { %7870 = vmatmul.mubr.bf16.gmra.mrb[68].mxu0 %v10346_v40  ;;  %v9123_v40 = vld [vmem:[%s9276_s24 + $0x98] sm:$0xf] }
 0x1ff   : > { %7873 = vmatprep.mubr.msk.bf16.mxu0 %vm9186_vm0, %v12565_v18  ;;  %v6595_v52 = vcombine.low %v9123_v40, %v9124_v15  ;;  %v8986_v15 = vld [vmem:[%s12424_s1 + $0x208] sm:$0xff]   ;;  %v9125_v40 = vld [vmem:[%s9276_s24 + $0xa4] sm:$0xf] }
 0x203   : > { %1564 = vmatmul.mubr.bf16.gmra.mrb[24].mxu1 %v9453_v25  ;;  %v10428_v25 = vsel %vm915_vm1, %v958_v23, %v10422_v16  ;;  %v9118_v23 = vld [vmem:[%s9276_s24 + $0x68] sm:$0xf] }
 0x204   : > { %1571 = vmatprep.mubr.bf16.mxu1 %v6588_v6  ;;  %v9117_v6 = vld [vmem:[%s9276_s24 + $0x64] sm:$0xf] }
 0x205   : > { %v6590_v49 = vcombine.low %v9117_v6, %v9118_v23  ;;  %v12645_v6 = vld [vmem:[#allocation35_spill] sm:$0xff] }
 0x206   : > { %7874 = vmatmul.mubr.bf16.gmra.mrb[72].mxu0 %v10362_v50  ;;  %v12646_v23 = vld [vmem:[#allocation31_spill] sm:$0xff] }
 0x207   : > { %7877 = vmatprep.mubr.msk.bf16.mxu0 %vm9186_vm0, %v12565_v18  ;;  %v12653_v50 = vld [vmem:[#allocation39_spill] sm:$0xff] }
 0x20b   : > { %1572 = vmatmul.mubr.bf16.gmra.mrb[28].mxu1 %v6587_v44  ;;  %v1069_v44 = vunpack.c.h.b16 %v10441_v42 }
 0x20c   : > { %1579 = vmatprep.mubr.bf16.mxu1 %v1208_v51  ;;  %v964_v51 = vrot.slane %v10024_v58, 1 }
 0x20d   : > { %v10455_v43 = vpack.c.b16 %v1071_v38, %v1069_v44  ;;  %v9120_v44 = vld [vmem:[%s9276_s24 + $0x80] sm:$0xf] }
 0x20e   : > { %7878 = vmatmul.mubr.bf16.gmra.mrb[76].mxu0 %v10385_v55  ;;  %v6591_v38 = vcombine.low %v9119_v57, %v9120_v44 }
 0x20f   : > { %7881 = vmatprep.mubr.msk.bf16.mxu0 %vm9186_vm0, %v12565_v18  ;;  %12643 = vst [vmem:[#allocation18_spill] sm:$0xff] %v10455_v43 }
 0x213   : > { %1580 = vmatmul.mubr.bf16.gmra.mrb[32].mxu1 %v6590_v49  ;;  %v6592_v49 = vcombine.low %v12646_v23, %v12645_v6  ;;  %v967_v23 = vrot.slane %v10040_v37, 1 }
 0x214   : > { %1587 = vmatprep.mubr.bf16.mxu1 %v12642_v1  ;;  %v10465_v1 = vrot.slane %v10038_v30, 1  ;;  %v12647_v30 = vld [vmem:[#allocation36_spill] sm:$0xff] }
 0x216   : > { %7882 = vmatmul.mubr.bf16.gmra.mrb[80].mxu0 %v10404_v19 }
 0x217   : > { %7885 = vmatprep.mubr.msk.bf16.mxu0 %vm9186_vm0, %v12565_v18 }
 0x21b   : > { %1588 = vmatmul.mubr.bf16.gmra.mrb[36].mxu1 %v12644_v17  ;;  %v10471_v17 = vsel %vm915_vm1, %v964_v51, %v10465_v1  ;;  %v9122_v51 = vld [vmem:[%s9276_s24 + $0x88] sm:$0xf] }
 0x21c   : > { %1595 = vmatprep.mubr.bf16.mxu1 %v6592_v49  ;;  %v9121_v49 = vld [vmem:[%s9276_s24 + $0x84] sm:$0xf] }
 0x21d   : > { %v6594_v44 = vcombine.low %v9121_v49, %v9122_v51 }
 0x21e   : > { %7886 = vmatmul.mubr.bf16.gmra.mrb[84].mxu0 %v10412_v13  ;;  %v1028_v13 = vunpack.c.l.b16 %v12647_v30 }
 0x21f   : > { %7889 = vmatprep.mubr.msk.bf16.mxu0 %vm9186_vm0, %v12565_v18 }
 0x223   : > { %1596 = vmatmul.mubr.bf16.gmra.mrb[40].mxu1 %v6591_v38  ;;  %v12649_v38 = vld [vmem:[#allocation37_spill] sm:$0xff] }
 0x226   : > { %7890 = vmatmul.mubr.bf16.gmra.mrb[88].mxu0 %v10428_v25 }
 0x227   : > { %7893 = vmatprep.mubr.msk.bf16.mxu0 %vm9186_vm0, %v12565_v18 }
 0x22e   : > { %7894 = vmatmul.mubr.bf16.gmra.mrb[92].mxu0 %v10447_v12  ;;  %v1026_v12 = vunpack.c.h.b16 %v12645_v6 }
 0x22f   : > { %7897 = vmatprep.mubr.msk.bf16.mxu0 %vm9186_vm0, %v12565_v18 }
 0x230   : > { %v1216_v19 = vpack.c.b16 %v1028_v13, %v1026_v12 }
 0x232   : > { %1603 = vmatprep.mubr.bf16.mxu1 %v1216_v19  ;;  %v12651_v19 = vld [vmem:[#allocation15_spill] sm:$0xff] }
 0x233   : > { %1604 = vmatmul.mubr.bf16.gmra.mrb[44].mxu1 %v6594_v44 }
 0x234   : > { %1611 = vmatprep.mubr.bf16.mxu1 %v12649_v38  ;;  %v12652_v38 = vld [vmem:[#allocation44_spill] sm:$0xff] }
 0x236   : > { %7898 = vmatmul.mubr.bf16.gmra.mrb[96].mxu0 %v10455_v43  ;;  %v10475_v43 = vrot.slane %v10054_v11, 1 }
 0x237   : > { %7901 = vmatprep.mubr.msk.bf16.mxu0 %vm9186_vm0, %v12565_v18 }
 0x238   : > { %v10484_v57 = vsel %vm915_vm1, %v967_v23, %v10475_v43  ;;  %v1083_v23 = vunpack.c.l.b16 %v10475_v43 }
 0x239   : > { %v10490_v11 = vcombine.low %v10465_v1, %v10484_v57  ;;  %v1081_v30 = vunpack.c.h.b16 %v10484_v57 }
 0x23b   : > { %12648 = vst [vmem:[#allocation12_spill] sm:$0xff] %v10490_v11  ;;  %v10498_v49 = vpack.c.b16 %v1083_v23, %v1081_v30  ;;  %1612 = vmatmul.mubr.bf16.gmra.mrb[48].mxu1 %v12651_v19  ;;  %v12654_v19 = vld [vmem:[#allocation3_spill] sm:$0xff] }
 0x23d   : > { %12650 = vst [vmem:[#allocation2_spill] sm:$0xff] %v10498_v49 }
 0x23e   : > { %7902 = vmatmul.mubr.bf16.gmra.mrb[100].mxu0 %v10471_v17 }
 0x23f   : > { %7905 = vmatprep.mubr.msk.bf16.mxu0 %vm9186_vm0, %v12565_v18 }
 0x246   : > { %7906 = vmatmul.mubr.bf16.gmra.mrb[104].mxu0 %v10490_v11  ;;  %v6596_v11 = vcombine.low %v12653_v50, %v12652_v38  ;;  %v1038_v50 = vunpack.c.h.b16 %v12652_v38 }
 0x247   : > { %7909 = vmatprep.mubr.msk.bf16.mxu0 %vm9186_vm0, %v12565_v18 }
 0x248   : > { %1619 = vmatprep.mubr.bf16.mxu1 %v6596_v11  ;;  %v9126_v11 = vld [vmem:[%s9276_s24 + $0xa8] sm:$0xf] }
 0x249   : > { %v2520_v13 = vpop.f32.mrb[108].mxu0  ;;  %1620 = vmatmul.mubr.bf16.gmra.mrb[52].mxu1 %v6595_v52 }
 0x24a   : > { %v2522_v12 = vpop.f32.mrb[109].mxu0 }
 0x24b   : > { %v2523_v51 = vpop.f32.mrb[110].mxu0  ;;  %v8980_v12 = vld [vmem:[%s12424_s1 + $0x200] sm:$0xff]  }
 0x24c   : > { %v2525_v44 = vpop.f32.mrb[111].mxu0 }
 0x24e   : > { %7910 = vmatmul.mubr.bf16.gmra.mrb[116].mxu0 %v10498_v49  ;;  %v12656_v49 = vld [vmem:[#allocation20_spill] sm:$0xff] }
 0x24f   : > { %3023 = vmatprep.mubr.bf16.mxu0 %v9670_v54  ;;  %v12655_v54 = vld [vmem:[#allocation45_spill] sm:$0xff] }
 0x250   : > { %v1040_v44 = vunpack.c.l.b16 %v12655_v54  ;;  %v12661_v54 = vld [vmem:[#allocation56_spill] sm:$0xff] }
 0x251   : > { %v2561_v13 = vpop.f32.mrb[112].mxu0 }
 0x252   : > { %v7807_v30 = vpop.f32.mrb[113].mxu0  ;;  %v6598_v13 = vcombine.low %v9125_v40, %v9126_v11  ;;  %v1224_v52 = vpack.c.b16 %v1040_v44, %v1038_v50  ;;  %v12660_v50 = vld [vmem:[#allocation24_spill] sm:$0xff]  ;;  %v12662_v44 = vld [vmem:[#allocation50_spill] sm:$0xff]  ;;  %v9000_v40 = vld [vmem:[%s12424_s1 + $0x228] sm:$0xff]  }
 0x253   : > { %v2564_v23 = vpop.f32.mrb[114].mxu0  ;;  %v8990_v30 = vld [vmem:[%s12424_s1 + $0x210] sm:$0xff]   ;;  %v12663_v11 = vld [vmem:[#allocation47_spill] sm:$0xff] }
 0x254   : > { %v7808_v51 = vpop.f32.mrb[115].mxu0  ;;  %1627 = vmatprep.mubr.bf16.mxu1 %v1224_v52  ;;  %v12658_v23 = vld [vmem:[#allocation22_spill] sm:$0xff] }
 0x255   : > { %1628 = vmatmul.mubr.bf16.gmra.mrb[56].mxu1 %v6598_v13  ;;  %v8993_v51 = vld [vmem:[%s12424_s1 + $0x218] sm:$0xff]   ;;  %v12664_v13 = vld [vmem:[#allocation40_spill] sm:$0xff] }
 0x256   : > { %3024 = vmatmul.mubr.bf16.vlgmr.msra.gmra.mrb[120].mxu0 %v12654_v19  ;;  %v8996_v19 = vld [vmem:[%s12424_s1 + $0x220] sm:$0xff]   ;;  %v6599_v52 = vcombine.low %v12664_v13, %v12663_v11  ;;  %v12672_v11 = vld [vmem:[#allocation27_spill] sm:$0xff]  ;;  %v12673_v13 = vld [vmem:[#allocation28_spill] sm:$0xff] }
 0x257   : > { %7914 = vmatpush3.bf16.msra.mxu0 %v8980_v12  ;;  %3031 = vmatprep.mubr.bf16.mxu0 %v12656_v49  ;;  %v12657_v49 = vld [vmem:[#allocation46_spill] sm:$0xff]  ;;  %v12659_v12 = vld [vmem:[#allocation23_spill] sm:$0xff] }
 0x258   : > { %7915 = vmatprep.subr.bf16.mxu0 %v12565_v18  ;;  %1635 = vmatprep.mubr.bf16.mxu1 %v12657_v49 }
 0x25b   : > { %7916 = vmatpush3.bf16.msra.mxu0 %v8986_v15  ;;  %v6600_v15 = vcombine.low %v12662_v44, %v12661_v54  ;;  %v12670_v44 = vld [vmem:[#allocation58_spill] sm:$0xff] }
 0x25c   : > { %7917 = vmatprep.subr.bf16.mxu0 %v12565_v18 }
 0x25d   : > { %1636 = vmatmul.mubr.bf16.gmra.mrb[60].mxu1 %v9832_v41  ;;  %v12665_v41 = vld [vmem:[#allocation4_spill] sm:$0xff] }
 0x25e   : > { %3032 = vmatmul.mubr.bf16.gmra.mrb[4].mxu0 %v12658_v23  ;;  %1643 = vmatprep.mubr.bf16.mxu1 %v6600_v15  ;;  %v12667_v23 = vld [vmem:[#allocation25_spill] sm:$0xff]  ;;  %v12671_v15 = vld [vmem:[#allocation26_spill] sm:$0xff] }
 0x25f   : > { %3039 = vmatprep.mubr.bf16.mxu0 %v12659_v12  ;;  %7918 = vmatpush3.bf16.msra.mxu0 %v8990_v30  ;;  %v1050_v30 = vunpack.c.h.b16 %v12661_v54  ;;  %v12668_v12 = vld [vmem:[#allocation51_spill] sm:$0xff] }
 0x260   : > { %7919 = vmatprep.subr.bf16.mxu0 %v12565_v18 }
 0x263   : > { %7920 = vmatpush3.bf16.msra.mxu0 %v8993_v51  ;;  %v12669_v51 = vld [vmem:[#allocation48_spill] sm:$0xff] }
 0x264   : > { %7921 = vmatprep.subr.bf16.mxu0 %v12565_v18 }
 0x265   : > { %1644 = vmatmul.mubr.bf16.gmra.mrb[64].mxu1 %v6599_v52  ;;  %v12674_v52 = vld [vmem:[#allocation67_spill] sm:$0xff] }
 0x266   : > { %3040 = vmatmul.mubr.bf16.gmra.mrb[8].mxu0 %v12660_v50 }
 0x267   : > { %3047 = vmatprep.mubr.bf16.mxu0 %v9722_v20  ;;  %7922 = vmatpush3.bf16.msra.mxu0 %v8996_v19  ;;  %v12666_v20 = vld [vmem:[#allocation57_spill] sm:$0xff]  ;;  %v6602_v19 = vcombine.low %v12669_v51, %v12668_v12  ;;  %v1062_v51 = vunpack.c.h.b16 %v12674_v52 }
 0x268   : > { %7923 = vmatprep.subr.bf16.mxu0 %v12565_v18  ;;  %v1052_v49 = vunpack.c.l.b16 %v12666_v20  ;;  %v12676_v20 = vld [vmem:[#allocation59_spill] sm:$0xff]  ;;  %v12678_v12 = vld [vmem:[#allocation5_spill] sm:$0xff] }
 0x26a   : > { %v1232_v50 = vpack.c.b16 %v1052_v49, %v1050_v30  ;;  %v12677_v49 = vld [vmem:[#allocation52_spill] sm:$0xff] }
 0x26b   : > { %7924 = vmatpush3.bf16.msra.mxu0 %v9000_v40  ;;  %v9003_v40 = vld [vmem:[%s12424_s1 + $0x230] sm:$0xff]  }
 0x26c   : > { %7925 = vmatprep.subr.bf16.mxu0 %v12565_v18  ;;  %1651 = vmatprep.mubr.bf16.mxu1 %v1232_v50 }
 0x26d   : > { %1652 = vmatmul.mubr.bf16.gmra.mrb[68].mxu1 %v6602_v19  ;;  %v12679_v19 = vld [vmem:[#allocation68_spill] sm:$0xff] }
 0x26e   : > { %3048 = vmatmul.mubr.bf16.gmra.mrb[12].mxu0 %v12665_v41  ;;  %1659 = vmatprep.mubr.bf16.mxu1 %v12670_v44  ;;  %v12675_v41 = vld [vmem:[#allocation62_spill] sm:$0xff]  ;;  %v1064_v50 = vunpack.c.l.b16 %v12679_v19 }
 0x26f   : > { %3055 = vmatprep.mubr.bf16.mxu0 %v12667_v23  ;;  %7926 = vmatpush3.bf16.msra.mxu0 %v9003_v40  ;;  %v6604_v30 = vcombine.low %v12675_v41, %v12674_v52  ;;  %v6603_v23 = vcombine.low %v12677_v49, %v12676_v20  ;;  %v12680_v44 = vld [vmem:[#allocation30_spill] sm:$0xff]  ;;  %v9006_v41 = vld [vmem:[%s12424_s1 + $0x238] sm:$0xff]  }
 0x270   : > { %7927 = vmatprep.subr.bf16.mxu0 %v12565_v18  ;;  %v12686_v20 = vld [vmem:[#allocation34_spill] sm:$0xff]  ;;  %v12687_v49 = vld [vmem:[#allocation73_spill] sm:$0xff] }
 0x271   : > { %v406_v19 = vld [vmem:[%s9276_s24 + $0x120] sm:$0xf] }
 0x273   : > { %7928 = vmatpush3.bf16.msra.mxu0 %v9006_v41  ;;  %v12691_v41 = vld [vmem:[#allocation71_spill] sm:$0xff] }
 0x275   : > { %1660 = vmatmul.mubr.bf16.gmra.mrb[72].mxu1 %v9903_v29  ;;  %v12681_v29 = vld [vmem:[#allocation63_spill] sm:$0xff] }
 0x276   : > { %3056 = vmatmul.mubr.bf16.gmra.mrb[16].mxu0 %v12671_v15  ;;  %1667 = vmatprep.mubr.bf16.mxu1 %v6604_v30  ;;  %v12682_v15 = vld [vmem:[#allocation60_spill] sm:$0xff]  ;;  %v12685_v30 = vld [vmem:[#allocation33_spill] sm:$0xff] }
 0x277   : > { %3063 = vmatprep.mubr.bf16.mxu0 %v12672_v11  ;;  %v6606_v40 = vcombine.low %v12682_v15, %v12681_v29  ;;  %v1240_v11 = vpack.c.b16 %v1064_v50, %v1062_v51  ;;  %v407_v50 = vld [vmem:[%s9276_s24 + $0x124] sm:$0xf]  ;;  %v10592_v15 = vld [vmem:[%s9276_s24 + $0x128] sm:$0xf] }
 0x278   : > { %v12689_v29 = vld [vmem:[#allocation10_spill] sm:$0xff] }
 0x27d   : > { %1668 = vmatmul.mubr.bf16.gmra.mrb[76].mxu1 %v6603_v23  ;;  %v6608_v23 = vcombine.low %v12687_v49, %v10067_v45 }
 0x27e   : > { %3064 = vmatmul.mubr.bf16.gmra.mrb[20].mxu0 %v12673_v13  ;;  %1675 = vmatprep.mubr.bf16.mxu1 %v1240_v11  ;;  %v12684_v13 = vld [vmem:[#allocation32_spill] sm:$0xff]  ;;  %v1076_v11 = vunpack.c.l.b16 %v10071_v7 }
 0x27f   : > { %3071 = vmatprep.mubr.bf16.mxu0 %v9766_v33  ;;  %v12683_v33 = vld [vmem:[#allocation69_spill] sm:$0xff] }
 0x285   : > { %1676 = vmatmul.mubr.bf16.gmra.mrb[80].mxu1 %v6606_v40  ;;  %v1074_v40 = vunpack.c.h.b16 %v10067_v45 }
 0x286   : > { %3072 = vmatmul.mubr.bf16.gmra.mrb[24].mxu0 %v12678_v12  ;;  %1683 = vmatprep.mubr.bf16.mxu1 %v12683_v33  ;;  %v12688_v12 = vld [vmem:[#allocation70_spill] sm:$0xff] }
 0x287   : > { %3079 = vmatprep.mubr.bf16.mxu0 %v12680_v44  ;;  %v6607_v51 = vcombine.low %v9976_v56, %v12688_v12  ;;  %v10588_v44 = vcombine.low %v406_v19, %v407_v50  ;;  %v12690_v33 = vld [vmem:[#allocation38_spill] sm:$0xff] }
 0x288   : > { %v12693_v12 = vld [vmem:[#allocation42_spill] sm:$0xff] }
 0x28d   : > { %1684 = vmatmul.mubr.bf16.gmra.mrb[84].mxu1 %v9973_v48  ;;  %v409_v48 = vld [vmem:[%s9276_s24 + $0x12c] sm:$0xf] }
 0x28e   : > { %3080 = vmatmul.mubr.bf16.gmra.mrb[28].mxu0 %v12684_v13  ;;  %1691 = vmatprep.mubr.bf16.mxu1 %v6608_v23  ;;  %v10599_v56 = vcombine.low %v10592_v15, %v409_v48  ;;  %v888_v13 = vshll.u32 %v10588_v44, 16  ;;  %v12692_v23 = vld [vmem:[#allocation41_spill] sm:$0xff] }
 0x28f   : > { %3087 = vmatprep.mubr.bf16.mxu0 %v12685_v30  ;;  %v6610_v30 = vcombine.low %v12691_v41, %v10027_v61  ;;  %v12694_v61 = vld [vmem:[#allocation43_spill] sm:$0xff]  ;;  %v12696_v41 = vld [vmem:[#allocation49_spill] sm:$0xff] }
 0x290   : > { %v890_v49 = vrot.slane %v888_v13, 1  ;;  %v893_v7 = vshll.u32 %v10599_v56, 16 }
 0x295   : > { %1692 = vmatmul.mubr.bf16.gmra.mrb[88].mxu1 %v6607_v51 }
 0x296   : > { %3088 = vmatmul.mubr.bf16.gmra.mrb[32].mxu0 %v12686_v20  ;;  %v886_v20 = vshrl.u32 %v10588_v44, 16 }
 0x297   : > { %3095 = vmatprep.mubr.bf16.mxu0 %v12645_v6  ;;  %v1248_v6 = vpack.c.b16 %v1076_v11, %v1074_v40  ;;  %v6611_v40 = vcombine.low %v10043_v46, %v406_v19  ;;  %v897_v11 = vshrl.u32 %v10599_v56, 16  ;;  %v12697_v46 = vld [vmem:[#allocation53_spill] sm:$0xff]  ;;  %v12698_v19 = vld [vmem:[#allocation54_spill] sm:$0xff] }
 0x298   : > { %v891_v51 = vor.u32 %v890_v49, %v886_v20 }
 0x299   : > { %1699 = vmatprep.mubr.bf16.mxu1 %v1248_v6 }
 0x29d   : > { %1700 = vmatmul.mubr.bf16.gmra.mrb[92].mxu1 %v6610_v30 }
 0x29e   : > { %3096 = vmatmul.mubr.bf16.gmra.mrb[36].mxu0 %v12689_v29  ;;  %1707 = vmatprep.mubr.bf16.mxu1 %v10075_v4  ;;  %v895_v29 = vrot.slane %v893_v7, 1 }
 0x29f   : > { %3103 = vmatprep.mubr.bf16.mxu0 %v12690_v33 }
 0x2a0   : > { %v10611_v48 = vsel %vm614_vm2, %v891_v51, %v895_v29  ;;  %v10620_v6 = vor.u32 %v897_v11, %v895_v29  ;;  %v1053_v29 = vunpack.c.l.b16 %v10376_v47  ;;  %v6605_v47 = vcombine.low %v10389_v22, %v10428_v25  ;;  %v12704_v11 = vld [vmem:[#allocation72_spill] sm:$0xff]  ;;  %v12705_v22 = vld [vmem:[#allocation74_spill] sm:$0xff] }
 0x2a1   : > { %v6612_v4 = vcombine.low %v10081_v31, %v10611_v48  ;;  %v1134_v33 = vunpack.c.h.b16 %v10611_v48  ;;  %v6614_v31 = vcombine.low %v407_v50, %v10592_v15  ;;  %v12699_v50 = vld [vmem:[#allocation55_spill] sm:$0xff] }
 0x2a2   : > { %v1136_v13 = vunpack.c.l.b16 %v10620_v6 }
 0x2a4   : > { %v1256_v30 = vpack.c.b16 %v1136_v13, %v1134_v33  ;;  %v413_v13 = vld [vmem:[%s9276_s24 + $0x13c] sm:$0xf] }
 0x2a5   : > { %1708 = vmatmul.mubr.bf16.gmra.mrb[96].mxu1 %v10040_v37  ;;  %v12695_v37 = vld [vmem:[#allocation16_spill] sm:$0xff] }
 0x2a6   : > { %3104 = vmatmul.mubr.bf16.gmra.mrb[40].mxu0 %v12692_v23  ;;  %1715 = vmatprep.mubr.bf16.mxu1 %v6612_v4 }
 0x2a7   : > { %3111 = vmatprep.mubr.bf16.mxu0 %v12693_v12  ;;  %v6601_v12 = vcombine.low %v10323_v32, %v10385_v55  ;;  %v12702_v32 = vld [vmem:[#allocation65_spill] sm:$0xff] }
 0x2ad   : > { %1716 = vmatmul.mubr.bf16.gmra.mrb[100].mxu1 %v6611_v40  ;;  %v1063_v40 = vunpack.c.h.b16 %v10428_v25 }
 0x2ae   : > { %3112 = vmatmul.mubr.bf16.gmra.mrb[44].mxu0 %v12694_v61  ;;  %1723 = vmatprep.mubr.bf16.mxu1 %v1256_v30  ;;  %v12700_v61 = vld [vmem:[#allocation61_spill] sm:$0xff] }
 0x2af   : > { %3119 = vmatprep.mubr.bf16.mxu0 %v12652_v38  ;;  %v1517_v38 = vpop.f32.mrb[0].mxu1 }
 0x2b0   : > { %v1519_v20 = vpop.f32.mrb[1].mxu1 }
 0x2b1   : > { %v1520_v49 = vpop.f32.mrb[2].mxu1 }
 0x2b2   : > { %v1522_v7 = vpop.f32.mrb[3].mxu1 }
 0x2b3   : > { %v1525_v23 = vpop.f32.mrb[4].mxu1 }
 0x2b4   : > { %v1527_v51 = vpop.f32.mrb[5].mxu1 }
 0x2b5   : > { %1724 = vmatmul.mubr.bf16.gmra.mrb[104].mxu1 %v6614_v31  ;;  %v10714_v51 = vpop.f32.mrb[6].mxu1 }
 0x2b6   : > { %3120 = vmatmul.mubr.bf16.gmra.mrb[48].mxu0 %v12695_v37  ;;  %7741 = vmatprep.mubr.msk.bf16.mxu1 %vm9186_vm0, %v12565_v18  ;;  %v412_v37 = vld [vmem:[%s9276_s24 + $0x138] sm:$0xf] }
 0x2b7   : > { %3127 = vmatprep.mubr.bf16.mxu0 %v12696_v41 }
 0x2bd   : > { %7742 = vmatmul.mubr.bf16.vlgmr.msra.gmra.mrb[60].mxu1 %v10336_v10  ;;  %v1051_v10 = vunpack.c.h.b16 %v10385_v55 }
 0x2be   : > { %3128 = vmatmul.mubr.bf16.gmra.mrb[52].mxu0 %v12697_v46  ;;  %7745 = vmatprep.mubr.msk.bf16.mxu1 %vm9186_vm0, %v12565_v18  ;;  %v970_v46 = vrot.slane %v10588_v44, 1 }
 0x2bf   : > { %3135 = vmatprep.mubr.bf16.mxu0 %v12698_v19  ;;  %v1233_v4 = vpack.c.b16 %v1053_v29, %v1051_v10 }
 0x2c5   : > { %7746 = vmatmul.mubr.bf16.gmra.mrb[64].mxu1 %v6601_v12 }
 0x2c6   : > { %3136 = vmatmul.mubr.bf16.gmra.mrb[56].mxu0 %v12699_v50  ;;  %7749 = vmatprep.mubr.msk.bf16.mxu1 %vm9186_vm0, %v12565_v18 }
 0x2c7   : > { %3143 = vmatprep.mubr.bf16.mxu0 %v12661_v54  ;;  %v12701_v54 = vld [vmem:[#allocation64_spill] sm:$0xff] }
 0x2cd   : > { %7750 = vmatmul.mubr.bf16.gmra.mrb[68].mxu1 %v1233_v4 }
 0x2ce   : > { %3144 = vmatmul.mubr.bf16.gmra.mrb[64].mxu0 %v9884_v9  ;;  %7753 = vmatprep.mubr.msk.bf16.mxu1 %vm9186_vm0, %v12565_v18  ;;  %v12703_v9 = vld [vmem:[#allocation66_spill] sm:$0xff] }
 0x2cf   : > { %3151 = vmatprep.mubr.bf16.mxu0 %v12700_v61 }
 0x2d5   : > { %7754 = vmatmul.mubr.bf16.gmra.mrb[72].mxu1 %v10398_v36  ;;  %v1065_v36 = vunpack.c.l.b16 %v10422_v16  ;;  %v410_v16 = vld [vmem:[%s9276_s24 + $0x130] sm:$0xf] }
 0x2d6   : > { %3152 = vmatmul.mubr.bf16.gmra.mrb[68].mxu0 %v12701_v54  ;;  %7757 = vmatprep.mubr.msk.bf16.mxu1 %vm9186_vm0, %v12565_v18  ;;  %v6699_v49 = vcombine.low %v10592_v15, %v410_v16 }
 0x2d7   : > { %3159 = vmatprep.mubr.bf16.mxu0 %v12702_v32  ;;  %v1241_v33 = vpack.c.b16 %v1065_v36, %v1063_v40 }
 0x2dd   : > { %7758 = vmatmul.mubr.bf16.gmra.mrb[76].mxu1 %v6605_v47 }
 0x2de   : > { %3160 = vmatmul.mubr.bf16.gmra.mrb[72].mxu0 %v12703_v9  ;;  %7761 = vmatprep.mubr.msk.bf16.mxu1 %vm9186_vm0, %v12565_v18 }
 0x2df   : > { %3167 = vmatprep.mubr.bf16.mxu0 %v12674_v52  ;;  %v1077_v52 = vunpack.c.l.b16 %v10465_v1 }
 0x2e5   : > { %7762 = vmatmul.mubr.bf16.gmra.mrb[80].mxu1 %v1241_v33 }
 0x2e6   : > { %3168 = vmatmul.mubr.bf16.gmra.mrb[76].mxu0 %v9954_v60  ;;  %7765 = vmatprep.mubr.msk.bf16.mxu1 %vm9186_vm0, %v12565_v18  ;;  %v6609_v60 = vcombine.low %v10432_v59, %v10471_v17  ;;  %v10683_v59 = vcombine.low %v412_v37, %v413_v13 }
 0x2e7   : > { %3175 = vmatprep.mubr.bf16.mxu0 %v12704_v11 }
 0x2e8   : > { %12706 = vst [vmem:[#allocation17_spill] sm:$0xff] %v10683_v59  ;;  %v908_v1 = vshll.u32 %v10683_v59, 16 }
 0x2ea   : > { %v910_v30 = vrot.slane %v908_v1, 1 }
 0x2ed   : > { %7766 = vmatmul.mubr.bf16.gmra.mrb[84].mxu1 %v10441_v42  ;;  %v1075_v42 = vunpack.c.h.b16 %v10471_v17 }
 0x2ee   : > { %3176 = vmatmul.mubr.bf16.gmra.mrb[80].mxu0 %v12705_v22  ;;  %7769 = vmatprep.mubr.msk.bf16.mxu1 %vm9186_vm0, %v12565_v18 }
 0x2ef   : > { %3183 = vmatprep.mubr.bf16.mxu0 %v10049_v34  ;;  %v411_v34 = vld [vmem:[%s9276_s24 + $0x134] sm:$0xf] }
 0x2f5   : > { %7770 = vmatmul.mubr.bf16.gmra.mrb[88].mxu1 %v6609_v60 }
 0x2f6   : > { %3184 = vmatmul.mubr.bf16.gmra.mrb[84].mxu0 %v10063_v35  ;;  %7773 = vmatprep.mubr.msk.bf16.mxu1 %vm9186_vm0, %v12565_v18  ;;  %v10679_v35 = vcombine.low %v410_v16, %v411_v34 }
 0x2f7   : > { %3191 = vmatprep.mubr.bf16.mxu0 %v10067_v45  ;;  %v1249_v45 = vpack.c.b16 %v1077_v52, %v1075_v42 }
 0x2f8   : > { %v903_v41 = vshll.u32 %v10679_v35, 16 }
 0x2fd   : > { %7774 = vmatmul.mubr.bf16.gmra.mrb[92].mxu1 %v1249_v45 }
 0x2fe   : > { %3192 = vmatmul.mubr.bf16.gmra.mrb[88].mxu0 %v10024_v58  ;;  %7777 = vmatprep.mubr.msk.bf16.mxu1 %vm9186_vm0, %v12565_v18  ;;  %v901_v58 = vshrl.u32 %v10679_v35, 16 }
 0x2ff   : > { %3199 = vmatprep.mubr.bf16.mxu0 %v10079_v39  ;;  %v905_v39 = vrot.slane %v903_v41, 1 }
 0x301   : > { %v906_v31 = vor.u32 %v905_v39, %v901_v58 }
 0x303   : > { %v911_v38 = vsel %vm614_vm2, %v906_v31, %v910_v30 }
 0x305   : > { %7778 = vmatmul.mubr.bf16.gmra.mrb[96].mxu1 %v10484_v57 }
 0x306   : > { %3200 = vmatmul.mubr.bf16.gmra.mrb[92].mxu0 %v10088_v8  ;;  %7781 = vmatprep.mubr.msk.bf16.mxu1 %vm9186_vm0, %v12565_v18  ;;  %v10698_v8 = vrot.slane %v10599_v56, 1  ;;  %v2778_v56 = vunpack.c.h.b16 %v911_v38 }
 0x307   : > { %3207 = vmatprep.mubr.bf16.mxu0 %v10090_v2  ;;  %v912_v2 = vshrl.u32 %v10683_v59, 16 }
 0x308   : > { %v10705_v57 = vsel %vm915_vm1, %v970_v46, %v10698_v8 }
 0x309   : > { %v6613_v19 = vcombine.low %v10475_v43, %v10705_v57  ;;  %v914_v20 = vor.u32 %v912_v2, %v910_v30  ;;  %v6702_v43 = vcombine.low %v411_v34, %v412_v37 }
 0x30d   : > { %7782 = vmatmul.mubr.bf16.gmra.mrb[100].mxu1 %v6613_v19 }
 0x30e   : > { %3208 = vmatmul.mubr.bf16.gmra.mrb[96].mxu0 %v10095_v53  ;;  %v6700_v53 = vcombine.low %v10620_v6, %v911_v38  ;;  %7785 = vmatprep.mubr.msk.bf16.mxu1 %vm9186_vm0, %v12565_v18 }
 0x30f   : > { %3215 = vmatprep.mubr.bf16.mxu0 %v10611_v48  ;;  %v2780_v48 = vunpack.c.l.b16 %v914_v20 }
 0x311   : > { %v2836_v7 = vpack.c.b16 %v2780_v48, %v2778_v56 }
 0x316   : > { %3216 = vmatmul.mubr.bf16.gmra.mrb[100].mxu0 %v10588_v44  ;;  %v1530_v44 = vpop.f32.mrb[7].mxu1 }
 0x317   : > { %3223 = vmatprep.mubr.bf16.mxu0 %v6700_v53  ;;  %v10719_v15 = vpop.f32.mrb[8].mxu1  ;;  %v9019_v44 = vld [vmem:[%s12427_s4 + $0x108] sm:$0xff]  }
 0x318   : > { %v1535_v54 = vpop.f32.mrb[9].mxu1 }
 0x319   : > { %v10723_v32 = vpop.f32.mrb[10].mxu1  ;;  %v12708_v54 = vld [vmem:[#allocation19_spill] sm:$0xff] }
 0x31a   : > { %v1538_v9 = vpop.f32.mrb[11].mxu1 }
 0x31b   : > { %v10726_v47 = vpop.f32.mrb[12].mxu1 }
 0x31c   : > { %v1543_v40 = vpop.f32.mrb[13].mxu1 }
 0x31d   : > { %v10730_v36 = vpop.f32.mrb[14].mxu1 }
 0x31e   : > { %3224 = vmatmul.mubr.bf16.gmra.mrb[104].mxu0 %v6699_v49 }
 0x31f   : > { %3231 = vmatprep.mubr.bf16.mxu0 %v2836_v7 }
 0x321   : > { %v2769_v50 = vpop.f32.mrb[116].mxu0 }
 0x322   : > { %v7911_v23 = vpop.f32.mrb[117].mxu0  ;;  %v9017_v50 = vld [vmem:[%s12427_s4 + $0x100] sm:$0xff]  }
 0x323   : > { %v2772_v12 = vpop.f32.mrb[118].mxu0  ;;  %v9018_v23 = vld [vmem:[%s12427_s4 + $0xc0] sm:$0xff]   ;;  %7233 = vmatprep.subr.bf16.mxu1 %v9017_v50 }
 0x324   : > { %v7912_v6 = vpop.f32.mrb[119].mxu0  ;;  %7234 = vmatpush3.bf16.msra.mxu1 %v9018_v23  ;;  %v9029_v23 = vld [vmem:[%s12427_s4 + $0x130] sm:$0xff]  }
 0x325   : > { %v12707_v6 = vld [vmem:[#allocation6_spill] sm:$0xff]  ;;  %7235 = vmatprep.subr.bf16.mxu1 %v9019_v44 }
 0x326   : > { %3232 = vmatmul.mubr.bf16.gmra.mrb[124].mxu0 %v6702_v43 }
 0x327   : > { %7929 = vmatprep.mubr.msk.bf16.mxu0 %vm9186_vm0, %v12565_v18 }
 0x329   : > { %v3025_v10 = vpop.f32.mrb[120].mxu0 }
 0x32a   : > { %v3027_v29 = vpop.f32.mrb[121].mxu0 }
 0x32b   : > { %v3028_v61 = vpop.f32.mrb[122].mxu0  ;;  %v9020_v29 = vld [vmem:[%s12427_s4 + $0xc8] sm:$0xff]  }
 0x32c   : > { %v3030_v4 = vpop.f32.mrb[123].mxu0  ;;  %7236 = vmatpush3.bf16.msra.mxu1 %v9020_v29  ;;  %v9021_v61 = vld [vmem:[%s12427_s4 + $0x110] sm:$0xff]   ;;  %v9031_v29 = vld [vmem:[%s12427_s4 + $0x138] sm:$0xff]  }
 0x32d   : > { %v9022_v4 = vld [vmem:[%s12427_s4 + $0xd0] sm:$0xff]   ;;  %7237 = vmatprep.subr.bf16.mxu1 %v9021_v61 }
 0x32e   : > { %7930 = vmatmul.mubr.bf16.vlgmr.msra.gmra.mrb[128].mxu0 %v9325_v28  ;;  %v1546_v28 = vpop.f32.mrb[15].mxu1 }
 0x32f   : > { %7933 = vmatprep.mubr.msk.bf16.mxu0 %vm9186_vm0, %v12565_v18  ;;  %v10733_v11 = vpop.f32.mrb[16].mxu1  ;;  %v9023_v28 = vld [vmem:[%s12427_s4 + $0x118] sm:$0xff]  }
 0x330   : > { %v1551_v33 = vpop.f32.mrb[17].mxu1  ;;  %7238 = vmatpush3.bf16.msra.mxu1 %v9022_v4  ;;  %v9032_v4 = vld [vmem:[%s12427_s4 + $0xf8] sm:$0xff]  }
 0x331   : > { %v10737_v22 = vpop.f32.mrb[18].mxu1  ;;  %7239 = vmatprep.subr.bf16.mxu1 %v9023_v28 }
 0x336   : > { %7934 = vmatmul.mubr.bf16.gmra.mrb[4].mxu0 %v10148_v5  ;;  %v1554_v5 = vpop.f32.mrb[19].mxu1 }
 0x337   : > { %7937 = vmatprep.mubr.msk.bf16.mxu0 %vm9186_vm0, %v12565_v18  ;;  %v10740_v60 = vpop.f32.mrb[20].mxu1  ;;  %v9024_v5 = vld [vmem:[%s12427_s4 + $0xd8] sm:$0xff]  }
 0x338   : > { %v1559_v16 = vpop.f32.mrb[21].mxu1  ;;  %7240 = vmatpush3.bf16.msra.mxu1 %v9024_v5 }
 0x339   : > { %v10744_v34 = vpop.f32.mrb[22].mxu1 }
 0x33e   : > { %7938 = vmatmul.mubr.bf16.gmra.mrb[8].mxu0 %v10163_v63  ;;  %v1562_v63 = vpop.f32.mrb[23].mxu1 }
 0x33f   : > { %7941 = vmatprep.mubr.msk.bf16.mxu0 %vm9186_vm0, %v12565_v18  ;;  %v10747_v42 = vpop.f32.mrb[24].mxu1 }
 0x340   : > { %v1567_v52 = vpop.f32.mrb[25].mxu1 }
 0x341   : > { %v10751_v45 = vpop.f32.mrb[26].mxu1 }
 0x346   : > { %7942 = vmatmul.mubr.bf16.gmra.mrb[12].mxu0 %v9415_v3  ;;  %v1570_v3 = vpop.f32.mrb[27].mxu1 }
 0x347   : > { %7945 = vmatprep.mubr.msk.bf16.mxu0 %vm9186_vm0, %v12565_v18  ;;  %v10754_v37 = vpop.f32.mrb[28].mxu1  ;;  %v9025_v3 = vld [vmem:[%s12427_s4 + $0x120] sm:$0xff]  }
 0x348   : > { %v1575_v13 = vpop.f32.mrb[29].mxu1  ;;  %7241 = vmatprep.subr.bf16.mxu1 %v9025_v3 }
 0x349   : > { %v10758_v41 = vpop.f32.mrb[30].mxu1 }
 0x34e   : > { %7946 = vmatmul.mubr.bf16.gmra.mrb[16].mxu0 %v10200_v24  ;;  %v1578_v24 = vpop.f32.mrb[31].mxu1 }
 0x34f   : > { %7949 = vmatprep.mubr.msk.bf16.mxu0 %vm9186_vm0, %v12565_v18  ;;  %v10761_v58 = vpop.f32.mrb[32].mxu1  ;;  %v9026_v24 = vld [vmem:[%s12427_s4 + $0xe0] sm:$0xff]  }
 0x350   : > { %v1583_v39 = vpop.f32.mrb[33].mxu1  ;;  %7242 = vmatpush3.bf16.msra.mxu1 %v9026_v24  ;;  %v12712_v24 = vld [vmem:[#allocation11_spill] sm:$0xff] }
 0x351   : > { %v10765_v1 = vpop.f32.mrb[34].mxu1 }
 0x356   : > { %7950 = vmatmul.mubr.bf16.gmra.mrb[20].mxu0 %v10220_v27  ;;  %v1586_v27 = vpop.f32.mrb[35].mxu1 }
 0x357   : > { %7953 = vmatprep.mubr.msk.bf16.mxu0 %vm9186_vm0, %v12565_v18  ;;  %v10768_v31 = vpop.f32.mrb[36].mxu1  ;;  %v12709_v27 = vld [vmem:[#allocation8_spill] sm:$0xff] }
 0x358   : > { %v1591_v30 = vpop.f32.mrb[37].mxu1 }
 0x359   : > { %v10772_v46 = vpop.f32.mrb[38].mxu1 }
 0x35e   : > { %7954 = vmatmul.mubr.bf16.gmra.mrb[24].mxu0 %v12626_v14  ;;  %v1594_v14 = vpop.f32.mrb[39].mxu1 }
 0x35f   : > { %7957 = vmatprep.mubr.msk.bf16.mxu0 %vm9186_vm0, %v12565_v18  ;;  %v10775_v2 = vpop.f32.mrb[40].mxu1 }
 0x360   : > { %v1599_v38 = vpop.f32.mrb[41].mxu1 }
 0x361   : > { %v10779_v19 = vpop.f32.mrb[42].mxu1  ;;  %v9027_v38 = vld [vmem:[%s12427_s4 + $0x128] sm:$0xff]  }
 0x362   : > { %7243 = vmatprep.subr.bf16.mxu1 %v9027_v38 }
 0x366   : > { %7958 = vmatmul.mubr.bf16.gmra.mrb[28].mxu0 %v10243_v21  ;;  %v1602_v21 = vpop.f32.mrb[43].mxu1 }
 0x367   : > { %7961 = vmatprep.mubr.msk.bf16.mxu0 %vm9186_vm0, %v12565_v18  ;;  %v10782_v53 = vpop.f32.mrb[44].mxu1 }
 0x368   : > { %v1607_v20 = vpop.f32.mrb[45].mxu1 }
 0x369   : > { %v10786_v56 = vpop.f32.mrb[46].mxu1  ;;  %v9028_v20 = vld [vmem:[%s12427_s4 + $0xe8] sm:$0xff]  }
 0x36a   : > { %7244 = vmatpush3.bf16.msra.mxu1 %v9028_v20 }
 0x36b   : > { %7245 = vmatprep.subr.bf16.mxu1 %v9029_v23 }
 0x36e   : > { %7962 = vmatmul.mubr.bf16.gmra.mrb[32].mxu0 %v10262_v0  ;;  %v1610_v0 = vpop.f32.mrb[47].mxu1 }
 0x36f   : > { %7965 = vmatprep.mubr.msk.bf16.mxu0 %vm9186_vm0, %v12565_v18  ;;  %v10788_v48 = vpop.f32.mrb[48].mxu1 }
 0x370   : > { %v1615_v49 = vpop.f32.mrb[49].mxu1 }
 0x371   : > { %v10791_v7 = vpop.f32.mrb[50].mxu1  ;;  %v1135_v49 = vunpack.c.h.b16 %v10705_v57 }
 0x376   : > { %7966 = vmatmul.mubr.bf16.gmra.mrb[36].mxu0 %v12630_v26  ;;  %v1618_v26 = vpop.f32.mrb[51].mxu1 }
 0x377   : > { %7969 = vmatprep.mubr.msk.bf16.mxu0 %vm9186_vm0, %v12565_v18  ;;  %v10801_v43 = vpop.f32.mrb[52].mxu1  ;;  %v1137_v26 = vunpack.c.l.b16 %v10698_v8 }
 0x378   : > { %v1623_v12 = vpop.f32.mrb[53].mxu1 }
 0x379   : > { %v1257_v50 = vpack.c.b16 %v1137_v26, %v1135_v49  ;;  %v9030_v12 = vld [vmem:[%s12427_s4 + $0xf0] sm:$0xff]  }
 0x37a   : > { %7246 = vmatpush3.bf16.msra.mxu1 %v9030_v12 }
 0x37b   : > { %7786 = vmatmul.mubr.bf16.gmra.mrb[108].mxu1 %v1257_v50  ;;  %7247 = vmatprep.subr.bf16.mxu1 %v9031_v29  ;;  %v12713_v50 = vld [vmem:[#allocation14_spill] sm:$0xff] }
 0x37e   : > { %7970 = vmatmul.mubr.bf16.gmra.mrb[40].mxu0 %v10291_v62  ;;  %v10804_v62 = vpop.f32.mrb[54].mxu1  ;;  %7248 = vmatpush3.bf16.msra.mxu1 %v9032_v4 }
 0x37f   : > { %7973 = vmatprep.mubr.msk.bf16.mxu0 %vm9186_vm0, %v12565_v18  ;;  %v1626_v10 = vpop.f32.mrb[55].mxu1 }
 0x380   : > { %v10821_v9 = vpop.f32.mrb[56].mxu1 }
 0x381   : > { %v1631_v40 = vpop.f32.mrb[57].mxu1 }
 0x382   : > { %v10828_v33 = vpop.f32.mrb[58].mxu1 }
 0x383   : > { %v1634_v16 = vpop.f32.mrb[59].mxu1 }
 0x386   : > { %7974 = vmatmul.mubr.bf16.gmra.mrb[44].mxu0 %v12707_v6  ;;  %v12710_v6 = vld [vmem:[#allocation13_spill] sm:$0xff] }
 0x387   : > { %7977 = vmatprep.mubr.msk.bf16.mxu0 %vm9186_vm0, %v12565_v18 }
 0x388   : > { %v1725_v63 = vpop.f32.mrb[104].mxu1 }
 0x389   : > { %v1727_v52 = vpop.f32.mrb[105].mxu1  ;;  %v12711_v63 = vld [vmem:[#allocation7_spill] sm:$0xff] }
 0x38a   : > { %v1728_v13 = vpop.f32.mrb[106].mxu1 }
 0x38b   : > { %v1730_v39 = vpop.f32.mrb[107].mxu1 }
 0x38e   : > { %7978 = vmatmul.mubr.bf16.gmra.mrb[48].mxu0 %v12708_v54 }
 0x38f   : > { %7981 = vmatprep.mubr.msk.bf16.mxu0 %vm9186_vm0, %v12565_v18 }
 0x390   : > { %v10840_v30 = vpop.f32.mrb[60].mxu1 }
 0x391   : > { %v7743_v14 = vpop.f32.mrb[61].mxu1 }
 0x392   : > { %v10847_v21 = vpop.f32.mrb[62].mxu1 }
 0x393   : > { %v7744_v0 = vpop.f32.mrb[63].mxu1 }
 0x396   : > { %7982 = vmatmul.mubr.bf16.gmra.mrb[52].mxu0 %v12709_v27 }
 0x397   : > { %7985 = vmatprep.mubr.msk.bf16.mxu0 %vm9186_vm0, %v12565_v18 }
 0x398   : > { %v10861_v44 = vpop.f32.mrb[64].mxu1 }
 0x399   : > { %v7747_v10 = vpop.f32.mrb[65].mxu1 }
 0x39a   : > { %v10868_v61 = vpop.f32.mrb[66].mxu1  ;;  %v12714_v10 = vld [vmem:[#allocation18_spill] sm:$0xff] }
 0x39b   : > { %v7748_v54 = vpop.f32.mrb[67].mxu1 }
 0x39e   : > { %7986 = vmatmul.mubr.bf16.gmra.mrb[56].mxu0 %v12710_v6 }
 0x39f   : > { %7989 = vmatprep.mubr.msk.bf16.mxu0 %vm9186_vm0, %v12565_v18 }
 0x3a0   : > { %v10876_v40 = vpop.f32.mrb[68].mxu1 }
 0x3a1   : > { %v7751_v28 = vpop.f32.mrb[69].mxu1 }
 0x3a2   : > { %v10878_v5 = vpop.f32.mrb[70].mxu1 }
 0x3a3   : > { %v7752_v16 = vpop.f32.mrb[71].mxu1 }
 0x3a6   : > { %7990 = vmatmul.mubr.bf16.gmra.mrb[64].mxu0 %v10385_v55 }
 0x3a7   : > { %7993 = vmatprep.mubr.msk.bf16.mxu0 %vm9186_vm0, %v12565_v18 }
 0x3a8   : > { %v10883_v52 = vpop.f32.mrb[72].mxu1 }
 0x3a9   : > { %v7755_v3 = vpop.f32.mrb[73].mxu1 }
 0x3aa   : > { %v10885_v13 = vpop.f32.mrb[74].mxu1 }
 0x3ab   : > { %v7756_v55 = vpop.f32.mrb[75].mxu1 }
 0x3ae   : > { %7994 = vmatmul.mubr.bf16.gmra.mrb[68].mxu0 %v12711_v63 }
 0x3af   : > { %7997 = vmatprep.mubr.msk.bf16.mxu0 %vm9186_vm0, %v12565_v18 }
 0x3b0   : > { %v10890_v39 = vpop.f32.mrb[76].mxu1 }
 0x3b1   : > { %v7759_v27 = vpop.f32.mrb[77].mxu1 }
 0x3b2   : > { %v10892_v14 = vpop.f32.mrb[78].mxu1 }
 0x3b3   : > { %v7760_v38 = vpop.f32.mrb[79].mxu1 }
 0x3b6   : > { %7998 = vmatmul.mubr.bf16.gmra.mrb[72].mxu0 %v12712_v24  ;;  %v12718_v24 = vld [vmem:[#allocation12_spill] sm:$0xff] }
 0x3b7   : > { %8001 = vmatprep.mubr.msk.bf16.mxu0 %vm9186_vm0, %v12565_v18 }
 0x3b8   : > { %v10897_v20 = vpop.f32.mrb[80].mxu1 }
 0x3b9   : > { %v7763_v0 = vpop.f32.mrb[81].mxu1 }
 0x3ba   : > { %v10899_v49 = vpop.f32.mrb[82].mxu1 }
 0x3bb   : > { %v7764_v26 = vpop.f32.mrb[83].mxu1 }
 0x3bc   : > { %v12721_v26 = vld [vmem:[#allocation2_spill] sm:$0xff] }
 0x3be   : > { %8002 = vmatmul.mubr.bf16.gmra.mrb[76].mxu0 %v10428_v25 }
 0x3bf   : > { %8005 = vmatprep.mubr.msk.bf16.mxu0 %vm9186_vm0, %v12565_v18 }
 0x3c0   : > { %v10904_v23 = vpop.f32.mrb[84].mxu1 }
 0x3c1   : > { %v7767_v12 = vpop.f32.mrb[85].mxu1 }
 0x3c2   : > { %v10906_v6 = vpop.f32.mrb[86].mxu1 }
 0x3c3   : > { %v7768_v25 = vpop.f32.mrb[87].mxu1 }
 0x3c6   : > { %8006 = vmatmul.mubr.bf16.gmra.mrb[80].mxu0 %v12713_v50 }
 0x3c7   : > { %8009 = vmatprep.mubr.msk.bf16.mxu0 %vm9186_vm0, %v12565_v18 }
 0x3c8   : > { %v10911_v29 = vpop.f32.mrb[88].mxu1 }
 0x3c9   : > { %v7771_v4 = vpop.f32.mrb[89].mxu1 }
 0x3ca   : > { %v10913_v54 = vpop.f32.mrb[90].mxu1  ;;  %v973_v4 = vrot.slane %v10679_v35, 1 }
 0x3cb   : > { %12715 = vst [vmem:[#allocation21_spill] sm:$0xff] %v10913_v54  ;;  %v7772_v28 = vpop.f32.mrb[91].mxu1 }
 0x3cc   : > { %v12529_v28 = vrot.slane %v10683_v59, 1 }
 0x3ce   : > { %8010 = vmatmul.mubr.bf16.gmra.mrb[84].mxu0 %v12714_v10 }
 0x3cf   : > { %8013 = vmatprep.mubr.msk.bf16.mxu0 %vm9186_vm0, %v12565_v18 }
 0x3d0   : > { %v10918_v16 = vpop.f32.mrb[92].mxu1 }
 0x3d1   : > { %12716 = vst [vmem:[#allocation29_spill] sm:$0xff] %v10918_v16  ;;  %v7775_v63 = vpop.f32.mrb[93].mxu1 }
 0x3d2   : > { %v10920_v3 = vpop.f32.mrb[94].mxu1  ;;  %v10939_v63 = vld [vmem:[%s12427_s4 + $0x140] sm:$0xff]  }
 0x3d3   : > { %12717 = vst [vmem:[#allocation9_spill] sm:$0xff] %v10920_v3  ;;  %v7776_v55 = vpop.f32.mrb[95].mxu1  ;;  %8037 = vmatprep.subr.bf16.mxu1 %v10939_v63 }
 0x3d4   : > { %v10948_v55 = vsel %vm915_vm1, %v973_v4, %v12529_v28  ;;  %v10957_v4 = vld [vmem:[%s12425_s2] ss:$0 sm:$0xff] }
 0x3d5   : > { %12723 = vst [vmem:[#allocation37_spill] sm:$0xff] %v10948_v55  ;;  %v6701_v35 = vcombine.low %v10698_v8, %v10948_v55 }
 0x3d6   : > { %8014 = vmatmul.mubr.bf16.gmra.mrb[88].mxu0 %v10471_v17 }
 0x3d7   : > { %8017 = vmatprep.mubr.msk.bf16.mxu0 %vm9186_vm0, %v12565_v18 }
 0x3d8   : > { %v10925_v27 = vpop.f32.mrb[96].mxu1 }
 0x3d9   : > { %12719 = vst [vmem:[#allocation35_spill] sm:$0xff] %v10925_v27  ;;  %v7779_v38 = vpop.f32.mrb[97].mxu1 }
 0x3da   : > { %v10927_v0 = vpop.f32.mrb[98].mxu1 }
 0x3db   : > { %12720 = vst [vmem:[#allocation31_spill] sm:$0xff] %v10927_v0  ;;  %v7780_v17 = vpop.f32.mrb[99].mxu1 }
 0x3de   : > { %8018 = vmatmul.mubr.bf16.gmra.mrb[92].mxu0 %v12718_v24 }
 0x3df   : > { %8021 = vmatprep.mubr.msk.bf16.mxu0 %vm9186_vm0, %v12565_v18 }
 0x3e0   : > { %v10932_v50 = vpop.f32.mrb[100].mxu1 }
 0x3e1   : > { %12722 = vst [vmem:[#allocation36_spill] sm:$0xff] %v10932_v50  ;;  %v7783_v12 = vpop.f32.mrb[101].mxu1 }
 0x3e2   : > { %v1969_v25 = vpop.f32.mrb[102].mxu1 }
 0x3e3   : > { %v7784_v10 = vpop.f32.mrb[103].mxu1 }
 0x3e6   : > { %8022 = vmatmul.mubr.bf16.gmra.mrb[96].mxu0 %v12721_v26 }
 0x3e7   : > { %8025 = vmatprep.mubr.msk.bf16.mxu0 %vm9186_vm0, %v12565_v18 }
 0x3ee   : > { %8026 = vmatmul.mubr.bf16.gmra.mrb[100].mxu0 %v10705_v57 }
 0x3ef   : > { %8029 = vmatprep.mubr.msk.bf16.mxu0 %vm9186_vm0, %v12565_v18 }
 0x3f6   : > { %8030 = vmatmul.mubr.bf16.gmra.mrb[104].mxu0 %v6701_v35 }
 0x3f7   : > { %8033 = vmatprep.mubr.msk.bf16.mxu0 %vm9186_vm0, %v12565_v18 }
 0x3f9   : > { %v3233_v24 = vpop.f32.mrb[124].mxu0 }
 0x3fa   : > { %v3235_v38 = vpop.f32.mrb[125].mxu0  ;;  %v10964_v24 = vld [vmem:[%s12426_s3] ss:$0 sm:$0xff] }
 0x3fb   : > { %v3236_v57 = vpop.f32.mrb[126].mxu0  ;;  %v3719_v38 = vlaneseq }
 0x3fc   : > { %v3238_v17 = vpop.f32.mrb[127].mxu0 }
 0x3fd   : > { %v10967_v57 = vshrl.u32 %v3719_v38, 7 }
 0x3ff   : > { %vm3723_vm3 = vcmp.ge.s32.totalorder %v10967_v57, 1 }
 0x400   : > { %vm11000_vm6 = vmpackc.low %vm9188_vm5, %vm3723_vm3 }
 0x401   : > { %v3274_v26 = vpop.f32.mrb[128].mxu0 }
 0x402   : > { %v7931_v12 = vpop.f32.mrb[129].mxu0 }
 0x403   : > { %v3277_v25 = vpop.f32.mrb[130].mxu0 }
 0x404   : > { %v7932_v10 = vpop.f32.mrb[131].mxu0 }
 0x409   : > { %v3282_v50 = vpop.f32.mrb[4].mxu0 }
 0x40a   : > { %v7935_v59 = vpop.f32.mrb[5].mxu0 }
 0x40b   : > { %v3285_v0 = vpop.f32.mrb[6].mxu0 }
 0x40c   : > { %v8245_v8 = vadd.f32 %v3285_v0, %v10714_v51  ;;  %v7936_v35 = vpop.f32.mrb[7].mxu0 }
 0x40e   : > { %v3553_v18 = vmul.f32 %v8245_v8, %v10957_v4  ;;  %v10973_v8 = vadd.s32 16, %v10967_v57 }
 0x410   : > { %v3614_v50 = vadd.f32 %v10964_v24, %v3553_v18  ;;  %vm3734_vm4 = vcmp.le.s32.totalorder %v10973_v8, 16  ;;  %v9042_v8 = vld [vmem:[%s12427_s4] sm:$0xff]  }
 0x411   : > { %v3290_v59 = vpop.f32.mrb[8].mxu0 }
 0x412   : > { %v8246_v17 = vadd.f32 %v3290_v59, %v10719_v15  ;;  %v7939_v26 = vpop.f32.mrb[9].mxu0  ;;  %v3668_v10 = vmax.f32 %v3614_v50, 0.0 }
 0x413   : > { %v3293_v12 = vpop.f32.mrb[10].mxu0 }
 0x414   : > { %v3554_v51 = vmul.f32 %v8246_v17, %v10957_v4  ;;  %v8247_v0 = vadd.f32 %v3293_v12, %v10723_v32  ;;  %v7940_v25 = vpop.f32.mrb[11].mxu0  ;;  %v3744_v59 = vsel %vm3723_vm3, %v3668_v10, 0.0 }
 0x416   : > { %v3615_v35 = vadd.f32 %v10964_v24, %v3554_v51  ;;  %v3555_v18 = vmul.f32 %v8247_v0, %v10957_v4 }
 0x418   : > { %v3669_v38 = vmax.f32 %v3615_v35, 0.0  ;;  %v3616_v15 = vadd.f32 %v10964_v24, %v3555_v18 }
 0x419   : > { %v3298_v32 = vpop.f32.mrb[12].mxu0 }
 0x41a   : > { %v3797_v17 = vpack.c.bf16 %v3669_v38, %v3744_v59  ;;  %v10982_v50 = vpack.c.bf16 %v3669_v38, %v3668_v10  ;;  %v3670_v26 = vmax.f32 %v3616_v15, 0.0  ;;  %v8248_v12 = vadd.f32 %v3298_v32, %v10726_v47  ;;  %v7943_v25 = vpop.f32.mrb[13].mxu0 }
 0x41b   : > { %v3301_v28 = vpop.f32.mrb[14].mxu0 }
 0x41c   : > { %v3746_v51 = vsel %vm3734_vm4, %v3670_v26, 0.0  ;;  %v3556_v0 = vmul.f32 %v8248_v12, %v10957_v4  ;;  %v8249_v35 = vadd.f32 %v3301_v28, %v10730_v36  ;;  %v7944_v18 = vpop.f32.mrb[15].mxu0  ;;  %v3846_v27 = vshll.u32 %v3797_v17, 16 }
 0x41d   : > { %v3798_v55 = vpack.c.bf16 %v3746_v51, %v3746_v51  ;;  %v3844_v38 = vshrl.u32 %v3797_v17, 16  ;;  %v4104_v47 = vrot.slane %v3797_v17, 1  ;;  %v9034_v17 = vld [vmem:[%s12427_s4 + $0x148] sm:$0xff]  }
 0x41e   : > { %v3617_v3 = vadd.f32 %v10964_v24, %v3556_v0  ;;  %v3557_v10 = vmul.f32 %v8249_v35, %v10957_v4  ;;  %v3848_v15 = vrot.slane %v3846_v27, 1 }
 0x41f   : > { %v3851_v59 = vshll.u32 %v3798_v55, 16  ;;  %v4105_v32 = vrot.slane %v3798_v55, 1 }
 0x420   : > { %v3671_v25 = vmax.f32 %v3617_v3, 0.0  ;;  %v3618_v16 = vadd.f32 %v10964_v24, %v3557_v10  ;;  %v3849_v54 = vor.u32 %v3848_v15, %v3844_v38 }
 0x421   : > { %v3306_v26 = vpop.f32.mrb[16].mxu0  ;;  %v3853_v12 = vrot.slane %v3851_v59, 1  ;;  %v10993_v36 = vsel %vm915_vm1, %v4104_v47, %v4105_v32  ;;  %v9035_v47 = vld [vmem:[%s12427_s4 + $0x150] sm:$0xff]  }
 0x422   : > { %v3747_v28 = vsel %vm3723_vm3, %v3671_v25, 0.0  ;;  %v3672_v51 = vmax.f32 %v3618_v16, 0.0  ;;  %v8250_v0 = vadd.f32 %v3306_v26, %v10733_v11  ;;  %v7947_v35 = vpop.f32.mrb[17].mxu0 }
 0x423   : > { %v3309_v27 = vpop.f32.mrb[18].mxu0  ;;  %v11005_v55 = vsel %vm614_vm2, %v3849_v54, %v3853_v12  ;;  %v9036_v35 = vld [vmem:[%s12427_s4 + $0x158] sm:$0xff]  }
 0x424   : > { %v3799_v18 = vpack.c.bf16 %v3672_v51, %v3747_v28  ;;  %v11010_v16 = vpack.c.bf16 %v3672_v51, %v3671_v25  ;;  %v3558_v11 = vmul.f32 %v8250_v0, %v10957_v4  ;;  %v8251_v10 = vadd.f32 %v3309_v27, %v10737_v22  ;;  %v7948_v38 = vpop.f32.mrb[19].mxu0  ;;  %4445 = vmatprep.mubr.bf16.mxu1 %v11005_v55 }
 0x425   : > { %6755 = vmatmul.mubr.msk.bf16.vlgmr.msra.gmra.mrb[112].mxu1 %vm11000_vm6, %v10982_v50 }
 0x426   : > { %12726 = vst [vmem:[#allocation15_spill] sm:$0xff] %v11010_v16  ;;  %v3619_v54 = vadd.f32 %v10964_v24, %v3558_v11  ;;  %v3559_v15 = vmul.f32 %v8251_v10, %v10957_v4  ;;  %8038 = vmatpush3.bf16.msra.mxu1 %v10939_v63  ;;  %v3858_v59 = vshll.u32 %v3799_v18, 16  ;;  %v3856_v38 = vshrl.u32 %v3799_v18, 16 }
 0x427   : > { %8039 = vmatprep.subr.bf16.mxu1 %v9034_v17 }
 0x428   : > { %v3673_v22 = vmax.f32 %v3619_v54, 0.0  ;;  %v3620_v32 = vadd.f32 %v10964_v24, %v3559_v15  ;;  %v3860_v63 = vrot.slane %v3858_v59, 1 }
 0x429   : > { %v3314_v25 = vpop.f32.mrb[20].mxu0 }
 0x42a   : > { %v3749_v26 = vsel %vm3734_vm4, %v3673_v22, 0.0  ;;  %v8252_v12 = vadd.f32 %v3314_v25, %v10740_v60  ;;  %v7951_v28 = vpop.f32.mrb[21].mxu0  ;;  %8040 = vmatpush3.bf16.msra.mxu1 %v9034_v17  ;;  %v3674_v15 = vmax.f32 %v3620_v32, 0.0  ;;  %v4107_v60 = vrot.slane %v3799_v18, 1 }
 0x42b   : > { %v3800_v51 = vpack.c.bf16 %v3749_v26, %v3749_v26  ;;  %v3317_v0 = vpop.f32.mrb[22].mxu0  ;;  %8041 = vmatprep.subr.bf16.mxu1 %v9035_v47  ;;  %v3861_v59 = vor.u32 %v3860_v63, %v3856_v38 }
 0x42c   : > { %v3560_v27 = vmul.f32 %v8252_v12, %v10957_v4  ;;  %v8253_v11 = vadd.f32 %v3317_v0, %v10744_v34  ;;  %v7952_v10 = vpop.f32.mrb[23].mxu0  ;;  %v9037_v12 = vld [vmem:[%s12427_s4 + $0x160] sm:$0xff]   ;;  %v3750_v18 = vsel %vm3723_vm3, %v3674_v15, 0.0 }
 0x42d   : > { %v4108_v54 = vrot.slane %v3800_v51, 1  ;;  %v3863_v22 = vshll.u32 %v3800_v51, 16 }
 0x42e   : > { %v3621_v17 = vadd.f32 %v10964_v24, %v3560_v27  ;;  %v3561_v25 = vmul.f32 %v8253_v11, %v10957_v4  ;;  %8042 = vmatpush3.bf16.msra.mxu1 %v9035_v47 }
 0x42f   : > { %v3865_v26 = vrot.slane %v3863_v22, 1  ;;  %8043 = vmatprep.subr.bf16.mxu1 %v9036_v35  ;;  %v11039_v34 = vsel %vm915_vm1, %v4107_v60, %v4108_v54 }
 0x430   : > { %v3675_v28 = vmax.f32 %v3621_v17, 0.0  ;;  %v3622_v32 = vadd.f32 %v10964_v24, %v3561_v25 }
 0x431   : > { %v3322_v51 = vpop.f32.mrb[24].mxu0  ;;  %v11045_v0 = vsel %vm614_vm2, %v3861_v59, %v3865_v26 }
 0x432   : > { %v3801_v47 = vpack.c.bf16 %v3675_v28, %v3750_v18  ;;  %v11047_v63 = vpack.c.bf16 %v3675_v28, %v3674_v15  ;;  %v3676_v27 = vmax.f32 %v3622_v32, 0.0  ;;  %v8254_v11 = vadd.f32 %v3322_v51, %v10747_v42  ;;  %v7955_v10 = vpop.f32.mrb[25].mxu0  ;;  %4453 = vmatprep.mubr.bf16.mxu1 %v11045_v0  ;;  %8044 = vmatpush3.bf16.msra.mxu1 %v9036_v35 }
 0x433   : > { %v3325_v38 = vpop.f32.mrb[26].mxu0  ;;  %6758 = vmatmul.mubr.msk.bf16.gmra.mrb[116].mxu1 %vm11000_vm6, %v11010_v16  ;;  %8045 = vmatprep.subr.bf16.mxu1 %v9037_v12 }
 0x434   : > { %v3752_v54 = vsel %vm3734_vm4, %v3676_v27, 0.0  ;;  %v3562_v22 = vmul.f32 %v8254_v11, %v10957_v4  ;;  %v8255_v15 = vadd.f32 %v3325_v38, %v10751_v45  ;;  %v7956_v60 = vpop.f32.mrb[27].mxu0  ;;  %v3870_v42 = vshll.u32 %v3801_v47, 16 }
 0x435   : > { %v3802_v17 = vpack.c.bf16 %v3752_v54, %v3752_v54  ;;  %v3868_v59 = vshrl.u32 %v3801_v47, 16  ;;  %v4110_v32 = vrot.slane %v3801_v47, 1 }
 0x436   : > { %v3623_v25 = vadd.f32 %v10964_v24, %v3562_v22  ;;  %v3563_v35 = vmul.f32 %v8255_v15, %v10957_v4  ;;  %8046 = vmatpush3.bf16.msra.mxu1 %v9037_v12  ;;  %v3872_v26 = vrot.slane %v3870_v42, 1 }
 0x437   : > { %v3875_v28 = vshll.u32 %v3802_v17, 16  ;;  %v4111_v18 = vrot.slane %v3802_v17, 1 }
 0x438   : > { %v3677_v51 = vmax.f32 %v3623_v25, 0.0  ;;  %v3624_v27 = vadd.f32 %v10964_v24, %v3563_v35  ;;  %v3873_v11 = vor.u32 %v3872_v26, %v3868_v59  ;;  %v9038_v59 = vld [vmem:[%s12427_s4 + $0x168] sm:$0xff]  }
 0x439   : > { %v3330_v10 = vpop.f32.mrb[28].mxu0  ;;  %v3877_v16 = vrot.slane %v3875_v28, 1  ;;  %v11062_v45 = vsel %vm915_vm1, %v4110_v32, %v4111_v18  ;;  %8047 = vmatprep.subr.bf16.mxu1 %v9038_v59 }
 0x43a   : > { %v3753_v38 = vsel %vm3723_vm3, %v3677_v51, 0.0  ;;  %v3678_v54 = vmax.f32 %v3624_v27, 0.0  ;;  %v8256_v22 = vadd.f32 %v3330_v10, %v10754_v37  ;;  %v7959_v12 = vpop.f32.mrb[29].mxu0  ;;  %8048 = vmatpush3.bf16.msra.mxu1 %v9038_v59 }
 0x43b   : > { %v3333_v15 = vpop.f32.mrb[30].mxu0  ;;  %v11068_v47 = vsel %vm614_vm2, %v3873_v11, %v3877_v16 }
 0x43c   : > { %v3803_v60 = vpack.c.bf16 %v3678_v54, %v3753_v38  ;;  %v11070_v17 = vpack.c.bf16 %v3678_v54, %v3677_v51  ;;  %v3564_v42 = vmul.f32 %v8256_v22, %v10957_v4  ;;  %v8257_v25 = vadd.f32 %v3333_v15, %v10758_v41  ;;  %v7960_v35 = vpop.f32.mrb[31].mxu0  ;;  %4461 = vmatprep.mubr.bf16.mxu1 %v11068_v47 }
 0x43d   : > { %6761 = vmatmul.mubr.msk.bf16.gmra.mrb[120].mxu1 %vm11000_vm6, %v11047_v63 }
 0x43e   : > { %v3625_v37 = vadd.f32 %v10964_v24, %v3564_v42  ;;  %v3565_v16 = vmul.f32 %v8257_v25, %v10957_v4  ;;  %v3882_v26 = vshll.u32 %v3803_v60, 16  ;;  %v3880_v15 = vshrl.u32 %v3803_v60, 16 }
 0x43f   : > { %v4113_v35 = vrot.slane %v3803_v60, 1 }
 0x440   : > { %v3679_v28 = vmax.f32 %v3625_v37, 0.0  ;;  %v3626_v41 = vadd.f32 %v10964_v24, %v3565_v16  ;;  %v3884_v38 = vrot.slane %v3882_v26, 1 }
 0x441   : > { %v3338_v32 = vpop.f32.mrb[32].mxu0 }
 0x442   : > { %v3755_v18 = vsel %vm3734_vm4, %v3679_v28, 0.0  ;;  %v8258_v51 = vadd.f32 %v3338_v32, %v10761_v58  ;;  %v7963_v27 = vpop.f32.mrb[33].mxu0  ;;  %v3680_v42 = vmax.f32 %v3626_v41, 0.0  ;;  %v3885_v28 = vor.u32 %v3884_v38, %v3880_v15 }
 0x443   : > { %v3804_v10 = vpack.c.bf16 %v3755_v18, %v3755_v18  ;;  %v3341_v11 = vpop.f32.mrb[34].mxu0 }
 0x444   : > { %v3566_v54 = vmul.f32 %v8258_v51, %v10957_v4  ;;  %v8259_v22 = vadd.f32 %v3341_v11, %v10765_v1  ;;  %v7964_v12 = vpop.f32.mrb[35].mxu0  ;;  %v3756_v1 = vsel %vm3723_vm3, %v3680_v42, 0.0 }
 0x445   : > { %v3887_v25 = vshll.u32 %v3804_v10, 16  ;;  %v4114_v59 = vrot.slane %v3804_v10, 1 }
 0x446   : > { %v3627_v37 = vadd.f32 %v10964_v24, %v3566_v54  ;;  %v3567_v16 = vmul.f32 %v8259_v22, %v10957_v4 }
 0x447   : > { %v3889_v58 = vrot.slane %v3887_v25, 1  ;;  %v11092_v32 = vsel %vm915_vm1, %v4113_v35, %v4114_v59 }
 0x448   : > { %v3681_v26 = vmax.f32 %v3627_v37, 0.0  ;;  %v3628_v18 = vadd.f32 %v10964_v24, %v3567_v16 }
 0x449   : > { %v3346_v51 = vpop.f32.mrb[36].mxu0  ;;  %v11098_v41 = vsel %vm614_vm2, %v3885_v28, %v3889_v58 }
 0x44a   : > { %v3805_v60 = vpack.c.bf16 %v3681_v26, %v3756_v1  ;;  %v11100_v27 = vpack.c.bf16 %v3681_v26, %v3680_v42  ;;  %v3682_v10 = vmax.f32 %v3628_v18, 0.0  ;;  %v8260_v11 = vadd.f32 %v3346_v51, %v10768_v31  ;;  %v7967_v38 = vpop.f32.mrb[37].mxu0  ;;  %4469 = vmatprep.mubr.bf16.mxu1 %v11098_v41  ;;  %v9039_v31 = vld [vmem:[%s12427_s4 + $0x170] sm:$0xff]  }
 0x44b   : > { %v3349_v54 = vpop.f32.mrb[38].mxu0  ;;  %6764 = vmatmul.mubr.msk.bf16.gmra.mrb[124].mxu1 %vm11000_vm6, %v11070_v17  ;;  %8049 = vmatprep.subr.bf16.mxu1 %v9039_v31 }
 0x44c   : > { %v3758_v22 = vsel %vm3734_vm4, %v3682_v10, 0.0  ;;  %v3568_v12 = vmul.f32 %v8260_v11, %v10957_v4  ;;  %v8261_v15 = vadd.f32 %v3349_v54, %v10772_v46  ;;  %v7968_v42 = vpop.f32.mrb[39].mxu0  ;;  %v3894_v35 = vshll.u32 %v3805_v60, 16  ;;  %8050 = vmatpush3.bf16.msra.mxu1 %v9039_v31  ;;  %v9040_v31 = vld [vmem:[%s12427_s4 + $0x178] sm:$0xff]  }
 0x44d   : > { %v3806_v25 = vpack.c.bf16 %v3758_v22, %v3758_v22  ;;  %v3892_v16 = vshrl.u32 %v3805_v60, 16  ;;  %v4116_v26 = vrot.slane %v3805_v60, 1  ;;  %8051 = vmatprep.subr.bf16.mxu1 %v9040_v31 }
 0x44e   : > { %v3629_v59 = vadd.f32 %v10964_v24, %v3568_v12  ;;  %v3569_v37 = vmul.f32 %v8261_v15, %v10957_v4  ;;  %v3896_v28 = vrot.slane %v3894_v35, 1 }
 0x44f   : > { %v3899_v58 = vshll.u32 %v3806_v25, 16  ;;  %v4117_v18 = vrot.slane %v3806_v25, 1 }
 0x450   : > { %v3683_v1 = vmax.f32 %v3629_v59, 0.0  ;;  %v3630_v46 = vadd.f32 %v10964_v24, %v3569_v37  ;;  %v3897_v10 = vor.u32 %v3896_v28, %v3892_v16  ;;  %8052 = vmatpush3.bf16.msra.mxu1 %v9040_v31 }
 0x451   : > { %v3354_v51 = vpop.f32.mrb[40].mxu0  ;;  %v3901_v11 = vrot.slane %v3899_v58, 1  ;;  %v11118_v38 = vsel %vm915_vm1, %v4116_v26, %v4117_v18 }
 0x452   : > { %v3759_v54 = vsel %vm3723_vm3, %v3683_v1, 0.0  ;;  %v3684_v22 = vmax.f32 %v3630_v46, 0.0  ;;  %v8262_v12 = vadd.f32 %v3354_v51, %v10775_v2  ;;  %v7971_v15 = vpop.f32.mrb[41].mxu0 }
 0x453   : > { %v3357_v42 = vpop.f32.mrb[42].mxu0  ;;  %v11124_v60 = vsel %vm614_vm2, %v3897_v10, %v3901_v11 }
 0x454   : > { %v3807_v25 = vpack.c.bf16 %v3684_v22, %v3759_v54  ;;  %v11129_v35 = vpack.c.bf16 %v3684_v22, %v3683_v1  ;;  %v3570_v59 = vmul.f32 %v8262_v12, %v10957_v4  ;;  %v8263_v37 = vadd.f32 %v3357_v42, %v10779_v19  ;;  %v7972_v16 = vpop.f32.mrb[43].mxu0  ;;  %4477 = vmatprep.mubr.bf16.mxu1 %v11124_v60 }
 0x455   : > { %6767 = vmatmul.mubr.msk.bf16.gmra.mrb[128].mxu1 %vm11000_vm6, %v11100_v27 }
 0x456   : > { %v3631_v2 = vadd.f32 %v10964_v24, %v3570_v59  ;;  %v3571_v28 = vmul.f32 %v8263_v37, %v10957_v4  ;;  %v3906_v58 = vshll.u32 %v3807_v25, 16  ;;  %v3904_v42 = vshrl.u32 %v3807_v25, 16 }
 0x457   : > { %v4119_v37 = vrot.slane %v3807_v25, 1 }
 0x458   : > { %v3685_v26 = vmax.f32 %v3631_v2, 0.0  ;;  %v3632_v18 = vadd.f32 %v10964_v24, %v3571_v28  ;;  %v3908_v54 = vrot.slane %v3906_v58, 1 }
 0x459   : > { %v3362_v1 = vpop.f32.mrb[44].mxu0 }
 0x45a   : > { %v3761_v19 = vsel %vm3734_vm4, %v3685_v26, 0.0  ;;  %v8264_v46 = vadd.f32 %v3362_v1, %v10782_v53  ;;  %v7975_v51 = vpop.f32.mrb[45].mxu0  ;;  %v3686_v31 = vmax.f32 %v3632_v18, 0.0  ;;  %v3909_v26 = vor.u32 %v3908_v54, %v3904_v42 }
 0x45b   : > { %v3808_v10 = vpack.c.bf16 %v3761_v19, %v3761_v19  ;;  %v3365_v11 = vpop.f32.mrb[46].mxu0 }
 0x45c   : > { %v3572_v22 = vmul.f32 %v8264_v46, %v10957_v4  ;;  %v8265_v12 = vadd.f32 %v3365_v11, %v10786_v56  ;;  %v7976_v15 = vpop.f32.mrb[47].mxu0  ;;  %v3762_v56 = vsel %vm3723_vm3, %v3686_v31, 0.0 }
 0x45d   : > { %v3911_v59 = vshll.u32 %v3808_v10, 16  ;;  %v4120_v16 = vrot.slane %v3808_v10, 1 }
 0x45e   : > { %v3633_v2 = vadd.f32 %v10964_v24, %v3572_v22  ;;  %v3573_v28 = vmul.f32 %v8265_v12, %v10957_v4  ;;  %v9041_v12 = vld [vmem:[%s12427_s4 + $0x40] sm:$0xff]  }
 0x45f   : > { %v3913_v53 = vrot.slane %v3911_v59, 1  ;;  %v11148_v1 = vsel %vm915_vm1, %v4119_v37, %v4120_v16  ;;  %7369 = vmatprep.subr.bf16.mxu1 %v9041_v12 }
 0x460   : > { %v3687_v58 = vmax.f32 %v3633_v2, 0.0  ;;  %v3634_v19 = vadd.f32 %v10964_v24, %v3573_v28 }
 0x461   : > { %v3370_v46 = vpop.f32.mrb[48].mxu0  ;;  %v11154_v18 = vsel %vm614_vm2, %v3909_v26, %v3913_v53 }
 0x462   : > { %v3809_v25 = vpack.c.bf16 %v3687_v58, %v3762_v56  ;;  %v11156_v51 = vpack.c.bf16 %v3687_v58, %v3686_v31  ;;  %v3688_v10 = vmax.f32 %v3634_v19, 0.0  ;;  %v8266_v11 = vadd.f32 %v3370_v46, %v10788_v48  ;;  %v7979_v54 = vpop.f32.mrb[49].mxu0  ;;  %4485 = vmatprep.mubr.bf16.mxu1 %v11154_v18 }
 0x463   : > { %v3373_v22 = vpop.f32.mrb[50].mxu0  ;;  %6770 = vmatmul.mubr.msk.bf16.gmra.mrb[132].mxu1 %vm11000_vm6, %v11129_v35 }
 0x464   : > { %v3764_v15 = vsel %vm3734_vm4, %v3688_v10, 0.0  ;;  %v3574_v42 = vmul.f32 %v8266_v11, %v10957_v4  ;;  %v8267_v31 = vadd.f32 %v3373_v22, %v10791_v7  ;;  %v7980_v48 = vpop.f32.mrb[51].mxu0  ;;  %v3918_v37 = vshll.u32 %v3809_v25, 16 }
 0x465   : > { %v3810_v59 = vpack.c.bf16 %v3764_v15, %v3764_v15  ;;  %v3916_v28 = vshrl.u32 %v3809_v25, 16  ;;  %v4122_v58 = vrot.slane %v3809_v25, 1 }
 0x466   : > { %v3635_v16 = vadd.f32 %v10964_v24, %v3574_v42  ;;  %v3575_v2 = vmul.f32 %v8267_v31, %v10957_v4  ;;  %v3920_v26 = vrot.slane %v3918_v37, 1 }
 0x467   : > { %v3923_v53 = vshll.u32 %v3810_v59, 16  ;;  %v4123_v19 = vrot.slane %v3810_v59, 1 }
 0x468   : > { %v3689_v56 = vmax.f32 %v3635_v16, 0.0  ;;  %v3636_v46 = vadd.f32 %v10964_v24, %v3575_v2  ;;  %v3921_v11 = vor.u32 %v3920_v26, %v3916_v28 }
 0x469   : > { %v3378_v10 = vpop.f32.mrb[52].mxu0  ;;  %v3925_v54 = vrot.slane %v3923_v53, 1  ;;  %v11174_v7 = vsel %vm915_vm1, %v4122_v58, %v4123_v19  ;;  %v1974_v58 = vpop.f32.mrb[108].mxu1 }
 0x46a   : > { %v3765_v22 = vsel %vm3723_vm3, %v3689_v56, 0.0  ;;  %v3690_v12 = vmax.f32 %v3636_v46, 0.0  ;;  %v8268_v15 = vadd.f32 %v3378_v10, %v10801_v43  ;;  %v7983_v42 = vpop.f32.mrb[53].mxu0  ;;  %v7787_v46 = vpop.f32.mrb[109].mxu1 }
 0x46b   : > { %v3381_v31 = vpop.f32.mrb[54].mxu0  ;;  %v11180_v25 = vsel %vm614_vm2, %v3921_v11, %v3925_v54  ;;  %v1977_v54 = vpop.f32.mrb[110].mxu1 }
 0x46c   : > { %v3811_v48 = vpack.c.bf16 %v3690_v12, %v3765_v22  ;;  %v11182_v59 = vpack.c.bf16 %v3690_v12, %v3689_v56  ;;  %v3576_v37 = vmul.f32 %v8268_v15, %v10957_v4  ;;  %v8269_v16 = vadd.f32 %v3381_v31, %v10804_v62  ;;  %v7984_v2 = vpop.f32.mrb[55].mxu0  ;;  %4493 = vmatprep.mubr.bf16.mxu1 %v11180_v25  ;;  %v7788_v42 = vpop.f32.mrb[111].mxu1 }
 0x46d   : > { %6773 = vmatmul.mubr.msk.bf16.gmra.mrb[136].mxu1 %vm11000_vm6, %v11156_v51 }
 0x46e   : > { %v3637_v43 = vadd.f32 %v10964_v24, %v3576_v37  ;;  %v3577_v28 = vmul.f32 %v8269_v16, %v10957_v4  ;;  %v3930_v26 = vshll.u32 %v3811_v48, 16  ;;  %v3928_v2 = vshrl.u32 %v3811_v48, 16 }
 0x46f   : > { %v4125_v58 = vrot.slane %v3811_v48, 1 }
 0x470   : > { %v3691_v53 = vmax.f32 %v3637_v43, 0.0  ;;  %v3638_v19 = vadd.f32 %v10964_v24, %v3577_v28  ;;  %v3932_v15 = vrot.slane %v3930_v26, 1 }
 0x471   : > { %v3386_v56 = vpop.f32.mrb[56].mxu0 }
 0x472   : > { %v3767_v62 = vsel %vm3734_vm4, %v3691_v53, 0.0  ;;  %v8270_v10 = vadd.f32 %v3386_v56, %v10821_v9  ;;  %v7987_v11 = vpop.f32.mrb[57].mxu0  ;;  %v3692_v43 = vmax.f32 %v3638_v19, 0.0  ;;  %v3933_v56 = vor.u32 %v3932_v15, %v3928_v2 }
 0x473   : > { %v3812_v22 = vpack.c.bf16 %v3767_v62, %v3767_v62  ;;  %v3389_v12 = vpop.f32.mrb[58].mxu0 }
 0x474   : > { %v3578_v31 = vmul.f32 %v8270_v10, %v10957_v4  ;;  %v8271_v37 = vadd.f32 %v3389_v12, %v10828_v33  ;;  %v7988_v16 = vpop.f32.mrb[59].mxu0  ;;  %v3768_v33 = vsel %vm3723_vm3, %v3692_v43, 0.0 }
 0x475   : > { %v3935_v28 = vshll.u32 %v3812_v22, 16  ;;  %v4126_v46 = vrot.slane %v3812_v22, 1 }
 0x476   : > { %v3639_v53 = vadd.f32 %v10964_v24, %v3578_v31  ;;  %v3579_v9 = vmul.f32 %v8271_v37, %v10957_v4 }
 0x477   : > { %v3937_v11 = vrot.slane %v3935_v28, 1  ;;  %v11201_v62 = vsel %vm915_vm1, %v4125_v58, %v4126_v46 }
 0x478   : > { %v3693_v26 = vmax.f32 %v3639_v53, 0.0  ;;  %v3640_v10 = vadd.f32 %v10964_v24, %v3579_v9 }
 0x479   : > { %v3394_v54 = vpop.f32.mrb[64].mxu0  ;;  %v11207_v19 = vsel %vm614_vm2, %v3933_v56, %v3937_v11 }
 0x47a   : > { %v3813_v48 = vpack.c.bf16 %v3693_v26, %v3768_v33  ;;  %v11209_v22 = vpack.c.bf16 %v3693_v26, %v3692_v43  ;;  %v3694_v12 = vmax.f32 %v3640_v10, 0.0  ;;  %v8272_v15 = vadd.f32 %v3394_v54, %v10840_v30  ;;  %v7991_v42 = vpop.f32.mrb[65].mxu0  ;;  %4501 = vmatprep.mubr.bf16.mxu1 %v11207_v19 }
 0x47b   : > { %v3397_v31 = vpop.f32.mrb[66].mxu0  ;;  %6776 = vmatmul.mubr.msk.bf16.gmra.mrb[140].mxu1 %vm11000_vm6, %v11182_v59 }
 0x47c   : > { %v3770_v37 = vsel %vm3734_vm4, %v3694_v12, 0.0  ;;  %v3580_v16 = vmul.f32 %v8272_v15, %v10957_v4  ;;  %v8273_v2 = vadd.f32 %v3397_v31, %v10847_v21  ;;  %v7992_v43 = vpop.f32.mrb[67].mxu0  ;;  %v3942_v58 = vshll.u32 %v3813_v48, 16 }
 0x47d   : > { %v3814_v28 = vpack.c.bf16 %v3770_v37, %v3770_v37  ;;  %v3940_v53 = vshrl.u32 %v3813_v48, 16  ;;  %v4128_v11 = vrot.slane %v3813_v48, 1 }
 0x47e   : > { %v3641_v30 = vadd.f32 %v10964_v24, %v3580_v16  ;;  %v3581_v46 = vmul.f32 %v8273_v2, %v10957_v4  ;;  %v3944_v9 = vrot.slane %v3942_v58, 1 }
 0x47f   : > { %v3947_v56 = vshll.u32 %v3814_v28, 16  ;;  %v4129_v26 = vrot.slane %v3814_v28, 1 }
 0x480   : > { %v3695_v10 = vmax.f32 %v3641_v30, 0.0  ;;  %v3642_v33 = vadd.f32 %v10964_v24, %v3581_v46  ;;  %v3945_v12 = vor.u32 %v3944_v9, %v3940_v53 }
 0x481   : > { %v3402_v54 = vpop.f32.mrb[68].mxu0  ;;  %v3949_v15 = vrot.slane %v3947_v56, 1  ;;  %v11224_v21 = vsel %vm915_vm1, %v4128_v11, %v4129_v26 }
 0x482   : > { %v3771_v42 = vsel %vm3723_vm3, %v3695_v10, 0.0  ;;  %v3696_v31 = vmax.f32 %v3642_v33, 0.0  ;;  %v8274_v37 = vadd.f32 %v3402_v54, %v10861_v44  ;;  %v7995_v16 = vpop.f32.mrb[69].mxu0 }
 0x483   : > { %v3405_v2 = vpop.f32.mrb[70].mxu0  ;;  %v11230_v48 = vsel %vm614_vm2, %v3945_v12, %v3949_v15 }
 0x484   : > { %v3815_v43 = vpack.c.bf16 %v3696_v31, %v3771_v42  ;;  %v11232_v28 = vpack.c.bf16 %v3696_v31, %v3695_v10  ;;  %v3582_v58 = vmul.f32 %v8274_v37, %v10957_v4  ;;  %v8275_v30 = vadd.f32 %v3405_v2, %v10868_v61  ;;  %v7996_v46 = vpop.f32.mrb[71].mxu0  ;;  %4509 = vmatprep.mubr.bf16.mxu1 %v11230_v48 }
 0x485   : > { %6779 = vmatmul.mubr.msk.bf16.gmra.mrb[144].mxu1 %vm11000_vm6, %v11209_v22 }
 0x486   : > { %v3643_v44 = vadd.f32 %v10964_v24, %v3582_v58  ;;  %v3583_v53 = vmul.f32 %v8275_v30, %v10957_v4  ;;  %v3954_v9 = vshll.u32 %v3815_v43, 16  ;;  %v3952_v16 = vshrl.u32 %v3815_v43, 16 }
 0x487   : > { %v4131_v30 = vrot.slane %v3815_v43, 1 }
 0x488   : > { %v3697_v56 = vmax.f32 %v3643_v44, 0.0  ;;  %v3644_v11 = vadd.f32 %v10964_v24, %v3583_v53  ;;  %v3956_v15 = vrot.slane %v3954_v9, 1 }
 0x489   : > { %v3410_v26 = vpop.f32.mrb[72].mxu0 }
 0x48a   : > { %v3773_v10 = vsel %vm3734_vm4, %v3697_v56, 0.0  ;;  %v8276_v61 = vadd.f32 %v3410_v26, %v10876_v40  ;;  %v7999_v33 = vpop.f32.mrb[73].mxu0  ;;  %v3698_v2 = vmax.f32 %v3644_v11, 0.0  ;;  %v3957_v56 = vor.u32 %v3956_v15, %v3952_v16 }
 0x48b   : > { %v3816_v54 = vpack.c.bf16 %v3773_v10, %v3773_v10  ;;  %v3413_v12 = vpop.f32.mrb[74].mxu0 }
 0x48c   : > { %v3584_v42 = vmul.f32 %v8276_v61, %v10957_v4  ;;  %v8277_v31 = vadd.f32 %v3413_v12, %v10878_v5  ;;  %v8000_v37 = vpop.f32.mrb[75].mxu0  ;;  %v3774_v5 = vsel %vm3723_vm3, %v3698_v2, 0.0 }
 0x48d   : > { %v3959_v58 = vshll.u32 %v3816_v54, 16  ;;  %v4132_v46 = vrot.slane %v3816_v54, 1 }
 0x48e   : > { %v3645_v44 = vadd.f32 %v10964_v24, %v3584_v42  ;;  %v3585_v53 = vmul.f32 %v8277_v31, %v10957_v4 }
 0x48f   : > { %v3961_v40 = vrot.slane %v3959_v58, 1  ;;  %v11251_v26 = vsel %vm915_vm1, %v4131_v30, %v4132_v46 }
 0x490   : > { %v3699_v9 = vmax.f32 %v3645_v44, 0.0  ;;  %v3646_v10 = vadd.f32 %v10964_v24, %v3585_v53 }
 0x491   : > { %v3418_v61 = vpop.f32.mrb[76].mxu0  ;;  %v11257_v11 = vsel %vm614_vm2, %v3957_v56, %v3961_v40 }
 0x492   : > { %v3817_v43 = vpack.c.bf16 %v3699_v9, %v3774_v5  ;;  %v11259_v33 = vpack.c.bf16 %v3699_v9, %v3698_v2  ;;  %v3700_v54 = vmax.f32 %v3646_v10, 0.0  ;;  %v8278_v12 = vadd.f32 %v3418_v61, %v10883_v52  ;;  %v8003_v15 = vpop.f32.mrb[77].mxu0  ;;  %4517 = vmatprep.mubr.bf16.mxu1 %v11257_v11 }
 0x493   : > { %v3421_v42 = vpop.f32.mrb[78].mxu0  ;;  %6782 = vmatmul.mubr.msk.bf16.gmra.mrb[148].mxu1 %vm11000_vm6, %v11232_v28 }
 0x494   : > { %12727 = vst [vmem:[#allocation44_spill] sm:$0xff] %v11259_v33  ;;  %v3776_v31 = vsel %vm3734_vm4, %v3700_v54, 0.0  ;;  %v3586_v37 = vmul.f32 %v8278_v12, %v10957_v4  ;;  %v8279_v16 = vadd.f32 %v3421_v42, %v10885_v13  ;;  %v8004_v2 = vpop.f32.mrb[79].mxu0  ;;  %v3966_v30 = vshll.u32 %v3817_v43, 16 }
 0x495   : > { %v3818_v58 = vpack.c.bf16 %v3776_v31, %v3776_v31  ;;  %v3964_v44 = vshrl.u32 %v3817_v43, 16  ;;  %v4134_v40 = vrot.slane %v3817_v43, 1 }
 0x496   : > { %v3647_v52 = vadd.f32 %v10964_v24, %v3586_v37  ;;  %v3587_v46 = vmul.f32 %v8279_v16, %v10957_v4  ;;  %v3968_v53 = vrot.slane %v3966_v30, 1 }
 0x497   : > { %v3971_v56 = vshll.u32 %v3818_v58, 16  ;;  %v4135_v9 = vrot.slane %v3818_v58, 1 }
 0x498   : > { %v3701_v10 = vmax.f32 %v3647_v52, 0.0  ;;  %v3648_v5 = vadd.f32 %v10964_v24, %v3587_v46  ;;  %v3969_v54 = vor.u32 %v3968_v53, %v3964_v44 }
 0x499   : > { %v3426_v61 = vpop.f32.mrb[80].mxu0  ;;  %v3973_v12 = vrot.slane %v3971_v56, 1  ;;  %v11274_v13 = vsel %vm915_vm1, %v4134_v40, %v4135_v9 }
 0x49a   : > { %v3777_v15 = vsel %vm3723_vm3, %v3701_v10, 0.0  ;;  %v3702_v42 = vmax.f32 %v3648_v5, 0.0  ;;  %v8280_v31 = vadd.f32 %v3426_v61, %v10890_v39  ;;  %v8007_v37 = vpop.f32.mrb[81].mxu0 }
 0x49b   : > { %v3429_v16 = vpop.f32.mrb[82].mxu0  ;;  %v11280_v43 = vsel %vm614_vm2, %v3969_v54, %v3973_v12 }
 0x49c   : > { %v3819_v2 = vpack.c.bf16 %v3702_v42, %v3777_v15  ;;  %v11282_v58 = vpack.c.bf16 %v3702_v42, %v3701_v10  ;;  %v3588_v30 = vmul.f32 %v8280_v31, %v10957_v4  ;;  %v8281_v52 = vadd.f32 %v3429_v16, %v10892_v14  ;;  %v8008_v46 = vpop.f32.mrb[83].mxu0  ;;  %4525 = vmatprep.mubr.bf16.mxu1 %v11280_v43 }
 0x49d   : > { %6785 = vmatmul.mubr.msk.bf16.gmra.mrb[152].mxu1 %vm11000_vm6, %v11259_v33 }
 0x49e   : > { %12728 = vst [vmem:[#allocation39_spill] sm:$0xff] %v11282_v58  ;;  %v3649_v39 = vadd.f32 %v10964_v24, %v3588_v30  ;;  %v3589_v44 = vmul.f32 %v8281_v52, %v10957_v4  ;;  %v3978_v53 = vshll.u32 %v3819_v2, 16  ;;  %v3976_v37 = vshrl.u32 %v3819_v2, 16 }
 0x49f   : > { %v4137_v52 = vrot.slane %v3819_v2, 1 }
 0x4a0   : > { %v3703_v56 = vmax.f32 %v3649_v39, 0.0  ;;  %v3650_v40 = vadd.f32 %v10964_v24, %v3589_v44  ;;  %v3980_v12 = vrot.slane %v3978_v53, 1 }
 0x4a1   : > { %v3434_v9 = vpop.f32.mrb[84].mxu0 }
 0x4a2   : > { %v3779_v10 = vsel %vm3734_vm4, %v3703_v56, 0.0  ;;  %v8282_v14 = vadd.f32 %v3434_v9, %v10897_v20  ;;  %v8011_v5 = vpop.f32.mrb[85].mxu0  ;;  %v3704_v16 = vmax.f32 %v3650_v40, 0.0  ;;  %v3981_v56 = vor.u32 %v3980_v12, %v3976_v37 }
 0x4a3   : > { %v3820_v61 = vpack.c.bf16 %v3779_v10, %v3779_v10  ;;  %v3437_v54 = vpop.f32.mrb[86].mxu0 }
 0x4a4   : > { %v3590_v15 = vmul.f32 %v8282_v14, %v10957_v4  ;;  %v8283_v42 = vadd.f32 %v3437_v54, %v10899_v49  ;;  %v8012_v31 = vpop.f32.mrb[87].mxu0  ;;  %v3780_v49 = vsel %vm3723_vm3, %v3704_v16, 0.0 }
 0x4a5   : > { %v3983_v30 = vshll.u32 %v3820_v61, 16  ;;  %v4138_v46 = vrot.slane %v3820_v61, 1 }
 0x4a6   : > { %v3651_v39 = vadd.f32 %v10964_v24, %v3590_v15  ;;  %v3591_v44 = vmul.f32 %v8283_v42, %v10957_v4 }
 0x4a7   : > { %v3985_v20 = vrot.slane %v3983_v30, 1  ;;  %v11301_v9 = vsel %vm915_vm1, %v4137_v52, %v4138_v46 }
 0x4a8   : > { %v3705_v53 = vmax.f32 %v3651_v39, 0.0  ;;  %v3652_v10 = vadd.f32 %v10964_v24, %v3591_v44 }
 0x4a9   : > { %v3442_v14 = vpop.f32.mrb[88].mxu0  ;;  %v11307_v40 = vsel %vm614_vm2, %v3981_v56, %v3985_v20 }
 0x4aa   : > { %12729 = vst [vmem:[#allocation3_spill] sm:$0xff] %v11307_v40  ;;  %v3821_v2 = vpack.c.bf16 %v3705_v53, %v3780_v49  ;;  %v11309_v5 = vpack.c.bf16 %v3705_v53, %v3704_v16  ;;  %v3706_v61 = vmax.f32 %v3652_v10, 0.0  ;;  %v8284_v54 = vadd.f32 %v3442_v14, %v10904_v23  ;;  %v8015_v12 = vpop.f32.mrb[89].mxu0  ;;  %4533 = vmatprep.mubr.bf16.mxu1 %v11307_v40 }
 0x4ab   : > { %v3445_v15 = vpop.f32.mrb[90].mxu0  ;;  %6788 = vmatmul.mubr.msk.bf16.gmra.mrb[156].mxu1 %vm11000_vm6, %v11282_v58 }
 0x4ac   : > { %12730 = vst [vmem:[#allocation45_spill] sm:$0xff] %v11309_v5  ;;  %v3782_v42 = vsel %vm3734_vm4, %v3706_v61, 0.0  ;;  %v3592_v31 = vmul.f32 %v8284_v54, %v10957_v4  ;;  %v8285_v37 = vadd.f32 %v3445_v15, %v10906_v6  ;;  %v8016_v16 = vpop.f32.mrb[91].mxu0  ;;  %v3990_v52 = vshll.u32 %v3821_v2, 16 }
 0x4ad   : > { %v3822_v30 = vpack.c.bf16 %v3782_v42, %v3782_v42  ;;  %v3988_v39 = vshrl.u32 %v3821_v2, 16  ;;  %v4140_v20 = vrot.slane %v3821_v2, 1 }
 0x4ae   : > { %v3653_v23 = vadd.f32 %v10964_v24, %v3592_v31  ;;  %v3593_v46 = vmul.f32 %v8285_v37, %v10957_v4  ;;  %v3992_v44 = vrot.slane %v3990_v52, 1 }
 0x4af   : > { %v3995_v56 = vshll.u32 %v3822_v30, 16  ;;  %v4141_v53 = vrot.slane %v3822_v30, 1 }
 0x4b0   : > { %v3707_v10 = vmax.f32 %v3653_v23, 0.0  ;;  %v3654_v49 = vadd.f32 %v10964_v24, %v3593_v46  ;;  %v3993_v61 = vor.u32 %v3992_v44, %v3988_v39  ;;  %v12733_v23 = vld [vmem:[#allocation21_spill] sm:$0xff]  ;;  %v11344_v44 = vld [vmem:[%s12425_s2] ss:$0 sm:$0xff] }
 0x4b1   : > { %v3450_v14 = vpop.f32.mrb[92].mxu0  ;;  %v3997_v54 = vrot.slane %v3995_v56, 1  ;;  %v11324_v6 = vsel %vm915_vm1, %v4140_v20, %v4141_v53  ;;  %v11350_v53 = vld [vmem:[%s12426_s3] ss:$0 sm:$0xff] }
 0x4b2   : > { %v3783_v12 = vsel %vm3723_vm3, %v3707_v10, 0.0  ;;  %v3708_v15 = vmax.f32 %v3654_v49, 0.0  ;;  %v8286_v42 = vadd.f32 %v3450_v14, %v10911_v29  ;;  %v8019_v31 = vpop.f32.mrb[93].mxu0  ;;  %v12734_v14 = vld [vmem:[#allocation29_spill] sm:$0xff] }
 0x4b3   : > { %v3453_v37 = vpop.f32.mrb[94].mxu0  ;;  %v11330_v2 = vsel %vm614_vm2, %v3993_v61, %v3997_v54 }
 0x4b4   : > { %12731 = vst [vmem:[#allocation20_spill] sm:$0xff] %v11330_v2  ;;  %v3823_v16 = vpack.c.bf16 %v3708_v15, %v3783_v12  ;;  %v11332_v30 = vpack.c.bf16 %v3708_v15, %v3707_v10  ;;  %v3594_v52 = vmul.f32 %v8286_v42, %v10957_v4  ;;  %v8287_v46 = vadd.f32 %v3453_v37, %v12733_v23  ;;  %v8020_v39 = vpop.f32.mrb[95].mxu0  ;;  %v12735_v37 = vld [vmem:[#allocation9_spill] sm:$0xff] }
 0x4b5   : > { %4541 = vmatprep.mubr.bf16.mxu1 %v11330_v2 }
 0x4b6   : > { %12732 = vst [vmem:[#allocation46_spill] sm:$0xff] %v11332_v30  ;;  %6791 = vmatmul.mubr.msk.bf16.gmra.mrb[160].mxu1 %vm11000_vm6, %v11309_v5  ;;  %v3655_v29 = vadd.f32 %v10964_v24, %v3594_v52  ;;  %v3595_v56 = vmul.f32 %v11344_v44, %v8287_v46  ;;  %v4002_v20 = vshll.u32 %v3823_v16, 16  ;;  %v4000_v46 = vshrl.u32 %v3823_v16, 16 }
 0x4b7   : > { %v4143_v5 = vrot.slane %v3823_v16, 1 }
 0x4b8   : > { %v3709_v4 = vmax.f32 %v3655_v29, 0.0  ;;  %v3656_v10 = vadd.f32 %v11350_v53, %v3595_v56  ;;  %v4004_v42 = vrot.slane %v4002_v20, 1 }
 0x4b9   : > { %v3458_v49 = vpop.f32.mrb[96].mxu0 }
 0x4ba   : > { %v3785_v24 = vsel %vm3734_vm4, %v3709_v4, 0.0  ;;  %v8288_v61 = vadd.f32 %v3458_v49, %v12734_v14  ;;  %v8023_v54 = vpop.f32.mrb[97].mxu0  ;;  %v3710_v39 = vmax.f32 %v3656_v10, 0.0  ;;  %v4005_v58 = vor.u32 %v4004_v42, %v4000_v46 }
 0x4bb   : > { %v3824_v12 = vpack.c.bf16 %v3785_v24, %v3785_v24  ;;  %v3461_v15 = vpop.f32.mrb[98].mxu0 }
 0x4bc   : > { %v3596_v31 = vmul.f32 %v11344_v44, %v8288_v61  ;;  %v8289_v52 = vadd.f32 %v3461_v15, %v12735_v37  ;;  %v8024_v23 = vpop.f32.mrb[99].mxu0  ;;  %v3786_v61 = vsel %vm3723_vm3, %v3710_v39, 0.0 }
 0x4bd   : > { %v4007_v29 = vshll.u32 %v3824_v12, 16  ;;  %v4144_v56 = vrot.slane %v3824_v12, 1 }
 0x4be   : > { %v3657_v2 = vadd.f32 %v11350_v53, %v3596_v31  ;;  %v3597_v4 = vmul.f32 %v11344_v44, %v8289_v52  ;;  %v12736_v31 = vld [vmem:[#allocation35_spill] sm:$0xff] }
 0x4bf   : > { %v4009_v49 = vrot.slane %v4007_v29, 1  ;;  %v11361_v24 = vsel %vm915_vm1, %v4143_v5, %v4144_v56  ;;  %v12737_v52 = vld [vmem:[#allocation31_spill] sm:$0xff] }
 0x4c0   : > { %v3711_v20 = vmax.f32 %v3657_v2, 0.0  ;;  %v3658_v14 = vadd.f32 %v11350_v53, %v3597_v4 }
 0x4c1   : > { %v3466_v54 = vpop.f32.mrb[100].mxu0  ;;  %v11367_v10 = vsel %vm614_vm2, %v4005_v58, %v4009_v49 }
 0x4c2   : > { %v3825_v16 = vpack.c.bf16 %v3711_v20, %v3786_v61  ;;  %v11369_v12 = vpack.c.bf16 %v3711_v20, %v3710_v39  ;;  %v3712_v15 = vmax.f32 %v3658_v14, 0.0  ;;  %v8290_v42 = vadd.f32 %v3466_v54, %v12736_v31  ;;  %v8027_v37 = vpop.f32.mrb[101].mxu0  ;;  %4549 = vmatprep.mubr.bf16.mxu1 %v11367_v10 }
 0x4c3   : > { %v3469_v5 = vpop.f32.mrb[102].mxu0  ;;  %6794 = vmatmul.mubr.msk.bf16.gmra.mrb[164].mxu1 %vm11000_vm6, %v11332_v30 }
 0x4c4   : > { %v3788_v2 = vsel %vm3734_vm4, %v3712_v15, 0.0  ;;  %v3598_v58 = vmul.f32 %v11344_v44, %v8290_v42  ;;  %v8291_v23 = vadd.f32 %v3469_v5, %v12737_v52  ;;  %v8028_v46 = vpop.f32.mrb[103].mxu0  ;;  %v4014_v29 = vshll.u32 %v3825_v16, 16  ;;  %v12738_v52 = vld [vmem:[#allocation36_spill] sm:$0xff] }
 0x4c5   : > { %v3826_v39 = vpack.c.bf16 %v3788_v2, %v3788_v2  ;;  %v4012_v49 = vshrl.u32 %v3825_v16, 16  ;;  %v4146_v61 = vrot.slane %v3825_v16, 1 }
 0x4c6   : > { %v3659_v56 = vadd.f32 %v11350_v53, %v3598_v58  ;;  %v3599_v4 = vmul.f32 %v11344_v44, %v8291_v23  ;;  %v4016_v20 = vrot.slane %v4014_v29, 1 }
 0x4c7   : > { %v4019_v14 = vshll.u32 %v3826_v39, 16  ;;  %v4147_v54 = vrot.slane %v3826_v39, 1 }
 0x4c8   : > { %v3713_v31 = vmax.f32 %v3659_v56, 0.0  ;;  %v3660_v37 = vadd.f32 %v11350_v53, %v3599_v4  ;;  %v4017_v30 = vor.u32 %v4016_v20, %v4012_v49 }
 0x4c9   : > { %v3474_v15 = vpop.f32.mrb[104].mxu0  ;;  %v4021_v42 = vrot.slane %v4019_v14, 1  ;;  %v11384_v5 = vsel %vm915_vm1, %v4146_v61, %v4147_v54 }
 0x4ca   : > { %v3789_v2 = vsel %vm3723_vm3, %v3713_v31, 0.0  ;;  %v3714_v58 = vmax.f32 %v3660_v37, 0.0  ;;  %v8292_v23 = vadd.f32 %v3474_v15, %v12738_v52  ;;  %v8031_v46 = vpop.f32.mrb[105].mxu0 }
 0x4cb   : > { %v3477_v29 = vpop.f32.mrb[106].mxu0  ;;  %v11390_v16 = vsel %vm614_vm2, %v4017_v30, %v4021_v42  ;;  %v9045_v46 = vld [vmem:[%s12427_s4 + $0x50] sm:$0xff]  }
 0x4cc   : > { %v3827_v39 = vpack.c.bf16 %v3714_v58, %v3789_v2  ;;  %v11392_v56 = vpack.c.bf16 %v3714_v58, %v3713_v31  ;;  %v3600_v4 = vmul.f32 %v11344_v44, %v8292_v23  ;;  %v8032_v49 = vpop.f32.mrb[107].mxu0  ;;  %4557 = vmatprep.mubr.bf16.mxu1 %v11390_v16  ;;  %v9044_v23 = vld [vmem:[%s12427_s4 + $0x8] sm:$0xff]   ;;  %v9046_v29 = vld [vmem:[%s12427_s4 + $0x10] sm:$0xff]  }
 0x4cd   : > { %6797 = vmatmul.mubr.msk.bf16.gmra.mrb[168].mxu1 %vm11000_vm6, %v11369_v12  ;;  %v9049_v49 = vld [vmem:[%s12427_s4 + $0x60] sm:$0xff]  }
 0x4ce   : > { %12739 = vst [vmem:[#allocation22_spill] sm:$0xff] %v11392_v56  ;;  %v3661_v57 = vadd.f32 %v11350_v53, %v3600_v4  ;;  %v4026_v20 = vshll.u32 %v3827_v39, 16  ;;  %v4024_v31 = vshrl.u32 %v3827_v39, 16  ;;  %v4149_v15 = vrot.slane %v3827_v39, 1  ;;  %v9043_v53 = vld [vmem:[%s12427_s4 + $0x48] sm:$0xff]   ;;  %v9047_v39 = vld [vmem:[%s12427_s4 + $0x58] sm:$0xff]  }
 0x4cf   : > { %v9048_v4 = vld [vmem:[%s12427_s4 + $0x18] sm:$0xff]  }
 0x4d0   : > { %v3715_v14 = vmax.f32 %v3661_v57, 0.0  ;;  %v4028_v54 = vrot.slane %v4026_v20, 1  ;;  %v9050_v57 = vld [vmem:[%s12427_s4 + $0x20] sm:$0xff]   ;;  %v9051_v20 = vld [vmem:[%s12427_s4 + $0x68] sm:$0xff]  }
 0x4d2   : > { %v3791_v30 = vsel %vm3734_vm4, %v3715_v14, 0.0  ;;  %v4029_v42 = vor.u32 %v4028_v54, %v4024_v31  ;;  %v9052_v14 = vld [vmem:[%s12427_s4 + $0x28] sm:$0xff]   ;;  %v9054_v54 = vld [vmem:[%s12427_s4 + $0x30] sm:$0xff]  }
 0x4d3   : > { %v3828_v61 = vpack.c.bf16 %v3791_v30, %v3791_v30  ;;  %v9053_v30 = vld [vmem:[%s12427_s4 + $0x70] sm:$0xff]  }
 0x4d5   : > { %v4031_v37 = vshll.u32 %v3828_v61, 16  ;;  %v4150_v44 = vrot.slane %v3828_v61, 1 }
 0x4d7   : > { %v4033_v2 = vrot.slane %v4031_v37, 1  ;;  %v11403_v58 = vsel %vm915_vm1, %v4149_v15, %v4150_v44  ;;  %v9055_v37 = vld [vmem:[%s12427_s4 + $0x78] sm:$0xff]  }
 0x4d8   : > { %12740 = vst [vmem:[#allocation23_spill] sm:$0xff] %v11403_v58 }
 0x4d9   : > { %v11406_v52 = vsel %vm614_vm2, %v4029_v42, %v4033_v2 }
 0x4da   : > { %12741 = vst [vmem:[#allocation24_spill] sm:$0xff] %v11406_v52  ;;  %4565 = vmatprep.mubr.bf16.mxu1 %v11406_v52 }
 0x4db   : > { %6800 = vmatmul.mubr.msk.bf16.gmra.mrb[172].mxu1 %vm11000_vm6, %v11392_v56 }
 0x4dc   : > { %8053 = vmatprep.mubr.bf16.mxu1 %v10993_v36 }
 0x4e3   : > { %8054 = vmatmul.mubr.bf16.vlgmr.msra.gmra.mrb[176].mxu1 %v11039_v34 }
 0x4e4   : > { %8057 = vmatprep.mubr.bf16.mxu1 %v11062_v45  ;;  %7370 = vmatpush3.bf16.msra.mxu1 %v9042_v8  ;;  %v9056_v8 = vld [vmem:[%s12427_s4 + $0x38] sm:$0xff]  }
 0x4e5   : > { %7371 = vmatprep.subr.bf16.mxu1 %v9043_v53  ;;  %v9057_v53 = vld [vmem:[%s12427_s4 + $0x80] sm:$0xff]  }
 0x4e8   : > { %7372 = vmatpush3.bf16.msra.mxu1 %v9044_v23 }
 0x4e9   : > { %7373 = vmatprep.subr.bf16.mxu1 %v9045_v46 }
 0x4eb   : > { %8058 = vmatmul.mubr.bf16.gmra.mrb[180].mxu1 %v11092_v32 }
 0x4ec   : > { %8061 = vmatprep.mubr.bf16.mxu1 %v11118_v38  ;;  %7374 = vmatpush3.bf16.msra.mxu1 %v9046_v29 }
 0x4ed   : > { %7375 = vmatprep.subr.bf16.mxu1 %v9047_v39 }
 0x4f0   : > { %7376 = vmatpush3.bf16.msra.mxu1 %v9048_v4 }
 0x4f1   : > { %7377 = vmatprep.subr.bf16.mxu1 %v9049_v49 }
 0x4f3   : > { %8062 = vmatmul.mubr.bf16.gmra.mrb[184].mxu1 %v11148_v1 }
 0x4f4   : > { %8065 = vmatprep.mubr.bf16.mxu1 %v11174_v7  ;;  %7378 = vmatpush3.bf16.msra.mxu1 %v9050_v57 }
 0x4f5   : > { %7379 = vmatprep.subr.bf16.mxu1 %v9051_v20 }
 0x4f8   : > { %v7249_v61 = vpop.f32.mrb[112].mxu1  ;;  %7380 = vmatpush3.bf16.msra.mxu1 %v9052_v14 }
 0x4f9   : > { %v7250_v31 = vpop.f32.mrb[113].mxu1  ;;  %7381 = vmatprep.subr.bf16.mxu1 %v9053_v30 }
 0x4fa   : > { %v11461_v15 = vadd.f32 %v7250_v31, %v7249_v61  ;;  %v7252_v44 = vpop.f32.mrb[114].mxu1  ;;  %v12742_v31 = vmov 0  }
 0x4fb   : > { %v7253_v42 = vpop.f32.mrb[115].mxu1  ;;  %8066 = vmatmul.mubr.bf16.gmra.mrb[188].mxu1 %v11201_v62 }
 0x4fc   : > { %v11464_v2 = vadd.f32 %v7253_v42, %v7252_v44  ;;  %8069 = vmatprep.mubr.bf16.mxu1 %v11224_v21  ;;  %7382 = vmatpush3.bf16.msra.mxu1 %v9054_v54 }
 0x4fd   : > { %7383 = vmatprep.subr.bf16.mxu1 %v9055_v37  ;;  %v11488_v37 = vrot.slane %v12742_v31, 1  ;;  %v9060_v31 = vld [vmem:[%s12427_s4 + $0x98] sm:$0xff]  }
 0x4ff   : > { %12743 = vst [vmem:[#allocation56_spill] sm:$0xff] %v11488_v37 }
 0x500   : > { %7384 = vmatpush3.bf16.msra.mxu1 %v9056_v8 }
 0x501   : > { %8085 = vmatprep.subr.bf16.mxu1 %v9057_v53 }
 0x503   : > { %8070 = vmatmul.mubr.bf16.gmra.mrb[192].mxu1 %v11251_v26 }
 0x504   : > { %8073 = vmatprep.mubr.bf16.mxu1 %v11274_v13 }
 0x506   : > { %v7255_v23 = vpop.f32.mrb[116].mxu1 }
 0x507   : > { %v7256_v46 = vpop.f32.mrb[117].mxu1 }
 0x508   : > { %v11475_v29 = vadd.f32 %v7256_v46, %v7255_v23  ;;  %v7258_v39 = vpop.f32.mrb[118].mxu1 }
 0x509   : > { %v7259_v4 = vpop.f32.mrb[119].mxu1 }
 0x50a   : > { %v11477_v49 = vadd.f32 %v7259_v4, %v7258_v39  ;;  %v9058_v39 = vld [vmem:[%s12427_s4 + $0x88] sm:$0xff]  }
 0x50b   : > { %8074 = vmatmul.mubr.bf16.gmra.mrb[196].mxu1 %v11301_v9 }
 0x50c   : > { %8077 = vmatprep.mubr.bf16.mxu1 %v11324_v6 }
 0x510   : > { %v7261_v57 = vpop.f32.mrb[120].mxu1 }
 0x511   : > { %v7262_v20 = vpop.f32.mrb[121].mxu1 }
 0x512   : > { %v11481_v14 = vadd.f32 %v7262_v20, %v7261_v57  ;;  %v7264_v30 = vpop.f32.mrb[122].mxu1  ;;  %v12541_v57 = vmov 0.0|0.0   ;;  %v9059_v20 = vld [vmem:[%s12427_s4 + $0x90] sm:$0xff]  }
 0x513   : > { %v7265_v61 = vpop.f32.mrb[123].mxu1  ;;  %8078 = vmatmul.mubr.bf16.gmra.mrb[200].mxu1 %v11361_v24 }
 0x514   : > { %v11484_v54 = vadd.f32 %v7265_v61, %v7264_v30  ;;  %8081 = vmatprep.mubr.bf16.mxu1 %v11384_v5 }
 0x51b   : > { %8082 = vmatmul.mubr.bf16.gmra.mrb[204].mxu1 %v11403_v58 }
 0x51c   : > { %4911 = vmatprep.mubr.bf16.mxu1 %v11488_v37 }
 0x51e   : > { %v7267_v44 = vpop.f32.mrb[124].mxu1 }
 0x51f   : > { %v7268_v42 = vpop.f32.mrb[125].mxu1 }
 0x520   : > { %v11492_v8 = vadd.f32 %v7268_v42, %v7267_v44  ;;  %v7270_v23 = vpop.f32.mrb[126].mxu1 }
 0x521   : > { %v7271_v46 = vpop.f32.mrb[127].mxu1 }
 0x522   : > { %v11497_v4 = vadd.f32 %v7271_v46, %v7270_v23  ;;  %v9062_v46 = vld [vmem:[%s12427_s4 + $0xa8] sm:$0xff]  }
 0x523   : > { %4912 = vmatmul.mubr.bf16.vlgmr.msra.gmra.mrb[208].mxu1 %v12541_v57 }
 0x524   : > { %4919 = vmatprep.mubr.bf16.mxu1 %v11005_v55  ;;  %8086 = vmatpush3.bf16.msra.mxu1 %v9057_v53  ;;  %v9061_v53 = vld [vmem:[%s12427_s4 + $0xa0] sm:$0xff]  }
 0x525   : > { %8087 = vmatprep.subr.bf16.mxu1 %v9058_v39 }
 0x528   : > { %v7273_v30 = vpop.f32.mrb[128].mxu1  ;;  %8088 = vmatpush3.bf16.msra.mxu1 %v9058_v39  ;;  %v12744_v39 = vld [vmem:[#allocation15_spill] sm:$0xff] }
 0x529   : > { %v7274_v61 = vpop.f32.mrb[129].mxu1  ;;  %8089 = vmatprep.subr.bf16.mxu1 %v9059_v20 }
 0x52a   : > { %v11507_v44 = vadd.f32 %v7274_v61, %v7273_v30  ;;  %v7276_v42 = vpop.f32.mrb[130].mxu1 }
 0x52b   : > { %v7277_v23 = vpop.f32.mrb[131].mxu1  ;;  %6827 = vmatmul.mubr.msk.bf16.gmra.mrb[212].mxu1 %vm11000_vm6, %v10982_v50  ;;  %v9063_v50 = vld [vmem:[%s12427_s4 + $0xb0] sm:$0xff]  }
 0x52c   : > { %v11512_v55 = vadd.f32 %v7277_v23, %v7276_v42  ;;  %4927 = vmatprep.mubr.bf16.mxu1 %v11045_v0  ;;  %8090 = vmatpush3.bf16.msra.mxu1 %v9059_v20  ;;  %v9064_v23 = vld [vmem:[%s12427_s4 + $0xb8] sm:$0xff]  }
 0x52d   : > { %8091 = vmatprep.subr.bf16.mxu1 %v9060_v31 }
 0x530   : > { %8092 = vmatpush3.bf16.msra.mxu1 %v9060_v31 }
 0x531   : > { %8093 = vmatprep.subr.bf16.mxu1 %v9061_v53 }
 0x533   : > { %6830 = vmatmul.mubr.msk.bf16.gmra.mrb[216].mxu1 %vm11000_vm6, %v12744_v39 }
 0x534   : > { %4935 = vmatprep.mubr.bf16.mxu1 %v11068_v47  ;;  %8094 = vmatpush3.bf16.msra.mxu1 %v9061_v53  ;;  %v9065_v53 = vld [vmem:[%s12427_s4 + $0x1c0] sm:$0xff]  }
 0x535   : > { %8095 = vmatprep.subr.bf16.mxu1 %v9062_v46 }
 0x536   : > { %v7279_v20 = vpop.f32.mrb[132].mxu1 }
 0x537   : > { %v7280_v30 = vpop.f32.mrb[133].mxu1 }
 0x538   : > { %v11528_v61 = vadd.f32 %v7280_v30, %v7279_v20  ;;  %v7282_v31 = vpop.f32.mrb[134].mxu1  ;;  %8096 = vmatpush3.bf16.msra.mxu1 %v9062_v46 }
 0x539   : > { %v7283_v42 = vpop.f32.mrb[135].mxu1  ;;  %8097 = vmatprep.subr.bf16.mxu1 %v9063_v50 }
 0x53a   : > { %v11533_v57 = vadd.f32 %v7283_v42, %v7282_v31 }
 0x53b   : > { %6833 = vmatmul.mubr.msk.bf16.gmra.mrb[220].mxu1 %vm11000_vm6, %v11047_v63 }
 0x53c   : > { %4943 = vmatprep.mubr.bf16.mxu1 %v11098_v41  ;;  %8098 = vmatpush3.bf16.msra.mxu1 %v9063_v50 }
 0x53d   : > { %8099 = vmatprep.subr.bf16.mxu1 %v9064_v23 }
 0x540   : > { %v7285_v46 = vpop.f32.mrb[136].mxu1  ;;  %8100 = vmatpush3.bf16.msra.mxu1 %v9064_v23 }
 0x541   : > { %v7286_v20 = vpop.f32.mrb[137].mxu1  ;;  %7505 = vmatprep.subr.bf16.mxu1 %v9065_v53 }
 0x542   : > { %v11542_v30 = vadd.f32 %v7286_v20, %v7285_v46  ;;  %v7288_v31 = vpop.f32.mrb[138].mxu1 }
 0x543   : > { %v7289_v42 = vpop.f32.mrb[139].mxu1  ;;  %6836 = vmatmul.mubr.msk.bf16.gmra.mrb[224].mxu1 %vm11000_vm6, %v11070_v17 }
 0x544   : > { %12745 = vst [vmem:[#allocation50_spill] sm:$0xff] %v11542_v30  ;;  %v11547_v58 = vadd.f32 %v7289_v42, %v7288_v31  ;;  %4951 = vmatprep.mubr.bf16.mxu1 %v11124_v60  ;;  %v12760_v30 = vld [vmem:[#allocation45_spill] sm:$0xff] }
 0x546   : > { %12746 = vst [vmem:[#allocation47_spill] sm:$0xff] %v11547_v58 }
 0x54b   : > { %6839 = vmatmul.mubr.msk.bf16.gmra.mrb[228].mxu1 %vm11000_vm6, %v11100_v27 }
 0x54c   : > { %4959 = vmatprep.mubr.bf16.mxu1 %v11154_v18 }
 0x54e   : > { %v7291_v50 = vpop.f32.mrb[140].mxu1 }
 0x54f   : > { %v7292_v23 = vpop.f32.mrb[141].mxu1 }
 0x550   : > { %v11554_v53 = vadd.f32 %v7292_v23, %v7291_v50  ;;  %v7294_v46 = vpop.f32.mrb[142].mxu1 }
 0x551   : > { %v7295_v20 = vpop.f32.mrb[143].mxu1 }
 0x552   : > { %12747 = vst [vmem:[#allocation40_spill] sm:$0xff] %v11554_v53  ;;  %v11556_v37 = vadd.f32 %v7295_v20, %v7294_v46 }
 0x553   : > { %6842 = vmatmul.mubr.msk.bf16.gmra.mrb[232].mxu1 %vm11000_vm6, %v11129_v35 }
 0x554   : > { %12748 = vst [vmem:[#allocation4_spill] sm:$0xff] %v11556_v37  ;;  %4967 = vmatprep.mubr.bf16.mxu1 %v11180_v25 }
 0x558   : > { %v7297_v31 = vpop.f32.mrb[144].mxu1 }
 0x559   : > { %v7298_v42 = vpop.f32.mrb[145].mxu1 }
 0x55a   : > { %v11562_v56 = vadd.f32 %v7298_v42, %v7297_v31  ;;  %v7300_v52 = vpop.f32.mrb[146].mxu1 }
 0x55b   : > { %v7301_v58 = vpop.f32.mrb[147].mxu1  ;;  %6845 = vmatmul.mubr.msk.bf16.gmra.mrb[236].mxu1 %vm11000_vm6, %v11156_v51 }
 0x55c   : > { %12749 = vst [vmem:[#allocation57_spill] sm:$0xff] %v11562_v56  ;;  %v11567_v50 = vadd.f32 %v7301_v58, %v7300_v52  ;;  %4975 = vmatprep.mubr.bf16.mxu1 %v11207_v19 }
 0x55e   : > { %12750 = vst [vmem:[#allocation25_spill] sm:$0xff] %v11567_v50 }
 0x563   : > { %6848 = vmatmul.mubr.msk.bf16.gmra.mrb[240].mxu1 %vm11000_vm6, %v11182_v59 }
 0x564   : > { %4983 = vmatprep.mubr.bf16.mxu1 %v11230_v48 }
 0x566   : > { %v7303_v23 = vpop.f32.mrb[148].mxu1 }
 0x567   : > { %v7304_v46 = vpop.f32.mrb[149].mxu1 }
 0x568   : > { %v11574_v20 = vadd.f32 %v7304_v46, %v7303_v23  ;;  %v7306_v31 = vpop.f32.mrb[150].mxu1 }
 0x569   : > { %v7307_v42 = vpop.f32.mrb[151].mxu1 }
 0x56a   : > { %12751 = vst [vmem:[#allocation51_spill] sm:$0xff] %v11574_v20  ;;  %v11576_v56 = vadd.f32 %v7307_v42, %v7306_v31 }
 0x56b   : > { %6851 = vmatmul.mubr.msk.bf16.gmra.mrb[244].mxu1 %vm11000_vm6, %v11209_v22 }
 0x56c   : > { %12752 = vst [vmem:[#allocation48_spill] sm:$0xff] %v11576_v56  ;;  %4991 = vmatprep.mubr.bf16.mxu1 %v11257_v11  ;;  %v12757_v56 = vld [vmem:[#allocation39_spill] sm:$0xff] }
 0x570   : > { %v7309_v58 = vpop.f32.mrb[152].mxu1 }
 0x571   : > { %v7310_v52 = vpop.f32.mrb[153].mxu1 }
 0x572   : > { %v11582_v50 = vadd.f32 %v7310_v52, %v7309_v58  ;;  %v7312_v37 = vpop.f32.mrb[154].mxu1 }
 0x573   : > { %v7313_v53 = vpop.f32.mrb[155].mxu1  ;;  %6854 = vmatmul.mubr.msk.bf16.gmra.mrb[248].mxu1 %vm11000_vm6, %v11232_v28 }
 0x574   : > { %12753 = vst [vmem:[#allocation58_spill] sm:$0xff] %v11582_v50  ;;  %v11587_v23 = vadd.f32 %v7313_v53, %v7312_v37  ;;  %4999 = vmatprep.mubr.bf16.mxu1 %v11280_v43  ;;  %v12758_v37 = vld [vmem:[#allocation20_spill] sm:$0xff] }
 0x576   : > { %12754 = vst [vmem:[#allocation26_spill] sm:$0xff] %v11587_v23 }
 0x57b   : > { %6857 = vmatmul.mubr.msk.bf16.gmra.mrb[252].mxu1 %vm11000_vm6, %v11259_v33 }
 0x57c   : > { %5007 = vmatprep.mubr.bf16.mxu1 %v11307_v40 }
 0x57e   : > { %v7315_v46 = vpop.f32.mrb[156].mxu1 }
 0x57f   : > { %v7316_v31 = vpop.f32.mrb[157].mxu1 }
 0x580   : > { %v11594_v42 = vadd.f32 %v7316_v31, %v7315_v46  ;;  %v7318_v58 = vpop.f32.mrb[158].mxu1  ;;  %v12762_v31 = vld [vmem:[#allocation46_spill] sm:$0xff] }
 0x581   : > { %v7319_v52 = vpop.f32.mrb[159].mxu1 }
 0x582   : > { %12755 = vst [vmem:[#allocation27_spill] sm:$0xff] %v11594_v42  ;;  %v11596_v50 = vadd.f32 %v7319_v52, %v7318_v58 }
 0x583   : > { %6860 = vmatmul.mubr.msk.bf16.gmra.mrb[0].mxu1 %vm11000_vm6, %v12757_v56 }
 0x584   : > { %12756 = vst [vmem:[#allocation28_spill] sm:$0xff] %v11596_v50  ;;  %5015 = vmatprep.mubr.bf16.mxu1 %v12758_v37 }
 0x589   : > { %v7321_v53 = vpop.f32.mrb[160].mxu1 }
 0x58a   : > { %v7322_v23 = vpop.f32.mrb[161].mxu1 }
 0x58b   : > { %v11602_v20 = vadd.f32 %v7322_v23, %v7321_v53  ;;  %v7324_v33 = vpop.f32.mrb[162].mxu1  ;;  %6863 = vmatmul.mubr.msk.bf16.gmra.mrb[104].mxu1 %vm11000_vm6, %v12760_v30 }
 0x58c   : > { %v7325_v40 = vpop.f32.mrb[163].mxu1  ;;  %5023 = vmatprep.mubr.bf16.mxu1 %v11367_v10 }
 0x58d   : > { %12759 = vst [vmem:[#allocation67_spill] sm:$0xff] %v11602_v20  ;;  %v11607_v46 = vadd.f32 %v7325_v40, %v7324_v33  ;;  %v12764_v20 = vmov 0.0|0.0   ;;  %v9066_v40 = vld [vmem:[%s12427_s4 + $0x180] sm:$0xff]  }
 0x58e   : > { %v11617_v50 = vrot.slane %v12764_v20, 1 }
 0x58f   : > { %12761 = vst [vmem:[#allocation62_spill] sm:$0xff] %v11607_v46  ;;  %v9069_v46 = vld [vmem:[%s12427_s4 + $0x1d0] sm:$0xff]  }
 0x590   : > { %12765 = vst [vmem:[#allocation52_spill] sm:$0xff] %v11617_v50 }
 0x593   : > { %6866 = vmatmul.mubr.msk.bf16.gmra.mrb[4].mxu1 %vm11000_vm6, %v12762_v31 }
 0x594   : > { %5031 = vmatprep.mubr.bf16.mxu1 %v11390_v16 }
 0x596   : > { %v7327_v58 = vpop.f32.mrb[164].mxu1 }
 0x597   : > { %v7328_v52 = vpop.f32.mrb[165].mxu1 }
 0x598   : > { %v11614_v23 = vadd.f32 %v7328_v52, %v7327_v58  ;;  %v7330_v53 = vpop.f32.mrb[166].mxu1  ;;  %v9067_v52 = vld [vmem:[%s12427_s4 + $0x1c8] sm:$0xff]  }
 0x599   : > { %v7331_v42 = vpop.f32.mrb[167].mxu1 }
 0x59a   : > { %12763 = vst [vmem:[#allocation59_spill] sm:$0xff] %v11614_v23  ;;  %v11619_v30 = vadd.f32 %v7331_v42, %v7330_v53 }
 0x59b   : > { %6869 = vmatmul.mubr.msk.bf16.gmra.mrb[8].mxu1 %vm11000_vm6, %v11369_v12 }
 0x59c   : > { %12766 = vst [vmem:[#allocation5_spill] sm:$0xff] %v11619_v30  ;;  %8101 = vmatprep.mubr.bf16.mxu1 %v11617_v50  ;;  %v9068_v50 = vld [vmem:[%s12427_s4 + $0x188] sm:$0xff]  }
 0x5a0   : > { %v7333_v33 = vpop.f32.mrb[168].mxu1 }
 0x5a1   : > { %v7334_v58 = vpop.f32.mrb[169].mxu1 }
 0x5a2   : > { %v11631_v23 = vadd.f32 %v7334_v58, %v7333_v33  ;;  %v7336_v42 = vpop.f32.mrb[170].mxu1  ;;  %v9070_v33 = vld [vmem:[%s12427_s4 + $0x190] sm:$0xff]  }
 0x5a3   : > { %v7337_v53 = vpop.f32.mrb[171].mxu1  ;;  %8102 = vmatmul.mubr.bf16.vlgmr.msra.gmra.mrb[176].mxu1 %v10993_v36  ;;  %v9071_v36 = vld [vmem:[%s12427_s4 + $0x1d8] sm:$0xff]  }
 0x5a4   : > { %v11634_v30 = vadd.f32 %v7337_v53, %v7336_v42  ;;  %8105 = vmatprep.mubr.bf16.mxu1 %v11039_v34  ;;  %7506 = vmatpush3.bf16.msra.mxu1 %v9066_v40  ;;  %v9072_v40 = vld [vmem:[%s12427_s4 + $0x198] sm:$0xff]   ;;  %v9074_v53 = vld [vmem:[%s12427_s4 + $0x1a0] sm:$0xff]  }
 0x5a5   : > { %7507 = vmatprep.subr.bf16.mxu1 %v9067_v52 }
 0x5a6   : > { %12767 = vst [vmem:[#allocation68_spill] sm:$0xff] %v11634_v30 }
 0x5a8   : > { %7508 = vmatpush3.bf16.msra.mxu1 %v9068_v50  ;;  %v9073_v50 = vld [vmem:[%s12427_s4 + $0x1e0] sm:$0xff]  }
 0x5a9   : > { %7509 = vmatprep.subr.bf16.mxu1 %v9069_v46 }
 0x5ab   : > { %8106 = vmatmul.mubr.bf16.gmra.mrb[180].mxu1 %v11062_v45 }
 0x5ac   : > { %8109 = vmatprep.mubr.bf16.mxu1 %v11092_v32  ;;  %7510 = vmatpush3.bf16.msra.mxu1 %v9070_v33 }
 0x5ad   : > { %7511 = vmatprep.subr.bf16.mxu1 %v9071_v36  ;;  %v9075_v36 = vld [vmem:[%s12427_s4 + $0x1e8] sm:$0xff]  }
 0x5ae   : > { %v7339_v58 = vpop.f32.mrb[172].mxu1 }
 0x5af   : > { %v7340_v46 = vpop.f32.mrb[173].mxu1 }
 0x5b0   : > { %v11657_v52 = vadd.f32 %v7340_v46, %v7339_v58  ;;  %v7342_v42 = vpop.f32.mrb[174].mxu1  ;;  %7512 = vmatpush3.bf16.msra.mxu1 %v9072_v40  ;;  %v9076_v40 = vld [vmem:[%s12427_s4 + $0x1a8] sm:$0xff]   ;;  %v9078_v58 = vld [vmem:[%s12427_s4 + $0x1b0] sm:$0xff]   ;;  %v9079_v46 = vld [vmem:[%s12427_s4 + $0x1f8] sm:$0xff]  }
 0x5b1   : > { %v7343_v33 = vpop.f32.mrb[175].mxu1  ;;  %7513 = vmatprep.subr.bf16.mxu1 %v9073_v50  ;;  %v9077_v50 = vld [vmem:[%s12427_s4 + $0x1f0] sm:$0xff]  }
 0x5b2   : > { %v11665_v30 = vadd.f32 %v7343_v33, %v7342_v42  ;;  %v9080_v42 = vld [vmem:[%s12427_s4 + $0x1b8] sm:$0xff]   ;;  %v9082_v33 = vld [vmem:[%s12427_s4 + $0x208] sm:$0xff]  }
 0x5b3   : > { %8110 = vmatmul.mubr.bf16.gmra.mrb[184].mxu1 %v11118_v38 }
 0x5b4   : > { %8113 = vmatprep.mubr.bf16.mxu1 %v11148_v1  ;;  %7514 = vmatpush3.bf16.msra.mxu1 %v9074_v53  ;;  %v9081_v53 = vld [vmem:[%s12427_s4 + $0x200] sm:$0xff]  }
 0x5b5   : > { %7515 = vmatprep.subr.bf16.mxu1 %v9075_v36  ;;  %v9083_v36 = vld [vmem:[%s12427_s4 + $0x210] sm:$0xff]  }
 0x5b8   : > { %7516 = vmatpush3.bf16.msra.mxu1 %v9076_v40 }
 0x5b9   : > { %7517 = vmatprep.subr.bf16.mxu1 %v9077_v50 }
 0x5bb   : > { %8114 = vmatmul.mubr.bf16.gmra.mrb[188].mxu1 %v11174_v7 }
 0x5bc   : > { %8117 = vmatprep.mubr.bf16.mxu1 %v11201_v62  ;;  %7518 = vmatpush3.bf16.msra.mxu1 %v9078_v58 }
 0x5bd   : > { %7519 = vmatprep.subr.bf16.mxu1 %v9079_v46 }
 0x5c0   : > { %7520 = vmatpush3.bf16.msra.mxu1 %v9080_v42  ;;  %v9088_v42 = vld [vmem:[%s12427_s4 + $0x238] sm:$0xff]  }
 0x5c1   : > { %8133 = vmatprep.subr.bf16.mxu1 %v9081_v53 }
 0x5c3   : > { %8118 = vmatmul.mubr.bf16.gmra.mrb[192].mxu1 %v11224_v21 }
 0x5c4   : > { %8121 = vmatprep.mubr.bf16.mxu1 %v11251_v26 }
 0x5cb   : > { %8122 = vmatmul.mubr.bf16.gmra.mrb[196].mxu1 %v11274_v13 }
 0x5cc   : > { %8125 = vmatprep.mubr.bf16.mxu1 %v11301_v9 }
 0x5d3   : > { %8126 = vmatmul.mubr.bf16.gmra.mrb[200].mxu1 %v11324_v6 }
 0x5d4   : > { %8129 = vmatprep.mubr.bf16.mxu1 %v11361_v24 }
 0x5db   : > { %8130 = vmatmul.mubr.bf16.gmra.mrb[204].mxu1 %v11384_v5 }
 0x5dc   : > { %5425 = vmatprep.mubr.bf16.mxu1 %v11045_v0  ;;  %v9084_v0 = vld [vmem:[%s12427_s4 + $0x218] sm:$0xff]  }
 0x5e3   : > { %6896 = vmatmul.mubr.msk.bf16.vlgmr.msra.gmra.mrb[12].mxu1 %vm11000_vm6, %v12744_v39  ;;  %v9086_v39 = vld [vmem:[%s12427_s4 + $0x228] sm:$0xff]  }
 0x5e4   : > { %5433 = vmatprep.mubr.bf16.mxu1 %v11068_v47  ;;  %8134 = vmatpush3.bf16.msra.mxu1 %v9081_v53  ;;  %v9085_v47 = vld [vmem:[%s12427_s4 + $0x220] sm:$0xff]  }
 0x5e5   : > { %8135 = vmatprep.subr.bf16.mxu1 %v9082_v33 }
 0x5e8   : > { %8136 = vmatpush3.bf16.msra.mxu1 %v9082_v33 }
 0x5e9   : > { %8137 = vmatprep.subr.bf16.mxu1 %v9083_v36 }
 0x5eb   : > { %6899 = vmatmul.mubr.msk.bf16.gmra.mrb[16].mxu1 %vm11000_vm6, %v11047_v63  ;;  %v9087_v63 = vld [vmem:[%s12427_s4 + $0x230] sm:$0xff]  }
 0x5ec   : > { %5441 = vmatprep.mubr.bf16.mxu1 %v11098_v41  ;;  %8138 = vmatpush3.bf16.msra.mxu1 %v9083_v36 }
 0x5ed   : > { %8139 = vmatprep.subr.bf16.mxu1 %v9084_v0 }
 0x5f0   : > { %8140 = vmatpush3.bf16.msra.mxu1 %v9084_v0 }
 0x5f1   : > { %8141 = vmatprep.subr.bf16.mxu1 %v9085_v47 }
 0x5f3   : > { %6902 = vmatmul.mubr.msk.bf16.gmra.mrb[20].mxu1 %vm11000_vm6, %v11070_v17 }
 0x5f4   : > { %5449 = vmatprep.mubr.bf16.mxu1 %v11124_v60  ;;  %8142 = vmatpush3.bf16.msra.mxu1 %v9085_v47 }
 0x5f5   : > { %8143 = vmatprep.subr.bf16.mxu1 %v9086_v39 }
 0x5f6   : > { %v7385_v41 = vpop.f32.mrb[208].mxu1 }
 0x5f7   : > { %v7386_v40 = vpop.f32.mrb[209].mxu1 }
 0x5f8   : > { %v7387_v50 = vadd.f32 %v7386_v40, %v7385_v41  ;;  %v7388_v58 = vpop.f32.mrb[210].mxu1  ;;  %8144 = vmatpush3.bf16.msra.mxu1 %v9086_v39 }
 0x5f9   : > { %v7389_v46 = vpop.f32.mrb[211].mxu1  ;;  %8145 = vmatprep.subr.bf16.mxu1 %v9087_v63 }
 0x5fa   : > { %v11731_v17 = vadd.f32 %v7387_v50, %v11461_v15  ;;  %v7390_v60 = vadd.f32 %v7389_v46, %v7388_v58 }
 0x5fb   : > { %6905 = vmatmul.mubr.msk.bf16.gmra.mrb[24].mxu1 %vm11000_vm6, %v11100_v27 }
 0x5fc   : > { %v11737_v53 = vadd.f32 %v7390_v60, %v11464_v2  ;;  %5457 = vmatprep.mubr.bf16.mxu1 %v11154_v18  ;;  %8146 = vmatpush3.bf16.msra.mxu1 %v9087_v63 }
 0x5fd   : > { %8147 = vmatprep.subr.bf16.mxu1 %v9088_v42 }
 0x5fe   : > { %v7391_v33 = vpop.f32.mrb[212].mxu1 }
 0x5ff   : > { %v7392_v36 = vpop.f32.mrb[213].mxu1 }
 0x600   : > { %v7393_v0 = vadd.f32 %v7392_v36, %v7391_v33  ;;  %v7394_v47 = vpop.f32.mrb[214].mxu1  ;;  %8148 = vmatpush3.bf16.msra.mxu1 %v9088_v42 }
 0x601   : > { %v7395_v39 = vpop.f32.mrb[215].mxu1 }
 0x602   : > { %v11741_v15 = vadd.f32 %v7393_v0, %v11475_v29  ;;  %v7396_v41 = vadd.f32 %v7395_v39, %v7394_v47 }
 0x603   : > { %6908 = vmatmul.mubr.msk.bf16.gmra.mrb[28].mxu1 %vm11000_vm6, %v11129_v35 }
 0x604   : > { %v11747_v27 = vadd.f32 %v7396_v41, %v11477_v49  ;;  %5465 = vmatprep.mubr.bf16.mxu1 %v11180_v25 }
 0x606   : > { %v7397_v18 = vpop.f32.mrb[216].mxu1 }
 0x607   : > { %v7398_v2 = vpop.f32.mrb[217].mxu1 }
 0x608   : > { %v7399_v63 = vadd.f32 %v7398_v2, %v7397_v18  ;;  %v7400_v40 = vpop.f32.mrb[218].mxu1 }
 0x609   : > { %v7401_v50 = vpop.f32.mrb[219].mxu1 }
 0x60a   : > { %v11751_v58 = vadd.f32 %v7399_v63, %v11481_v14  ;;  %v7402_v29 = vadd.f32 %v7401_v50, %v7400_v40 }
 0x60b   : > { %6911 = vmatmul.mubr.msk.bf16.gmra.mrb[32].mxu1 %vm11000_vm6, %v11156_v51 }
 0x60c   : > { %v11757_v35 = vadd.f32 %v7402_v29, %v11484_v54  ;;  %5473 = vmatprep.mubr.bf16.mxu1 %v11207_v19 }
 0x60e   : > { %v7403_v49 = vpop.f32.mrb[220].mxu1 }
 0x60f   : > { %v7404_v25 = vpop.f32.mrb[221].mxu1 }
 0x610   : > { %v7405_v46 = vadd.f32 %v7404_v25, %v7403_v49  ;;  %v7406_v42 = vpop.f32.mrb[222].mxu1  ;;  %v12768_v49 = vld [vmem:[#allocation50_spill] sm:$0xff] }
 0x611   : > { %v7407_v60 = vpop.f32.mrb[223].mxu1 }
 0x612   : > { %v11761_v33 = vadd.f32 %v7405_v46, %v11492_v8  ;;  %v7408_v14 = vadd.f32 %v7407_v60, %v7406_v42  ;;  %v12769_v46 = vld [vmem:[#allocation44_spill] sm:$0xff]  ;;  %v12770_v42 = vld [vmem:[#allocation47_spill] sm:$0xff] }
 0x613   : > { %6914 = vmatmul.mubr.msk.bf16.gmra.mrb[36].mxu1 %vm11000_vm6, %v11182_v59 }
 0x614   : > { %v11767_v51 = vadd.f32 %v7408_v14, %v11497_v4  ;;  %5481 = vmatprep.mubr.bf16.mxu1 %v11230_v48 }
 0x616   : > { %v7409_v54 = vpop.f32.mrb[224].mxu1 }
 0x617   : > { %v7410_v19 = vpop.f32.mrb[225].mxu1 }
 0x618   : > { %v7411_v36 = vadd.f32 %v7410_v19, %v7409_v54  ;;  %v7412_v0 = vpop.f32.mrb[226].mxu1 }
 0x619   : > { %v7413_v47 = vpop.f32.mrb[227].mxu1 }
 0x61a   : > { %v11771_v39 = vadd.f32 %v7411_v36, %v11507_v44  ;;  %v7414_v8 = vadd.f32 %v7413_v47, %v7412_v0  ;;  %v12772_v36 = vld [vmem:[#allocation40_spill] sm:$0xff] }
 0x61b   : > { %6917 = vmatmul.mubr.msk.bf16.gmra.mrb[40].mxu1 %vm11000_vm6, %v11209_v22 }
 0x61c   : > { %v11777_v59 = vadd.f32 %v7414_v8, %v11512_v55  ;;  %5489 = vmatprep.mubr.bf16.mxu1 %v11257_v11  ;;  %v12773_v8 = vld [vmem:[#allocation4_spill] sm:$0xff] }
 0x61e   : > { %v7415_v4 = vpop.f32.mrb[228].mxu1 }
 0x61f   : > { %v7416_v48 = vpop.f32.mrb[229].mxu1 }
 0x620   : > { %v7417_v41 = vadd.f32 %v7416_v48, %v7415_v4  ;;  %v7418_v18 = vpop.f32.mrb[230].mxu1 }
 0x621   : > { %v7419_v2 = vpop.f32.mrb[231].mxu1 }
 0x622   : > { %v11781_v63 = vadd.f32 %v7417_v41, %v11528_v61  ;;  %v7420_v44 = vadd.f32 %v7419_v2, %v7418_v18 }
 0x623   : > { %6920 = vmatmul.mubr.msk.bf16.gmra.mrb[44].mxu1 %vm11000_vm6, %v11232_v28 }
 0x624   : > { %v11787_v22 = vadd.f32 %v7420_v44, %v11533_v57  ;;  %5497 = vmatprep.mubr.bf16.mxu1 %v11280_v43  ;;  %v12771_v57 = vld [vmem:[#allocation3_spill] sm:$0xff] }
 0x626   : > { %v7421_v55 = vpop.f32.mrb[232].mxu1 }
 0x627   : > { %v7422_v11 = vpop.f32.mrb[233].mxu1 }
 0x628   : > { %v7423_v40 = vadd.f32 %v7422_v11, %v7421_v55  ;;  %v7424_v50 = vpop.f32.mrb[234].mxu1  ;;  %v12774_v55 = vld [vmem:[#allocation57_spill] sm:$0xff] }
 0x629   : > { %v7425_v29 = vpop.f32.mrb[235].mxu1 }
 0x62a   : > { %v11791_v25 = vadd.f32 %v7423_v40, %v12768_v49  ;;  %v7426_v61 = vadd.f32 %v7425_v29, %v7424_v50  ;;  %v12775_v50 = vld [vmem:[#allocation45_spill] sm:$0xff] }
 0x62b   : > { %6923 = vmatmul.mubr.msk.bf16.gmra.mrb[48].mxu1 %vm11000_vm6, %v12769_v46  ;;  %v12776_v29 = vld [vmem:[#allocation25_spill] sm:$0xff] }
 0x62c   : > { %v11797_v28 = vadd.f32 %v7426_v61, %v12770_v42  ;;  %5505 = vmatprep.mubr.bf16.mxu1 %v12771_v57  ;;  %v12777_v57 = vld [vmem:[#allocation51_spill] sm:$0xff] }
 0x62e   : > { %v7427_v60 = vpop.f32.mrb[236].mxu1 }
 0x62f   : > { %v7428_v43 = vpop.f32.mrb[237].mxu1 }
 0x630   : > { %v7429_v14 = vadd.f32 %v7428_v43, %v7427_v60  ;;  %v7430_v54 = vpop.f32.mrb[238].mxu1 }
 0x631   : > { %v7431_v19 = vpop.f32.mrb[239].mxu1 }
 0x632   : > { %v11801_v0 = vadd.f32 %v7429_v14, %v12772_v36  ;;  %v7432_v47 = vadd.f32 %v7431_v19, %v7430_v54  ;;  %v12778_v14 = vld [vmem:[#allocation48_spill] sm:$0xff] }
 0x633   : > { %6926 = vmatmul.mubr.msk.bf16.gmra.mrb[52].mxu1 %vm11000_vm6, %v12757_v56 }
 0x634   : > { %v11807_v4 = vadd.f32 %v7432_v47, %v12773_v8  ;;  %5513 = vmatprep.mubr.bf16.mxu1 %v12758_v37 }
 0x636   : > { %v7433_v48 = vpop.f32.mrb[240].mxu1 }
 0x637   : > { %v7434_v41 = vpop.f32.mrb[241].mxu1 }
 0x638   : > { %v7435_v18 = vadd.f32 %v7434_v41, %v7433_v48  ;;  %v7436_v2 = vpop.f32.mrb[242].mxu1  ;;  %v12779_v48 = vld [vmem:[#allocation58_spill] sm:$0xff] }
 0x639   : > { %v7437_v44 = vpop.f32.mrb[243].mxu1 }
 0x63a   : > { %v11811_v11 = vadd.f32 %v7435_v18, %v12774_v55  ;;  %v7438_v40 = vadd.f32 %v7437_v44, %v7436_v2  ;;  %v12780_v2 = vld [vmem:[#allocation26_spill] sm:$0xff]  ;;  %v12781_v44 = vld [vmem:[#allocation24_spill] sm:$0xff] }
 0x63b   : > { %6929 = vmatmul.mubr.msk.bf16.gmra.mrb[56].mxu1 %vm11000_vm6, %v12775_v50 }
 0x63c   : > { %v11817_v56 = vadd.f32 %v7438_v40, %v12776_v29  ;;  %5521 = vmatprep.mubr.bf16.mxu1 %v11367_v10 }
 0x63e   : > { %v7439_v49 = vpop.f32.mrb[244].mxu1 }
 0x63f   : > { %v7440_v37 = vpop.f32.mrb[245].mxu1 }
 0x640   : > { %v7441_v61 = vadd.f32 %v7440_v37, %v7439_v49  ;;  %v7442_v46 = vpop.f32.mrb[246].mxu1  ;;  %v12782_v49 = vld [vmem:[#allocation27_spill] sm:$0xff] }
 0x641   : > { %v7443_v42 = vpop.f32.mrb[247].mxu1 }
 0x642   : > { %v11821_v60 = vadd.f32 %v7441_v61, %v12777_v57  ;;  %v7444_v43 = vadd.f32 %v7443_v42, %v7442_v46  ;;  %v12783_v46 = vld [vmem:[#allocation22_spill] sm:$0xff]  ;;  %v12784_v42 = vld [vmem:[#allocation28_spill] sm:$0xff] }
 0x643   : > { %6932 = vmatmul.mubr.msk.bf16.gmra.mrb[108].mxu1 %vm11000_vm6, %v12762_v31  ;;  %v12785_v57 = vld [vmem:[#allocation56_spill] sm:$0xff] }
 0x644   : > { %v11827_v54 = vadd.f32 %v7444_v43, %v12778_v14  ;;  %5529 = vmatprep.mubr.bf16.mxu1 %v11390_v16 }
 0x646   : > { %v7445_v19 = vpop.f32.mrb[248].mxu1 }
 0x647   : > { %v7446_v10 = vpop.f32.mrb[249].mxu1 }
 0x648   : > { %v7447_v36 = vadd.f32 %v7446_v10, %v7445_v19  ;;  %v7448_v47 = vpop.f32.mrb[250].mxu1 }
 0x649   : > { %v7449_v8 = vpop.f32.mrb[251].mxu1 }
 0x64a   : > { %v11831_v41 = vadd.f32 %v7447_v36, %v12779_v48  ;;  %v7450_v18 = vadd.f32 %v7449_v8, %v7448_v47  ;;  %v12786_v47 = vld [vmem:[#allocation67_spill] sm:$0xff] }
 0x64b   : > { %6935 = vmatmul.mubr.msk.bf16.gmra.mrb[60].mxu1 %vm11000_vm6, %v11369_v12 }
 0x64c   : > { %v11837_v31 = vadd.f32 %v7450_v18, %v12780_v2  ;;  %5537 = vmatprep.mubr.bf16.mxu1 %v12781_v44  ;;  %v12787_v18 = vld [vmem:[#allocation62_spill] sm:$0xff] }
 0x64e   : > { %v7451_v55 = vpop.f32.mrb[252].mxu1 }
 0x64f   : > { %v7452_v16 = vpop.f32.mrb[253].mxu1 }
 0x650   : > { %v7453_v40 = vadd.f32 %v7452_v16, %v7451_v55  ;;  %v7454_v50 = vpop.f32.mrb[254].mxu1 }
 0x651   : > { %v7455_v29 = vpop.f32.mrb[255].mxu1 }
 0x652   : > { %v11841_v37 = vadd.f32 %v7453_v40, %v12782_v49  ;;  %v7456_v61 = vadd.f32 %v7455_v29, %v7454_v50  ;;  %v12788_v50 = vld [vmem:[#allocation59_spill] sm:$0xff] }
 0x653   : > { %6938 = vmatmul.mubr.msk.bf16.gmra.mrb[64].mxu1 %vm11000_vm6, %v12783_v46 }
 0x654   : > { %v11847_v12 = vadd.f32 %v7456_v61, %v12784_v42  ;;  %5545 = vmatprep.mubr.bf16.mxu1 %v12785_v57  ;;  %v12789_v61 = vld [vmem:[#allocation5_spill] sm:$0xff] }
 0x656   : > { %v7457_v43 = vpop.f32.mrb[0].mxu1 }
 0x657   : > { %v7458_v14 = vpop.f32.mrb[1].mxu1 }
 0x658   : > { %v7459_v19 = vadd.f32 %v7458_v14, %v7457_v43  ;;  %v7460_v10 = vpop.f32.mrb[2].mxu1 }
 0x659   : > { %v7461_v36 = vpop.f32.mrb[3].mxu1 }
 0x65a   : > { %v11851_v8 = vadd.f32 %v7459_v19, %v12786_v47  ;;  %v7462_v48 = vadd.f32 %v7461_v36, %v7460_v10  ;;  %v12790_v10 = vld [vmem:[#allocation68_spill] sm:$0xff] }
 0x65b   : > { %5546 = vmatmul.mubr.bf16.gmra.mrb[68].mxu1 %v12764_v20 }
 0x65c   : > { %v11855_v2 = vadd.f32 %v7462_v48, %v12787_v18  ;;  %8149 = vmatprep.mubr.bf16.mxu1 %v11039_v34 }
 0x65e   : > { %v7463_v3 = vpop.f32.mrb[104].mxu1 }
 0x65f   : > { %v7464_v44 = vpop.f32.mrb[105].mxu1 }
 0x660   : > { %v7465_v55 = vadd.f32 %v7464_v44, %v7463_v3  ;;  %v7466_v16 = vpop.f32.mrb[106].mxu1 }
 0x661   : > { %v7467_v40 = vpop.f32.mrb[107].mxu1 }
 0x662   : > { %v11859_v29 = vadd.f32 %v7465_v55, %v12788_v50  ;;  %v7468_v49 = vadd.f32 %v7467_v40, %v7466_v16 }
 0x663   : > { %8150 = vmatmul.mubr.bf16.vlgmr.msra.gmra.mrb[176].mxu1 %v11062_v45 }
 0x664   : > { %v11863_v46 = vadd.f32 %v7468_v49, %v12789_v61  ;;  %8153 = vmatprep.mubr.bf16.mxu1 %v11092_v32  ;;  %v9095_v49 = vld [vmem:[%s12430_s7 + $0x30] sm:$0xff]  }
 0x666   : > { %v7469_v20 = vpop.f32.mrb[4].mxu1 }
 0x667   : > { %v7470_v42 = vpop.f32.mrb[5].mxu1 }
 0x668   : > { %v7471_v57 = vadd.f32 %v7470_v42, %v7469_v20  ;;  %v7472_v34 = vpop.f32.mrb[6].mxu1 }
 0x669   : > { %v7473_v43 = vpop.f32.mrb[7].mxu1 }
 0x66a   : > { %v11867_v14 = vadd.f32 %v7471_v57, %v11631_v23  ;;  %v7474_v19 = vadd.f32 %v7473_v43, %v7472_v34 }
 0x66b   : > { %8154 = vmatmul.mubr.bf16.gmra.mrb[180].mxu1 %v11118_v38  ;;  %v9089_v38 = vld [vmem:[%s12430_s7] sm:$0xff]  }
 0x66c   : > { %v11871_v36 = vadd.f32 %v7474_v19, %v12790_v10  ;;  %8157 = vmatprep.mubr.bf16.mxu1 %v11148_v1  ;;  %8181 = vmatprep.subr.bf16.mxu1 %v9089_v38  ;;  %v9090_v1 = vld [vmem:[%s12430_s7 + $0x8] sm:$0xff]  }
 0x66d   : > { %8182 = vmatpush3.bf16.msra.mxu1 %v9089_v38 }
 0x66e   : > { %v7475_v45 = vpop.f32.mrb[8].mxu1  ;;  %8183 = vmatprep.subr.bf16.mxu1 %v9090_v1 }
 0x66f   : > { %v7476_v47 = vpop.f32.mrb[9].mxu1 }
 0x670   : > { %v7477_v48 = vadd.f32 %v7476_v47, %v7475_v45  ;;  %v7478_v32 = vpop.f32.mrb[10].mxu1 }
 0x671   : > { %v7479_v18 = vpop.f32.mrb[11].mxu1  ;;  %8184 = vmatpush3.bf16.msra.mxu1 %v9090_v1 }
 0x672   : > { %v11875_v3 = vadd.f32 %v7477_v48, %v11657_v52  ;;  %v7480_v44 = vadd.f32 %v7479_v18, %v7478_v32 }
 0x673   : > { %8158 = vmatmul.mubr.bf16.gmra.mrb[184].mxu1 %v11174_v7  ;;  %v12791_v7 = vld [vmem:[#allocation23_spill] sm:$0xff] }
 0x674   : > { %v11879_v23 = vadd.f32 %v7480_v44, %v11665_v30  ;;  %8161 = vmatprep.mubr.bf16.mxu1 %v11201_v62  ;;  %v9091_v62 = vld [vmem:[%s12430_s7 + $0x10] sm:$0xff]  }
 0x675   : > { %8185 = vmatprep.subr.bf16.mxu1 %v9091_v62 }
 0x676   : > { %8186 = vmatpush3.bf16.msra.mxu1 %v9091_v62 }
 0x67b   : > { %8162 = vmatmul.mubr.bf16.gmra.mrb[188].mxu1 %v11224_v21  ;;  %v12792_v21 = vld [vmem:[#allocation52_spill] sm:$0xff] }
 0x67c   : > { %8165 = vmatprep.mubr.bf16.mxu1 %v11251_v26  ;;  %v9092_v26 = vld [vmem:[%s12430_s7 + $0x18] sm:$0xff]  }
 0x67d   : > { %8187 = vmatprep.subr.bf16.mxu1 %v9092_v26 }
 0x67e   : > { %8188 = vmatpush3.bf16.msra.mxu1 %v9092_v26 }
 0x683   : > { %8166 = vmatmul.mubr.bf16.gmra.mrb[192].mxu1 %v11274_v13  ;;  %v9093_v13 = vld [vmem:[%s12430_s7 + $0x20] sm:$0xff]  }
 0x684   : > { %8169 = vmatprep.mubr.bf16.mxu1 %v11301_v9  ;;  %8189 = vmatprep.subr.bf16.mxu1 %v9093_v13  ;;  %v9094_v9 = vld [vmem:[%s12430_s7 + $0x28] sm:$0xff]  }
 0x685   : > { %8190 = vmatpush3.bf16.msra.mxu1 %v9093_v13 }
 0x686   : > { %8191 = vmatprep.subr.bf16.mxu1 %v9094_v9 }
 0x689   : > { %8192 = vmatpush3.bf16.msra.mxu1 %v9094_v9 }
 0x68a   : > { %8193 = vmatprep.subr.bf16.mxu1 %v9095_v49 }
 0x68b   : > { %8170 = vmatmul.mubr.bf16.gmra.mrb[196].mxu1 %v11324_v6 }
 0x68c   : > { %8173 = vmatprep.mubr.bf16.mxu1 %v11361_v24 }
 0x68d   : > { %8194 = vmatpush3.bf16.msra.mxu1 %v9095_v49 }
 0x693   : > { %8174 = vmatmul.mubr.bf16.gmra.mrb[200].mxu1 %v11384_v5 }
 0x694   : > { %8177 = vmatprep.mubr.bf16.mxu1 %v12791_v7 }
 0x69b   : > { %8178 = vmatmul.mubr.bf16.gmra.mrb[204].mxu1 %v12792_v21 }
 0x6b6   : > { %v7521_v6 = vpop.f32.mrb[12].mxu1 }
 0x6b7   : > { %v7522_v24 = vpop.f32.mrb[13].mxu1 }
 0x6b8   : > { %v7523_v5 = vadd.f32 %v7522_v24, %v7521_v6  ;;  %v7524_v30 = vpop.f32.mrb[14].mxu1 }
 0x6b9   : > { %v7525_v52 = vpop.f32.mrb[15].mxu1 }
 0x6ba   : > { %v7526_v55 = vadd.f32 %v7525_v52, %v7524_v30  ;;  %v11910_v16 = vadd.f32 %v11731_v17, %v7523_v5  ;;  %v9096_v17 = vld [vmem:[%s12430_s7 + $0x38] sm:$0xff]  }
 0x6bb   : > { %8195 = vmatprep.subr.bf16.mxu1 %v9096_v17 }
 0x6bc   : > { %v11913_v40 = vadd.f32 %v11737_v53, %v7526_v55  ;;  %8196 = vmatpush3.bf16.msra.mxu1 %v9096_v17 }
 0x6be   : > { %v7527_v50 = vpop.f32.mrb[16].mxu1 }
 0x6bf   : > { %v7528_v61 = vpop.f32.mrb[17].mxu1 }
 0x6c0   : > { %v7529_v20 = vadd.f32 %v7528_v61, %v7527_v50  ;;  %v7530_v42 = vpop.f32.mrb[18].mxu1 }
 0x6c1   : > { %v7531_v57 = vpop.f32.mrb[19].mxu1 }
 0x6c2   : > { %v7532_v34 = vadd.f32 %v7531_v57, %v7530_v42  ;;  %v11919_v43 = vadd.f32 %v11741_v15, %v7529_v20 }
 0x6c4   : > { %v11925_v53 = vadd.f32 %v11747_v27, %v7532_v34 }
 0x6c6   : > { %v7533_v19 = vpop.f32.mrb[20].mxu1 }
 0x6c7   : > { %v7534_v10 = vpop.f32.mrb[21].mxu1 }
 0x6c8   : > { %v7535_v45 = vadd.f32 %v7534_v10, %v7533_v19  ;;  %v7536_v47 = vpop.f32.mrb[22].mxu1 }
 0x6c9   : > { %v7537_v48 = vpop.f32.mrb[23].mxu1 }
 0x6ca   : > { %v7538_v32 = vadd.f32 %v7537_v48, %v7536_v47  ;;  %v11928_v18 = vadd.f32 %v11751_v58, %v7535_v45 }
 0x6cc   : > { %v11931_v15 = vadd.f32 %v11757_v35, %v7538_v32 }
 0x6ce   : > { %v7539_v44 = vpop.f32.mrb[24].mxu1 }
 0x6cf   : > { %v7540_v38 = vpop.f32.mrb[25].mxu1 }
 0x6d0   : > { %v7541_v1 = vadd.f32 %v7540_v38, %v7539_v44  ;;  %v7542_v7 = vpop.f32.mrb[26].mxu1 }
 0x6d1   : > { %v7543_v27 = vpop.f32.mrb[27].mxu1 }
 0x6d2   : > { %v7544_v62 = vadd.f32 %v7543_v27, %v7542_v7  ;;  %v11934_v21 = vadd.f32 %v11761_v33, %v7541_v1 }
 0x6d4   : > { %v11937_v26 = vadd.f32 %v11767_v51, %v7544_v62 }
 0x6d6   : > { %v7545_v13 = vpop.f32.mrb[28].mxu1 }
 0x6d7   : > { %v7546_v9 = vpop.f32.mrb[29].mxu1 }
 0x6d8   : > { %v7547_v6 = vadd.f32 %v7546_v9, %v7545_v13  ;;  %v7548_v58 = vpop.f32.mrb[30].mxu1 }
 0x6d9   : > { %v7549_v24 = vpop.f32.mrb[31].mxu1 }
 0x6da   : > { %v7550_v5 = vadd.f32 %v7549_v24, %v7548_v58  ;;  %v11940_v35 = vadd.f32 %v11771_v39, %v7547_v6  ;;  %v12793_v58 = vld [vmem:[#allocation37_spill] sm:$0xff] }
 0x6db   : > { %v2779_v24 = vunpack.c.h.b16 %v12793_v58 }
 0x6dc   : > { %v11943_v30 = vadd.f32 %v11777_v59, %v7550_v5 }
 0x6de   : > { %v7551_v52 = vpop.f32.mrb[32].mxu1 }
 0x6df   : > { %v7552_v55 = vpop.f32.mrb[33].mxu1 }
 0x6e0   : > { %v7553_v50 = vadd.f32 %v7552_v55, %v7551_v52  ;;  %v7554_v33 = vpop.f32.mrb[34].mxu1 }
 0x6e1   : > { %v7555_v49 = vpop.f32.mrb[35].mxu1 }
 0x6e2   : > { %v7556_v61 = vadd.f32 %v7555_v49, %v7554_v33  ;;  %v11946_v51 = vadd.f32 %v11781_v63, %v7553_v50 }
 0x6e4   : > { %v11949_v20 = vadd.f32 %v11787_v22, %v7556_v61 }
 0x6e6   : > { %v7557_v42 = vpop.f32.mrb[36].mxu1 }
 0x6e7   : > { %v7558_v57 = vpop.f32.mrb[37].mxu1 }
 0x6e8   : > { %v7559_v34 = vadd.f32 %v7558_v57, %v7557_v42  ;;  %v7560_v39 = vpop.f32.mrb[38].mxu1 }
 0x6e9   : > { %v7561_v17 = vpop.f32.mrb[39].mxu1 }
 0x6ea   : > { %v7562_v19 = vadd.f32 %v7561_v17, %v7560_v39  ;;  %v11952_v59 = vadd.f32 %v11791_v25, %v7559_v34 }
 0x6ec   : > { %v11955_v10 = vadd.f32 %v11797_v28, %v7562_v19 }
 0x6ee   : > { %v7563_v45 = vpop.f32.mrb[40].mxu1 }
 0x6ef   : > { %v7564_v47 = vpop.f32.mrb[41].mxu1 }
 0x6f0   : > { %v7565_v48 = vadd.f32 %v7564_v47, %v7563_v45  ;;  %v7566_v63 = vpop.f32.mrb[42].mxu1 }
 0x6f1   : > { %v7567_v32 = vpop.f32.mrb[43].mxu1 }
 0x6f2   : > { %v7568_v44 = vadd.f32 %v7567_v32, %v7566_v63  ;;  %v11958_v22 = vadd.f32 %v11801_v0, %v7565_v48  ;;  %v12794_v0 = vld [vmem:[#allocation17_spill] sm:$0xff] }
 0x6f3   : > { %v12795_v5 = vrot.slane %v12794_v0, 1 }
 0x6f4   : > { %v11961_v38 = vadd.f32 %v11807_v4, %v7568_v44 }
 0x6f5   : > { %v2781_v52 = vunpack.c.l.b16 %v12795_v5 }
 0x6f6   : > { %v7569_v1 = vpop.f32.mrb[44].mxu1 }
 0x6f7   : > { %v7570_v7 = vpop.f32.mrb[45].mxu1  ;;  %v2837_v33 = vpack.c.b16 %v2781_v52, %v2779_v24 }
 0x6f8   : > { %v7571_v27 = vadd.f32 %v7570_v7, %v7569_v1  ;;  %v7572_v25 = vpop.f32.mrb[46].mxu1 }
 0x6f9   : > { %v7573_v62 = vpop.f32.mrb[47].mxu1  ;;  %8034 = vmatmul.mubr.bf16.gmra.mrb[132].mxu0 %v2837_v33  ;;  %v9130_v33 = vld [vmem:[%s9276_s24 + $0x34] sm:$0xf] }
 0x6fa   : > { %v7574_v13 = vadd.f32 %v7573_v62, %v7572_v25  ;;  %v11964_v28 = vadd.f32 %v11811_v11, %v7571_v27 }
 0x6fc   : > { %v11967_v9 = vadd.f32 %v11817_v56, %v7574_v13 }
 0x6fe   : > { %v7575_v6 = vpop.f32.mrb[48].mxu1 }
 0x6ff   : > { %v7576_v4 = vpop.f32.mrb[49].mxu1 }
 0x700   : > { %v7577_v55 = vadd.f32 %v7576_v4, %v7575_v6  ;;  %v7578_v50 = vpop.f32.mrb[50].mxu1 }
 0x701   : > { %v7579_v49 = vpop.f32.mrb[51].mxu1 }
 0x702   : > { %v7580_v61 = vadd.f32 %v7579_v49, %v7578_v50  ;;  %v11973_v42 = vadd.f32 %v11821_v60, %v7577_v55  ;;  %v5837_v49 = vrot.slane %v9130_v33, 5 }
 0x704   : > { %v11976_v11 = vadd.f32 %v11827_v54, %v7580_v61 }
 0x706   : > { %v7581_v56 = vpop.f32.mrb[52].mxu1 }
 0x707   : > { %v7582_v57 = vpop.f32.mrb[53].mxu1 }
 0x708   : > { %v7583_v34 = vadd.f32 %v7582_v57, %v7581_v56  ;;  %v7584_v39 = vpop.f32.mrb[54].mxu1 }
 0x709   : > { %v7585_v17 = vpop.f32.mrb[55].mxu1 }
 0x70a   : > { %v7586_v19 = vadd.f32 %v7585_v17, %v7584_v39  ;;  %v11979_v45 = vadd.f32 %v11831_v41, %v7583_v34  ;;  %v9131_v39 = vld [vmem:[%s9276_s24 + $0x20] sm:$0xf]  ;;  %v9132_v17 = vld [vmem:[%s9276_s24 + $0x24] sm:$0xf] }
 0x70c   : > { %v11982_v47 = vadd.f32 %v11837_v31, %v7586_v19  ;;  %v5830_v19 = vrot.slane %v9132_v17, 5 }
 0x70e   : > { %v7587_v48 = vpop.f32.mrb[56].mxu1 }
 0x70f   : > { %v7588_v63 = vpop.f32.mrb[57].mxu1 }
 0x710   : > { %v7589_v60 = vadd.f32 %v7588_v63, %v7587_v48  ;;  %v7590_v32 = vpop.f32.mrb[58].mxu1 }
 0x711   : > { %v7591_v44 = vpop.f32.mrb[59].mxu1 }
 0x712   : > { %v7592_v1 = vadd.f32 %v7591_v44, %v7590_v32  ;;  %v11985_v54 = vadd.f32 %v11841_v37, %v7589_v60  ;;  %v9133_v60 = vld [vmem:[%s9276_s24 + $0x54] sm:$0xf] }
 0x713   : > { %v5851_v32 = vrot.slane %v9133_v60, 5 }
 0x714   : > { %v11988_v7 = vadd.f32 %v11847_v12, %v7592_v1  ;;  %v9134_v1 = vld [vmem:[%s9276_s24 + $0x38] sm:$0xf] }
 0x716   : > { %v7593_v27 = vpop.f32.mrb[108].mxu1 }
 0x717   : > { %v7594_v25 = vpop.f32.mrb[109].mxu1 }
 0x718   : > { %v7595_v62 = vadd.f32 %v7594_v25, %v7593_v27  ;;  %v7596_v41 = vpop.f32.mrb[110].mxu1  ;;  %v5840_v27 = vrot.slane %v9134_v1, 5  ;;  %v9135_v25 = vld [vmem:[%s9276_s24 + $0x44] sm:$0xf] }
 0x719   : > { %v7597_v13 = vpop.f32.mrb[111].mxu1 }
 0x71a   : > { %v7598_v31 = vadd.f32 %v7597_v13, %v7596_v41  ;;  %v11991_v6 = vadd.f32 %v11851_v8, %v7595_v62  ;;  %v5844_v62 = vrot.slane %v9135_v25, 5  ;;  %v5839_v41 = vrot.slane %v5837_v49, 4  ;;  %v9136_v13 = vld [vmem:[%s9276_s24 + $0x74] sm:$0xf] }
 0x71c   : > { %v11994_v58 = vadd.f32 %v11855_v2, %v7598_v31  ;;  %v9129_v2 = vld [vmem:[%s9276_s24 + $0x30] sm:$0xf]  ;;  %v5865_v31 = vrot.slane %v9136_v13, 5 }
 0x71d   : > { %v6942_v50 = vrot.slane %v9129_v2, 9 }
 0x71e   : > { %v7599_v24 = vpop.f32.mrb[60].mxu1 }
 0x71f   : > { %v7600_v37 = vpop.f32.mrb[61].mxu1  ;;  %v12012_v63 = vsel %vm12004_vm9, %v6942_v50, %v5837_v49  ;;  %v9139_v50 = vld [vmem:[%s9276_s24 + $0x50] sm:$0xf]  ;;  %v5853_v49 = vrot.slane %v5851_v32, 4 }
 0x720   : > { %v7601_v0 = vadd.f32 %v7600_v37, %v7599_v24  ;;  %v7602_v5 = vpop.f32.mrb[62].mxu1  ;;  %v9137_v24 = vld [vmem:[%s9276_s24 + $0x28] sm:$0xf]  ;;  %v6944_v33 = vrot.slane %v9139_v50, 9  ;;  %v9145_v50 = vld [vmem:[%s9276_s24 + $0x78] sm:$0xf] }
 0x721   : > { %v7603_v12 = vpop.f32.mrb[63].mxu1  ;;  %v5833_v37 = vrot.slane %v9137_v24, 5  ;;  %v12039_v24 = vsel %vm12004_vm9, %v5839_v41, %v5840_v27 }
 0x722   : > { %v7604_v52 = vadd.f32 %v7603_v12, %v7602_v5  ;;  %v11997_v4 = vadd.f32 %v11859_v29, %v7601_v0  ;;  %v5832_v12 = vrot.slane %v5830_v19, 4  ;;  %v12050_v27 = vsel %vm12004_vm9, %v6944_v33, %v5851_v32 }
 0x724   : > { %v12000_v55 = vadd.f32 %v11863_v46, %v7604_v52  ;;  %v6941_v46 = vrot.slane %v9131_v39, 9  ;;  %v9138_v52 = vld [vmem:[%s9276_s24 + $0x64] sm:$0xf]  ;;  %v9142_v39 = vld [vmem:[%s9276_s24 + $0x70] sm:$0xf] }
 0x725   : > { %v6946_v17 = vrot.slane %v9142_v39, 9  ;;  %v12044_v39 = vsel %vm12004_vm9, %v5832_v12, %v5833_v37 }
 0x726   : > { %v7605_v8 = vpop.f32.mrb[64].mxu1 }
 0x727   : > { %v7606_v61 = vpop.f32.mrb[65].mxu1  ;;  %v12065_v12 = vsel %vm12004_vm9, %v6946_v17, %v5865_v31 }
 0x728   : > { %v7607_v29 = vadd.f32 %v7606_v61, %v7605_v8  ;;  %v7608_v57 = vpop.f32.mrb[66].mxu1  ;;  %v5858_v8 = vrot.slane %v9138_v52, 5  ;;  %v9140_v61 = vld [vmem:[%s9276_s24 + $0x58] sm:$0xf]  ;;  %v5867_v52 = vrot.slane %v5865_v31, 4 }
 0x729   : > { %v7609_v34 = vpop.f32.mrb[67].mxu1 }
 0x72a   : > { %v7610_v48 = vadd.f32 %v7609_v34, %v7608_v57  ;;  %v12016_v44 = vadd.f32 %v11867_v14, %v7607_v29  ;;  %v12028_v14 = vsel %vm12004_vm9, %v6941_v46, %v5830_v19  ;;  %v5854_v29 = vrot.slane %v9140_v61, 5  ;;  %v9144_v19 = vld [vmem:[%s9276_s24 + $0x60] sm:$0xf] }
 0x72b   : > { %v5846_v46 = vrot.slane %v5844_v62, 4  ;;  %v6945_v1 = vrot.slane %v9144_v19, 9  ;;  %v5868_v61 = vrot.slane %v9145_v50, 5  ;;  %v5860_v5 = vrot.slane %v5858_v8, 4  ;;  %v9146_v19 = vld [vmem:[%s9276_s24 + $0x68] sm:$0xf] }
 0x72c   : > { %12798 = vst [vmem:[#allocation30_spill] sm:$0xff] %v12016_v44  ;;  %v12023_v0 = vadd.f32 %v11871_v36, %v7610_v48  ;;  %v9141_v36 = vld [vmem:[%s9276_s24 + $0x40] sm:$0xf]  ;;  %v9143_v48 = vld [vmem:[%s9276_s24 + $0x48] sm:$0xf]  ;;  %v12061_v37 = vsel %vm12004_vm9, %v5853_v49, %v5854_v29 }
 0x72d   : > { %v6943_v57 = vrot.slane %v9141_v36, 9  ;;  %v5847_v60 = vrot.slane %v9143_v48, 5  ;;  %v12073_v32 = vsel %vm12004_vm9, %v6945_v1, %v5858_v8  ;;  %v9148_v49 = vld [vmem:[%s9276_s24 + $0x94] sm:$0xf]  ;;  %v12094_v1 = vld [vmem:[%s12428_s5] ss:$0 sm:$0xff] }
 0x72e   : > { %12799 = vst [vmem:[#allocation63_spill] sm:$0xff] %v12023_v0  ;;  %v7611_v2 = vpop.f32.mrb[68].mxu1  ;;  %v5879_v29 = vrot.slane %v9148_v49, 5  ;;  %v9152_v48 = vld [vmem:[%s9276_s24 + $0x88] sm:$0xf] }
 0x72f   : > { %v7612_v34 = vpop.f32.mrb[69].mxu1  ;;  %v12054_v41 = vsel %vm12004_vm9, %v6943_v57, %v5844_v62  ;;  %v9147_v62 = vld [vmem:[%s9276_s24 + $0x90] sm:$0xf]  ;;  %v5975_v57 = vunpack.c.l.bf16 %v12039_v24  ;;  %v9155_v44 = vld [vmem:[%s9276_s24 + $0xa4] sm:$0xf] }
 0x730   : > { %v7613_v25 = vadd.f32 %v7612_v34, %v7611_v2  ;;  %v7614_v13 = vpop.f32.mrb[70].mxu1  ;;  %v5861_v2 = vrot.slane %v9146_v19, 5  ;;  %v6948_v33 = vrot.slane %v9147_v62, 9 }
 0x731   : > { %v7615_v36 = vpop.f32.mrb[71].mxu1 }
 0x732   : > { %v7616_v34 = vadd.f32 %v7615_v36, %v7614_v13  ;;  %v12057_v50 = vadd.f32 %v11875_v3, %v7613_v25  ;;  %v12069_v13 = vsel %vm12004_vm9, %v5846_v46, %v5847_v60  ;;  %v12077_v3 = vsel %vm12004_vm9, %v5867_v52, %v5868_v61  ;;  %v9149_v52 = vld [vmem:[%s9276_s24 + $0x84] sm:$0xf]  ;;  %v9151_v25 = vld [vmem:[%s9276_s24 + $0x98] sm:$0xf] }
 0x733   : > { %v5973_v46 = vunpack.c.l.bf16 %v12044_v39  ;;  %v12089_v8 = vsel %vm12004_vm9, %v5860_v5, %v5861_v2  ;;  %v5872_v61 = vrot.slane %v9149_v52, 5  ;;  %v9150_v52 = vld [vmem:[%s9276_s24 + $0x80] sm:$0xf] }
 0x734   : > { %12800 = vst [vmem:[#allocation60_spill] sm:$0xff] %v12057_v50  ;;  %v12082_v31 = vadd.f32 %v11879_v23, %v7616_v34  ;;  %v12107_v34 = vld [vmem:[%s12429_s6] ss:$0 sm:$0xff]  ;;  %v6947_v19 = vrot.slane %v9150_v52, 9  ;;  %v5881_v23 = vrot.slane %v5879_v29, 4 }
 0x735   : > { %v5874_v17 = vrot.slane %v5872_v61, 4 }
 0x736   : > { %12801 = vst [vmem:[#allocation69_spill] sm:$0xff] %v12082_v31  ;;  %v8151_v60 = vpop.f32.mrb[176].mxu1  ;;  %v9153_v31 = vld [vmem:[%s9276_s24 + $0xb0] sm:$0xf] }
 0x737   : > { %v8295_v36 = vadd.f32 %v11919_v43, %v8151_v60  ;;  %v5588_v5 = vpop.f32.mrb[177].mxu1  ;;  %v12112_v43 = vsel %vm12004_vm9, %v6948_v33, %v5879_v29  ;;  %v5875_v60 = vrot.slane %v9152_v48, 5 }
 0x738   : > { %v8298_v62 = vadd.f32 %v11910_v16, %v5588_v5  ;;  %v8152_v49 = vpop.f32.mrb[178].mxu1  ;;  %v5882_v16 = vrot.slane %v9151_v25, 5 }
 0x739   : > { %v5756_v2 = vmul.f32 %v8295_v36, %v12094_v1  ;;  %v8301_v39 = vadd.f32 %v11925_v53, %v8152_v49  ;;  %v5591_v24 = vpop.f32.mrb[179].mxu1  ;;  %v6950_v36 = vrot.slane %v9153_v31, 9  ;;  %v9154_v53 = vld [vmem:[%s9276_s24 + $0xb4] sm:$0xf]  ;;  %v12139_v31 = vsel %vm12004_vm9, %v6947_v19, %v5872_v61 }
 0x73a   : > { %v5754_v5 = vmul.f32 %v8298_v62, %v12094_v1  ;;  %v8304_v33 = vadd.f32 %v11913_v40, %v5591_v24  ;;  %v5893_v49 = vrot.slane %v9154_v53, 5  ;;  %v5886_v40 = vrot.slane %v9155_v44, 5 }
 0x73b   : > { %v5795_v0 = vadd.f32 %v12107_v34, %v5756_v2  ;;  %v5757_v52 = vmul.f32 %v8301_v39, %v12094_v1  ;;  %v12802_v24 = vunpack.c.l.bf16 %v12012_v63  ;;  %v12135_v39 = vsel %vm12004_vm9, %v5881_v23, %v5882_v16 }
 0x73c   : > { %v5793_v29 = vadd.f32 %v12107_v34, %v5754_v5  ;;  %v5755_v25 = vmul.f32 %v8304_v33, %v12094_v1  ;;  %v12803_v53 = vunpack.c.l.bf16 %v12028_v14  ;;  %v12146_v63 = vsel %vm12004_vm9, %v5874_v17, %v5875_v60 }
 0x73d   : > { %v6006_v48 = vadd.f32 %v12802_v24, %v5795_v0  ;;  %v5796_v2 = vadd.f32 %v12107_v34, %v5757_v52  ;;  %v9156_v0 = vld [vmem:[%s9276_s24 + $0xa0] sm:$0xf]  ;;  %v12152_v61 = vsel %vm12004_vm9, %v6950_v36, %v5893_v49  ;;  %v5895_v19 = vrot.slane %v5893_v49, 4 }
 0x73e   : > { %v5794_v5 = vadd.f32 %v12107_v34, %v5755_v25  ;;  %v8155_v33 = vpop.f32.mrb[180].mxu1  ;;  %v6004_v44 = vadd.f32 %v12803_v53, %v5793_v29  ;;  %v6949_v52 = vrot.slane %v9156_v0, 9  ;;  %v9157_v29 = vld [vmem:[%s9276_s24 + $0xb8] sm:$0xf]  ;;  %v5888_v17 = vrot.slane %v5886_v40, 4 }
 0x73f   : > { %v6007_v24 = vadd.f32 %v5975_v57, %v5796_v2  ;;  %v8307_v23 = vadd.f32 %v11934_v21, %v8155_v33  ;;  %v5604_v16 = vpop.f32.mrb[181].mxu1  ;;  %v5896_v53 = vrot.slane %v9157_v29, 5  ;;  %v6038_v60 = vmax.f32 %v6006_v48, 0.0 }
 0x740   : > { %v8310_v25 = vadd.f32 %v11928_v18, %v5604_v16  ;;  %v8156_v62 = vpop.f32.mrb[182].mxu1  ;;  %v6005_v14 = vadd.f32 %v5973_v46, %v5794_v5  ;;  %v6036_v49 = vmax.f32 %v6004_v44, 0.0  ;;  %v9158_v16 = vld [vmem:[%s9276_s24 + $0xa8] sm:$0xf]  ;;  %v5985_v44 = vunpack.c.l.bf16 %v12146_v63 }
 0x741   : > { %v6039_v50 = vmax.f32 %v6007_v24, 0.0  ;;  %v5760_v57 = vmul.f32 %v8307_v23, %v12094_v1  ;;  %v8313_v21 = vadd.f32 %v11937_v26, %v8156_v62  ;;  %v5607_v2 = vpop.f32.mrb[183].mxu1  ;;  %v5889_v29 = vrot.slane %v9158_v16, 5 }
 0x742   : > { %v5758_v33 = vmul.f32 %v8310_v25, %v12094_v1  ;;  %v8316_v36 = vadd.f32 %v11931_v15, %v5607_v2  ;;  %v6037_v0 = vmax.f32 %v6005_v14, 0.0  ;;  %v5984_v26 = vunpack.c.l.bf16 %v12139_v31 }
 0x743   : > { %v6069_v18 = vpack.c.bf16 %v6039_v50, %v6038_v60  ;;  %v5799_v46 = vadd.f32 %v12107_v34, %v5760_v57  ;;  %v5761_v5 = vmul.f32 %v8313_v21, %v12094_v1  ;;  %v12804_v62 = vunpack.c.l.bf16 %v12050_v27 }
 0x744   : > { %v5797_v48 = vadd.f32 %v12107_v34, %v5758_v33  ;;  %v5759_v24 = vmul.f32 %v8316_v36, %v12094_v1  ;;  %v6068_v23 = vpack.c.bf16 %v6037_v0, %v6036_v49  ;;  %v5987_v50 = vunpack.c.l.bf16 %v12135_v39 }
 0x745   : > { %v6010_v25 = vadd.f32 %v12804_v62, %v5799_v46  ;;  %v5800_v15 = vadd.f32 %v12107_v34, %v5761_v5  ;;  %v12805_v57 = vunpack.c.l.bf16 %v12054_v41  ;;  %v5990_v2 = vunpack.c.l.bf16 %v12152_v61 }
 0x746   : > { %v5798_v14 = vadd.f32 %v12107_v34, %v5759_v24  ;;  %v8159_v60 = vpop.f32.mrb[184].mxu1  ;;  %8197 = vmatprep.mubr.bf16.mxu1 %v6068_v23  ;;  %v12177_v27 = vsel %vm12004_vm9, %v6949_v52, %v5886_v40  ;;  %v12806_v33 = vunpack.c.l.bf16 %v12061_v37  ;;  %v12184_v46 = vsel %vm12004_vm9, %v5895_v19, %v5896_v53  ;;  %v9159_v37 = vld [vmem:[%s9276_s24 + $0xd0] sm:$0xf]  ;;  %v9160_v24 = vld [vmem:[%s9276_s24 + $0xd4] sm:$0xf] }
 0x747   : > { %v6008_v21 = vadd.f32 %v12805_v57, %v5797_v48  ;;  %v8319_v49 = vadd.f32 %v11946_v51, %v8159_v60  ;;  %v5620_v0 = vpop.f32.mrb[185].mxu1  ;;  %8198 = vmatmul.mubr.bf16.vlgmr.msra.gmra.mrb[72].mxu1 %v6069_v18  ;;  %v12188_v41 = vsel %vm12004_vm9, %v5888_v17, %v5889_v29  ;;  %v12807_v40 = vunpack.c.l.bf16 %v12069_v13 }
 0x748   : > { %v6011_v36 = vadd.f32 %v12806_v33, %v5800_v15  ;;  %v8322_v5 = vadd.f32 %v11940_v35, %v5620_v0  ;;  %v8160_v16 = vpop.f32.mrb[186].mxu1  ;;  %v6952_v48 = vrot.slane %v9159_v37, 9  ;;  %v5907_v51 = vrot.slane %v9160_v24, 5 }
 0x749   : > { %v6009_v52 = vadd.f32 %v12807_v40, %v5798_v14  ;;  %v6042_v23 = vmax.f32 %v6010_v25, 0.0  ;;  %v5764_v19 = vmul.f32 %v8319_v49, %v12094_v1  ;;  %v8325_v53 = vadd.f32 %v11949_v20, %v8160_v16  ;;  %v5623_v62 = vpop.f32.mrb[187].mxu1 }
 0x74a   : > { %v6043_v18 = vmax.f32 %v6011_v36, 0.0  ;;  %v5762_v17 = vmul.f32 %v8322_v5, %v12094_v1  ;;  %v8328_v35 = vadd.f32 %v11943_v30, %v5623_v62  ;;  %v6040_v29 = vmax.f32 %v6008_v21, 0.0  ;;  %v9161_v36 = vld [vmem:[%s9276_s24 + $0xc4] sm:$0xf] }
 0x74b   : > { %v6041_v15 = vmax.f32 %v6009_v52, 0.0  ;;  %v5803_v14 = vadd.f32 %v12107_v34, %v5764_v19  ;;  %v5765_v60 = vmul.f32 %v8325_v53, %v12094_v1  ;;  %v5988_v25 = vunpack.c.l.bf16 %v12177_v27 }
 0x74c   : > { %v6071_v13 = vpack.c.bf16 %v6043_v18, %v6042_v23  ;;  %v5801_v57 = vadd.f32 %v12107_v34, %v5762_v17  ;;  %v5763_v33 = vmul.f32 %v8328_v35, %v12094_v1  ;;  %v5900_v49 = vrot.slane %v9161_v36, 5 }
 0x74d   : > { %v6070_v20 = vpack.c.bf16 %v6041_v15, %v6040_v29  ;;  %v12808_v0 = vunpack.c.l.bf16 %v12065_v12  ;;  %v5804_v21 = vadd.f32 %v12107_v34, %v5765_v60  ;;  %v5991_v5 = vunpack.c.l.bf16 %v12184_v46  ;;  %v9162_v12 = vld [vmem:[%s9276_s24 + $0xc0] sm:$0xf]  ;;  %v9163_v29 = vld [vmem:[%s9276_s24 + $0xd8] sm:$0xf]  ;;  %v9171_v46 = vld [vmem:[%s9276_s24 + $0x110] sm:$0xf] }
 0x74e   : > { %v5989_v16 = vunpack.c.l.bf16 %v12188_v41  ;;  %v5802_v40 = vadd.f32 %v12107_v34, %v5763_v33  ;;  %v8163_v52 = vpop.f32.mrb[188].mxu1  ;;  %v12809_v37 = vunpack.c.l.bf16 %v12073_v32  ;;  %v12215_v23 = vsel %vm12004_vm9, %v6952_v48, %v5907_v51  ;;  %v9164_v33 = vld [vmem:[%s9276_s24 + $0xc8] sm:$0xf] }
 0x74f   : > { %v6014_v30 = vadd.f32 %v12808_v0, %v5803_v14  ;;  %8201 = vmatprep.mubr.bf16.mxu1 %v6070_v20  ;;  %v6951_v18 = vrot.slane %v9162_v12, 9  ;;  %v12810_v19 = vunpack.c.l.bf16 %v12077_v3  ;;  %v8331_v62 = vadd.f32 %v11958_v22, %v8163_v52  ;;  %v5636_v17 = vpop.f32.mrb[189].mxu1 }
 0x750   : > { %v6012_v24 = vadd.f32 %v12809_v37, %v5801_v57  ;;  %8202 = vmatmul.mubr.bf16.gmra.mrb[76].mxu1 %v6071_v13  ;;  %v5909_v35 = vrot.slane %v5907_v51, 4  ;;  %v5910_v15 = vrot.slane %v9163_v29, 5  ;;  %v8334_v32 = vadd.f32 %v11952_v59, %v5636_v17  ;;  %v8164_v14 = vpop.f32.mrb[190].mxu1 }
 0x751   : > { %v6015_v53 = vadd.f32 %v12810_v19, %v5804_v21  ;;  %v12811_v60 = vunpack.c.l.bf16 %v12089_v8  ;;  %v5902_v48 = vrot.slane %v5900_v49, 4  ;;  %v5903_v20 = vrot.slane %v9164_v33, 5  ;;  %v5639_v13 = vpop.f32.mrb[191].mxu1 }
 0x752   : > { %v6046_v36 = vmax.f32 %v6014_v30, 0.0  ;;  %v5768_v0 = vmul.f32 %v8331_v62, %v12094_v1  ;;  %v8337_v22 = vadd.f32 %v11961_v38, %v8164_v14  ;;  %v5766_v51 = vmul.f32 %v8334_v32, %v12094_v1 }
 0x753   : > { %v6013_v57 = vadd.f32 %v12811_v60, %v5802_v40  ;;  %v6047_v3 = vmax.f32 %v6015_v53, 0.0  ;;  %v8340_v21 = vadd.f32 %v11955_v10, %v5639_v13  ;;  %v6044_v59 = vmax.f32 %v6012_v24, 0.0  ;;  %v9165_v53 = vld [vmem:[%s9276_s24 + $0xf4] sm:$0xf] }
 0x754   : > { %v5807_v8 = vadd.f32 %v12107_v34, %v5768_v0  ;;  %v5769_v40 = vmul.f32 %v8337_v22, %v12094_v1  ;;  %v5994_v30 = vunpack.c.l.bf16 %v12215_v23  ;;  %v5805_v12 = vadd.f32 %v12107_v34, %v5766_v51  ;;  %v9168_v0 = vld [vmem:[%s9276_s24 + $0xe4] sm:$0xf] }
 0x755   : > { %v6045_v52 = vmax.f32 %v6013_v57, 0.0  ;;  %v6073_v37 = vpack.c.bf16 %v6047_v3, %v6046_v36  ;;  %v5767_v19 = vmul.f32 %v8340_v21, %v12094_v1  ;;  %v5921_v62 = vrot.slane %v9165_v53, 5  ;;  %v9166_v57 = vld [vmem:[%s9276_s24 + $0xf0] sm:$0xf] }
 0x756   : > { %v12812_v17 = vunpack.c.l.bf16 %v12112_v43  ;;  %v5808_v24 = vadd.f32 %v12107_v34, %v5769_v40  ;;  %v12241_v29 = vsel %vm12004_vm9, %v5909_v35, %v5910_v15  ;;  %v12245_v32 = vsel %vm12004_vm9, %v6951_v18, %v5900_v49  ;;  %v8167_v60 = vpop.f32.mrb[192].mxu1  ;;  %v9167_v15 = vld [vmem:[%s9276_s24 + $0xe0] sm:$0xf] }
 0x757   : > { %v6072_v38 = vpack.c.bf16 %v6045_v52, %v6044_v59  ;;  %v5806_v14 = vadd.f32 %v12107_v34, %v5767_v19  ;;  %v6016_v43 = vadd.f32 %v5984_v26, %v5805_v12  ;;  %v6954_v33 = vrot.slane %v9166_v57, 9  ;;  %v5652_v18 = vpop.f32.mrb[193].mxu1 }
 0x758   : > { %v6018_v10 = vadd.f32 %v12812_v17, %v5807_v8  ;;  %v12253_v36 = vsel %vm12004_vm9, %v5902_v48, %v5903_v20  ;;  %v6019_v35 = vadd.f32 %v5987_v50, %v5808_v24  ;;  %v8343_v49 = vadd.f32 %v11973_v42, %v8167_v60  ;;  %v8168_v26 = vpop.f32.mrb[194].mxu1  ;;  %v9169_v48 = vld [vmem:[%s9276_s24 + $0xf8] sm:$0xf]  ;;  %v9170_v17 = vld [vmem:[%s9276_s24 + $0xe8] sm:$0xf] }
 0x759   : > { %8205 = vmatprep.mubr.bf16.mxu1 %v6072_v38  ;;  %v6953_v3 = vrot.slane %v9167_v15, 9  ;;  %v5914_v22 = vrot.slane %v9168_v0, 5  ;;  %v8346_v31 = vadd.f32 %v11964_v28, %v5652_v18  ;;  %v6017_v13 = vadd.f32 %v5985_v44, %v5806_v14  ;;  %v5655_v59 = vpop.f32.mrb[195].mxu1 }
 0x75a   : > { %8206 = vmatmul.mubr.bf16.gmra.mrb[80].mxu1 %v6073_v37  ;;  %v5923_v51 = vrot.slane %v5921_v62, 4  ;;  %v5924_v20 = vrot.slane %v9169_v48, 5  ;;  %v6050_v21 = vmax.f32 %v6018_v10, 0.0  ;;  %v6051_v39 = vmax.f32 %v6019_v35, 0.0 }
 0x75b   : > { %v5772_v42 = vmul.f32 %v8343_v49, %v12094_v1  ;;  %v8349_v50 = vadd.f32 %v11976_v11, %v8168_v26  ;;  %v5770_v52 = vmul.f32 %v8346_v31, %v12094_v1  ;;  %v8352_v37 = vadd.f32 %v11967_v9, %v5655_v59 }
 0x75c   : > { %v6048_v28 = vmax.f32 %v6016_v43, 0.0  ;;  %v6049_v8 = vmax.f32 %v6017_v13, 0.0  ;;  %v6075_v40 = vpack.c.bf16 %v6051_v39, %v6050_v21  ;;  %v5916_v12 = vrot.slane %v5914_v22, 4 }
 0x75d   : > { %v5811_v63 = vadd.f32 %v12107_v34, %v5772_v42  ;;  %v5773_v44 = vmul.f32 %v8349_v50, %v12094_v1  ;;  %v5809_v19 = vadd.f32 %v12107_v34, %v5770_v52  ;;  %v5771_v38 = vmul.f32 %v8352_v37, %v12094_v1 }
 0x75e   : > { %v6074_v53 = vpack.c.bf16 %v6049_v8, %v6048_v28  ;;  %v5917_v11 = vrot.slane %v9170_v17, 5  ;;  %v5995_v24 = vunpack.c.l.bf16 %v12241_v29  ;;  %v5992_v14 = vunpack.c.l.bf16 %v12245_v32  ;;  %v8171_v43 = vpop.f32.mrb[196].mxu1 }
 0x75f   : > { %v6022_v10 = vadd.f32 %v5990_v2, %v5811_v63  ;;  %v5812_v9 = vadd.f32 %v12107_v34, %v5773_v44  ;;  %v5810_v60 = vadd.f32 %v12107_v34, %v5771_v38  ;;  %v12281_v57 = vsel %vm12004_vm9, %v6954_v33, %v5921_v62  ;;  %v5668_v32 = vpop.f32.mrb[197].mxu1 }
 0x760   : > { %8209 = vmatprep.mubr.bf16.mxu1 %v6074_v53  ;;  %v6020_v35 = vadd.f32 %v5988_v25, %v5809_v19  ;;  %v5993_v61 = vunpack.c.l.bf16 %v12253_v36  ;;  %v8355_v29 = vadd.f32 %v11985_v54, %v8171_v43  ;;  %v12291_v49 = vsel %vm12004_vm9, %v5923_v51, %v5924_v20  ;;  %v8172_v25 = vpop.f32.mrb[198].mxu1  ;;  %v9172_v51 = vld [vmem:[%s9276_s24 + $0x114] sm:$0xf]  ;;  %v9174_v19 = vld [vmem:[%s9276_s24 + $0x104] sm:$0xf] }
 0x761   : > { %v6023_v2 = vadd.f32 %v5991_v5, %v5812_v9  ;;  %v12295_v62 = vsel %vm12004_vm9, %v6953_v3, %v5914_v22  ;;  %v8358_v27 = vadd.f32 %v11979_v45, %v5668_v32  ;;  %v6021_v33 = vadd.f32 %v5989_v16, %v5810_v60  ;;  %v5671_v0 = vpop.f32.mrb[199].mxu1  ;;  %v9175_v9 = vld [vmem:[%s9276_s24 + $0x118] sm:$0xf] }
 0x762   : > { %8210 = vmatmul.mubr.bf16.gmra.mrb[84].mxu1 %v6075_v40  ;;  %v6956_v5 = vrot.slane %v9171_v46, 9  ;;  %v12303_v54 = vsel %vm12004_vm9, %v5916_v12, %v5917_v11  ;;  %v6054_v36 = vmax.f32 %v6022_v10, 0.0  ;;  %v5776_v15 = vmul.f32 %v8355_v29, %v12094_v1  ;;  %v9173_v40 = vld [vmem:[%s9276_s24 + $0x100] sm:$0xf]  ;;  %v9176_v46 = vld [vmem:[%s9276_s24 + $0x108] sm:$0xf] }
 0x763   : > { %v6055_v18 = vmax.f32 %v6023_v2, 0.0  ;;  %v8361_v3 = vadd.f32 %v11988_v7, %v8172_v25  ;;  %v5774_v45 = vmul.f32 %v8358_v27, %v12094_v1  ;;  %v8364_v22 = vadd.f32 %v11982_v47, %v5671_v0  ;;  %v12813_v0 = vld [vmem:[#allocation60_spill] sm:$0xff] }
 0x764   : > { %v6052_v41 = vmax.f32 %v6020_v35, 0.0  ;;  %v6053_v16 = vmax.f32 %v6021_v33, 0.0  ;;  %v5815_v26 = vadd.f32 %v12107_v34, %v5776_v15  ;;  %v5935_v48 = vrot.slane %v9172_v51, 5 }
 0x765   : > { %v6077_v31 = vpack.c.bf16 %v6055_v18, %v6054_v36  ;;  %v5777_v13 = vmul.f32 %v8361_v3, %v12094_v1  ;;  %v5813_v20 = vadd.f32 %v12107_v34, %v5774_v45  ;;  %v5775_v21 = vmul.f32 %v8364_v22, %v12094_v1 }
 0x766   : > { %v5998_v7 = vunpack.c.l.bf16 %v12281_v57  ;;  %v6076_v39 = vpack.c.bf16 %v6053_v16, %v6052_v41  ;;  %v6026_v47 = vadd.f32 %v5994_v30, %v5815_v26  ;;  %v5999_v50 = vunpack.c.l.bf16 %v12291_v49  ;;  %v8175_v37 = vpop.f32.mrb[200].mxu1 }
 0x767   : > { %v5816_v42 = vadd.f32 %v12107_v34, %v5777_v13  ;;  %v5996_v59 = vunpack.c.l.bf16 %v12295_v62  ;;  %v5814_v52 = vadd.f32 %v12107_v34, %v5775_v21  ;;  %v6024_v28 = vadd.f32 %v5992_v14, %v5813_v20  ;;  %v5684_v30 = vpop.f32.mrb[201].mxu1 }
 0x768   : > { %8213 = vmatprep.mubr.bf16.mxu1 %v6076_v39  ;;  %v5997_v8 = vunpack.c.l.bf16 %v12303_v54  ;;  %v6955_v63 = vrot.slane %v9173_v40, 9  ;;  %v8367_v23 = vadd.f32 %v11997_v4, %v8175_v37  ;;  %v12326_v12 = vsel %vm12004_vm9, %v6956_v5, %v5935_v48  ;;  %v8176_v17 = vpop.f32.mrb[202].mxu1 }
 0x769   : > { %v6027_v44 = vadd.f32 %v5995_v24, %v5816_v42  ;;  %v5928_v38 = vrot.slane %v9174_v19, 5  ;;  %v8370_v53 = vadd.f32 %v11991_v6, %v5684_v30  ;;  %v6025_v11 = vadd.f32 %v5993_v61, %v5814_v52  ;;  %v5687_v57 = vpop.f32.mrb[203].mxu1  ;;  %v12816_v52 = vld [vmem:[#allocation63_spill] sm:$0xff] }
 0x76a   : > { %8214 = vmatmul.mubr.bf16.gmra.mrb[88].mxu1 %v6077_v31  ;;  %v5937_v10 = vrot.slane %v5935_v48, 4  ;;  %v5938_v14 = vrot.slane %v9175_v9, 5  ;;  %v6058_v60 = vmax.f32 %v6026_v47, 0.0  ;;  %v5780_v4 = vmul.f32 %v8367_v23, %v12094_v1  ;;  %v12814_v31 = vld [vmem:[#allocation30_spill] sm:$0xff]  ;;  %v12815_v47 = vld [vmem:[#allocation69_spill] sm:$0xff] }
 0x76b   : > { %v6059_v24 = vmax.f32 %v6027_v44, 0.0  ;;  %v8373_v43 = vadd.f32 %v12000_v55, %v8176_v17  ;;  %v5778_v35 = vmul.f32 %v8370_v53, %v12094_v1  ;;  %v8376_v2 = vadd.f32 %v11994_v58, %v5687_v57 }
 0x76c   : > { %v6056_v29 = vmax.f32 %v6024_v28, 0.0  ;;  %v6057_v32 = vmax.f32 %v6025_v11, 0.0  ;;  %v5819_v61 = vadd.f32 %v12107_v34, %v5780_v4  ;;  %v5930_v62 = vrot.slane %v5928_v38, 4 }
 0x76d   : > { %v6079_v6 = vpack.c.bf16 %v6059_v24, %v6058_v60  ;;  %v5781_v49 = vmul.f32 %v8373_v43, %v12094_v1  ;;  %v5817_v27 = vadd.f32 %v12107_v34, %v5778_v35  ;;  %v5779_v25 = vmul.f32 %v8376_v2, %v12094_v1 }
 0x76e   : > { %v6078_v33 = vpack.c.bf16 %v6057_v32, %v6056_v29  ;;  %v5931_v55 = vrot.slane %v9176_v46, 5  ;;  %v6030_v5 = vadd.f32 %v5998_v7, %v5819_v61  ;;  %v5929_v58 = vsel %vm12004_vm9, %v6955_v63, %v5928_v38  ;;  %v8179_v18 = vpop.f32.mrb[204].mxu1 }
 0x76f   : > { %v5820_v54 = vadd.f32 %v12107_v34, %v5781_v49  ;;  %v5818_v36 = vadd.f32 %v12107_v34, %v5779_v25  ;;  %v6028_v15 = vadd.f32 %v5996_v59, %v5817_v27  ;;  %v8379_v45 = vadd.f32 %v12813_v0, %v8179_v18  ;;  %v5700_v41 = vpop.f32.mrb[205].mxu1 }
 0x770   : > { %8217 = vmatprep.mubr.bf16.mxu1 %v6078_v33  ;;  %v6002_v22 = vunpack.c.l.bf16 %v12326_v12  ;;  %v5939_v16 = vsel %vm12004_vm9, %v5937_v10, %v5938_v14  ;;  %v8382_v26 = vadd.f32 %v12814_v31, %v5700_v41  ;;  %v8180_v13 = vpop.f32.mrb[206].mxu1  ;;  %v5932_v48 = vsel %vm12004_vm9, %v5930_v62, %v5931_v55 }
 0x771   : > { %v6031_v3 = vadd.f32 %v5999_v50, %v5820_v54  ;;  %v6029_v51 = vadd.f32 %v5997_v8, %v5818_v36  ;;  %v6000_v20 = vunpack.c.l.bf16 %v5929_v58  ;;  %v6062_v21 = vmax.f32 %v6030_v5, 0.0  ;;  %v5703_v50 = vpop.f32.mrb[207].mxu1 }
 0x772   : > { %8218 = vmatmul.mubr.bf16.gmra.mrb[92].mxu1 %v6079_v6  ;;  %v5784_v39 = vmul.f32 %v8379_v45, %v12094_v1  ;;  %v8385_v42 = vadd.f32 %v12815_v47, %v8180_v13  ;;  %v5782_v59 = vmul.f32 %v8382_v26, %v12094_v1  ;;  %v8388_v37 = vadd.f32 %v12816_v52, %v5703_v50 }
 0x773   : > { %v6063_v7 = vmax.f32 %v6031_v3, 0.0  ;;  %v6060_v28 = vmax.f32 %v6028_v15, 0.0  ;;  %v6061_v40 = vmax.f32 %v6029_v51, 0.0  ;;  %v6003_v44 = vunpack.c.l.bf16 %v5939_v16 }
 0x774   : > { %v5823_v8 = vadd.f32 %v12107_v34, %v5784_v39  ;;  %v5785_v56 = vmul.f32 %v8385_v42, %v12094_v1  ;;  %v5821_v23 = vadd.f32 %v12107_v34, %v5782_v59  ;;  %v5783_v30 = vmul.f32 %v8388_v37, %v12094_v1 }
 0x775   : > { %v6081_v63 = vpack.c.bf16 %v6063_v7, %v6062_v21  ;;  %v6080_v12 = vpack.c.bf16 %v6061_v40, %v6060_v28  ;;  %v6001_v19 = vunpack.c.l.bf16 %v5932_v48 }
 0x776   : > { %v6034_v38 = vadd.f32 %v6002_v22, %v5823_v8  ;;  %v5824_v53 = vadd.f32 %v12107_v34, %v5785_v56  ;;  %v5822_v17 = vadd.f32 %v12107_v34, %v5783_v30  ;;  %v6032_v11 = vadd.f32 %v6000_v20, %v5821_v23  ;;  %v12364_v34 = vld [vmem:[%s12431_s8] ss:$0 sm:$0xff] }
 0x777   : > { %8221 = vmatprep.mubr.bf16.mxu1 %v6080_v12 }
 0x778   : > { %v6035_v10 = vadd.f32 %v6003_v44, %v5824_v53  ;;  %v6033_v9 = vadd.f32 %v6001_v19, %v5822_v17  ;;  %v6066_v14 = vmax.f32 %v6034_v38, 0.0  ;;  %v6064_v24 = vmax.f32 %v6032_v11, 0.0 }
 0x77a   : > { %8222 = vmatmul.mubr.bf16.gmra.mrb[96].mxu1 %v6081_v63  ;;  %v6067_v60 = vmax.f32 %v6035_v10, 0.0  ;;  %v6065_v4 = vmax.f32 %v6033_v9, 0.0 }
 0x77c   : > { %v6083_v43 = vpack.c.bf16 %v6067_v60, %v6066_v14  ;;  %v6082_v57 = vpack.c.bf16 %v6065_v4, %v6064_v24 }
 0x77e   : > { %8225 = vmatprep.mubr.bf16.mxu1 %v6082_v57 }
 0x782   : > { %8226 = vmatmul.mubr.bf16.gmra.mrb[100].mxu1 %v6083_v43 }
 0x7cc   : > { %v3482_v1 = vpop.f32.mrb[132].mxu0 }
 0x7cd   : > { %v8035_v35 = vpop.f32.mrb[133].mxu0 }
 0x7ce   : > { %v3485_v2 = vpop.f32.mrb[134].mxu0 }
 0x7cf   : > { %v8036_v29 = vpop.f32.mrb[135].mxu0 }
 0x81a   : > { %v8199_v32 = vpop.f32.mrb[72].mxu1 }
 0x81b   : > { %v6189_v6 = vpop.f32.mrb[73].mxu1  ;;  %v6198_v49 = vadd.f32 %v8199_v32, %v12364_v34 }
 0x81c   : > { %v8200_v61 = vpop.f32.mrb[74].mxu1  ;;  %v6190_v25 = vadd.f32 %v12364_v34, %v6189_v6 }
 0x81d   : > { %v6201_v62 = vadd.f32 %v8200_v61, %v12364_v34  ;;  %v6192_v27 = vpop.f32.mrb[75].mxu1 }
 0x81e   : > { %v6193_v33 = vadd.f32 %v12364_v34, %v6192_v27 }
 0x81f   : > { %v7041_v46 = vpack.c.bf16 %v6201_v62, %v6198_v49 }
 0x820   : > { %v7036_v55 = vpack.c.bf16 %v6193_v33, %v6190_v25 }
 0x821   : > { %7113 = vst [vmem:[%s12373_s27 + $0x8] sm:$0xff] %v7041_v46  }
 0x822   : > { %7037 = vst [vmem:[%s12373_s27] sm:$0xff] %v7036_v55  }
 0x823   : > { %v8203_v5 = vpop.f32.mrb[76].mxu1 }
 0x824   : > { %v6205_v54 = vpop.f32.mrb[77].mxu1  ;;  %v6214_v36 = vadd.f32 %v8203_v5, %v12364_v34 }
 0x825   : > { %v8204_v58 = vpop.f32.mrb[78].mxu1  ;;  %v6206_v3 = vadd.f32 %v12364_v34, %v6205_v54 }
 0x826   : > { %v6217_v18 = vadd.f32 %v8204_v58, %v12364_v34  ;;  %v6208_v15 = vpop.f32.mrb[79].mxu1 }
 0x827   : > { %v6209_v0 = vadd.f32 %v12364_v34, %v6208_v15 }
 0x828   : > { %v7051_v45 = vpack.c.bf16 %v6217_v18, %v6214_v36 }
 0x829   : > { %v7046_v22 = vpack.c.bf16 %v6209_v0, %v6206_v3 }
 0x82a   : > { %7115 = vst [vmem:[%s12373_s27 + $0x18] sm:$0xff] %v7051_v45  }
 0x82b   : > { %7114 = vst [vmem:[%s12373_s27 + $0x10] sm:$0xff] %v7046_v22  }
 0x82d   : > { %v8207_v41 = vpop.f32.mrb[80].mxu1 }
 0x82e   : > { %v6221_v16 = vpop.f32.mrb[81].mxu1  ;;  %v6230_v26 = vadd.f32 %v8207_v41, %v12364_v34 }
 0x82f   : > { %v8208_v31 = vpop.f32.mrb[82].mxu1  ;;  %v6222_v48 = vadd.f32 %v12364_v34, %v6221_v16 }
 0x830   : > { %v6233_v13 = vadd.f32 %v8208_v31, %v12364_v34  ;;  %v6224_v51 = vpop.f32.mrb[83].mxu1 }
 0x831   : > { %v6225_v20 = vadd.f32 %v12364_v34, %v6224_v51 }
 0x832   : > { %v7061_v21 = vpack.c.bf16 %v6233_v13, %v6230_v26 }
 0x833   : > { %v7056_v7 = vpack.c.bf16 %v6225_v20, %v6222_v48 }
 0x834   : > { %7117 = vst [vmem:[%s12373_s27 + $0x28] sm:$0xff] %v7061_v21  }
 0x835   : > { %7116 = vst [vmem:[%s12373_s27 + $0x20] sm:$0xff] %v7056_v7   ;;  %v8211_v39 = vpop.f32.mrb[84].mxu1 }
 0x836   : > { %v6237_v47 = vpop.f32.mrb[85].mxu1  ;;  %v6246_v50 = vadd.f32 %v8211_v39, %v12364_v34 }
 0x837   : > { %v8212_v42 = vpop.f32.mrb[86].mxu1  ;;  %v6238_v37 = vadd.f32 %v12364_v34, %v6237_v47 }
 0x838   : > { %v6249_v59 = vadd.f32 %v8212_v42, %v12364_v34  ;;  %v6240_v52 = vpop.f32.mrb[87].mxu1 }
 0x839   : > { %v6241_v28 = vadd.f32 %v12364_v34, %v6240_v52 }
 0x83a   : > { %v7071_v40 = vpack.c.bf16 %v6249_v59, %v6246_v50 }
 0x83b   : > { %v7066_v63 = vpack.c.bf16 %v6241_v28, %v6238_v37 }
 0x83c   : > { %7119 = vst [vmem:[%s12373_s27 + $0x38] sm:$0xff] %v7071_v40  }
 0x83d   : > { %7118 = vst [vmem:[%s12373_s27 + $0x30] sm:$0xff] %v7066_v63   ;;  %v8215_v8 = vpop.f32.mrb[88].mxu1 }
 0x83e   : > { %v6253_v56 = vpop.f32.mrb[89].mxu1  ;;  %v6262_v23 = vadd.f32 %v8215_v8, %v12364_v34 }
 0x83f   : > { %v8216_v44 = vpop.f32.mrb[90].mxu1  ;;  %v6254_v19 = vadd.f32 %v12364_v34, %v6253_v56 }
 0x840   : > { %v6265_v30 = vadd.f32 %v8216_v44, %v12364_v34  ;;  %v6256_v12 = vpop.f32.mrb[91].mxu1 }
 0x841   : > { %v6257_v38 = vadd.f32 %v12364_v34, %v6256_v12 }
 0x842   : > { %v7081_v53 = vpack.c.bf16 %v6265_v30, %v6262_v23 }
 0x843   : > { %v7076_v17 = vpack.c.bf16 %v6257_v38, %v6254_v19 }
 0x844   : > { %7121 = vst [vmem:[%s12373_s27 + $0x48] sm:$0xff] %v7081_v53  }
 0x845   : > { %7120 = vst [vmem:[%s12373_s27 + $0x40] sm:$0xff] %v7076_v17   ;;  %v8219_v11 = vpop.f32.mrb[92].mxu1 }
 0x846   : > { %v6269_v10 = vpop.f32.mrb[93].mxu1  ;;  %v6278_v14 = vadd.f32 %v8219_v11, %v12364_v34 }
 0x847   : > { %v8220_v9 = vpop.f32.mrb[94].mxu1  ;;  %v6270_v4 = vadd.f32 %v12364_v34, %v6269_v10 }
 0x848   : > { %v6281_v60 = vadd.f32 %v8220_v9, %v12364_v34  ;;  %v6272_v24 = vpop.f32.mrb[95].mxu1 }
 0x849   : > { %v6273_v43 = vadd.f32 %v12364_v34, %v6272_v24 }
 0x84a   : > { %v7091_v57 = vpack.c.bf16 %v6281_v60, %v6278_v14 }
 0x84b   : > { %v7086_v1 = vpack.c.bf16 %v6273_v43, %v6270_v4 }
 0x84c   : > { %7123 = vst [vmem:[%s12373_s27 + $0x58] sm:$0xff] %v7091_v57  }
 0x84d   : > { %7122 = vst [vmem:[%s12373_s27 + $0x50] sm:$0xff] %v7086_v1   ;;  %v8223_v35 = vpop.f32.mrb[96].mxu1 }
 0x84e   : > { %v6285_v2 = vpop.f32.mrb[97].mxu1  ;;  %v6294_v32 = vadd.f32 %v8223_v35, %v12364_v34 }
 0x84f   : > { %v8224_v29 = vpop.f32.mrb[98].mxu1  ;;  %v6286_v49 = vadd.f32 %v12364_v34, %v6285_v2 }
 0x850   : > { %v6297_v6 = vadd.f32 %v8224_v29, %v12364_v34  ;;  %v6288_v61 = vpop.f32.mrb[99].mxu1 }
 0x851   : > { %v6289_v62 = vadd.f32 %v12364_v34, %v6288_v61 }
 0x852   : > { %v7101_v27 = vpack.c.bf16 %v6297_v6, %v6294_v32 }
 0x853   : > { %v7096_v25 = vpack.c.bf16 %v6289_v62, %v6286_v49 }
 0x854   : > { %7125 = vst [vmem:[%s12373_s27 + $0x68] sm:$0xff] %v7101_v27  }
 0x855   : > { %7124 = vst [vmem:[%s12373_s27 + $0x60] sm:$0xff] %v7096_v25   ;;  %v8227_v33 = vpop.f32.mrb[100].mxu1 }
 0x856   : > { %v6301_v46 = vpop.f32.mrb[101].mxu1  ;;  %v6310_v5 = vadd.f32 %v8227_v33, %v12364_v34 }
 0x857   : > { %v8228_v55 = vpop.f32.mrb[102].mxu1  ;;  %v6302_v36 = vadd.f32 %v12364_v34, %v6301_v46 }
 0x858   : > { %v6313_v54 = vadd.f32 %v8228_v55, %v12364_v34  ;;  %v6304_v58 = vpop.f32.mrb[103].mxu1 }
 0x859   : > { %v6305_v18 = vadd.f32 %v12364_v34, %v6304_v58 }
 0x85a   : > { %v7111_v15 = vpack.c.bf16 %v6313_v54, %v6310_v5 }
 0x85b   : > { %v7106_v3 = vpack.c.bf16 %v6305_v18, %v6302_v36 }
 0x85c   : > { %7127 = vst [vmem:[%s12373_s27 + $0x78] sm:$0xff] %v7111_v15  }
 0x85d   : > { %7126 = vst [vmem:[%s12373_s27 + $0x70] sm:$0xff] %v7106_v3  }
 0x85e PF: > { %s19_s30 = sadd.s32 1, %s9183_s30  }
 0x85f   : > { %p16_p4 = scmp.ge.s32.totalorder %s19_s30, 4  }
 0x861   :  { %18 = sbr.rel (!%p16_p4) target bundleno = 1 (0x1), region = 86 }

</bundles_post_ra>
